<compile_context>
chip_gen: v7x
topology: tpu7x:2x2x1
jax: 0.10.0
libtpu: 0.0.40
codegen_flags: <defaults>
</compile_context>

<pallas_src>
import functools

import jax
import jax.numpy as jnp
from jax import lax
from jax.experimental import pallas as pl
from jax.experimental.pallas import tpu as pltpu

NEG_SLOPE = 0.01  # nn.LeakyReLU default negative slope


def _inverted_residual_kernel(H, W, b_blk,
                              x_ref, mask_ref, w1_ref, ss1_ref, wdw_ref, ss2_ref,
                              fc1w_ref, fc1b_ref, fc2w_ref, fc2b_ref,
                              w3_ref, ss3_ref, out_ref):
    HW = H * W
    L = b_blk * HW
    x = x_ref[0]                                           # (Cin, L) f32, lane-dense

    # ---- 1x1 expand conv (bf16 MXU, f32 acc) + folded BN + LeakyReLU ----
    h1 = jnp.dot(w1_ref[...], x.astype(jnp.bfloat16),
                 preferred_element_type=jnp.float32)       # (Ch, L)
    h1 = h1 * ss1_ref[:, 0:1] + ss1_ref[:, 1:2]
    h1 = jnp.where(h1 > 0, h1, NEG_SLOPE * h1)

    # ---- 3x3 depthwise conv, stride 1, pad 1 (row-separable, 4 rolls) ----
    masks = mask_ref[...]                                  # (4, L) {0,1} f32
    colm_l = masks[0:1, :]                                 # col >= 1   (left tap)
    colm_r = masks[1:2, :]                                 # col <= W-2 (right tap)
    rowm_u = masks[2:3, :]                                 # row >= 1   (upper row)
    rowm_d = masks[3:4, :]                                 # row <= H-2 (lower row)

    # roll(x, s)[q] = x[q - s]; cross-row / cross-image wraps are zeroed by masks.
    h_l = pltpu.roll(h1, shift=1, axis=1) * colm_l         # h1[q-1], in-row only
    h_r = pltpu.roll(h1, shift=L - 1, axis=1) * colm_r     # h1[q+1], in-row only

    wdw = wdw_ref[...]                                     # (Ch, 9), tap t = 3*kh + kw

    def row_sum(kh):
        t = 3 * kh
        return (h_l * wdw[:, t:t + 1]
                + h1 * wdw[:, t + 1:t + 2]
                + h_r * wdw[:, t + 2:t + 3])

    # Accumulate each row sum immediately after its vertical roll to keep the
    # live set at ~{h1, h_l, h_r, acc}.
    acc = row_sum(1)                                                   # dh = 0
    acc = acc + pltpu.roll(row_sum(0), shift=W, axis=1) * rowm_u       # dh = -1
    acc = acc + pltpu.roll(row_sum(2), shift=L - W, axis=1) * rowm_d   # dh = +1

    h2 = acc * ss2_ref[:, 0:1] + ss2_ref[:, 1:2]
    h2 = jnp.where(h2 > 0, h2, NEG_SLOPE * h2)

    # ---- Squeeze & Excite (per-image; static 128-aligned lane slices) ----
    sq = jnp.concatenate(
        [jnp.mean(h2[:, b * HW:(b + 1) * HW], axis=1, keepdims=True)
         for b in range(b_blk)], axis=1)                   # (Ch, b_blk)
    e = jnp.dot(fc1w_ref[...], sq, preferred_element_type=jnp.float32) + fc1b_ref[...]
    e = jnp.maximum(e, 0.0)
    e = jnp.dot(fc2w_ref[...], e, preferred_element_type=jnp.float32) + fc2b_ref[...]
    e = jax.nn.sigmoid(e)                                  # (Ch, b_blk)
    h2 = jnp.concatenate(
        [h2[:, b * HW:(b + 1) * HW] * e[:, b:b + 1] for b in range(b_blk)], axis=1)

    # ---- 1x1 project conv (bf16 MXU, f32 acc) + folded BN ----
    y = jnp.dot(w3_ref[...], h2.astype(jnp.bfloat16),
                preferred_element_type=jnp.float32)        # (Cout, L)
    y = y * ss3_ref[:, 0:1] + ss3_ref[:, 1:2]

    # ---- residual (stride == 1 and inp == oup): full-lane unmasked store ----
    out_ref[0] = y + x


def inverted_residual_v3(x_nchw, params, b_blk=None):
    """x_nchw: (N, Cin, H, W) float32. Returns (N, Cout, H, W) float32."""
    (w1, ss1, wdw, ss2, fc1w, fc1b, fc2w, fc2b, w3, ss3) = params
    N, Cin, H, W = x_nchw.shape
    Cout = w3.shape[0]
    assert Cin == Cout, "residual branch requires stride==1 and inp == oup"
    HW = H * W

    # Batch-block choice: keep the grid length >= 2 (v7x has 2 TensorCores),
    # cap the lane extent so the per-step tile stays small, require N % b_blk == 0.
    if b_blk is None:
        b_blk = max(1, N // 2)
        max_lanes = 4096
        b_blk = min(b_blk, max(1, max_lanes // HW))
        while N % b_blk:
            b_blk -= 1
    G = N // b_blk
    L = b_blk * HW

    # Regroup so each grid step sees b_blk whole images contiguously on lanes:
    # (G, Cin, b_blk*HW).  This reorder touches only a few KB; everything else
    # stays channels-on-sublane / HW-on-lane with no big HBM relayout.
    x_flat = x_nchw.reshape(G, b_blk, Cin, HW)
    x_flat = jnp.transpose(x_flat, (0, 2, 1, 3)).reshape(G, Cin, L)

    # Precomputed boundary masks, one row per tap group (f32 multiply in-kernel).
    hw_idx = jnp.arange(L, dtype=jnp.int32) % HW
    row = hw_idx // W
    col = hw_idx % W
    masks = jnp.stack([col >= 1, col <= W - 2, row >= 1, row <= H - 2],
                      axis=0).astype(jnp.float32)          # (4, L)

    # bf16 matmul weights (activations cast at the dot; everything else f32).
    w1b = w1.astype(jnp.bfloat16)
    w3b = w3.astype(jnp.bfloat16)

    kernel = functools.partial(_inverted_residual_kernel, H, W, b_blk)
    consts = (masks, w1b, ss1, wdw, ss2, fc1w, fc1b, fc2w, fc2b, w3b, ss3)

    def run(single_buffer_consts):
        def const_spec(arr):
            nd = arr.ndim
            kwargs = {}
            if single_buffer_consts:
                # Constants never change block index -> second buffer is wasted VMEM.
                kwargs = dict(pipeline_mode=pl.Buffered(1))
            return pl.BlockSpec(arr.shape, lambda n, _nd=nd: (0,) * _nd, **kwargs)

        return pl.pallas_call(
            kernel,
            out_shape=jax.ShapeDtypeStruct((G, Cout, L), jnp.float32),
            grid_spec=pltpu.PrefetchScalarGridSpec(
                num_scalar_prefetch=0,
                grid=(G,),
                in_specs=[pl.BlockSpec((1, Cin, L), lambda n: (n, 0, 0))]
                         + [const_spec(a) for a in consts],
                out_specs=pl.BlockSpec((1, Cout, L), lambda n: (n, 0, 0)),
            ),
            compiler_params=pltpu.CompilerParams(
                dimension_semantics=("parallel",)),
        )(x_flat, *consts)

    try:
        out_flat = run(True)
    except Exception:
        # Older JAX may reject pl.Buffered(buffer_count=1); fall back to defaults.
        out_flat = run(False)

    out = out_flat.reshape(G, Cout, b_blk, HW)
    out = jnp.transpose(out, (0, 2, 1, 3)).reshape(N, Cout, H, W)
    return out


def make_params(key, inp, oup, hidden, reduced):
    """Deterministic synthetic params matching the PyTorch module's shapes,
    stored in channels-on-sublane orientation."""
    ks = jax.random.split(key, 10)

    def rnd(k, shape, scale=0.1):
        return scale * jax.random.normal(k, shape, jnp.float32)

    eps = 1e-5

    def fold_bn(conv_bias, c):
        # fresh nn.BatchNorm2d in eval(): gamma=1, beta=0, running_mean=0, running_var=1
        gamma = jnp.ones((c,), jnp.float32)
        beta = jnp.zeros((c,), jnp.float32)
        mean = jnp.zeros((c,), jnp.float32)
        var = jnp.ones((c,), jnp.float32)
        scale = gamma / jnp.sqrt(var + eps)
        shift = (conv_bias - mean) * scale + beta
        return jnp.stack([scale, shift], axis=1)            # (c, 2): [scale, shift]

    w1 = rnd(ks[0], (hidden, inp))        # 1x1 expand conv weight (Ch, Cin)
    b1 = rnd(ks[1], (hidden,))
    wdw = rnd(ks[2], (hidden, 9))         # depthwise 3x3 weight (Ch, tap = 3*kh+kw)
    bdw = rnd(ks[3], (hidden,))
    fc1w = rnd(ks[4], (reduced, hidden))  # SE fc1 (PyTorch Linear weight layout)
    fc1b = rnd(ks[5], (reduced, 1))
    fc2w = rnd(ks[6], (hidden, reduced))  # SE fc2
    fc2b = rnd(ks[7], (hidden, 1))
    w3 = rnd(ks[8], (oup, hidden))        # 1x1 project conv weight (Cout, Ch)
    b3 = rnd(ks[9], (oup,))
    return (w1, fold_bn(b1, hidden), wdw, fold_bn(bdw, hidden),
            fc1w, fc1b, fc2w, fc2b, w3, fold_bn(b3, oup))


def reference(x_nchw, params):
    """Pure-JAX reference of the same forward pass (matching bf16 matmul
    operands for the two 1x1 convs; everything else f32)."""
    (w1, ss1, wdw, ss2, fc1w, fc1b, fc2w, fc2b, w3, ss3) = params
    N, Cin, H, W = x_nchw.shape
    Ch = w1.shape[0]
    bf16 = jnp.bfloat16
    xf = jnp.transpose(x_nchw, (0, 2, 3, 1)).reshape(N, H * W, Cin)
    h1 = jnp.einsum('nlc,hc->nlh', xf.astype(bf16), w1.astype(bf16),
                    preferred_element_type=jnp.float32)
    h1 = h1 * ss1[:, 0] + ss1[:, 1]
    h1 = jnp.where(h1 > 0, h1, NEG_SLOPE * h1)
    k_hwio = jnp.transpose(wdw, (1, 0)).reshape(3, 3, 1, Ch)
    h2 = lax.conv_general_dilated(
        h1.reshape(N, H, W, Ch), k_hwio, (1, 1), 'SAME',
        dimension_numbers=('NHWC', 'HWIO', 'NHWC'), feature_group_count=Ch)
    h2 = h2.reshape(N, H * W, Ch) * ss2[:, 0] + ss2[:, 1]
    h2 = jnp.where(h2 > 0, h2, NEG_SLOPE * h2)
    sq = h2.mean(axis=1)                                    # (N, Ch)
    e = jnp.maximum(sq @ fc1w.T + fc1b[:, 0], 0.0)
    e = jax.nn.sigmoid(e @ fc2w.T + fc2b[:, 0])
    h2 = h2 * e[:, None, :]
    y = jnp.einsum('nlh,oh->nlo', h2.astype(bf16), w3.astype(bf16),
                   preferred_element_type=jnp.float32)
    y = y * ss3[:, 0] + ss3[:, 1] + xf
    return jnp.transpose(y.reshape(N, H, W, -1), (0, 3, 1, 2))


if __name__ == "__main__":
    key = jax.random.PRNGKey(0)
    kx, kp = jax.random.split(key)

    # Module config: inp=oup=8, kernel=3, stride=1, expandRatio=6,
    # reductionNum=4 -> hiddenDim=48, SE hidden=12, residual connection active.
    # (The 3x3 depthwise stage uses pad=1 / 'SAME', as in the module.)
    # N=4 so the batch-blocked grid still has 2 parallel steps (v7x: 2 TCs).
    N, Cin, H, W = 4, 8, 16, 16
    expand_ratio, reduction_num = 6, 4
    hidden = Cin * expand_ratio
    reduced = hidden // reduction_num

    x = jax.random.normal(kx, (N, Cin, H, W), jnp.float32)
    params = make_params(kp, Cin, Cin, hidden, reduced)

    out = inverted_residual_v3(x, params)
    out = jax.block_until_ready(out)

    ref = reference(x, params)
    assert out.shape == (N, Cin, H, W), out.shape
    if not jnp.allclose(out, ref, atol=1e-4, rtol=1e-4):
        raise AssertionError(
            f"mismatch, max abs err = {float(jnp.max(jnp.abs(out - ref)))}")
    print("KERNEL_OK")
</pallas_src>

<mosaic_0001>
module attributes {stable_mosaic.version = 11 : i64} {
  func.func @_inverted_residual_kernel(%arg0: i32, %arg1: memref<1x8x512xf32, #tpu.memory_space<vmem>>, %arg2: memref<4x512xf32, #tpu.memory_space<vmem>>, %arg3: memref<48x8xbf16, #tpu.memory_space<vmem>>, %arg4: memref<48x2xf32, #tpu.memory_space<vmem>>, %arg5: memref<48x9xf32, #tpu.memory_space<vmem>>, %arg6: memref<48x2xf32, #tpu.memory_space<vmem>>, %arg7: memref<12x48xf32, #tpu.memory_space<vmem>>, %arg8: memref<12x1xf32, #tpu.memory_space<vmem>>, %arg9: memref<48x12xf32, #tpu.memory_space<vmem>>, %arg10: memref<48x1xf32, #tpu.memory_space<vmem>>, %arg11: memref<8x48xbf16, #tpu.memory_space<vmem>>, %arg12: memref<8x2xf32, #tpu.memory_space<vmem>>, %arg13: memref<1x8x512xf32, #tpu.memory_space<vmem>>) attributes {dimension_semantics = [#tpu.dimension_semantics<parallel>], iteration_bounds = array<i64: 2>, scalar_prefetch = 0 : i64, scratch_operands = 0 : i64, tpu.core_type = #tpu.core_type<tc>, window_params = [{transform_indices = @transform_0, window_bounds = array<i64: 1, 8, 512>}, {pipeline_mode = #tpu.pipeline_mode<synchronous>, transform_indices = @transform_1, window_bounds = array<i64: 4, 512>}, {pipeline_mode = #tpu.pipeline_mode<synchronous>, transform_indices = @transform_2, window_bounds = array<i64: 48, 8>}, {pipeline_mode = #tpu.pipeline_mode<synchronous>, transform_indices = @transform_3, window_bounds = array<i64: 48, 2>}, {pipeline_mode = #tpu.pipeline_mode<synchronous>, transform_indices = @transform_4, window_bounds = array<i64: 48, 9>}, {pipeline_mode = #tpu.pipeline_mode<synchronous>, transform_indices = @transform_5, window_bounds = array<i64: 48, 2>}, {pipeline_mode = #tpu.pipeline_mode<synchronous>, transform_indices = @transform_6, window_bounds = array<i64: 12, 48>}, {pipeline_mode = #tpu.pipeline_mode<synchronous>, transform_indices = @transform_7, window_bounds = array<i64: 12, 1>}, {pipeline_mode = #tpu.pipeline_mode<synchronous>, transform_indices = @transform_8, window_bounds = array<i64: 48, 12>}, {pipeline_mode = #tpu.pipeline_mode<synchronous>, transform_indices = @transform_9, window_bounds = array<i64: 48, 1>}, {pipeline_mode = #tpu.pipeline_mode<synchronous>, transform_indices = @transform_10, window_bounds = array<i64: 8, 48>}, {pipeline_mode = #tpu.pipeline_mode<synchronous>, transform_indices = @transform_11, window_bounds = array<i64: 8, 2>}, {transform_indices = @transform_12, window_bounds = array<i64: 1, 8, 512>}]} {
    %c0 = arith.constant 0 : index
    %c0_0 = arith.constant 0 : index
    %c0_1 = arith.constant 0 : index
    %0 = vector.load %arg1[%c0, %c0_0, %c0_1] : memref<1x8x512xf32, #tpu.memory_space<vmem>>, vector<1x8x512xf32>
    %1 = vector.shape_cast %0 : vector<1x8x512xf32> to vector<8x512xf32>
    %c0_2 = arith.constant 0 : index
    %c0_3 = arith.constant 0 : index
    %2 = vector.load %arg3[%c0_2, %c0_3] : memref<48x8xbf16, #tpu.memory_space<vmem>>, vector<48x8xbf16>
    %3 = arith.truncf %1 : vector<8x512xf32> to vector<8x512xbf16>
    %cst = arith.constant dense<0.000000e+00> : vector<48x512xf32>
    %4 = tpu.matmul %2, %3, %cst {dimension_numbers = #tpu.dot_dimension_numbers<[1], [0], [0], [1], [0, 0, 1, 1], [], []>} : vector<48x8xbf16>, vector<8x512xbf16>, vector<48x512xf32> -> vector<48x512xf32>
    %c0_4 = arith.constant 0 : index
    %c0_5 = arith.constant 0 : index
    %5 = vector.load %arg4[%c0_4, %c0_5] : memref<48x2xf32, #tpu.memory_space<vmem>>, vector<48x1xf32>
    %6 = vector.broadcast %5 : vector<48x1xf32> to vector<48x512xf32>
    %7 = arith.mulf %4, %6 : vector<48x512xf32>
    %c0_6 = arith.constant 0 : index
    %c1 = arith.constant 1 : index
    %8 = vector.load %arg4[%c0_6, %c1] : memref<48x2xf32, #tpu.memory_space<vmem>>, vector<48x1xf32>
    %9 = vector.broadcast %8 : vector<48x1xf32> to vector<48x512xf32>
    %10 = arith.addf %7, %9 : vector<48x512xf32>
    %cst_7 = arith.constant 0.000000e+00 : f32
    %11 = vector.broadcast %cst_7 : f32 to vector<48x512xf32>
    %12 = arith.cmpf ogt, %10, %11 : vector<48x512xf32>
    %cst_8 = arith.constant 0.00999999977 : f32
    %13 = vector.broadcast %cst_8 : f32 to vector<48x512xf32>
    %14 = arith.mulf %13, %10 : vector<48x512xf32>
    %15 = arith.select %12, %10, %14 : vector<48x512xi1>, vector<48x512xf32>
    %c0_9 = arith.constant 0 : index
    %c0_10 = arith.constant 0 : index
    %16 = vector.load %arg2[%c0_9, %c0_10] : memref<4x512xf32, #tpu.memory_space<vmem>>, vector<4x512xf32>
    %17 = vector.extract_strided_slice %16 {offsets = [0, 0], sizes = [1, 512], strides = [1, 1]} : vector<4x512xf32> to vector<1x512xf32>
    %18 = vector.extract_strided_slice %16 {offsets = [1, 0], sizes = [1, 512], strides = [1, 1]} : vector<4x512xf32> to vector<1x512xf32>
    %19 = vector.extract_strided_slice %16 {offsets = [2, 0], sizes = [1, 512], strides = [1, 1]} : vector<4x512xf32> to vector<1x512xf32>
    %20 = vector.extract_strided_slice %16 {offsets = [3, 0], sizes = [1, 512], strides = [1, 1]} : vector<4x512xf32> to vector<1x512xf32>
    %c1_i32 = arith.constant 1 : i32
    %21 = tpu.dynamic_rotate %15 by %c1_i32 dim 1 : vector<48x512xf32>, i32 -> vector<48x512xf32>
    %22 = vector.broadcast %17 : vector<1x512xf32> to vector<48x512xf32>
    %23 = arith.mulf %21, %22 : vector<48x512xf32>
    %c511_i32 = arith.constant 511 : i32
    %24 = tpu.dynamic_rotate %15 by %c511_i32 dim 1 : vector<48x512xf32>, i32 -> vector<48x512xf32>
    %25 = vector.broadcast %18 : vector<1x512xf32> to vector<48x512xf32>
    %26 = arith.mulf %24, %25 : vector<48x512xf32>
    %c0_11 = arith.constant 0 : index
    %c0_12 = arith.constant 0 : index
    %27 = vector.load %arg5[%c0_11, %c0_12] : memref<48x9xf32, #tpu.memory_space<vmem>>, vector<48x9xf32>
    %28 = vector.extract_strided_slice %27 {offsets = [0, 3], sizes = [48, 1], strides = [1, 1]} : vector<48x9xf32> to vector<48x1xf32>
    %29 = vector.broadcast %28 : vector<48x1xf32> to vector<48x512xf32>
    %30 = arith.mulf %23, %29 : vector<48x512xf32>
    %31 = vector.extract_strided_slice %27 {offsets = [0, 4], sizes = [48, 1], strides = [1, 1]} : vector<48x9xf32> to vector<48x1xf32>
    %32 = vector.broadcast %31 : vector<48x1xf32> to vector<48x512xf32>
    %33 = arith.mulf %15, %32 : vector<48x512xf32>
    %34 = arith.addf %30, %33 : vector<48x512xf32>
    %35 = vector.extract_strided_slice %27 {offsets = [0, 5], sizes = [48, 1], strides = [1, 1]} : vector<48x9xf32> to vector<48x1xf32>
    %36 = vector.broadcast %35 : vector<48x1xf32> to vector<48x512xf32>
    %37 = arith.mulf %26, %36 : vector<48x512xf32>
    %38 = arith.addf %34, %37 : vector<48x512xf32>
    %39 = vector.extract_strided_slice %27 {offsets = [0, 0], sizes = [48, 1], strides = [1, 1]} : vector<48x9xf32> to vector<48x1xf32>
    %40 = vector.broadcast %39 : vector<48x1xf32> to vector<48x512xf32>
    %41 = arith.mulf %23, %40 : vector<48x512xf32>
    %42 = vector.extract_strided_slice %27 {offsets = [0, 1], sizes = [48, 1], strides = [1, 1]} : vector<48x9xf32> to vector<48x1xf32>
    %43 = vector.broadcast %42 : vector<48x1xf32> to vector<48x512xf32>
    %44 = arith.mulf %15, %43 : vector<48x512xf32>
    %45 = arith.addf %41, %44 : vector<48x512xf32>
    %46 = vector.extract_strided_slice %27 {offsets = [0, 2], sizes = [48, 1], strides = [1, 1]} : vector<48x9xf32> to vector<48x1xf32>
    %47 = vector.broadcast %46 : vector<48x1xf32> to vector<48x512xf32>
    %48 = arith.mulf %26, %47 : vector<48x512xf32>
    %49 = arith.addf %45, %48 : vector<48x512xf32>
    %c16_i32 = arith.constant 16 : i32
    %50 = tpu.dynamic_rotate %49 by %c16_i32 dim 1 : vector<48x512xf32>, i32 -> vector<48x512xf32>
    %51 = vector.broadcast %19 : vector<1x512xf32> to vector<48x512xf32>
    %52 = arith.mulf %50, %51 : vector<48x512xf32>
    %53 = arith.addf %38, %52 : vector<48x512xf32>
    %54 = vector.extract_strided_slice %27 {offsets = [0, 6], sizes = [48, 1], strides = [1, 1]} : vector<48x9xf32> to vector<48x1xf32>
    %55 = vector.broadcast %54 : vector<48x1xf32> to vector<48x512xf32>
    %56 = arith.mulf %23, %55 : vector<48x512xf32>
    %57 = vector.extract_strided_slice %27 {offsets = [0, 7], sizes = [48, 1], strides = [1, 1]} : vector<48x9xf32> to vector<48x1xf32>
    %58 = vector.broadcast %57 : vector<48x1xf32> to vector<48x512xf32>
    %59 = arith.mulf %15, %58 : vector<48x512xf32>
    %60 = arith.addf %56, %59 : vector<48x512xf32>
    %61 = vector.extract_strided_slice %27 {offsets = [0, 8], sizes = [48, 1], strides = [1, 1]} : vector<48x9xf32> to vector<48x1xf32>
    %62 = vector.broadcast %61 : vector<48x1xf32> to vector<48x512xf32>
    %63 = arith.mulf %26, %62 : vector<48x512xf32>
    %64 = arith.addf %60, %63 : vector<48x512xf32>
    %c496_i32 = arith.constant 496 : i32
    %65 = tpu.dynamic_rotate %64 by %c496_i32 dim 1 : vector<48x512xf32>, i32 -> vector<48x512xf32>
    %66 = vector.broadcast %20 : vector<1x512xf32> to vector<48x512xf32>
    %67 = arith.mulf %65, %66 : vector<48x512xf32>
    %68 = arith.addf %53, %67 : vector<48x512xf32>
    %c0_13 = arith.constant 0 : index
    %c0_14 = arith.constant 0 : index
    %69 = vector.load %arg6[%c0_13, %c0_14] : memref<48x2xf32, #tpu.memory_space<vmem>>, vector<48x1xf32>
    %70 = vector.broadcast %69 : vector<48x1xf32> to vector<48x512xf32>
    %71 = arith.mulf %68, %70 : vector<48x512xf32>
    %c0_15 = arith.constant 0 : index
    %c1_16 = arith.constant 1 : index
    %72 = vector.load %arg6[%c0_15, %c1_16] : memref<48x2xf32, #tpu.memory_space<vmem>>, vector<48x1xf32>
    %73 = vector.broadcast %72 : vector<48x1xf32> to vector<48x512xf32>
    %74 = arith.addf %71, %73 : vector<48x512xf32>
    %cst_17 = arith.constant 0.000000e+00 : f32
    %75 = vector.broadcast %cst_17 : f32 to vector<48x512xf32>
    %76 = arith.cmpf ogt, %74, %75 : vector<48x512xf32>
    %cst_18 = arith.constant 0.00999999977 : f32
    %77 = vector.broadcast %cst_18 : f32 to vector<48x512xf32>
    %78 = arith.mulf %77, %74 : vector<48x512xf32>
    %79 = arith.select %76, %74, %78 : vector<48x512xi1>, vector<48x512xf32>
    %80 = vector.extract_strided_slice %79 {offsets = [0, 0], sizes = [48, 256], strides = [1, 1]} : vector<48x512xf32> to vector<48x256xf32>
    %cst_19 = arith.constant dense<0.000000e+00> : vector<48xf32>
    %81 = vector.multi_reduction <add>, %80, %cst_19 [1] : vector<48x256xf32> to vector<48xf32>
    %82 = vector.shape_cast %81 : vector<48xf32> to vector<48x1xf32>
    %cst_20 = arith.constant 2.560000e+02 : f32
    %83 = vector.broadcast %cst_20 : f32 to vector<48x1xf32>
    %84 = arith.divf %82, %83 : vector<48x1xf32>
    %85 = vector.extract_strided_slice %79 {offsets = [0, 256], sizes = [48, 256], strides = [1, 1]} : vector<48x512xf32> to vector<48x256xf32>
    %cst_21 = arith.constant dense<0.000000e+00> : vector<48xf32>
    %86 = vector.multi_reduction <add>, %85, %cst_21 [1] : vector<48x256xf32> to vector<48xf32>
    %87 = vector.shape_cast %86 : vector<48xf32> to vector<48x1xf32>
    %cst_22 = arith.constant 2.560000e+02 : f32
    %88 = vector.broadcast %cst_22 : f32 to vector<48x1xf32>
    %89 = arith.divf %87, %88 : vector<48x1xf32>
    %90 = tpu.concatenate %84, %89 in 1 : vector<48x1xf32>, vector<48x1xf32> -> vector<48x2xf32>
    %c0_23 = arith.constant 0 : index
    %c0_24 = arith.constant 0 : index
    %91 = vector.load %arg7[%c0_23, %c0_24] : memref<12x48xf32, #tpu.memory_space<vmem>>, vector<12x48xf32>
    %cst_25 = arith.constant dense<0.000000e+00> : vector<12x2xf32>
    %92 = tpu.matmul %91, %90, %cst_25 {dimension_numbers = #tpu.dot_dimension_numbers<[1], [0], [0], [1], [0, 0, 1, 1], [], []>} : vector<12x48xf32>, vector<48x2xf32>, vector<12x2xf32> -> vector<12x2xf32>
    %c0_26 = arith.constant 0 : index
    %c0_27 = arith.constant 0 : index
    %93 = vector.load %arg8[%c0_26, %c0_27] : memref<12x1xf32, #tpu.memory_space<vmem>>, vector<12x1xf32>
    %94 = vector.broadcast %93 : vector<12x1xf32> to vector<12x2xf32>
    %95 = arith.addf %92, %94 : vector<12x2xf32>
    %cst_28 = arith.constant 0.000000e+00 : f32
    %96 = vector.broadcast %cst_28 : f32 to vector<12x2xf32>
    %97 = arith.maximumf %95, %96 : vector<12x2xf32>
    %c0_29 = arith.constant 0 : index
    %c0_30 = arith.constant 0 : index
    %98 = vector.load %arg9[%c0_29, %c0_30] : memref<48x12xf32, #tpu.memory_space<vmem>>, vector<48x12xf32>
    %cst_31 = arith.constant dense<0.000000e+00> : vector<48x2xf32>
    %99 = tpu.matmul %98, %97, %cst_31 {dimension_numbers = #tpu.dot_dimension_numbers<[1], [0], [0], [1], [0, 0, 1, 1], [], []>} : vector<48x12xf32>, vector<12x2xf32>, vector<48x2xf32> -> vector<48x2xf32>
    %c0_32 = arith.constant 0 : index
    %c0_33 = arith.constant 0 : index
    %100 = vector.load %arg10[%c0_32, %c0_33] : memref<48x1xf32, #tpu.memory_space<vmem>>, vector<48x1xf32>
    %101 = vector.broadcast %100 : vector<48x1xf32> to vector<48x2xf32>
    %102 = arith.addf %99, %101 : vector<48x2xf32>
    %103 = arith.negf %102 : vector<48x2xf32>
    %104 = math.exp %103 : vector<48x2xf32>
    %cst_34 = arith.constant 1.000000e+00 : f32
    %105 = vector.broadcast %cst_34 : f32 to vector<48x2xf32>
    %106 = arith.addf %105, %104 : vector<48x2xf32>
    %107 = arith.divf %105, %106 : vector<48x2xf32>
    %108 = vector.extract_strided_slice %79 {offsets = [0, 0], sizes = [48, 256], strides = [1, 1]} : vector<48x512xf32> to vector<48x256xf32>
    %109 = vector.extract_strided_slice %107 {offsets = [0, 0], sizes = [48, 1], strides = [1, 1]} : vector<48x2xf32> to vector<48x1xf32>
    %110 = vector.broadcast %109 : vector<48x1xf32> to vector<48x256xf32>
    %111 = arith.mulf %108, %110 : vector<48x256xf32>
    %112 = vector.extract_strided_slice %79 {offsets = [0, 256], sizes = [48, 256], strides = [1, 1]} : vector<48x512xf32> to vector<48x256xf32>
    %113 = vector.extract_strided_slice %107 {offsets = [0, 1], sizes = [48, 1], strides = [1, 1]} : vector<48x2xf32> to vector<48x1xf32>
    %114 = vector.broadcast %113 : vector<48x1xf32> to vector<48x256xf32>
    %115 = arith.mulf %112, %114 : vector<48x256xf32>
    %116 = tpu.concatenate %111, %115 in 1 : vector<48x256xf32>, vector<48x256xf32> -> vector<48x512xf32>
    %c0_35 = arith.constant 0 : index
    %c0_36 = arith.constant 0 : index
    %117 = vector.load %arg11[%c0_35, %c0_36] : memref<8x48xbf16, #tpu.memory_space<vmem>>, vector<8x48xbf16>
    %118 = arith.truncf %116 : vector<48x512xf32> to vector<48x512xbf16>
    %cst_37 = arith.constant dense<0.000000e+00> : vector<8x512xf32>
    %119 = tpu.matmul %117, %118, %cst_37 {dimension_numbers = #tpu.dot_dimension_numbers<[1], [0], [0], [1], [0, 0, 1, 1], [], []>} : vector<8x48xbf16>, vector<48x512xbf16>, vector<8x512xf32> -> vector<8x512xf32>
    %c0_38 = arith.constant 0 : index
    %c0_39 = arith.constant 0 : index
    %120 = vector.load %arg12[%c0_38, %c0_39] : memref<8x2xf32, #tpu.memory_space<vmem>>, vector<8x1xf32>
    %121 = vector.broadcast %120 : vector<8x1xf32> to vector<8x512xf32>
    %122 = arith.mulf %119, %121 : vector<8x512xf32>
    %c0_40 = arith.constant 0 : index
    %c1_41 = arith.constant 1 : index
    %123 = vector.load %arg12[%c0_40, %c1_41] : memref<8x2xf32, #tpu.memory_space<vmem>>, vector<8x1xf32>
    %124 = vector.broadcast %123 : vector<8x1xf32> to vector<8x512xf32>
    %125 = arith.addf %122, %124 : vector<8x512xf32>
    %126 = arith.addf %125, %1 : vector<8x512xf32>
    %c0_42 = arith.constant 0 : index
    %c0_43 = arith.constant 0 : index
    %c0_44 = arith.constant 0 : index
    %127 = vector.load %arg13[%c0_42, %c0_43, %c0_44] : memref<1x8x512xf32, #tpu.memory_space<vmem>>, vector<1x8x512xf32>
    %128 = vector.shape_cast %127 : vector<1x8x512xf32> to vector<8x512xf32>
    %129 = vector.shape_cast %126 : vector<8x512xf32> to vector<1x8x512xf32>
    tpu.vector_store %arg13[%c0_42, %c0_43, %c0_44], %129 {strides = array<i32>} : memref<1x8x512xf32, #tpu.memory_space<vmem>>, vector<1x8x512xf32>,
    return
  }
  func.func @transform_0(%arg0: i32) -> (i32, i32, i32) {
    %c0_i32 = arith.constant 0 : i32
    %c0_i32_0 = arith.constant 0 : i32
    %c0_i32_1 = arith.constant 0 : i32
    return %arg0, %c0_i32, %c0_i32_0 : i32, i32, i32
  }
  func.func @transform_1(%arg0: i32) -> (i32, i32) {
    %c0_i32 = arith.constant 0 : i32
    %c0_i32_0 = arith.constant 0 : i32
    %c0_i32_1 = arith.constant 0 : i32
    return %c0_i32, %c0_i32_0 : i32, i32
  }
  func.func @transform_2(%arg0: i32) -> (i32, i32) {
    %c0_i32 = arith.constant 0 : i32
    %c0_i32_0 = arith.constant 0 : i32
    %c0_i32_1 = arith.constant 0 : i32
    return %c0_i32, %c0_i32_0 : i32, i32
  }
  func.func @transform_3(%arg0: i32) -> (i32, i32) {
    %c0_i32 = arith.constant 0 : i32
    %c0_i32_0 = arith.constant 0 : i32
    %c0_i32_1 = arith.constant 0 : i32
    return %c0_i32, %c0_i32_0 : i32, i32
  }
  func.func @transform_4(%arg0: i32) -> (i32, i32) {
    %c0_i32 = arith.constant 0 : i32
    %c0_i32_0 = arith.constant 0 : i32
    %c0_i32_1 = arith.constant 0 : i32
    return %c0_i32, %c0_i32_0 : i32, i32
  }
  func.func @transform_5(%arg0: i32) -> (i32, i32) {
    %c0_i32 = arith.constant 0 : i32
    %c0_i32_0 = arith.constant 0 : i32
    %c0_i32_1 = arith.constant 0 : i32
    return %c0_i32, %c0_i32_0 : i32, i32
  }
  func.func @transform_6(%arg0: i32) -> (i32, i32) {
    %c0_i32 = arith.constant 0 : i32
    %c0_i32_0 = arith.constant 0 : i32
    %c0_i32_1 = arith.constant 0 : i32
    return %c0_i32, %c0_i32_0 : i32, i32
  }
  func.func @transform_7(%arg0: i32) -> (i32, i32) {
    %c0_i32 = arith.constant 0 : i32
    %c0_i32_0 = arith.constant 0 : i32
    %c0_i32_1 = arith.constant 0 : i32
    return %c0_i32, %c0_i32_0 : i32, i32
  }
  func.func @transform_8(%arg0: i32) -> (i32, i32) {
    %c0_i32 = arith.constant 0 : i32
    %c0_i32_0 = arith.constant 0 : i32
    %c0_i32_1 = arith.constant 0 : i32
    return %c0_i32, %c0_i32_0 : i32, i32
  }
  func.func @transform_9(%arg0: i32) -> (i32, i32) {
    %c0_i32 = arith.constant 0 : i32
    %c0_i32_0 = arith.constant 0 : i32
    %c0_i32_1 = arith.constant 0 : i32
    return %c0_i32, %c0_i32_0 : i32, i32
  }
  func.func @transform_10(%arg0: i32) -> (i32, i32) {
    %c0_i32 = arith.constant 0 : i32
    %c0_i32_0 = arith.constant 0 : i32
    %c0_i32_1 = arith.constant 0 : i32
    return %c0_i32, %c0_i32_0 : i32, i32
  }
  func.func @transform_11(%arg0: i32) -> (i32, i32) {
    %c0_i32 = arith.constant 0 : i32
    %c0_i32_0 = arith.constant 0 : i32
    %c0_i32_1 = arith.constant 0 : i32
    return %c0_i32, %c0_i32_0 : i32, i32
  }
  func.func @transform_12(%arg0: i32) -> (i32, i32, i32) {
    %c0_i32 = arith.constant 0 : i32
    %c0_i32_0 = arith.constant 0 : i32
    %c0_i32_1 = arith.constant 0 : i32
    return %arg0, %c0_i32, %c0_i32_0 : i32, i32, i32
  }
}

module attributes {stable_mosaic.version = 11 : i64} {
  func.func @_inverted_residual_kernel(%arg0: i32, %arg1: memref<1x8x512xf32, #tpu.memory_space<vmem>>, %arg2: memref<4x512xf32, #tpu.memory_space<vmem>>, %arg3: memref<48x8xbf16, #tpu.memory_space<vmem>>, %arg4: memref<48x2xf32, #tpu.memory_space<vmem>>, %arg5: memref<48x9xf32, #tpu.memory_space<vmem>>, %arg6: memref<48x2xf32, #tpu.memory_space<vmem>>, %arg7: memref<12x48xf32, #tpu.memory_space<vmem>>, %arg8: memref<12x1xf32, #tpu.memory_space<vmem>>, %arg9: memref<48x12xf32, #tpu.memory_space<vmem>>, %arg10: memref<48x1xf32, #tpu.memory_space<vmem>>, %arg11: memref<8x48xbf16, #tpu.memory_space<vmem>>, %arg12: memref<8x2xf32, #tpu.memory_space<vmem>>, %arg13: memref<1x8x512xf32, #tpu.memory_space<vmem>>) attributes {dimension_semantics = [#tpu.dimension_semantics<parallel>], iteration_bounds = array<i64: 2>, scalar_prefetch = 0 : i64, scratch_operands = 0 : i64, tpu.core_type = #tpu.core_type<tc>, window_params = [{transform_indices = @transform_0, window_bounds = array<i64: 1, 8, 512>}, {pipeline_mode = #tpu.pipeline_mode<synchronous>, transform_indices = @transform_1, window_bounds = array<i64: 4, 512>}, {pipeline_mode = #tpu.pipeline_mode<synchronous>, transform_indices = @transform_2, window_bounds = array<i64: 48, 8>}, {pipeline_mode = #tpu.pipeline_mode<synchronous>, transform_indices = @transform_3, window_bounds = array<i64: 48, 2>}, {pipeline_mode = #tpu.pipeline_mode<synchronous>, transform_indices = @transform_4, window_bounds = array<i64: 48, 9>}, {pipeline_mode = #tpu.pipeline_mode<synchronous>, transform_indices = @transform_5, window_bounds = array<i64: 48, 2>}, {pipeline_mode = #tpu.pipeline_mode<synchronous>, transform_indices = @transform_6, window_bounds = array<i64: 12, 48>}, {pipeline_mode = #tpu.pipeline_mode<synchronous>, transform_indices = @transform_7, window_bounds = array<i64: 12, 1>}, {pipeline_mode = #tpu.pipeline_mode<synchronous>, transform_indices = @transform_8, window_bounds = array<i64: 48, 12>}, {pipeline_mode = #tpu.pipeline_mode<synchronous>, transform_indices = @transform_9, window_bounds = array<i64: 48, 1>}, {pipeline_mode = #tpu.pipeline_mode<synchronous>, transform_indices = @transform_10, window_bounds = array<i64: 8, 48>}, {pipeline_mode = #tpu.pipeline_mode<synchronous>, transform_indices = @transform_11, window_bounds = array<i64: 8, 2>}, {transform_indices = @transform_12, window_bounds = array<i64: 1, 8, 512>}]} {
    %c0 = arith.constant 0 : index
    %c0_0 = arith.constant 0 : index
    %c0_1 = arith.constant 0 : index
    %0 = vector.load %arg1[%c0, %c0_0, %c0_1] : memref<1x8x512xf32, #tpu.memory_space<vmem>>, vector<1x8x512xf32>
    %1 = vector.shape_cast %0 : vector<1x8x512xf32> to vector<8x512xf32>
    %c0_2 = arith.constant 0 : index
    %c0_3 = arith.constant 0 : index
    %2 = vector.load %arg3[%c0_2, %c0_3] : memref<48x8xbf16, #tpu.memory_space<vmem>>, vector<48x8xbf16>
    %3 = arith.truncf %1 : vector<8x512xf32> to vector<8x512xbf16>
    %cst = arith.constant dense<0.000000e+00> : vector<48x512xf32>
    %4 = tpu.matmul %2, %3, %cst {dimension_numbers = #tpu.dot_dimension_numbers<[1], [0], [0], [1], [0, 0, 1, 1], [], []>} : vector<48x8xbf16>, vector<8x512xbf16>, vector<48x512xf32> -> vector<48x512xf32>
    %c0_4 = arith.constant 0 : index
    %c0_5 = arith.constant 0 : index
    %5 = vector.load %arg4[%c0_4, %c0_5] : memref<48x2xf32, #tpu.memory_space<vmem>>, vector<48x1xf32>
    %6 = vector.broadcast %5 : vector<48x1xf32> to vector<48x512xf32>
    %7 = arith.mulf %4, %6 : vector<48x512xf32>
    %c0_6 = arith.constant 0 : index
    %c1 = arith.constant 1 : index
    %8 = vector.load %arg4[%c0_6, %c1] : memref<48x2xf32, #tpu.memory_space<vmem>>, vector<48x1xf32>
    %9 = vector.broadcast %8 : vector<48x1xf32> to vector<48x512xf32>
    %10 = arith.addf %7, %9 : vector<48x512xf32>
    %cst_7 = arith.constant 0.000000e+00 : f32
    %11 = vector.broadcast %cst_7 : f32 to vector<48x512xf32>
    %12 = arith.cmpf ogt, %10, %11 : vector<48x512xf32>
    %cst_8 = arith.constant 0.00999999977 : f32
    %13 = vector.broadcast %cst_8 : f32 to vector<48x512xf32>
    %14 = arith.mulf %13, %10 : vector<48x512xf32>
    %15 = arith.select %12, %10, %14 : vector<48x512xi1>, vector<48x512xf32>
    %c0_9 = arith.constant 0 : index
    %c0_10 = arith.constant 0 : index
    %16 = vector.load %arg2[%c0_9, %c0_10] : memref<4x512xf32, #tpu.memory_space<vmem>>, vector<4x512xf32>
    %17 = vector.extract_strided_slice %16 {offsets = [0, 0], sizes = [1, 512], strides = [1, 1]} : vector<4x512xf32> to vector<1x512xf32>
    %18 = vector.extract_strided_slice %16 {offsets = [1, 0], sizes = [1, 512], strides = [1, 1]} : vector<4x512xf32> to vector<1x512xf32>
    %19 = vector.extract_strided_slice %16 {offsets = [2, 0], sizes = [1, 512], strides = [1, 1]} : vector<4x512xf32> to vector<1x512xf32>
    %20 = vector.extract_strided_slice %16 {offsets = [3, 0], sizes = [1, 512], strides = [1, 1]} : vector<4x512xf32> to vector<1x512xf32>
    %c1_i32 = arith.constant 1 : i32
    %21 = tpu.dynamic_rotate %15 by %c1_i32 dim 1 : vector<48x512xf32>, i32 -> vector<48x512xf32>
    %22 = vector.broadcast %17 : vector<1x512xf32> to vector<48x512xf32>
    %23 = arith.mulf %21, %22 : vector<48x512xf32>
    %c511_i32 = arith.constant 511 : i32
    %24 = tpu.dynamic_rotate %15 by %c511_i32 dim 1 : vector<48x512xf32>, i32 -> vector<48x512xf32>
    %25 = vector.broadcast %18 : vector<1x512xf32> to vector<48x512xf32>
    %26 = arith.mulf %24, %25 : vector<48x512xf32>
    %c0_11 = arith.constant 0 : index
    %c0_12 = arith.constant 0 : index
    %27 = vector.load %arg5[%c0_11, %c0_12] : memref<48x9xf32, #tpu.memory_space<vmem>>, vector<48x9xf32>
    %28 = vector.extract_strided_slice %27 {offsets = [0, 3], sizes = [48, 1], strides = [1, 1]} : vector<48x9xf32> to vector<48x1xf32>
    %29 = vector.broadcast %28 : vector<48x1xf32> to vector<48x512xf32>
    %30 = arith.mulf %23, %29 : vector<48x512xf32>
    %31 = vector.extract_strided_slice %27 {offsets = [0, 4], sizes = [48, 1], strides = [1, 1]} : vector<48x9xf32> to vector<48x1xf32>
    %32 = vector.broadcast %31 : vector<48x1xf32> to vector<48x512xf32>
    %33 = arith.mulf %15, %32 : vector<48x512xf32>
    %34 = arith.addf %30, %33 : vector<48x512xf32>
    %35 = vector.extract_strided_slice %27 {offsets = [0, 5], sizes = [48, 1], strides = [1, 1]} : vector<48x9xf32> to vector<48x1xf32>
    %36 = vector.broadcast %35 : vector<48x1xf32> to vector<48x512xf32>
    %37 = arith.mulf %26, %36 : vector<48x512xf32>
    %38 = arith.addf %34, %37 : vector<48x512xf32>
    %39 = vector.extract_strided_slice %27 {offsets = [0, 0], sizes = [48, 1], strides = [1, 1]} : vector<48x9xf32> to vector<48x1xf32>
    %40 = vector.broadcast %39 : vector<48x1xf32> to vector<48x512xf32>
    %41 = arith.mulf %23, %40 : vector<48x512xf32>
    %42 = vector.extract_strided_slice %27 {offsets = [0, 1], sizes = [48, 1], strides = [1, 1]} : vector<48x9xf32> to vector<48x1xf32>
    %43 = vector.broadcast %42 : vector<48x1xf32> to vector<48x512xf32>
    %44 = arith.mulf %15, %43 : vector<48x512xf32>
    %45 = arith.addf %41, %44 : vector<48x512xf32>
    %46 = vector.extract_strided_slice %27 {offsets = [0, 2], sizes = [48, 1], strides = [1, 1]} : vector<48x9xf32> to vector<48x1xf32>
    %47 = vector.broadcast %46 : vector<48x1xf32> to vector<48x512xf32>
    %48 = arith.mulf %26, %47 : vector<48x512xf32>
    %49 = arith.addf %45, %48 : vector<48x512xf32>
    %c16_i32 = arith.constant 16 : i32
    %50 = tpu.dynamic_rotate %49 by %c16_i32 dim 1 : vector<48x512xf32>, i32 -> vector<48x512xf32>
    %51 = vector.broadcast %19 : vector<1x512xf32> to vector<48x512xf32>
    %52 = arith.mulf %50, %51 : vector<48x512xf32>
    %53 = arith.addf %38, %52 : vector<48x512xf32>
    %54 = vector.extract_strided_slice %27 {offsets = [0, 6], sizes = [48, 1], strides = [1, 1]} : vector<48x9xf32> to vector<48x1xf32>
    %55 = vector.broadcast %54 : vector<48x1xf32> to vector<48x512xf32>
    %56 = arith.mulf %23, %55 : vector<48x512xf32>
    %57 = vector.extract_strided_slice %27 {offsets = [0, 7], sizes = [48, 1], strides = [1, 1]} : vector<48x9xf32> to vector<48x1xf32>
    %58 = vector.broadcast %57 : vector<48x1xf32> to vector<48x512xf32>
    %59 = arith.mulf %15, %58 : vector<48x512xf32>
    %60 = arith.addf %56, %59 : vector<48x512xf32>
    %61 = vector.extract_strided_slice %27 {offsets = [0, 8], sizes = [48, 1], strides = [1, 1]} : vector<48x9xf32> to vector<48x1xf32>
    %62 = vector.broadcast %61 : vector<48x1xf32> to vector<48x512xf32>
    %63 = arith.mulf %26, %62 : vector<48x512xf32>
    %64 = arith.addf %60, %63 : vector<48x512xf32>
    %c496_i32 = arith.constant 496 : i32
    %65 = tpu.dynamic_rotate %64 by %c496_i32 dim 1 : vector<48x512xf32>, i32 -> vector<48x512xf32>
    %66 = vector.broadcast %20 : vector<1x512xf32> to vector<48x512xf32>
    %67 = arith.mulf %65, %66 : vector<48x512xf32>
    %68 = arith.addf %53, %67 : vector<48x512xf32>
    %c0_13 = arith.constant 0 : index
    %c0_14 = arith.constant 0 : index
    %69 = vector.load %arg6[%c0_13, %c0_14] : memref<48x2xf32, #tpu.memory_space<vmem>>, vector<48x1xf32>
    %70 = vector.broadcast %69 : vector<48x1xf32> to vector<48x512xf32>
    %71 = arith.mulf %68, %70 : vector<48x512xf32>
    %c0_15 = arith.constant 0 : index
    %c1_16 = arith.constant 1 : index
    %72 = vector.load %arg6[%c0_15, %c1_16] : memref<48x2xf32, #tpu.memory_space<vmem>>, vector<48x1xf32>
    %73 = vector.broadcast %72 : vector<48x1xf32> to vector<48x512xf32>
    %74 = arith.addf %71, %73 : vector<48x512xf32>
    %cst_17 = arith.constant 0.000000e+00 : f32
    %75 = vector.broadcast %cst_17 : f32 to vector<48x512xf32>
    %76 = arith.cmpf ogt, %74, %75 : vector<48x512xf32>
    %cst_18 = arith.constant 0.00999999977 : f32
    %77 = vector.broadcast %cst_18 : f32 to vector<48x512xf32>
    %78 = arith.mulf %77, %74 : vector<48x512xf32>
    %79 = arith.select %76, %74, %78 : vector<48x512xi1>, vector<48x512xf32>
    %80 = vector.extract_strided_slice %79 {offsets = [0, 0], sizes = [48, 256], strides = [1, 1]} : vector<48x512xf32> to vector<48x256xf32>
    %cst_19 = arith.constant dense<0.000000e+00> : vector<48xf32>
    %81 = vector.multi_reduction <add>, %80, %cst_19 [1] : vector<48x256xf32> to vector<48xf32>
    %82 = vector.shape_cast %81 : vector<48xf32> to vector<48x1xf32>
    %cst_20 = arith.constant 2.560000e+02 : f32
    %83 = vector.broadcast %cst_20 : f32 to vector<48x1xf32>
    %84 = arith.divf %82, %83 : vector<48x1xf32>
    %85 = vector.extract_strided_slice %79 {offsets = [0, 256], sizes = [48, 256], strides = [1, 1]} : vector<48x512xf32> to vector<48x256xf32>
    %cst_21 = arith.constant dense<0.000000e+00> : vector<48xf32>
    %86 = vector.multi_reduction <add>, %85, %cst_21 [1] : vector<48x256xf32> to vector<48xf32>
    %87 = vector.shape_cast %86 : vector<48xf32> to vector<48x1xf32>
    %cst_22 = arith.constant 2.560000e+02 : f32
    %88 = vector.broadcast %cst_22 : f32 to vector<48x1xf32>
    %89 = arith.divf %87, %88 : vector<48x1xf32>
    %90 = tpu.concatenate %84, %89 in 1 : vector<48x1xf32>, vector<48x1xf32> -> vector<48x2xf32>
    %c0_23 = arith.constant 0 : index
    %c0_24 = arith.constant 0 : index
    %91 = vector.load %arg7[%c0_23, %c0_24] : memref<12x48xf32, #tpu.memory_space<vmem>>, vector<12x48xf32>
    %cst_25 = arith.constant dense<0.000000e+00> : vector<12x2xf32>
    %92 = tpu.matmul %91, %90, %cst_25 {dimension_numbers = #tpu.dot_dimension_numbers<[1], [0], [0], [1], [0, 0, 1, 1], [], []>} : vector<12x48xf32>, vector<48x2xf32>, vector<12x2xf32> -> vector<12x2xf32>
    %c0_26 = arith.constant 0 : index
    %c0_27 = arith.constant 0 : index
    %93 = vector.load %arg8[%c0_26, %c0_27] : memref<12x1xf32, #tpu.memory_space<vmem>>, vector<12x1xf32>
    %94 = vector.broadcast %93 : vector<12x1xf32> to vector<12x2xf32>
    %95 = arith.addf %92, %94 : vector<12x2xf32>
    %cst_28 = arith.constant 0.000000e+00 : f32
    %96 = vector.broadcast %cst_28 : f32 to vector<12x2xf32>
    %97 = arith.maximumf %95, %96 : vector<12x2xf32>
    %c0_29 = arith.constant 0 : index
    %c0_30 = arith.constant 0 : index
    %98 = vector.load %arg9[%c0_29, %c0_30] : memref<48x12xf32, #tpu.memory_space<vmem>>, vector<48x12xf32>
    %cst_31 = arith.constant dense<0.000000e+00> : vector<48x2xf32>
    %99 = tpu.matmul %98, %97, %cst_31 {dimension_numbers = #tpu.dot_dimension_numbers<[1], [0], [0], [1], [0, 0, 1, 1], [], []>} : vector<48x12xf32>, vector<12x2xf32>, vector<48x2xf32> -> vector<48x2xf32>
    %c0_32 = arith.constant 0 : index
    %c0_33 = arith.constant 0 : index
    %100 = vector.load %arg10[%c0_32, %c0_33] : memref<48x1xf32, #tpu.memory_space<vmem>>, vector<48x1xf32>
    %101 = vector.broadcast %100 : vector<48x1xf32> to vector<48x2xf32>
    %102 = arith.addf %99, %101 : vector<48x2xf32>
    %103 = arith.negf %102 : vector<48x2xf32>
    %104 = math.exp %103 : vector<48x2xf32>
    %cst_34 = arith.constant 1.000000e+00 : f32
    %105 = vector.broadcast %cst_34 : f32 to vector<48x2xf32>
    %106 = arith.addf %105, %104 : vector<48x2xf32>
    %107 = arith.divf %105, %106 : vector<48x2xf32>
    %108 = vector.extract_strided_slice %79 {offsets = [0, 0], sizes = [48, 256], strides = [1, 1]} : vector<48x512xf32> to vector<48x256xf32>
    %109 = vector.extract_strided_slice %107 {offsets = [0, 0], sizes = [48, 1], strides = [1, 1]} : vector<48x2xf32> to vector<48x1xf32>
    %110 = vector.broadcast %109 : vector<48x1xf32> to vector<48x256xf32>
    %111 = arith.mulf %108, %110 : vector<48x256xf32>
    %112 = vector.extract_strided_slice %79 {offsets = [0, 256], sizes = [48, 256], strides = [1, 1]} : vector<48x512xf32> to vector<48x256xf32>
    %113 = vector.extract_strided_slice %107 {offsets = [0, 1], sizes = [48, 1], strides = [1, 1]} : vector<48x2xf32> to vector<48x1xf32>
    %114 = vector.broadcast %113 : vector<48x1xf32> to vector<48x256xf32>
    %115 = arith.mulf %112, %114 : vector<48x256xf32>
    %116 = tpu.concatenate %111, %115 in 1 : vector<48x256xf32>, vector<48x256xf32> -> vector<48x512xf32>
    %c0_35 = arith.constant 0 : index
    %c0_36 = arith.constant 0 : index
    %117 = vector.load %arg11[%c0_35, %c0_36] : memref<8x48xbf16, #tpu.memory_space<vmem>>, vector<8x48xbf16>
    %118 = arith.truncf %116 : vector<48x512xf32> to vector<48x512xbf16>
    %cst_37 = arith.constant dense<0.000000e+00> : vector<8x512xf32>
    %119 = tpu.matmul %117, %118, %cst_37 {dimension_numbers = #tpu.dot_dimension_numbers<[1], [0], [0], [1], [0, 0, 1, 1], [], []>} : vector<8x48xbf16>, vector<48x512xbf16>, vector<8x512xf32> -> vector<8x512xf32>
    %c0_38 = arith.constant 0 : index
    %c0_39 = arith.constant 0 : index
    %120 = vector.load %arg12[%c0_38, %c0_39] : memref<8x2xf32, #tpu.memory_space<vmem>>, vector<8x1xf32>
    %121 = vector.broadcast %120 : vector<8x1xf32> to vector<8x512xf32>
    %122 = arith.mulf %119, %121 : vector<8x512xf32>
    %c0_40 = arith.constant 0 : index
    %c1_41 = arith.constant 1 : index
    %123 = vector.load %arg12[%c0_40, %c1_41] : memref<8x2xf32, #tpu.memory_space<vmem>>, vector<8x1xf32>
    %124 = vector.broadcast %123 : vector<8x1xf32> to vector<8x512xf32>
    %125 = arith.addf %122, %124 : vector<8x512xf32>
    %126 = arith.addf %125, %1 : vector<8x512xf32>
    %c0_42 = arith.constant 0 : index
    %c0_43 = arith.constant 0 : index
    %c0_44 = arith.constant 0 : index
    %127 = vector.load %arg13[%c0_42, %c0_43, %c0_44] : memref<1x8x512xf32, #tpu.memory_space<vmem>>, vector<1x8x512xf32>
    %128 = vector.shape_cast %127 : vector<1x8x512xf32> to vector<8x512xf32>
    %129 = vector.shape_cast %126 : vector<8x512xf32> to vector<1x8x512xf32>
    tpu.vector_store %arg13[%c0_42, %c0_43, %c0_44], %129 {strides = array<i32>} : memref<1x8x512xf32, #tpu.memory_space<vmem>>, vector<1x8x512xf32>,
    return
  }
  func.func @transform_0(%arg0: i32) -> (i32, i32, i32) {
    %c0_i32 = arith.constant 0 : i32
    %c0_i32_0 = arith.constant 0 : i32
    %c0_i32_1 = arith.constant 0 : i32
    return %arg0, %c0_i32, %c0_i32_0 : i32, i32, i32
  }
  func.func @transform_1(%arg0: i32) -> (i32, i32) {
    %c0_i32 = arith.constant 0 : i32
    %c0_i32_0 = arith.constant 0 : i32
    %c0_i32_1 = arith.constant 0 : i32
    return %c0_i32, %c0_i32_0 : i32, i32
  }
  func.func @transform_2(%arg0: i32) -> (i32, i32) {
    %c0_i32 = arith.constant 0 : i32
    %c0_i32_0 = arith.constant 0 : i32
    %c0_i32_1 = arith.constant 0 : i32
    return %c0_i32, %c0_i32_0 : i32, i32
  }
  func.func @transform_3(%arg0: i32) -> (i32, i32) {
    %c0_i32 = arith.constant 0 : i32
    %c0_i32_0 = arith.constant 0 : i32
    %c0_i32_1 = arith.constant 0 : i32
    return %c0_i32, %c0_i32_0 : i32, i32
  }
  func.func @transform_4(%arg0: i32) -> (i32, i32) {
    %c0_i32 = arith.constant 0 : i32
    %c0_i32_0 = arith.constant 0 : i32
    %c0_i32_1 = arith.constant 0 : i32
    return %c0_i32, %c0_i32_0 : i32, i32
  }
  func.func @transform_5(%arg0: i32) -> (i32, i32) {
    %c0_i32 = arith.constant 0 : i32
    %c0_i32_0 = arith.constant 0 : i32
    %c0_i32_1 = arith.constant 0 : i32
    return %c0_i32, %c0_i32_0 : i32, i32
  }
  func.func @transform_6(%arg0: i32) -> (i32, i32) {
    %c0_i32 = arith.constant 0 : i32
    %c0_i32_0 = arith.constant 0 : i32
    %c0_i32_1 = arith.constant 0 : i32
    return %c0_i32, %c0_i32_0 : i32, i32
  }
  func.func @transform_7(%arg0: i32) -> (i32, i32) {
    %c0_i32 = arith.constant 0 : i32
    %c0_i32_0 = arith.constant 0 : i32
    %c0_i32_1 = arith.constant 0 : i32
    return %c0_i32, %c0_i32_0 : i32, i32
  }
  func.func @transform_8(%arg0: i32) -> (i32, i32) {
    %c0_i32 = arith.constant 0 : i32
    %c0_i32_0 = arith.constant 0 : i32
    %c0_i32_1 = arith.constant 0 : i32
    return %c0_i32, %c0_i32_0 : i32, i32
  }
  func.func @transform_9(%arg0: i32) -> (i32, i32) {
    %c0_i32 = arith.constant 0 : i32
    %c0_i32_0 = arith.constant 0 : i32
    %c0_i32_1 = arith.constant 0 : i32
    return %c0_i32, %c0_i32_0 : i32, i32
  }
  func.func @transform_10(%arg0: i32) -> (i32, i32) {
    %c0_i32 = arith.constant 0 : i32
    %c0_i32_0 = arith.constant 0 : i32
    %c0_i32_1 = arith.constant 0 : i32
    return %c0_i32, %c0_i32_0 : i32, i32
  }
  func.func @transform_11(%arg0: i32) -> (i32, i32) {
    %c0_i32 = arith.constant 0 : i32
    %c0_i32_0 = arith.constant 0 : i32
    %c0_i32_1 = arith.constant 0 : i32
    return %c0_i32, %c0_i32_0 : i32, i32
  }
  func.func @transform_12(%arg0: i32) -> (i32, i32, i32) {
    %c0_i32 = arith.constant 0 : i32
    %c0_i32_0 = arith.constant 0 : i32
    %c0_i32_1 = arith.constant 0 : i32
    return %arg0, %c0_i32, %c0_i32_0 : i32, i32, i32
  }
}

</mosaic_0001>

<bundles_post_ra>
// kernel: tpu_custom_call.1
= control target key start
LH: loop header
LB: loop body
LE: loop exit
PB: predicated region body
PF: predicated region fallthrough
CT: control target
= control target key end

     0   :  { %s5249_s0 = inlined_call_operand.vmem [shape: f32[2,8,512], index: 0, kind: input, shape index: {}]   ;;  %s5250_s1 = inlined_call_operand.vmem [shape: f32[4,512], index: 1, kind: input, shape index: {}]   ;;  %s5251_s2 = inlined_call_operand.vmem [shape: bf16[48,8], index: 2, kind: input, shape index: {}]   ;;  %s5252_s3 = inlined_call_operand.vmem [shape: f32[48,2], index: 3, kind: input, shape index: {}]   ;;  %s5253_s4 = inlined_call_operand.vmem [shape: f32[48,9], index: 4, kind: input, shape index: {}]   ;;  %s5254_s5 = inlined_call_operand.vmem [shape: f32[48,2], index: 5, kind: input, shape index: {}]   ;;  %s5255_s6 = inlined_call_operand.vmem [shape: f32[12,48], index: 6, kind: input, shape index: {}]   ;;  %s5256_s7 = inlined_call_operand.vmem [shape: f32[12,1], index: 7, kind: input, shape index: {}]   ;;  %s5257_s8 = inlined_call_operand.vmem [shape: f32[48,12], index: 8, kind: input, shape index: {}]   ;;  %s5258_s9 = inlined_call_operand.vmem [shape: f32[48,1], index: 9, kind: input, shape index: {}]   ;;  %s5259_s10 = inlined_call_operand.vmem [shape: bf16[8,48], index: 10, kind: input, shape index: {}]   ;;  %s5260_s11 = inlined_call_operand.vmem [shape: f32[8,2], index: 11, kind: input, shape index: {}]   ;;  %s5261_s12 = inlined_call_operand.hbm [shape: f32[2,8,512], index: 12, kind: output, shape index: {}]  }
   0x1   :  { %5390 = sst [smem:[#allocation80_spill]] %s5249_s0 }
   0x2   :  { %17 = vsyncpa [#allocation3], 0 }
   0x3   :  { %19 = vsyncpa [#allocation3 + $0x1], 0  ;;  %s3146_s21 = smov 0   ;;  %s3148_s22 = smov 0  }
   0x4   :  { %s3150_s23 = smov 0   ;;  %s3152_s24 = smov 0  }
   0x5 LB: > { %s3167_s25 = sadd.s32 4294967295, %s3064_s24   ;;  %s2750_s26 = sadd.s32 4294967294, %s3064_s24   ;;  %s3064_s24 = sphi %s3152_s24, %s5632_s24   ;;  %s3060_s23 = sphi %s3150_s23, %s5631_s23   ;;  %s3056_s22 = sphi %s3148_s22, %s5630_s22   ;;  %s3052_s21 = sphi %s3146_s21, %s5629_s21  }
   0x6   : > { %s3171_s27 = sadd.s32 1, %s3064_s24   ;;  %s289_s28 = sadd.s32 1, %s3060_s23 }
   0x7   : > { %s286_s29 = ssub.s32 %s3064_s24, %s3171_s27  ;;  %p299_p0 = scmp.ne.s32.totalorder %s3060_s23, %s3056_s22 }
   0x8   : > { %p287_p1 = scmp.eq.s32.totalorder %s286_s29, 0  ;;  %p300_p2 = scmp.eq.s32.totalorder %s3167_s25, 1 }
   0x9   : > { %p305_p3 = scmp.ne.s32.totalorder %s3056_s22, %s3052_s21  ;;  %p306_p4 = scmp.eq.s32.totalorder %s2750_s26, 1 }
   0xa   : > { %s3182_s30 = scalar_select %p287_p1, %s3060_s23, %s289_s28  }
   0xb   : > { %p3184_p5 = por %p300_p2, %p299_p0  ;;  %p3188_p6 = por %p306_p4, %p305_p3 }
   0xc   : > { %p2753_p7 = scmp.ge.s32.totalorder %s3064_s24, 1  ;;  %p365_p8 = scmp.lt.s32.totalorder %s3064_s24, 3 }
   0xe   : > { %p366_p9 = pnand %p2753_p7, %p365_p8 }
  0x10   : > { %369 = sbr.rel (%p366_p9) target bundleno = 1763 (0x6e3), region = 68 }
  0x17   : > { %v591_v0 = vld [vmem:[%s5252_s3] sm:$0xff]  ;;  %p407_p10 = scmp.lt.s32.totalorder %s3167_s25, 1  ;;  %v5262_v1 = vmov 1   ;;  %v5266_v2 = vmov 0   ;;  %v592_v3 = vld [vmem:[%s5252_s3 + $0x8] sm:$0xff]  ;;  %s5393_s0 = sld [smem:[#allocation80_spill]] }
  0x18   : > { %2907 = vset.pattern.permute.xlu1 %v5262_v1  ;;  %497 = vmatprep.mubr.bf16.mxu0 %v5266_v2  ;;  %v593_v4 = vld [vmem:[%s5252_s3 + $0x10] sm:$0xff]  ;;  %vm452_vm0 = vcmask 1043456   ;;  %v594_v13 = vld [vmem:[%s5252_s3 + $0x18] sm:$0xff]  ;;  %v2967_v15 = vld [vmem:[%s5251_s2] sm:$0xff]   ;;  %vm442_vm1 = vcmask 64512   ;;  %v3068_v22 = vmov 2  }
  0x19   : > { %652 = vperm.xlu1 %2907, %v591_v0   ;;  %s408_s17 = scalar_select %p407_p10, %s3167_s25, 1  ;;  %560 = vmatprep.mubr.bf16.mxu1 %v5266_v2  ;;  %v2968_v17 = vld [vmem:[%s5251_s2 + $0x8] sm:$0xff]   ;;  %v595_v18 = vld [vmem:[%s5252_s3 + $0x20] sm:$0xff]  ;;  %v2969_v19 = vld [vmem:[%s5251_s2 + $0x10] sm:$0xff]   ;;  %v3069_v26 = vmov 7   ;;  %v3070_v28 = vmov 6  }
  0x1a   : > { %2909 = vset.pattern.permute.xlu0 %v5262_v1  ;;  %v596_v20 = vld [vmem:[%s5252_s3 + $0x28] sm:$0xff]  ;;  %v3264_v23 = vld [vmem:[%s5253_s4 + $0x18] sm:$0xff]  ;;  %v3280_v25 = vld [vmem:[%s5253_s4] sm:$0xff]  ;;  %v3071_v30 = vmov 8   ;;  %v3072_v31 = vmov 3   ;;  %v5265_v32 = vmov 4  }
  0x1b   : > { %s2790_s20 = sshll.u32 %s408_s17, 5  ;;  %660 = vperm.xlu0 %2909, %v593_v4   ;;  %v3258_v21 = vld [vmem:[%s5253_s4 + $0x8] sm:$0xff]  ;;  %v3287_v27 = vld [vmem:[%s5253_s4 + $0x10] sm:$0xff]  ;;  %v3294_v29 = vld [vmem:[%s5253_s4 + $0x20] sm:$0xff]  ;;  %v5264_v39 = vmov 5   ;;  %s3075_s17 = smov 1  }
  0x1c   : > { %v3272_v24 = vld [vmem:[%s5253_s4 + $0x28] sm:$0xff]  ;;  %s3076_s18 = smov 127  }
  0x1d   : > { %s3209_s29 = scalar_lea.vmem %s5393_s0, %s2790_s20  ;;  %656 = vperm.xlu1 %2907, %v592_v3   ;;  %s2791_s20 = sshll.u32 %s3167_s25, 9 }
  0x1e   : > { %v414_v5 = vld [vmem:[%s3209_s29 + $0x8] sm:$0xff]  ;;  %v416_v6 = vld [vmem:[%s3209_s29 + $0x18] sm:$0xff]  ;;  %v413_v7 = vld [vmem:[%s3209_s29] sm:$0xff]  ;;  %s5205_s16 = scalar_lea.hbm %s5261_s12, %s2791_s20 }
  0x1f   : > { %v424_v8 = vpack.c.bf16 %v414_v5, %v414_v5  ;;  %v426_v9 = vpack.c.bf16 %v416_v6, %v416_v6  ;;  %v423_v10 = vpack.c.bf16 %v413_v7, %v413_v7  ;;  %v415_v11 = vld [vmem:[%s3209_s29 + $0x10] sm:$0xff]  ;;  %2910 = vset.pattern.permute.xlu0 %v5266_v2 }
  0x20   : > { %v425_v12 = vpack.c.bf16 %v415_v11, %v415_v11  ;;  %599 = vperm.xlu0 %2910, %v591_v0  }
  0x21   : > { %2760 = vmatprep.subr.msk.bf16.mxu0 %vm452_vm0, %v424_v8  ;;  %2764 = vmatprep.subr.msk.bf16.mxu1 %vm452_vm0, %v426_v9  ;;  %v454_v14 = vsel %vm452_vm0, %v423_v10, 0 }
  0x22   : > { %2908 = vset.pattern.permute.xlu1 %v5266_v2  ;;  %466 = vmatpush1.bf16.msra.mxu0 %v454_v14  ;;  %v460_v16 = vsel %vm452_vm0, %v425_v12, 0 }
  0x23   : > { %529 = vmatpush1.bf16.msra.mxu1 %v460_v16  ;;  %614 = vperm.xlu1 %2908, %v594_v13  }
  0x24   : > { %604 = vperm.xlu0 %2910, %v592_v3  }
  0x25   : > { %2761 = vmatmul.mubr.msk.bf16.vlgmr.msra.gmra.mrb[0].mxu0 %vm442_vm1, %v2967_v15 }
  0x26   : > { %2765 = vmatmul.mubr.msk.bf16.vlgmr.msra.gmra.mrb[0].mxu1 %vm442_vm1, %v2967_v15  ;;  %507 = vmatprep.mubr.bf16.mxu0 %v5266_v2 }
  0x27   : > { %2911 = vset.pattern.permute.xlu1 %v5262_v1  ;;  %570 = vmatprep.mubr.bf16.mxu1 %v5266_v2 }
  0x28   : > { %664 = vperm.xlu1 %2911, %v594_v13   ;;  %609 = vperm.xlu0 %2910, %v593_v4  }
  0x2c   : > { %2912 = vset.pattern.permute.xlu1 %v5266_v2  ;;  %624 = vperm.xlu0 %2910, %v596_v20  }
  0x2d   : > { %619 = vperm.xlu1 %2912, %v595_v18   ;;  %2762 = vmatmul.mubr.msk.bf16.gmra.mrb[4].mxu0 %vm442_vm1, %v2968_v17 }
  0x2e   : > { %2766 = vmatmul.mubr.msk.bf16.gmra.mrb[4].mxu1 %vm442_vm1, %v2968_v17  ;;  %517 = vmatprep.mubr.bf16.mxu0 %v5266_v2 }
  0x2f   : > { %580 = vmatprep.mubr.bf16.mxu1 %v5266_v2 }
  0x30   : > { %2917 = vset.pattern.permute.xlu0 %v3068_v22 }
  0x31   : > { %2913 = vset.pattern.permute.xlu1 %v5262_v1  ;;  %1372 = vperm.xlu0 %2917, %v3258_v21  }
  0x32   : > { %668 = vperm.xlu1 %2913, %v595_v18  }
  0x35   : > { %2763 = vmatmul.mubr.msk.bf16.gmra.mrb[8].mxu0 %vm442_vm1, %v2969_v19  ;;  %1380 = vperm.xlu0 %2917, %v3264_v23  }
  0x36   : > { %2767 = vmatmul.mubr.msk.bf16.gmra.mrb[8].mxu1 %vm442_vm1, %v2969_v19  ;;  %672 = vperm.xlu1 %2913, %v596_v20  }
  0x39   : > { %1388 = vperm.xlu0 %2917, %v3272_v24  }
  0x3a   : > { %2914 = vset.pattern.permute.xlu1 %v5266_v2 }
  0x3b   : > { %1252 = vperm.xlu1 %2914, %v3258_v21  }
  0x3d   : > { %2930 = vset.pattern.permute.xlu0 %v3069_v26 }
  0x3e   : > { %1645 = vperm.xlu0 %2930, %v3280_v25  }
  0x3f   : > { %2915 = vset.pattern.permute.xlu1 %v5262_v1 }
  0x40   : > { %1300 = vperm.xlu1 %2915, %v3258_v21  }
  0x42   : > { %1653 = vperm.xlu0 %2930, %v3287_v27  }
  0x44   : > { %2916 = vset.pattern.permute.xlu1 %v3068_v22 }
  0x45   : > { %1368 = vperm.xlu1 %2916, %v3280_v25  }
  0x46   : > { %1661 = vperm.xlu0 %2930, %v3294_v29  }
  0x49   : > { %2918 = vset.pattern.permute.xlu1 %v3070_v28 }
  0x4a   : > { %1597 = vperm.xlu1 %2918, %v3280_v25   ;;  %2932 = vset.pattern.permute.xlu0 %v3071_v30 }
  0x4b   : > { %1717 = vperm.xlu0 %2932, %v3280_v25  }
  0x4e   : > { %1601 = vperm.xlu1 %2918, %v3258_v21  }
  0x4f   : > { %1725 = vperm.xlu0 %2932, %v3287_v27  }
  0x52   : > { %2919 = vset.pattern.permute.xlu1 %v3069_v26 }
  0x53   : > { %1649 = vperm.xlu1 %2919, %v3258_v21   ;;  %1737 = vperm.xlu0 %2932, %v3272_v24  }
  0x57   : > { %2920 = vset.pattern.permute.xlu1 %v5266_v2  ;;  %2935 = vset.pattern.permute.xlu0 %v3072_v31 }
  0x58   : > { %1256 = vperm.xlu1 %2920, %v3287_v27   ;;  %1051 = vperm.xlu0 %2935, %v3280_v25  }
  0x5c   : > { %2921 = vset.pattern.permute.xlu1 %v5262_v1  ;;  %1061 = vperm.xlu0 %2935, %v3287_v27  }
  0x5d   : > { %1304 = vperm.xlu1 %2921, %v3287_v27  }
  0x60   : > { %1071 = vperm.xlu0 %2935, %v3294_v29  }
  0x61   : > { %1308 = vperm.xlu1 %2921, %v3264_v23  }
  0x64   : > { %2942 = vset.pattern.permute.xlu0 %v5265_v32 }
  0x65   : > { %2922 = vset.pattern.permute.xlu1 %v3071_v30  ;;  %1108 = vperm.xlu0 %2942, %v3258_v21  }
  0x66   : > { %1721 = vperm.xlu1 %2922, %v3258_v21  }
  0x69   : > { %1116 = vperm.xlu0 %2942, %v3264_v23  }
  0x6a   : > { %2923 = vset.pattern.permute.xlu1 %v3068_v22 }
  0x6b   : > { %1376 = vperm.xlu1 %2923, %v3287_v27  }
  0x6f   : > { %2924 = vset.pattern.permute.xlu1 %v3070_v28 }
  0x70   : > { %1605 = vperm.xlu1 %2924, %v3287_v27  }
  0x74   : > { %1609 = vperm.xlu1 %2924, %v3264_v23  }
  0x78   : > { %2925 = vset.pattern.permute.xlu1 %v3069_v26 }
  0x79   : > { %1657 = vperm.xlu1 %2925, %v3264_v23  }
  0x7d   : > { %2926 = vset.pattern.permute.xlu1 %v5266_v2 }
  0x7e   : > { %1264 = vperm.xlu1 %2926, %v3294_v29  }
  0x82   : > { %2927 = vset.pattern.permute.xlu1 %v5262_v1 }
  0x83   : > { %1312 = vperm.xlu1 %2927, %v3294_v29  }
  0x87   : > { %1316 = vperm.xlu1 %2927, %v3272_v24  }
  0x8b   : > { %2928 = vset.pattern.permute.xlu1 %v3071_v30 }
  0x8c   : > { %1729 = vperm.xlu1 %2928, %v3264_v23  }
  0x90   : > { %2929 = vset.pattern.permute.xlu1 %v3068_v22 }
  0x91   : > { %1384 = vperm.xlu1 %2929, %v3294_v29  }
  0x95   : > { %2931 = vset.pattern.permute.xlu1 %v3070_v28 }
  0x96   : > { %1613 = vperm.xlu1 %2931, %v3294_v29  }
  0x98   : > { %v3326_v33 = vpop.permute.xlu1 %652 }
  0x9a   : > { %1617 = vperm.xlu1 %2931, %v3272_v24   ;;  %v3371_v49 = vpop.permute.xlu0 %660 }
  0x9c   : > { %v3329_v34 = vpop.permute.xlu1 %656 }
  0x9e   : > { %2933 = vset.pattern.permute.xlu1 %v3069_v26 }
  0x9f   : > { %1665 = vperm.xlu1 %2933, %v3272_v24   ;;  %v600_v51 = vpop.permute.xlu0 %599 }
  0xa2   : > { %v3332_v35 = vpop.permute.xlu1 %614 }
  0xa3   : > { %2934 = vset.pattern.permute.xlu1 %v3071_v30  ;;  %v605_v53 = vpop.permute.xlu0 %604 }
  0xa4   : > { %1733 = vperm.xlu1 %2934, %v3294_v29  }
  0xa7   : > { %v3335_v36 = vpop.permute.xlu1 %664 }
  0xa8   : > { %2936 = vset.pattern.permute.xlu1 %v3072_v31 }
  0xa9   : > { %1056 = vperm.xlu1 %2936, %v3258_v21  }
  0xac   : > { %v3338_v37 = vpop.permute.xlu1 %619 }
  0xad   : > { %2937 = vset.pattern.permute.xlu1 %v5265_v32 }
  0xae   : > { %1104 = vperm.xlu1 %2937, %v3280_v25  }
  0xb1   : > { %v3342_v38 = vpop.permute.xlu1 %668 }
  0xb2   : > { %2938 = vset.pattern.permute.xlu1 %v5264_v39 }
  0xb3   : > { %1176 = vperm.xlu1 %2938, %v3280_v25  }
  0xb5   : > { %v3346_v40 = vpop.permute.xlu1 %672 }
  0xb7   : > { %1180 = vperm.xlu1 %2938, %v3258_v21  }
  0xba   : > { %v3350_v41 = vpop.permute.xlu1 %1252 }
  0xbb   : > { %2939 = vset.pattern.permute.xlu1 %v3072_v31 }
  0xbc   : > { %1066 = vperm.xlu1 %2939, %v3264_v23  }
  0xbf   : > { %v3354_v42 = vpop.permute.xlu1 %1300 }
  0xc0   : > { %2940 = vset.pattern.permute.xlu1 %v5265_v32 }
  0xc1   : > { %1112 = vperm.xlu1 %2940, %v3287_v27  }
  0xc4   : > { %v3358_v43 = vpop.permute.xlu1 %1368 }
  0xc5   : > { %2941 = vset.pattern.permute.xlu1 %v5264_v39  ;;  %5394 = vst [vmem:[#allocation5_spill] sm:$0xff] %v3358_v43 }
  0xc6   : > { %1184 = vperm.xlu1 %2941, %v3287_v27  }
  0xc9   : > { %v3361_v44 = vpop.permute.xlu1 %1597 }
  0xca   : > { %1188 = vperm.xlu1 %2941, %v3264_v23  }
  0xcd   : > { %v3363_v45 = vpop.permute.xlu1 %1601 }
  0xce   : > { %2943 = vset.pattern.permute.xlu1 %v3072_v31 }
  0xd2   : > { %v3365_v46 = vpop.permute.xlu1 %1649 }
  0xd7   : > { %v3367_v47 = vpop.permute.xlu1 %1256 }
  0xd8   : > { %5395 = vst [vmem:[#allocation6_spill] sm:$0xff] %v3367_v47 }
  0xdc   : > { %v3369_v48 = vpop.permute.xlu1 %1304 }
  0xe0   : > { %v3373_v50 = vpop.permute.xlu1 %1308 }
  0xe1   : > { %5396 = vst [vmem:[#allocation7_spill] sm:$0xff] %v3373_v50 }
  0xe5   : > { %v3375_v52 = vpop.permute.xlu1 %1721 }
  0xea   : > { %v3377_v54 = vpop.permute.xlu1 %1376 }
  0xeb   : > { %5397 = vst [vmem:[#allocation8_spill] sm:$0xff] %v3377_v54 }
  0xef   : > { %v3382_v9 = vpop.permute.xlu1 %1605 }
  0xf0   : > { %5398 = vst [vmem:[#allocation9_spill] sm:$0xff] %v3382_v9 }
  0xf3   : > { %v3401_v28 = vpop.permute.xlu1 %1609 }
  0xf4   : > { %5401 = vst [vmem:[#allocation12_spill] sm:$0xff] %v3401_v28 }
  0xf8   : > { %v499_v55 = vpop.f32.mrb[0].mxu0 }
  0xf9   : > { %v627_v56 = vmul.f32 %v600_v51, %v499_v55  ;;  %v562_v57 = vpop.f32.mrb[0].mxu1  ;;  %v501_v58 = vpop.f32.mrb[1].mxu0 }
  0xfa   : > { %v629_v59 = vmul.f32 %v600_v51, %v562_v57  ;;  %v564_v60 = vpop.f32.mrb[1].mxu1  ;;  %v503_v61 = vpop.f32.mrb[2].mxu0  ;;  %v628_v21 = vmul.f32 %v600_v51, %v501_v58 }
  0xfb   : > { %v675_v62 = vadd.f32 %v3326_v33, %v627_v56  ;;  %v631_v63 = vmul.f32 %v605_v53, %v503_v61  ;;  %v566_v0 = vpop.f32.mrb[2].mxu1  ;;  %v505_v3 = vpop.f32.mrb[3].mxu0  ;;  %v630_v57 = vmul.f32 %v600_v51, %v564_v60 }
  0xfc   : > { %v677_v4 = vadd.f32 %v3326_v33, %v629_v59  ;;  %v633_v5 = vmul.f32 %v605_v53, %v566_v0  ;;  %v568_v6 = vpop.f32.mrb[3].mxu1  ;;  %v632_v30 = vmul.f32 %v605_v53, %v505_v3  ;;  %v676_v56 = vadd.f32 %v3326_v33, %v628_v21  ;;  %v3425_v3 = vpop.permute.xlu1 %1657 }
  0xfd   : > { %vm699_vm2 = vcmp.gt.f32.partialorder %v675_v62, 0.0  ;;  %v723_v7 = vmul.f32 0.01, %v675_v62  ;;  %v679_v8 = vadd.f32 %v3329_v34, %v631_v63  ;;  %v634_v59 = vmul.f32 %v605_v53, %v568_v6  ;;  %5402 = vst [vmem:[#allocation13_spill] sm:$0xff] %v3425_v3 }
  0xfe   : > { %v725_v11 = vmul.f32 0.01, %v677_v4  ;;  %v681_v12 = vadd.f32 %v3329_v34, %v633_v5  ;;  %vm701_vm4 = vcmp.gt.f32.partialorder %v677_v4, 0.0  ;;  %v680_v58 = vadd.f32 %v3329_v34, %v632_v30 }
  0xff   : > { %vm703_vm3 = vcmp.gt.f32.partialorder %v679_v8, 0.0  ;;  %v727_v10 = vmul.f32 0.01, %v679_v8  ;;  %v3385_v13 = vsel %vm699_vm2, %v675_v62, %v723_v7  ;;  %v724_v51 = vmul.f32 0.01, %v676_v56 }
 0x100   : > { %5399 = vst [vmem:[#allocation10_spill] sm:$0xff] %v3385_v13  ;;  %v509_v14 = vpop.f32.mrb[4].mxu0  ;;  %773 = vrot.lane.b32.xlu1 %v3385_v13, %s3075_s17  ;;  %vm705_vm5 = vcmp.gt.f32.partialorder %v681_v12, 0.0  ;;  %v729_v18 = vmul.f32 0.01, %v681_v12  ;;  %v3397_v22 = vsel %vm701_vm4, %v677_v4, %v725_v11  ;;  %v678_v53 = vadd.f32 %v3326_v33, %v630_v57 }
 0x101   : > { %v572_v15 = vpop.f32.mrb[4].mxu1  ;;  %v3389_v16 = vpop.f32.mrb[5].mxu0  ;;  %v3391_v17 = vsel %vm703_vm3, %v679_v8, %v727_v10  ;;  %5400 = vst [vmem:[#allocation11_spill] sm:$0xff] %v3397_v22  ;;  %vm700_vm6 = vcmp.gt.f32.partialorder %v676_v56, 0.0  ;;  %v728_v5 = vmul.f32 0.01, %v680_v58  ;;  %v682_v6 = vadd.f32 %v3329_v34, %v634_v59 }
 0x102   : > { %775 = vrot.lane.b32.xlu0 %v3391_v17, %s3075_s17  ;;  %v3395_v19 = vpop.f32.mrb[5].mxu1  ;;  %v513_v20 = vpop.f32.mrb[6].mxu0  ;;  %v3405_v31 = vsel %vm705_vm5, %v681_v12, %v729_v18  ;;  %vm704_vm7 = vcmp.gt.f32.partialorder %v680_v58, 0.0  ;;  %v726_v33 = vmul.f32 0.01, %v678_v53  ;;  %v3441_v10 = vsel %vm700_vm6, %v676_v56, %v724_v51 }
 0x103   : > { %v576_v26 = vpop.f32.mrb[6].mxu1  ;;  %v3399_v27 = vpop.f32.mrb[7].mxu0  ;;  %5403 = vst [vmem:[#allocation14_spill] sm:$0xff] %v3441_v10  ;;  %vm702_vm8 = vcmp.gt.f32.partialorder %v678_v53, 0.0  ;;  %v730_v11 = vmul.f32 0.01, %v682_v6  ;;  %v3445_v34 = vsel %vm704_vm7, %v680_v58, %v728_v5  ;;  %v639_v56 = vmul.f32 %v3332_v35, %v513_v20 }
 0x104   : > { %797 = vrot.lane.b32.xlu1 %v3397_v22, %s3075_s17  ;;  %v3407_v55 = vpop.f32.mrb[7].mxu1  ;;  %vm706_vm9 = vcmp.gt.f32.partialorder %v682_v6, 0.0  ;;  %v610_v12 = vpop.permute.xlu0 %609  ;;  %v3451_v30 = vsel %vm702_vm8, %v678_v53, %v726_v33  ;;  %v641_v5 = vmul.f32 %v3332_v35, %v576_v26 }
 0x105   : > { %v3449_v18 = vpop.permute.xlu1 %1264  ;;  %v635_v21 = vmul.f32 %v610_v12, %v509_v14  ;;  %5405 = vst [vmem:[#allocation16_spill] sm:$0xff] %v3451_v30  ;;  %v3456_v57 = vsel %vm706_vm9, %v682_v6, %v730_v11  ;;  %v637_v58 = vmul.f32 %v610_v12, %v572_v15  ;;  %v687_v14 = vadd.f32 %v3335_v36, %v639_v56 }
 0x106   : > { %799 = vrot.lane.b32.xlu0 %v3405_v31, %s3075_s17  ;;  %5404 = vst [vmem:[#allocation15_spill] sm:$0xff] %v3449_v18  ;;  %v689_v15 = vadd.f32 %v3335_v36, %v641_v5  ;;  %v636_v1 = vmul.f32 %v610_v12, %v3389_v16  ;;  %v638_v32 = vmul.f32 %v610_v12, %v3395_v19  ;;  %v5443_v18 = vmov 5  }
 0x107   : > { %v683_v59 = vadd.f32 %v3371_v49, %v635_v21  ;;  %v685_v20 = vadd.f32 %v3371_v49, %v637_v58  ;;  %v735_v6 = vmul.f32 0.01, %v687_v14  ;;  %vm711_vm11 = vcmp.gt.f32.partialorder %v687_v14, 0.0 }
 0x108   : > { %910 = vrot.lane.b32.xlu1 %v3385_v13, %s3076_s18  ;;  %v3417_v62 = vpop.f32.mrb[8].mxu0  ;;  %v3473_v33 = vpop.permute.xlu0 %624  ;;  %v737_v56 = vmul.f32 0.01, %v689_v15  ;;  %vm713_vm13 = vcmp.gt.f32.partialorder %v689_v15, 0.0 }
 0x109   : > { %v3413_v61 = vpop.f32.mrb[8].mxu1  ;;  %v3419_v63 = vpop.f32.mrb[9].mxu0  ;;  %v731_v53 = vmul.f32 0.01, %v683_v59  ;;  %vm707_vm10 = vcmp.gt.f32.partialorder %v683_v59, 0.0  ;;  %vm709_vm12 = vcmp.gt.f32.partialorder %v685_v20, 0.0  ;;  %v3483_v58 = vsel %vm711_vm11, %v687_v14, %v735_v6 }
 0x10a   : > { %v3421_v0 = vpop.f32.mrb[9].mxu1  ;;  %912 = vrot.lane.b32.xlu0 %v3391_v17, %s3076_s18  ;;  %v3430_v4 = vpop.f32.mrb[10].mxu0  ;;  %v733_v11 = vmul.f32 0.01, %v685_v20  ;;  %5408 = vst [vmem:[#allocation19_spill] sm:$0xff] %v3483_v58  ;;  %v3498_v14 = vsel %vm713_vm13, %v689_v15, %v737_v56  ;;  %v684_v6 = vadd.f32 %v3371_v49, %v636_v1  ;;  %v686_v1 = vadd.f32 %v3371_v49, %v638_v32 }
 0x10b   : > { %v3428_v60 = vpop.f32.mrb[10].mxu1  ;;  %v3433_v7 = vpop.f32.mrb[11].mxu0  ;;  %v3479_v21 = vsel %vm707_vm10, %v683_v59, %v731_v53  ;;  %v640_v59 = vmul.f32 %v3332_v35, %v3399_v27  ;;  %5410 = vst [vmem:[#allocation21_spill] sm:$0xff] %v3498_v14 }
 0x10c   : > { %v3435_v8 = vpop.f32.mrb[11].mxu1  ;;  %934 = vrot.lane.b32.xlu1 %v3397_v22, %s3076_s18  ;;  %v3461_v51 = vpop.permute.xlu1 %1312  ;;  %v3490_v39 = vsel %vm709_vm12, %v685_v20, %v733_v11  ;;  %v642_v20 = vmul.f32 %v3332_v35, %v3407_v55  ;;  %v732_v11 = vmul.f32 0.01, %v684_v6  ;;  %vm708_vm14 = vcmp.gt.f32.partialorder %v684_v6, 0.0 }
 0x10d   : > { %5406 = vst [vmem:[#allocation17_spill] sm:$0xff] %v3461_v51  ;;  %v3487_v5 = vpop.permute.xlu0 %1372  ;;  %v688_v16 = vadd.f32 %v3335_v36, %v640_v59  ;;  %v734_v55 = vmul.f32 0.01, %v686_v1  ;;  %vm710_vm1 = vcmp.gt.f32.partialorder %v686_v1, 0.0 }
 0x10e   : > { %936 = vrot.lane.b32.xlu0 %v3405_v31, %s3076_s18  ;;  %v690_v12 = vadd.f32 %v3335_v36, %v642_v20  ;;  %v3523_v56 = vsel %vm708_vm14, %v684_v6, %v732_v11  ;;  %v643_v36 = vmul.f32 %v3338_v37, %v3417_v62  ;;  %v645_v6 = vmul.f32 %v3338_v37, %v3413_v61 }
 0x10f   : > { %v736_v19 = vmul.f32 0.01, %v688_v16  ;;  %vm712_vm15 = vcmp.gt.f32.partialorder %v688_v16, 0.0  ;;  %v3535_v49 = vsel %vm710_vm1, %v686_v1, %v734_v55  ;;  %v644_v1 = vmul.f32 %v3338_v37, %v3419_v63 }
 0x110   : > { %785 = vrot.lane.b32.xlu1 %v3441_v10, %s3075_s17  ;;  %v3477_v26 = vpop.permute.xlu1 %1316  ;;  %v738_v59 = vmul.f32 0.01, %v690_v12  ;;  %vm714_vm2 = vcmp.gt.f32.partialorder %v690_v12, 0.0  ;;  %5416 = vst [vmem:[#allocation27_spill] sm:$0xff] %v3535_v49  ;;  %v693_v62 = vadd.f32 %v3342_v38, %v645_v6 }
 0x111   : > { %5407 = vst [vmem:[#allocation18_spill] sm:$0xff] %v3477_v26  ;;  %v3509_v27 = vpop.permute.xlu0 %1380  ;;  %v3529_v32 = vsel %vm712_vm15, %v688_v16, %v736_v19  ;;  %v691_v19 = vadd.f32 %v3342_v38, %v643_v36  ;;  %v646_v36 = vmul.f32 %v3338_v37, %v3421_v0 }
 0x112   : > { %787 = vrot.lane.b32.xlu0 %v3445_v34, %s3075_s17  ;;  %5411 = vst [vmem:[#allocation22_spill] sm:$0xff] %v3509_v27  ;;  %5415 = vst [vmem:[#allocation26_spill] sm:$0xff] %v3529_v32  ;;  %v3541_v20 = vsel %vm714_vm2, %v690_v12, %v738_v59  ;;  %v741_v55 = vmul.f32 0.01, %v693_v62  ;;  %v692_v59 = vadd.f32 %v3342_v38, %v644_v1  ;;  %vm717_vm4 = vcmp.gt.f32.partialorder %v693_v62, 0.0 }
 0x113   : > { %5417 = vst [vmem:[#allocation28_spill] sm:$0xff] %v3541_v20  ;;  %v739_v12 = vmul.f32 0.01, %v691_v19  ;;  %vm715_vm3 = vcmp.gt.f32.partialorder %v691_v19, 0.0  ;;  %v647_v1 = vmul.f32 %v3473_v33, %v3430_v4  ;;  %v821_v27 = vlaneseq }
 0x114   : > { %809 = vrot.lane.b32.xlu1 %v3451_v30, %s3075_s17  ;;  %v3494_v53 = vpop.permute.xlu1 %1729  ;;  %v3577_v37 = vsel %vm717_vm4, %v693_v62, %v741_v55  ;;  %vm716_vm5 = vcmp.gt.f32.partialorder %v692_v59, 0.0 }
 0x115   : > { %5409 = vst [vmem:[#allocation20_spill] sm:$0xff] %v3494_v53  ;;  %v3521_v35 = vpop.permute.xlu0 %1388  ;;  %v3568_v63 = vsel %vm715_vm3, %v691_v19, %v739_v12  ;;  %5422 = vst [vmem:[#allocation33_spill] sm:$0xff] %v3577_v37  ;;  %v695_v12 = vadd.f32 %v3346_v40, %v647_v1 }
 0x116   : > { %811 = vrot.lane.b32.xlu0 %v3456_v57, %s3075_s17  ;;  %5413 = vst [vmem:[#allocation24_spill] sm:$0xff] %v3521_v35  ;;  %5420 = vst [vmem:[#allocation31_spill] sm:$0xff] %v3568_v63  ;;  %v694_v35 = vadd.f32 %v3342_v38, %v646_v36  ;;  %v649_v38 = vmul.f32 %v3473_v33, %v3428_v60  ;;  %v648_v60 = vmul.f32 %v3473_v33, %v3433_v7 }
 0x117   : > { %vm719_vm7 = vcmp.gt.f32.partialorder %v695_v12, 0.0 }
 0x118   : > { %922 = vrot.lane.b32.xlu1 %v3441_v10, %s3076_s18  ;;  %v3513_v15 = vpop.permute.xlu1 %1384  ;;  %v742_v19 = vmul.f32 0.01, %v694_v35  ;;  %vm718_vm6 = vcmp.gt.f32.partialorder %v694_v35, 0.0  ;;  %v697_v36 = vadd.f32 %v3346_v40, %v649_v38 }
 0x119   : > { %5412 = vst [vmem:[#allocation23_spill] sm:$0xff] %v3513_v15  ;;  %v3543_v11 = vpop.permute.xlu0 %1645  ;;  %v1945_v15 = vld [vmem:[%s5254_s5] sm:$0xff] }
 0x11a   : > { %924 = vrot.lane.b32.xlu0 %v3445_v34, %s3076_s18  ;;  %v3601_v1 = vsel %vm718_vm6, %v694_v35, %v742_v19  ;;  %vm721_vm8 = vcmp.gt.f32.partialorder %v697_v36, 0.0 }
 0x11b   : > { %5425 = vst [vmem:[#allocation36_spill] sm:$0xff] %v3601_v1 }
 0x11c   : > { %946 = vrot.lane.b32.xlu1 %v3451_v30, %s3076_s18  ;;  %v3525_v2 = vpop.permute.xlu1 %1613 }
 0x11d   : > { %5414 = vst [vmem:[#allocation25_spill] sm:$0xff] %v3525_v2  ;;  %v3557_v61 = vpop.permute.xlu0 %1653  ;;  %v740_v2 = vmul.f32 0.01, %v692_v59 }
 0x11e   : > { %948 = vrot.lane.b32.xlu0 %v3456_v57, %s3076_s18 }
 0x11f   : > { %v3588_v4 = vsel %vm716_vm5, %v692_v59, %v740_v2  ;;  %v745_v2 = vmul.f32 0.01, %v697_v36  ;;  %v696_v59 = vadd.f32 %v3346_v40, %v648_v60 }
 0x120   : > { %777 = vrot.lane.b32.xlu1 %v3479_v21, %s3075_s17  ;;  %v3547_v16 = vpop.permute.xlu1 %1617  ;;  %5424 = vst [vmem:[#allocation35_spill] sm:$0xff] %v3588_v4 }
 0x121   : > { %5418 = vst [vmem:[#allocation29_spill] sm:$0xff] %v3547_v16  ;;  %v3579_v0 = vpop.permute.xlu0 %1661  ;;  %v744_v35 = vmul.f32 0.01, %v696_v59  ;;  %vm720_vm9 = vcmp.gt.f32.partialorder %v696_v59, 0.0 }
 0x122   : > { %779 = vrot.lane.b32.xlu0 %v3483_v58, %s3075_s17  ;;  %5423 = vst [vmem:[#allocation34_spill] sm:$0xff] %v3579_v0  ;;  %v650_v0 = vmul.f32 %v3473_v33, %v3435_v8  ;;  %v3623_v8 = vsel %vm721_vm8, %v697_v36, %v745_v2 }
 0x123   : > { %5430 = vst [vmem:[#allocation41_spill] sm:$0xff] %v3623_v8 }
 0x124   : > { %801 = vrot.lane.b32.xlu1 %v3490_v39, %s3075_s17  ;;  %v3562_v6 = vpop.permute.xlu1 %1665  ;;  %v698_v19 = vadd.f32 %v3346_v40, %v650_v0 }
 0x125   : > { %5419 = vst [vmem:[#allocation30_spill] sm:$0xff] %v3562_v6  ;;  %v3594_v55 = vpop.permute.xlu0 %1717  ;;  %v3724_v6 = vand.u32 127, %v821_v27 }
 0x126   : > { %803 = vrot.lane.b32.xlu0 %v3498_v14, %s3075_s17  ;;  %vm722_vm10 = vcmp.gt.f32.partialorder %v698_v19, 0.0 }
 0x127   : > { %5447 = vst [vmem:[#allocation54_spill] sm:$0xff] %v3724_v6  ;;  %vm823_vm11 = vcmp.lt.s32.totalorder %v3724_v6, 1  ;;  %vm958_vm12 = vcmp.lt.s32.totalorder %v3724_v6, 127 }
 0x128   : > { %914 = vrot.lane.b32.xlu1 %v3479_v21, %s3076_s18  ;;  %v3573_v26 = vpop.permute.xlu1 %1733 }
 0x129   : > { %5421 = vst [vmem:[#allocation32_spill] sm:$0xff] %v3573_v26  ;;  %v743_v26 = vmul.f32 0.01, %v695_v12  ;;  %v3614_v43 = vpop.permute.xlu0 %1725 }
 0x12a   : > { %916 = vrot.lane.b32.xlu0 %v3483_v58, %s3076_s18  ;;  %5428 = vst [vmem:[#allocation39_spill] sm:$0xff] %v3614_v43 }
 0x12b   : > { %v3612_v7 = vsel %vm719_vm7, %v695_v12, %v743_v26  ;;  %v746_v26 = vmul.f32 0.01, %v698_v19  ;;  %v3631_v12 = vsel %vm720_vm9, %v696_v59, %v744_v35  ;;  %v5437_v35 = vmov 0  }
 0x12c   : > { %938 = vrot.lane.b32.xlu1 %v3490_v39, %s3076_s18  ;;  %v3592_v62 = vpop.permute.xlu1 %1056  ;;  %5427 = vst [vmem:[#allocation38_spill] sm:$0xff] %v3612_v7  ;;  %5432 = vst [vmem:[#allocation43_spill] sm:$0xff] %v3631_v12 }
 0x12d   : > { %v3627_v33 = vpop.permute.xlu0 %1737  ;;  %v3639_v0 = vsel %vm722_vm10, %v698_v19, %v746_v26 }
 0x12e   : > { %940 = vrot.lane.b32.xlu0 %v3498_v14, %s3076_s18  ;;  %5431 = vst [vmem:[#allocation42_spill] sm:$0xff] %v3627_v33  ;;  %5433 = vst [vmem:[#allocation44_spill] sm:$0xff] %v3639_v0  ;;  %v3709_v33 = vshrl.u32 %v821_v27, 7  ;;  %v1668_v27 = vmul.f32 %v3543_v11, %v3385_v13 }
 0x130   : > { %789 = vrot.lane.b32.xlu1 %v3523_v56, %s3075_s17  ;;  %v3608_v38 = vpop.permute.xlu1 %1104  ;;  %5446 = vst [vmem:[#allocation53_spill] sm:$0xff] %v3709_v33  ;;  %v852_v16 = vsub.s32 0, %v3709_v33 }
 0x131   : > { %5426 = vst [vmem:[#allocation37_spill] sm:$0xff] %v3608_v38  ;;  %v3641_v36 = vpop.permute.xlu0 %1051  ;;  %v5441_v38 = vmov 4  }
 0x132   : > { %791 = vrot.lane.b32.xlu0 %v3529_v32, %s3075_s17  ;;  %5434 = vst [vmem:[#allocation45_spill] sm:$0xff] %v3641_v36 }
 0x134   : > { %813 = vrot.lane.b32.xlu1 %v3535_v49, %s3075_s17  ;;  %v3619_v60 = vpop.permute.xlu1 %1176 }
 0x135   : > { %5429 = vst [vmem:[#allocation40_spill] sm:$0xff] %v3619_v60  ;;  %v3650_v59 = vpop.permute.xlu0 %1061 }
 0x136   : > { %815 = vrot.lane.b32.xlu0 %v3541_v20, %s3075_s17  ;;  %5436 = vst [vmem:[#allocation47_spill] sm:$0xff] %v3650_v59 }
 0x138   : > { %926 = vrot.lane.b32.xlu1 %v3523_v56, %s3076_s18  ;;  %v3635_v40 = vpop.permute.xlu1 %1180 }
 0x139   : > { %v3659_v26 = vpop.permute.xlu0 %1071 }
 0x13a   : > { %928 = vrot.lane.b32.xlu0 %v3529_v32, %s3076_s18  ;;  %5439 = vst [vmem:[#allocation49_spill] sm:$0xff] %v3659_v26 }
 0x13c   : > { %950 = vrot.lane.b32.xlu1 %v3535_v49, %s3076_s18  ;;  %v3645_v2 = vpop.permute.xlu1 %1066 }
 0x13d   : > { %5435 = vst [vmem:[#allocation46_spill] sm:$0xff] %v3645_v2  ;;  %v3667_v36 = vpop.permute.xlu0 %1108 }
 0x13e   : > { %952 = vrot.lane.b32.xlu0 %v3541_v20, %s3076_s18 }
 0x140   : > { %781 = vrot.lane.b32.xlu1 %v3568_v63, %s3075_s17  ;;  %v3655_v19 = vpop.permute.xlu1 %1112 }
 0x141   : > { %5438 = vst [vmem:[#allocation48_spill] sm:$0xff] %v3655_v19  ;;  %v771_v19 = vld [vmem:[%s5250_s1] sm:$0xff] }
 0x142   : > { %942 = vrot.lane.b32.xlu0 %v3577_v37, %s3076_s18 }
 0x144   : > { %805 = vrot.lane.b32.xlu1 %v3577_v37, %s3075_s17 }
 0x145   : > { %v3662_v60 = vpop.permute.xlu1 %1184 }
 0x146   : > { %930 = vrot.lane.b32.xlu0 %v3588_v4, %s3076_s18  ;;  %5440 = vst [vmem:[#allocation50_spill] sm:$0xff] %v3662_v60 }
 0x148   : > { %918 = vrot.lane.b32.xlu1 %v3568_v63, %s3076_s18  ;;  %v5445_v63 = vmov 1  }
 0x149   : > { %v3672_v51 = vpop.permute.xlu1 %1188 }
 0x14a   : > { %954 = vrot.lane.b32.xlu0 %v3601_v1, %s3076_s18  ;;  %5442 = vst [vmem:[#allocation51_spill] sm:$0xff] %v3672_v51 }
 0x14c   : > { %793 = vrot.lane.b32.xlu1 %v3588_v4, %s3075_s17 }
 0x14e   : > { %783 = vrot.lane.b32.xlu0 %v3612_v7, %s3075_s17 }
 0x150   : > { %817 = vrot.lane.b32.xlu1 %v3601_v1, %s3075_s17 }
 0x152   : > { %807 = vrot.lane.b32.xlu0 %v3623_v8, %s3075_s17 }
 0x154   : > { %920 = vrot.lane.b32.xlu1 %v3612_v7, %s3076_s18 }
 0x156   : > { %795 = vrot.lane.b32.xlu0 %v3631_v12, %s3075_s17 }
 0x158   : > { %944 = vrot.lane.b32.xlu1 %v3623_v8, %s3076_s18  ;;  %v772_v8 = vld [vmem:[%s5250_s1 + $0x8] sm:$0xff] }
 0x159   : > { %v861_v51 = vrot.slane %v772_v8, %v852_v16 }
 0x15a   : > { %819 = vrot.lane.b32.xlu0 %v3639_v0, %s3075_s17  ;;  %s3077_s17 = smov 112  }
 0x15c   : > { %932 = vrot.lane.b32.xlu1 %v3631_v12, %s3076_s18 }
 0x15e   : > { %1124 = vperm.xlu0 %2942, %v3272_v24  }
 0x160   : > { %956 = vrot.lane.b32.xlu1 %v3639_v0, %s3076_s18  ;;  %v856_v0 = vsub.s32 4, %v3709_v33  ;;  %s3078_s18 = smov 16  }
 0x162   : > { %2945 = vset.pattern.permute.xlu0 %v5437_v35  ;;  %v857_v7 = vrot.slane %v771_v19, %v856_v0  ;;  %v865_v53 = vrot.slane %v772_v8, %v856_v0  ;;  %v3744_v0 = vmul.f32 %v3543_v11, %v3397_v22 }
 0x163   : > { %1248 = vperm.xlu0 %2945, %v3280_v25  }
 0x164   : > { %1076 = vperm.xlu1 %2943, %v3272_v24  }
 0x167   : > { %1260 = vperm.xlu0 %2945, %v3264_v23   ;;  %v3676_v23 = vpop.permute.xlu0 %1116 }
 0x168   : > { %2944 = vset.pattern.permute.xlu1 %v5441_v38  ;;  %5444 = vst [vmem:[#allocation52_spill] sm:$0xff] %v3676_v23  ;;  %v1947_v38 = vld [vmem:[%s5254_s5 + $0x10] sm:$0xff] }
 0x169   : > { %1120 = vperm.xlu1 %2944, %v3294_v29  }
 0x16b   : > { %1268 = vperm.xlu0 %2945, %v3272_v24  }
 0x16d   : > { %2946 = vset.pattern.permute.xlu1 %v5443_v18  ;;  %v1949_v18 = vld [vmem:[%s5254_s5 + $0x20] sm:$0xff] }
 0x16e   : > { %1192 = vperm.xlu1 %2946, %v3294_v29   ;;  %v1946_v29 = vld [vmem:[%s5254_s5 + $0x8] sm:$0xff] }
 0x16f   : > { %1953 = vperm.xlu0 %2945, %v1945_v15  }
 0x172   : > { %v3681_v26 = vpop.permute.xlu1 %773  ;;  %1196 = vperm.xlu1 %2946, %v3272_v24  }
 0x173   : > { %1963 = vperm.xlu0 %2945, %v1947_v38  }
 0x174   : > { %v3684_v1 = vpop.permute.xlu0 %775 }
 0x176   : > { %v3692_v37 = vpop.permute.xlu1 %797  ;;  %2947 = vset.pattern.permute.xlu1 %v5437_v35 }
 0x177   : > { %1973 = vperm.xlu0 %2945, %v1949_v18   ;;  %1958 = vperm.xlu1 %2947, %v1946_v29   ;;  %v1948_v18 = vld [vmem:[%s5254_s5 + $0x18] sm:$0xff] }
 0x178   : > { %v3695_v4 = vpop.permute.xlu0 %799 }
 0x17a   : > { %v3697_v24 = vpop.permute.xlu1 %910 }
 0x17b   : > { %2951 = vset.pattern.permute.xlu0 %v5445_v63  ;;  %2948 = vset.pattern.permute.xlu1 %v5445_v63 }
 0x17c   : > { %v3701_v50 = vpop.permute.xlu0 %912  ;;  %1296 = vperm.xlu0 %2951, %v3280_v25   ;;  %2006 = vperm.xlu1 %2948, %v1945_v15   ;;  %v985_v15 = vsub.s32 1, %v3709_v33 }
 0x17e   : > { %v3704_v60 = vpop.permute.xlu1 %934  ;;  %v986_v20 = vrot.slane %v771_v19, %v985_v15  ;;  %v994_v2 = vrot.slane %v772_v8, %v985_v15 }
 0x180   : > { %v3711_v59 = vpop.permute.xlu0 %936  ;;  %2010 = vperm.xlu0 %2951, %v1946_v29   ;;  %2949 = vset.pattern.permute.xlu1 %v5437_v35  ;;  %v989_v29 = vsub.s32 5, %v3709_v33  ;;  %v3762_v47 = vrot.slane %v994_v2, %v985_v15  ;;  %v3789_v2 = vmul.f32 %v3365_v46, %v3405_v31 }
 0x181   : > { %1968 = vperm.xlu1 %2949, %v1948_v18   ;;  %v853_v18 = vrot.slane %v771_v19, %v852_v16 }
 0x182   : > { %v786_v25 = vpop.permute.xlu1 %785  ;;  %v990_v28 = vrot.slane %v771_v19, %v989_v29  ;;  %v998_v54 = vrot.slane %v772_v8, %v989_v29  ;;  %v3748_v8 = vmul.f32 %v3543_v11, %v3451_v30  ;;  %v3750_v19 = vrot.slane %v857_v7, %v852_v16  ;;  %5454 = vst [vmem:[#allocation61_spill] sm:$0xff] %v3762_v47 }
 0x183   : > { %v3730_v9 = vrot.slane %v853_v18, %v852_v16  ;;  %v3752_v29 = vrot.slane %v861_v51, %v852_v16  ;;  %v3755_v18 = vrot.slane %v986_v20, %v985_v15  ;;  %v830_v51 = vsel %vm823_vm11, %v786_v25, %v3692_v37 }
 0x184   : > { %v788_v12 = vpop.permute.xlu0 %787  ;;  %5449 = vst [vmem:[#allocation56_spill] sm:$0xff] %v3750_v19  ;;  %v3760_v13 = vrot.slane %v990_v28, %v985_v15  ;;  %v836_v20 = vsel %vm823_vm11, %v3681_v26, %v786_v25  ;;  %v1672_v28 = vmul.f32 %v3365_v46, %v3391_v17 }
 0x185   : > { %2950 = vset.pattern.permute.xlu1 %v5445_v63  ;;  %5448 = vst [vmem:[#allocation55_spill] sm:$0xff] %v3730_v9  ;;  %5450 = vst [vmem:[#allocation57_spill] sm:$0xff] %v3752_v29  ;;  %v3803_v30 = vmul.f32 %v3750_v19, %v836_v20  ;;  %v3806_v14 = vmul.f32 %v3752_v29, %v830_v51  ;;  %v3825_v20 = vmul.f32 %v3667_v36, %v3405_v31 }
 0x186   : > { %v3727_v23 = vpop.permute.xlu1 %809  ;;  %2014 = vperm.xlu1 %2950, %v1947_v38   ;;  %v3740_v38 = vmul.f32 %v3543_v11, %v3441_v10  ;;  %5451 = vst [vmem:[#allocation58_spill] sm:$0xff] %v3755_v18  ;;  %v3758_v10 = vrot.slane %v865_v53, %v852_v16  ;;  %5453 = vst [vmem:[#allocation60_spill] sm:$0xff] %v3760_v13  ;;  %v3764_v11 = vrot.slane %v998_v54, %v985_v15 }
 0x187   : > { %v842_v33 = vsel %vm823_vm11, %v3727_v23, %v3681_v26  ;;  %v837_v53 = vsel %vm823_vm11, %v3684_v1, %v788_v12  ;;  %v3785_v16 = vmul.f32 %v3365_v46, %v3445_v34  ;;  %5457 = vst [vmem:[#allocation64_spill] sm:$0xff] %v3803_v30  ;;  %5458 = vst [vmem:[#allocation65_spill] sm:$0xff] %v3806_v14 }
 0x188   : > { %v812_v43 = vpop.permute.xlu0 %811  ;;  %5452 = vst [vmem:[#allocation59_spill] sm:$0xff] %v3758_v10  ;;  %v3773_v7 = vmul.f32 %v3730_v9, %v842_v33  ;;  %v831_v33 = vsel %vm823_vm11, %v788_v12, %v3695_v4 }
 0x189   : > { %v843_v26 = vsel %vm823_vm11, %v812_v43, %v3684_v1  ;;  %v3813_v1 = vmul.f32 %v3365_v46, %v3456_v57  ;;  %v825_v46 = vsel %vm823_vm11, %v3695_v4, %v812_v43 }
 0x18a   : > { %v923_v63 = vpop.permute.xlu1 %922  ;;  %2952 = vset.pattern.permute.xlu1 %v5437_v35  ;;  %5455 = vst [vmem:[#allocation62_spill] sm:$0xff] %v3773_v7  ;;  %v1132_v35 = vmul.f32 %v3667_v36, %v3445_v34  ;;  %v1620_v3 = vmul.f32 %v3361_v44, %v3773_v7  ;;  %v3836_v7 = vmul.f32 %v3667_v36, %v3391_v17 }
 0x18b   : > { %v971_v54 = vsel %vm958_vm12, %v3697_v24, %v923_v63  ;;  %v965_v12 = vsel %vm958_vm12, %v923_v63, %v3704_v60  ;;  %v3828_v63 = vmul.f32 %v3752_v29, %v831_v33  ;;  %v3870_v29 = vmul.f32 %v3758_v10, %v825_v46 }
 0x18c   : > { %v925_v22 = vpop.permute.xlu0 %924  ;;  %v3798_v25 = vmul.f32 %v3755_v18, %v971_v54  ;;  %v3816_v54 = vmul.f32 %v3750_v19, %v837_v53  ;;  %v890_v53 = vmul.f32 %v3730_v9, %v843_v26  ;;  %v3839_v19 = vmul.f32 %v3760_v13, %v965_v12 }
 0x18d   : > { %v972_v51 = vsel %vm958_vm12, %v3701_v50, %v925_v22  ;;  %v966_v33 = vsel %vm958_vm12, %v925_v22, %v3711_v59  ;;  %v1621_v26 = vmul.f32 %v3361_v44, %v3803_v30  ;;  %v1622_v12 = vmul.f32 %v3361_v44, %v3806_v14 }
 0x18e   : > { %5456 = vst [vmem:[#allocation63_spill] sm:$0xff] %v3798_v25  ;;  %v947_v15 = vpop.permute.xlu1 %946  ;;  %5459 = vst [vmem:[#allocation66_spill] sm:$0xff] %v3839_v19  ;;  %v1740_v58 = vmul.f32 %v3594_v55, %v3798_v25  ;;  %v3856_v9 = vmul.f32 %v3755_v18, %v972_v51  ;;  %v824_v30 = vsel %vm823_vm11, %v3692_v37, %v3727_v23 }
 0x18f   : > { %v959_v25 = vsel %vm958_vm12, %v3704_v60, %v947_v15  ;;  %v1692_v14 = vadd.f32 %v1668_v27, %v1620_v3  ;;  %v1624_v51 = vmul.f32 %v3363_v45, %v890_v53  ;;  %v3874_v18 = vmul.f32 %v3760_v13, %v966_v33 }
 0x190   : > { %v949_v32 = vpop.permute.xlu0 %948  ;;  %v1085_v49 = vmul.f32 %v3592_v62, %v3828_v63  ;;  %v1741_v37 = vmul.f32 %v3594_v55, %v3839_v19  ;;  %v3887_v3 = vmul.f32 %v3762_v47, %v959_v25  ;;  %v1625_v46 = vmul.f32 %v3363_v45, %v3816_v54 }
 0x191   : > { %v960_v43 = vsel %vm958_vm12, %v3711_v59, %v949_v32  ;;  %v1084_v59 = vmul.f32 %v3592_v62, %v3816_v54  ;;  %v978_v60 = vsel %vm958_vm12, %v949_v32, %v3701_v50  ;;  %v1764_v23 = vadd.f32 %v1740_v58, %v1692_v14 }
 0x192   : > { %v3849_v4 = vpop.permute.xlu1 %777  ;;  %5461 = vst [vmem:[#allocation68_spill] sm:$0xff] %v3887_v3  ;;  %v1626_v50 = vmul.f32 %v3363_v45, %v3828_v63  ;;  %v1744_v32 = vmul.f32 %v3375_v52, %v3856_v9  ;;  %v977_v33 = vsel %vm958_vm12, %v947_v15, %v3697_v24  ;;  %v3903_v25 = vmul.f32 %v3758_v10, %v824_v30 }
 0x193   : > { %v1083_v58 = vmul.f32 %v3592_v62, %v890_v53  ;;  %v3907_v14 = vmul.f32 %v3764_v11, %v978_v60  ;;  %1788 = vrot.lane.b32.xlu1 %v1764_v23, %s3077_s17  ;;  %v1693_v19 = vadd.f32 %v3740_v38, %v1621_v26  ;;  %v1745_v24 = vmul.f32 %v3375_v52, %v3874_v18 }
 0x194   : > { %v3861_v22 = vpop.permute.xlu0 %779  ;;  %5463 = vst [vmem:[#allocation70_spill] sm:$0xff] %v3903_v25  ;;  %v1696_v15 = vadd.f32 %v1672_v28, %v1624_v51  ;;  %v1627_v13 = vmul.f32 %v3363_v45, %v3870_v29  ;;  %v3920_v60 = vmul.f32 %v3764_v11, %v977_v33  ;;  %v1742_v23 = vmul.f32 %v3594_v55, %v3887_v3 }
 0x195   : > { %5460 = vst [vmem:[#allocation67_spill] sm:$0xff] %v3861_v22  ;;  %v3880_v22 = vmul.f32 %v3762_v47, %v960_v43  ;;  %v1086_v47 = vmul.f32 %v3592_v62, %v3870_v29  ;;  %v1765_v38 = vadd.f32 %v1741_v37, %v1693_v19  ;;  %v1698_v28 = vadd.f32 %v3789_v2, %v1626_v50 }
 0x196   : > { %v3889_v27 = vpop.permute.xlu1 %801  ;;  %5464 = vst [vmem:[#allocation71_spill] sm:$0xff] %v3920_v60  ;;  %v3928_v10 = vadd.f32 %v1744_v32, %v1696_v15  ;;  %v1156_v51 = vadd.f32 %v1132_v35, %v1084_v59  ;;  %v1623_v45 = vmul.f32 %v3361_v44, %v3903_v25  ;;  %v1747_v33 = vmul.f32 %v3375_v52, %v3907_v14 }
 0x197   : > { %v1746_v30 = vmul.f32 %v3375_v52, %v3880_v22  ;;  %1800 = vrot.lane.b32.xlu1 %v1765_v38, %s3077_s17  ;;  %v1694_v19 = vadd.f32 %v3744_v0, %v1622_v12  ;;  %v1134_v37 = vmul.f32 %v3667_v36, %v3456_v57  ;;  %v1275_v32 = vmul.f32 %v3350_v41, %v890_v53 }
 0x198   : > { %v3900_v43 = vpop.permute.xlu0 %803  ;;  %5465 = vst [vmem:[#allocation72_spill] sm:$0xff] %v3928_v10  ;;  %v1204_v35 = vmul.f32 %v3635_v40, %v3874_v18  ;;  %v1743_v44 = vmul.f32 %v3594_v55, %v3920_v60  ;;  %v1699_v0 = vadd.f32 %v3813_v1, %v1627_v13  ;;  %v1157_v12 = vadd.f32 %v3825_v20, %v1085_v49 }
 0x199   : > { %5462 = vst [vmem:[#allocation69_spill] sm:$0xff] %v3900_v43  ;;  %v1697_v43 = vadd.f32 %v3785_v16, %v1625_v46  ;;  %v3943_v16 = vadd.f32 %v1746_v30, %v1698_v28  ;;  %v1766_v52 = vadd.f32 %v1742_v23, %v1694_v19  ;;  %v1205_v59 = vmul.f32 %v3635_v40, %v3880_v22 }
 0x19a   : > { %v3924_v26 = vpop.permute.xlu1 %914  ;;  %v3955_v53 = vadd.f32 %v1204_v35, %v1156_v51  ;;  %v1155_v46 = vadd.f32 %v3836_v7, %v1083_v58  ;;  %v1158_v50 = vadd.f32 %v1134_v37, %v1086_v47  ;;  %v1695_v55 = vadd.f32 %v3748_v8, %v1623_v45 }
 0x19b   : > { %v3941_v15 = vadd.f32 %v1745_v24, %v1697_v43  ;;  %5467 = vst [vmem:[#allocation74_spill] sm:$0xff] %v3943_v16  ;;  %1812 = vrot.lane.b32.xlu1 %v1766_v52, %s3077_s17  ;;  %v3962_v43 = vadd.f32 %v1747_v33, %v1699_v0  ;;  %v1203_v13 = vmul.f32 %v3635_v40, %v3856_v9  ;;  %v5474_v0 = vld [vmem:[#allocation19_spill] sm:$0xff] }
 0x19c   : > { %v3926_v62 = vpop.permute.xlu0 %916  ;;  %5468 = vst [vmem:[#allocation75_spill] sm:$0xff] %v3955_v53  ;;  %v1206_v49 = vmul.f32 %v3635_v40, %v3907_v14  ;;  %v1323_v1 = vmul.f32 %v3354_v42, %v3391_v17  ;;  %v3970_v20 = vadd.f32 %v1205_v59, %v1157_v12  ;;  %v1395_v47 = vmul.f32 %v3487_v5, %v3856_v9  ;;  %v5475_v12 = vld [vmem:[#allocation13_spill] sm:$0xff] }
 0x19d   : > { %5466 = vst [vmem:[#allocation73_spill] sm:$0xff] %v3941_v15  ;;  %5469 = vst [vmem:[#allocation76_spill] sm:$0xff] %v3962_v43  ;;  %v1767_v7 = vadd.f32 %v1743_v44, %v1695_v55  ;;  %v3974_v24 = vadd.f32 %v1203_v13, %v1155_v46  ;;  %v1276_v23 = vmul.f32 %v3350_v41, %v3816_v54  ;;  %v5476_v46 = vld [vmem:[#allocation67_spill] sm:$0xff] }
 0x19e   : > { %v3949_v2 = vpop.permute.xlu1 %938  ;;  %5470 = vst [vmem:[#allocation77_spill] sm:$0xff] %v3970_v20  ;;  %v3976_v8 = vadd.f32 %v1206_v49, %v1158_v50  ;;  %v1347_v40 = vadd.f32 %v1323_v1, %v1275_v32  ;;  %v1324_v17 = vmul.f32 %v3354_v42, %v3445_v34  ;;  %v1325_v38 = vmul.f32 %v3354_v42, %v3405_v31  ;;  %v5473_v32 = vld [vmem:[#allocation27_spill] sm:$0xff]  ;;  %v5478_v49 = vld [vmem:[#allocation56_spill] sm:$0xff] }
 0x19f   : > { %5471 = vst [vmem:[#allocation78_spill] sm:$0xff] %v3974_v24  ;;  %1824 = vrot.lane.b32.xlu1 %v1767_v7, %s3077_s17  ;;  %v1326_v9 = vmul.f32 %v3354_v42, %v3456_v57  ;;  %v3989_v28 = vmul.f32 %v3369_v48, %v3479_v21  ;;  %v3993_v51 = vmul.f32 %v3557_v61, %v3479_v21 }
 0x1a0   : > { %v3953_v36 = vpop.permute.xlu0 %940  ;;  %5472 = vst [vmem:[#allocation79_spill] sm:$0xff] %v3976_v8  ;;  %v1277_v54 = vmul.f32 %v3350_v41, %v3828_v63  ;;  %v1396_v34 = vmul.f32 %v3487_v5, %v3874_v18  ;;  %v1419_v45 = vadd.f32 %v1395_v47, %v1347_v40  ;;  %v4001_v31 = vmul.f32 %v3557_v61, %v3523_v56  ;;  %v5480_v47 = vld [vmem:[#allocation69_spill] sm:$0xff] }
 0x1a1   : > { %v1278_v42 = vmul.f32 %v3350_v41, %v3870_v29  ;;  %v4007_v19 = vmul.f32 %v3557_v61, %v3490_v39  ;;  %v4011_v63 = vmul.f32 %v3369_v48, %v3523_v56  ;;  %v4015_v18 = vmul.f32 %v3369_v48, %v3490_v39 }
 0x1a2   : > { %v790_v58 = vpop.permute.xlu1 %789  ;;  %v1397_v37 = vmul.f32 %v3487_v5, %v3880_v22  ;;  %v1348_v29 = vadd.f32 %v1324_v17, %v1276_v23  ;;  %v4025_v35 = vmul.f32 %v3369_v48, %v5473_v32  ;;  %v1398_v44 = vmul.f32 %v3487_v5, %v3907_v14  ;;  %v5477_v5 = vld [vmem:[#allocation26_spill] sm:$0xff]  ;;  %v5481_v23 = vld [vmem:[#allocation21_spill] sm:$0xff] }
 0x1a3   : > { %v838_v41 = vsel %vm823_vm11, %v3849_v4, %v790_v58  ;;  %1441 = vrot.lane.b32.xlu1 %v1419_v45, %s3078_s18  ;;  %v832_v52 = vsel %vm823_vm11, %v790_v58, %v3889_v27  ;;  %v4037_v59 = vmul.f32 %v5475_v12, %v5474_v0  ;;  %v1349_v13 = vadd.f32 %v1325_v38, %v1277_v54  ;;  %v5482_v17 = vld [vmem:[#allocation57_spill] sm:$0xff]  ;;  %v5483_v54 = vld [vmem:[#allocation55_spill] sm:$0xff] }
 0x1a4   : > { %v792_v30 = vpop.permute.xlu0 %791  ;;  %v1420_v50 = vadd.f32 %v1396_v34, %v1348_v29  ;;  %v4044_v14 = vmul.f32 %v5475_v12, %v5477_v5  ;;  %v4047_v1 = vmul.f32 %v5478_v49, %v838_v41  ;;  %v1350_v58 = vadd.f32 %v1326_v9, %v1278_v42 }
 0x1a5   : > { %v839_v48 = vsel %vm823_vm11, %v5476_v46, %v792_v30  ;;  %v4054_v40 = vmul.f32 %v5475_v12, %v5481_v23  ;;  %v4057_v34 = vmul.f32 %v5482_v17, %v832_v52  ;;  %v1421_v41 = vadd.f32 %v1397_v37, %v1349_v13  ;;  %v5486_v37 = vld [vmem:[#allocation58_spill] sm:$0xff]  ;;  %v5489_v13 = vld [vmem:[#allocation59_spill] sm:$0xff] }
 0x1a6   : > { %v814_v33 = vpop.permute.xlu1 %813  ;;  %5479 = vst [vmem:[#allocation27_spill] sm:$0xff] %v4047_v1  ;;  %v1422_v29 = vadd.f32 %v1398_v44, %v1350_v58 }
 0x1a7   : > { %v844_v22 = vsel %vm823_vm11, %v814_v33, %v3849_v4  ;;  %v833_v4 = vsel %vm823_vm11, %v792_v30, %v5480_v47  ;;  %v826_v38 = vsel %vm823_vm11, %v3889_v27, %v814_v33  ;;  %1453 = vrot.lane.b32.xlu1 %v1420_v50, %s3078_s18  ;;  %v4067_v30 = vmul.f32 %v5478_v49, %v839_v48  ;;  %v5488_v48 = vld [vmem:[#allocation6_spill] sm:$0xff] }
 0x1a8   : > { %v816_v57 = vpop.permute.xlu0 %815  ;;  %v4063_v45 = vmul.f32 %v5483_v54, %v844_v22  ;;  %v4076_v27 = vmul.f32 %v5482_v17, %v833_v4  ;;  %v1280_v50 = vmul.f32 %v5488_v48, %v4047_v1  ;;  %v4090_v44 = vmul.f32 %v5489_v13, %v826_v38 }
 0x1a9   : > { %5485 = vst [vmem:[#allocation13_spill] sm:$0xff] %v4067_v30  ;;  %v845_v9 = vsel %vm823_vm11, %v816_v57, %v5476_v46  ;;  %v827_v38 = vsel %vm823_vm11, %v5480_v47, %v816_v57  ;;  %v5492_v57 = vld [vmem:[#allocation8_spill] sm:$0xff] }
 0x1aa   : > { %v927_v55 = vpop.permute.xlu1 %926  ;;  %5484 = vst [vmem:[#allocation19_spill] sm:$0xff] %v4063_v45  ;;  %v1279_v8 = vmul.f32 %v5488_v48, %v4063_v45  ;;  %v4106_v20 = vmul.f32 %v5483_v54, %v845_v9  ;;  %v5493_v9 = vld [vmem:[#allocation61_spill] sm:$0xff]  ;;  %v1282_v25 = vmul.f32 %v5488_v48, %v4090_v44 }
 0x1ab   : > { %v973_v42 = vsel %vm958_vm12, %v3924_v26, %v927_v55  ;;  %v967_v33 = vsel %vm958_vm12, %v927_v55, %v3949_v2  ;;  %1465 = vrot.lane.b32.xlu1 %v1421_v41, %s3078_s18 }
 0x1ac   : > { %v929_v7 = vpop.permute.xlu0 %928  ;;  %v4082_v52 = vmul.f32 %v5486_v37, %v973_v42  ;;  %v1281_v42 = vmul.f32 %v5488_v48, %v4057_v34 }
 0x1ad   : > { %v974_v22 = vsel %vm958_vm12, %v3926_v62, %v929_v7  ;;  %v968_v24 = vsel %vm958_vm12, %v929_v7, %v3953_v36  ;;  %v5495_v7 = vld [vmem:[#allocation46_spill] sm:$0xff] }
 0x1ae   : > { %5487 = vst [vmem:[#allocation67_spill] sm:$0xff] %v4082_v52  ;;  %v951_v46 = vpop.permute.xlu1 %950  ;;  %v4118_v43 = vmul.f32 %v5486_v37, %v974_v22  ;;  %v1399_v47 = vmul.f32 %v5492_v57, %v4082_v52  ;;  %v1092_v10 = vmul.f32 %v5495_v7, %v4067_v30  ;;  %v5496_v22 = vld [vmem:[#allocation12_spill] sm:$0xff] }
 0x1af   : > { %v961_v4 = vsel %vm958_vm12, %v3949_v2, %v951_v46  ;;  %v979_v55 = vsel %vm958_vm12, %v951_v46, %v3924_v26  ;;  %v5490_v2 = vld [vmem:[#allocation9_spill] sm:$0xff]  ;;  %v5491_v26 = vld [vmem:[#allocation60_spill] sm:$0xff]  ;;  %v1633_v60 = vmul.f32 %v5496_v22, %v4067_v30  ;;  %1477 = vrot.lane.b32.xlu1 %v1422_v29, %s3078_s18 }
 0x1b0   : > { %v953_v58 = vpop.permute.xlu0 %952  ;;  %v1629_v53 = vmul.f32 %v5490_v2, %v4047_v1  ;;  %v4112_v46 = vmul.f32 %v5491_v26, %v967_v33  ;;  %v4123_v16 = vmul.f32 %v5493_v9, %v961_v4  ;;  %v4126_v41 = vmul.f32 %v3764_v11, %v979_v55  ;;  %v5499_v29 = vld [vmem:[#allocation20_spill] sm:$0xff] }
 0x1b1   : > { %v962_v33 = vsel %vm958_vm12, %v3953_v36, %v953_v58  ;;  %v4140_v4 = vmul.f32 %v5489_v13, %v827_v38  ;;  %v1628_v3 = vmul.f32 %v5490_v2, %v4063_v45  ;;  %v1632_v36 = vmul.f32 %v5496_v22, %v4106_v20  ;;  %v5498_v38 = vld [vmem:[#allocation39_spill] sm:$0xff] }
 0x1b2   : > { %v4131_v15 = vpop.permute.xlu1 %781  ;;  %v980_v30 = vsel %vm958_vm12, %v953_v58, %v3926_v62  ;;  %v1400_v48 = vmul.f32 %v5492_v57, %v4112_v46  ;;  %v4158_v1 = vmul.f32 %v5491_v26, %v968_v24  ;;  %v4161_v45 = vmul.f32 %v5493_v9, %v962_v33 }
 0x1b3   : > { %5494 = vst [vmem:[#allocation26_spill] sm:$0xff] %v4131_v15  ;;  %v1351_v15 = vadd.f32 %v3989_v28, %v1279_v8  ;;  %v1752_v37 = vmul.f32 %v5499_v29, %v4118_v43  ;;  %v1401_v62 = vmul.f32 %v5492_v57, %v4123_v16  ;;  %v1402_v8 = vmul.f32 %v5492_v57, %v4126_v41 }
 0x1b4   : > { %v4142_v55 = vpop.permute.xlu0 %942  ;;  %v1635_v24 = vmul.f32 %v5496_v22, %v4140_v4  ;;  %v4176_v33 = vmul.f32 %v3764_v11, %v980_v30  ;;  %v1352_v26 = vadd.f32 %v4011_v63, %v1280_v50  ;;  %v1700_v57 = vadd.f32 %v3993_v51, %v1628_v3 }
 0x1b5   : > { %5497 = vst [vmem:[#allocation56_spill] sm:$0xff] %v4142_v55  ;;  %v1748_v55 = vmul.f32 %v5498_v38, %v4082_v52  ;;  %v1423_v28 = vadd.f32 %v1399_v47, %v1351_v15  ;;  %v1634_v52 = vmul.f32 %v5496_v22, %v4076_v27  ;;  %v1353_v15 = vadd.f32 %v4015_v18, %v1281_v42  ;;  %v5507_v42 = vld [vmem:[#allocation28_spill] sm:$0xff] }
 0x1b6   : > { %v4169_v58 = vpop.permute.xlu1 %805  ;;  %5501 = vst [vmem:[#allocation21_spill] sm:$0xff] %v4176_v33  ;;  %v1354_v47 = vadd.f32 %v4025_v35, %v1282_v25  ;;  %v1749_v22 = vmul.f32 %v5498_v38, %v4112_v46  ;;  %v1753_v30 = vmul.f32 %v5499_v29, %v4158_v1  ;;  %v4192_v63 = vadd.f32 %v1400_v48, %v1352_v26 }
 0x1b7   : > { %5500 = vst [vmem:[#allocation69_spill] sm:$0xff] %v4169_v58  ;;  %1443 = vrot.lane.b32.xlu1 %v1423_v28, %s3078_s18  ;;  %v1704_v58 = vadd.f32 %v4037_v59, %v1632_v36  ;;  %v1772_v50 = vadd.f32 %v1748_v55, %v1700_v57  ;;  %v4196_v3 = vadd.f32 %v1401_v62, %v1353_v15  ;;  %v5508_v55 = vld [vmem:[#allocation52_spill] sm:$0xff] }
 0x1b8   : > { %v4178_v9 = vpop.permute.xlu0 %930  ;;  %5503 = vst [vmem:[#allocation55_spill] sm:$0xff] %v4192_v63  ;;  %v4198_v51 = vadd.f32 %v1402_v8, %v1354_v47  ;;  %v1630_v18 = vmul.f32 %v5490_v2, %v4057_v34  ;;  %v1705_v59 = vadd.f32 %v4044_v14, %v1633_v60  ;;  %v1683_v26 = vmul.f32 %v5475_v12, %v5507_v42  ;;  %v5531_v63 = vld [vmem:[#allocation19_spill] sm:$0xff] }
 0x1b9   : > { %5502 = vst [vmem:[#allocation57_spill] sm:$0xff] %v4178_v9  ;;  %v1754_v9 = vmul.f32 %v5499_v29, %v4161_v45  ;;  %5504 = vst [vmem:[#allocation6_spill] sm:$0xff] %v4196_v3  ;;  %v4200_v25 = vadd.f32 %v1752_v37, %v1704_v58  ;;  %v1140_v36 = vmul.f32 %v5508_v55, %v5477_v5 }
 0x1ba   : > { %v4194_v28 = vpop.permute.xlu1 %918  ;;  %5505 = vst [vmem:[#allocation59_spill] sm:$0xff] %v4198_v51  ;;  %v1093_v48 = vmul.f32 %v5495_v7, %v4076_v27  ;;  %v1755_v37 = vmul.f32 %v5499_v29, %v4176_v33  ;;  %v1701_v62 = vadd.f32 %v4001_v31, %v1629_v53  ;;  %v1706_v8 = vadd.f32 %v4054_v40, %v1634_v52 }
 0x1bb   : > { %5506 = vst [vmem:[#allocation9_spill] sm:$0xff] %v4200_v25  ;;  %1792 = vrot.lane.b32.xlu1 %v1772_v50, %s3077_s17  ;;  %v1091_v60 = vmul.f32 %v5495_v7, %v4106_v20  ;;  %v1750_v12 = vmul.f32 %v5498_v38, %v4123_v16  ;;  %v4222_v14 = vadd.f32 %v1753_v30, %v1705_v59 }
 0x1bc   : > { %v4204_v35 = vpop.permute.xlu0 %954  ;;  %v1707_v58 = vadd.f32 %v1683_v26, %v1635_v24  ;;  %v1094_v57 = vmul.f32 %v5495_v7, %v4140_v4  ;;  %v1773_v15 = vadd.f32 %v1749_v22, %v1701_v62  ;;  %v4228_v47 = vadd.f32 %v1754_v9, %v1706_v8  ;;  %v5512_v9 = vld [vmem:[#allocation51_spill] sm:$0xff] }
 0x1bd   : > { %5509 = vst [vmem:[#allocation8_spill] sm:$0xff] %v4222_v14  ;;  %v1164_v53 = vadd.f32 %v1140_v36, %v1092_v10  ;;  %v1702_v31 = vadd.f32 %v4007_v19, %v1630_v18  ;;  %v1141_v52 = vmul.f32 %v5508_v55, %v5481_v23  ;;  %v1139_v30 = vmul.f32 %v5508_v55, %v5474_v0 }
 0x1be   : > { %v4226_v29 = vpop.permute.xlu1 %793  ;;  %5510 = vst [vmem:[#allocation46_spill] sm:$0xff] %v4228_v47  ;;  %v1631_v24 = vmul.f32 %v5490_v2, %v4090_v44  ;;  %v4238_v7 = vadd.f32 %v1755_v37, %v1707_v58  ;;  %v1212_v22 = vmul.f32 %v5512_v9, %v4158_v1  ;;  %v1142_v10 = vmul.f32 %v5508_v55, %v5507_v42 }
 0x1bf   : > { %1804 = vrot.lane.b32.xlu1 %v1773_v15, %s3077_s17  ;;  %v1751_v19 = vmul.f32 %v5498_v38, %v4126_v41  ;;  %v1774_v50 = vadd.f32 %v1750_v12, %v1702_v31  ;;  %v1679_v18 = vmul.f32 %v3557_v61, %v5473_v32  ;;  %v1165_v59 = vadd.f32 %v1141_v52, %v1093_v48 }
 0x1c0   : > { %v784_v40 = vpop.permute.xlu0 %783  ;;  %5511 = vst [vmem:[#allocation12_spill] sm:$0xff] %v4238_v7  ;;  %v4250_v2 = vadd.f32 %v1212_v22, %v1164_v53  ;;  %v1213_v36 = vmul.f32 %v5512_v9, %v4161_v45  ;;  %v1163_v37 = vadd.f32 %v1139_v30, %v1091_v60  ;;  %v1166_v62 = vadd.f32 %v1142_v10, %v1094_v57  ;;  %v5515_v30 = vld [vmem:[#allocation38_spill] sm:$0xff] }
 0x1c1   : > { %v1703_v55 = vadd.f32 %v1679_v18, %v1631_v24  ;;  %v1211_v53 = vmul.f32 %v5512_v9, %v4118_v43  ;;  %v1214_v31 = vmul.f32 %v5512_v9, %v4176_v33  ;;  %v5516_v24 = vld [vmem:[#allocation30_spill] sm:$0xff] }
 0x1c2   : > { %v4248_v26 = vpop.permute.xlu1 %817  ;;  %5513 = vst [vmem:[#allocation39_spill] sm:$0xff] %v4250_v2  ;;  %v4255_v12 = vadd.f32 %v1213_v36, %v1165_v59  ;;  %v1688_v22 = vmul.f32 %v5516_v24, %v5515_v30  ;;  %v5518_v59 = vld [vmem:[#allocation41_spill] sm:$0xff] }
 0x1c3   : > { %1816 = vrot.lane.b32.xlu1 %v1774_v50, %s3077_s17  ;;  %v1775_v58 = vadd.f32 %v1751_v19, %v1703_v55  ;;  %v5517_v50 = vld [vmem:[#allocation43_spill] sm:$0xff]  ;;  %v1690_v36 = vmul.f32 %v5516_v24, %v5518_v59  ;;  %v5519_v55 = vld [vmem:[#allocation48_spill] sm:$0xff]  ;;  %v4294_v7 = vadd.f32 %v1211_v53, %v1163_v37  ;;  %v4296_v47 = vadd.f32 %v1214_v31, %v1166_v62  ;;  %v5524_v62 = vld [vmem:[#allocation58_spill] sm:$0xff] }
 0x1c4   : > { %v808_v8 = vpop.permute.xlu0 %807  ;;  %5514 = vst [vmem:[#allocation20_spill] sm:$0xff] %v4255_v12  ;;  %v1689_v18 = vmul.f32 %v5516_v24, %v5517_v50  ;;  %v1138_v37 = vmul.f32 %v5519_v55, %v5473_v32  ;;  %v5526_v31 = vld [vmem:[#allocation60_spill] sm:$0xff]  ;;  %v5530_v32 = vld [vmem:[#allocation42_spill] sm:$0xff] }
 0x1c5   : > { %5522 = vst [vmem:[#allocation28_spill] sm:$0xff] %v4294_v7  ;;  %5523 = vst [vmem:[#allocation52_spill] sm:$0xff] %v4296_v47  ;;  %v5528_v47 = vld [vmem:[#allocation27_spill] sm:$0xff] }
 0x1c6   : > { %v921_v38 = vpop.permute.xlu1 %920  ;;  %v5529_v7 = vld [vmem:[#allocation47_spill] sm:$0xff] }
 0x1c7   : > { %1828 = vrot.lane.b32.xlu1 %v1775_v58, %s3077_s17  ;;  %v1135_v58 = vmul.f32 %v5519_v55, %v3479_v21  ;;  %v1136_v21 = vmul.f32 %v5519_v55, %v3523_v56  ;;  %v1088_v14 = vmul.f32 %v5529_v7, %v5528_v47  ;;  %v1089_v25 = vmul.f32 %v5529_v7, %v4057_v34 }
 0x1c8   : > { %v796_v15 = vpop.permute.xlu0 %795  ;;  %v1087_v47 = vmul.f32 %v5529_v7, %v5531_v63  ;;  %v1090_v34 = vmul.f32 %v5529_v7, %v4090_v44 }
 0x1c9   : > { %v841_v61 = vsel %vm823_vm11, %v784_v40, %v796_v15  ;;  %v835_v48 = vsel %vm823_vm11, %v796_v15, %v808_v8  ;;  %v1160_v63 = vadd.f32 %v1136_v21, %v1088_v14 }
 0x1ca   : > { %v4263_v60 = vmul.f32 %v5478_v49, %v841_v61  ;;  %v945_v57 = vpop.permute.xlu1 %944  ;;  %v4282_v9 = vmul.f32 %v5482_v17, %v835_v48  ;;  %v5520_v61 = vld [vmem:[#allocation44_spill] sm:$0xff]  ;;  %v1159_v14 = vadd.f32 %v1135_v58, %v1087_v47  ;;  %v1162_v21 = vadd.f32 %v1138_v37, %v1090_v34  ;;  %v5542_v37 = vld [vmem:[#allocation26_spill] sm:$0xff]  ;;  %v5543_v47 = vld [vmem:[#allocation7_spill] sm:$0xff] }
 0x1cb   : > { %v5544_v34 = vld [vmem:[#allocation22_spill] sm:$0xff] }
 0x1cc   : > { %v820_v52 = vpop.permute.xlu0 %819 }
 0x1cd   : > { %v829_v10 = vsel %vm823_vm11, %v808_v8, %v820_v52  ;;  %v847_v19 = vsel %vm823_vm11, %v820_v52, %v784_v40  ;;  %v1691_v8 = vmul.f32 %v5516_v24, %v5520_v61  ;;  %v5521_v40 = vld [vmem:[#allocation29_spill] sm:$0xff] }
 0x1ce   : > { %v4285_v15 = vmul.f32 %v5483_v54, %v847_v19  ;;  %v1641_v52 = vmul.f32 %v5521_v40, %v4263_v60  ;;  %v4292_v12 = vmul.f32 %v5489_v13, %v829_v10  ;;  %v933_v2 = vpop.permute.xlu1 %932  ;;  %v1137_v10 = vmul.f32 %v5519_v55, %v3490_v39 }
 0x1cf   : > { %v970_v24 = vsel %vm958_vm12, %v933_v2, %v945_v57  ;;  %v976_v19 = vsel %vm958_vm12, %v921_v38, %v933_v2  ;;  %v1642_v2 = vmul.f32 %v5521_v40, %v4282_v9 }
 0x1d0   : > { %v1640_v48 = vmul.f32 %v5521_v40, %v4285_v15  ;;  %v4311_v53 = vmul.f32 %v5524_v62, %v976_v19  ;;  %v4314_v56 = vmul.f32 %v5526_v31, %v970_v24  ;;  %v1643_v39 = vmul.f32 %v5521_v40, %v4292_v12 }
 0x1d1   : > { %v1713_v3 = vadd.f32 %v1689_v18, %v1641_v52  ;;  %v5533_v52 = vld [vmem:[#allocation50_spill] sm:$0xff]  ;;  %v1161_v7 = vadd.f32 %v1137_v10, %v1089_v25  ;;  %v5538_v25 = vld [vmem:[#allocation67_spill] sm:$0xff] }
 0x1d2   : > { %5525 = vst [vmem:[#allocation51_spill] sm:$0xff] %v4311_v53  ;;  %5527 = vst [vmem:[#allocation38_spill] sm:$0xff] %v4314_v56  ;;  %v1712_v51 = vadd.f32 %v1688_v22, %v1640_v48  ;;  %v1760_v55 = vmul.f32 %v5530_v32, %v4311_v53  ;;  %v1761_v24 = vmul.f32 %v5530_v32, %v4314_v56  ;;  %v957_v19 = vpop.permute.xlu1 %956  ;;  %v5532_v48 = vld [vmem:[#allocation61_spill] sm:$0xff] }
 0x1d3   : > { %v964_v22 = vsel %vm958_vm12, %v945_v57, %v957_v19  ;;  %v982_v40 = vsel %vm958_vm12, %v957_v19, %v921_v38  ;;  %v1208_v44 = vmul.f32 %v5533_v52, %v4112_v46  ;;  %v1209_v57 = vmul.f32 %v5533_v52, %v4123_v16 }
 0x1d4   : > { %v4337_v33 = vmul.f32 %v5532_v48, %v964_v22  ;;  %v4340_v53 = vmul.f32 %v3764_v11, %v982_v40  ;;  %v4342_v56 = vadd.f32 %v1760_v55, %v1712_v51  ;;  %v4344_v18 = vadd.f32 %v1761_v24, %v1713_v3 }
 0x1d5   : > { %v1714_v22 = vadd.f32 %v1690_v36, %v1642_v2  ;;  %v1715_v40 = vadd.f32 %v1691_v8, %v1643_v39  ;;  %v4354_v51 = vadd.f32 %v1208_v44, %v1160_v63  ;;  %v4356_v3 = vadd.f32 %v1209_v57, %v1161_v7  ;;  %v5541_v2 = vld [vmem:[#allocation69_spill] sm:$0xff] }
 0x1d6   : > { %v1762_v38 = vmul.f32 %v5530_v32, %v4337_v33  ;;  %v1763_v19 = vmul.f32 %v5530_v32, %v4340_v53  ;;  %v1207_v16 = vmul.f32 %v5533_v52, %v5538_v25  ;;  %v1210_v10 = vmul.f32 %v5533_v52, %v4126_v41  ;;  %v5545_v52 = vld [vmem:[#allocation56_spill] sm:$0xff]  ;;  %v5546_v44 = vld [vmem:[#allocation57_spill] sm:$0xff] }
 0x1d7   : > { %5534 = vst [vmem:[#allocation30_spill] sm:$0xff] %v4354_v51  ;;  %5535 = vst [vmem:[#allocation43_spill] sm:$0xff] %v4356_v3  ;;  %v834_v58 = vsel %vm823_vm11, %v4226_v29, %v5541_v2  ;;  %v840_v39 = vsel %vm823_vm11, %v5542_v37, %v4226_v29  ;;  %v1331_v41 = vmul.f32 %v5543_v47, %v5474_v0 }
 0x1d8   : > { %v4358_v55 = vadd.f32 %v1762_v38, %v1714_v22  ;;  %v4360_v46 = vadd.f32 %v1763_v19, %v1715_v40  ;;  %v4366_v24 = vadd.f32 %v1207_v16, %v1159_v14  ;;  %v4368_v36 = vadd.f32 %v1210_v10, %v1162_v21 }
 0x1d9   : > { %v1403_v63 = vmul.f32 %v5544_v34, %v4118_v43  ;;  %v969_v7 = vsel %vm958_vm12, %v5546_v44, %v5545_v52  ;;  %v1332_v57 = vmul.f32 %v5543_v47, %v5477_v5  ;;  %v1333_v38 = vmul.f32 %v5543_v47, %v5481_v23 }
 0x1da   : > { %5536 = vst [vmem:[#allocation41_spill] sm:$0xff] %v4358_v55  ;;  %5537 = vst [vmem:[#allocation48_spill] sm:$0xff] %v4360_v46  ;;  %v4393_v29 = vmul.f32 %v5478_v49, %v840_v39  ;;  %v4396_v19 = vmul.f32 %v5482_v17, %v834_v58  ;;  %v828_v43 = vsel %vm823_vm11, %v5541_v2, %v4248_v26  ;;  %v5547_v58 = vld [vmem:[#allocation13_spill] sm:$0xff] }
 0x1db   : > { %5539 = vst [vmem:[#allocation44_spill] sm:$0xff] %v4366_v24  ;;  %5540 = vst [vmem:[#allocation29_spill] sm:$0xff] %v4368_v36  ;;  %v846_v0 = vsel %vm823_vm11, %v4248_v26, %v5542_v37  ;;  %v4418_v10 = vmul.f32 %v5489_v13, %v828_v43  ;;  %v4452_v51 = vmul.f32 %v5526_v31, %v969_v7 }
 0x1dc   : > { %v4415_v26 = vmul.f32 %v5483_v54, %v846_v0  ;;  %v963_v54 = vsel %vm958_vm12, %v5545_v52, %v4204_v35  ;;  %v5548_v0 = vld [vmem:[#allocation31_spill] sm:$0xff]  ;;  %v1404_v52 = vmul.f32 %v5544_v34, %v4158_v1 }
 0x1dd   : > { %v1125_v8 = vpop.permute.xlu0 %1124  ;;  %v4458_v6 = vmul.f32 %v5532_v48, %v963_v54 }
 0x1de   : > { %v1147_v40 = vmul.f32 %v1125_v8, %v5515_v30  ;;  %v1148_v14 = vmul.f32 %v1125_v8, %v5517_v50  ;;  %v1149_v21 = vmul.f32 %v1125_v8, %v5518_v59  ;;  %v1150_v25 = vmul.f32 %v1125_v8, %v5520_v61 }
 0x1df   : > { %v975_v8 = vsel %vm958_vm12, %v4194_v28, %v5546_v44 }
 0x1e0   : > { %v4455_v1 = vmul.f32 %v5524_v62, %v975_v8 }
 0x1e2   : > { %v4378_v32 = vpop.permute.xlu0 %1248 }
 0x1e3   : > { %v1077_v5 = vpop.permute.xlu1 %1076 }
 0x1e4   : > { %v1099_v22 = vmul.f32 %v1077_v5, %v4285_v15  ;;  %v1100_v23 = vmul.f32 %v1077_v5, %v4263_v60  ;;  %v1101_v49 = vmul.f32 %v1077_v5, %v4282_v9  ;;  %v1102_v17 = vmul.f32 %v1077_v5, %v4292_v12 }
 0x1e6   : > { %v1261_v16 = vpop.permute.xlu0 %1260  ;;  %v1172_v39 = vadd.f32 %v1148_v14, %v1100_v23  ;;  %v1173_v5 = vadd.f32 %v1149_v21, %v1101_v49  ;;  %v1171_v36 = vadd.f32 %v1147_v40, %v1099_v22  ;;  %v1174_v24 = vadd.f32 %v1150_v25, %v1102_v17  ;;  %v5549_v23 = vld [vmem:[#allocation35_spill] sm:$0xff]  ;;  %v5550_v17 = vld [vmem:[#allocation33_spill] sm:$0xff]  ;;  %v5551_v14 = vld [vmem:[#allocation36_spill] sm:$0xff] }
 0x1e7   : > { %v1283_v2 = vmul.f32 %v1261_v16, %v4106_v20  ;;  %v1284_v37 = vmul.f32 %v1261_v16, %v5547_v58  ;;  %v981_v20 = vsel %vm958_vm12, %v4204_v35, %v4194_v28  ;;  %v5552_v25 = vld [vmem:[#allocation49_spill] sm:$0xff] }
 0x1e8   : > { %v1121_v43 = vpop.permute.xlu1 %1120  ;;  %v1096_v58 = vmul.f32 %v5552_v25, %v4393_v29  ;;  %v1097_v28 = vmul.f32 %v5552_v25, %v4396_v19  ;;  %v1095_v35 = vmul.f32 %v5552_v25, %v4415_v26  ;;  %v4461_v46 = vmul.f32 %v3764_v11, %v981_v20 }
 0x1e9   : > { %v1355_v13 = vadd.f32 %v1331_v41, %v1283_v2  ;;  %v1143_v22 = vmul.f32 %v1121_v43, %v5548_v0  ;;  %v1144_v49 = vmul.f32 %v1121_v43, %v5549_v23  ;;  %v1145_v40 = vmul.f32 %v1121_v43, %v5550_v17 }
 0x1ea   : > { %v1146_v44 = vmul.f32 %v1121_v43, %v5551_v14  ;;  %v4438_v21 = vpop.permute.xlu0 %1268  ;;  %v1098_v41 = vmul.f32 %v5552_v25, %v4418_v10  ;;  %v1285_v2 = vmul.f32 %v1261_v16, %v4076_v27  ;;  %v1356_v43 = vadd.f32 %v1332_v57, %v1284_v37 }
 0x1eb   : > { %v1427_v3 = vadd.f32 %v1403_v63, %v1355_v13  ;;  %v1168_v27 = vadd.f32 %v1144_v49, %v1096_v58  ;;  %v1169_v57 = vadd.f32 %v1145_v40, %v1097_v28  ;;  %v1167_v63 = vadd.f32 %v1143_v22, %v1095_v35  ;;  %v5556_v40 = vld [vmem:[#allocation15_spill] sm:$0xff]  ;;  %v5558_v58 = vld [vmem:[#allocation38_spill] sm:$0xff] }
 0x1ec   : > { %v1170_v37 = vadd.f32 %v1146_v44, %v1098_v41  ;;  %v1286_v11 = vmul.f32 %v1261_v16, %v4140_v4  ;;  %v1357_v8 = vadd.f32 %v1333_v38, %v1285_v2  ;;  %v1428_v54 = vadd.f32 %v1404_v52, %v1356_v43  ;;  %v5557_v16 = vld [vmem:[#allocation51_spill] sm:$0xff]  ;;  %v5559_v43 = vld [vmem:[#allocation17_spill] sm:$0xff] }
 0x1ed   : > { %v1193_v55 = vpop.permute.xlu1 %1192  ;;  %1445 = vrot.lane.b32.xlu1 %v1427_v3, %s3078_s18  ;;  %v1405_v49 = vmul.f32 %v5544_v34, %v4161_v45  ;;  %v1287_v44 = vmul.f32 %v5556_v40, %v4415_v26 }
 0x1ee   : > { %v4464_v25 = vpop.permute.xlu0 %1953  ;;  %v1215_v31 = vmul.f32 %v1193_v55, %v4455_v1  ;;  %v1216_v62 = vmul.f32 %v1193_v55, %v4452_v51  ;;  %v1217_v7 = vmul.f32 %v1193_v55, %v4458_v6  ;;  %v1218_v48 = vmul.f32 %v1193_v55, %v4461_v46 }
 0x1ef   : > { %v1334_v55 = vmul.f32 %v5543_v47, %v5507_v42  ;;  %v1429_v2 = vadd.f32 %v1405_v49, %v1357_v8 }
 0x1f0   : > { %v4471_v20 = vadd.f32 %v1216_v62, %v1168_v27  ;;  %v4473_v3 = vadd.f32 %v1217_v7, %v1169_v57  ;;  %v4475_v13 = vadd.f32 %v1215_v31, %v1167_v63  ;;  %v4477_v22 = vadd.f32 %v1218_v48, %v1170_v37  ;;  %v5564_v37 = vld [vmem:[#allocation21_spill] sm:$0xff] }
 0x1f1   : > { %v1197_v4 = vpop.permute.xlu1 %1196  ;;  %1457 = vrot.lane.b32.xlu1 %v1428_v54, %s3078_s18  ;;  %v1358_v45 = vadd.f32 %v1334_v55, %v1286_v11  ;;  %v1335_v27 = vmul.f32 %v5559_v43, %v5548_v0  ;;  %v1406_v31 = vmul.f32 %v5544_v34, %v5564_v37  ;;  %v5566_v11 = vld [vmem:[#allocation23_spill] sm:$0xff]  ;;  %v1291_v54 = vmul.f32 %v4438_v21, %v4285_v15  ;;  %v5568_v34 = vld [vmem:[#allocation10_spill] sm:$0xff] }
 0x1f2   : > { %5553 = vst [vmem:[#allocation58_spill] sm:$0xff] %v4473_v3  ;;  %5554 = vst [vmem:[#allocation60_spill] sm:$0xff] %v4475_v13  ;;  %v4486_v38 = vpop.permute.xlu0 %1963  ;;  %v1219_v52 = vmul.f32 %v1197_v4, %v5557_v16  ;;  %v1220_v28 = vmul.f32 %v1197_v4, %v5558_v58  ;;  %v1221_v35 = vmul.f32 %v1197_v4, %v4337_v33  ;;  %v5569_v55 = vld [vmem:[#allocation14_spill] sm:$0xff] }
 0x1f3   : > { %5555 = vst [vmem:[#allocation27_spill] sm:$0xff] %v4477_v22  ;;  %v1222_v41 = vmul.f32 %v1197_v4, %v4340_v53  ;;  %v1359_v7 = vadd.f32 %v1335_v27, %v1287_v44  ;;  %v1430_v48 = vadd.f32 %v1406_v31, %v1358_v45  ;;  %v1407_v8 = vmul.f32 %v5566_v11, %v4455_v1  ;;  %v5571_v44 = vld [vmem:[#allocation5_spill] sm:$0xff]  ;;  %v5573_v45 = vld [vmem:[#allocation18_spill] sm:$0xff]  ;;  %v5579_v22 = vld [vmem:[#allocation68_spill] sm:$0xff] }
 0x1f4   : > { %v4494_v57 = vadd.f32 %v1220_v28, %v1172_v39  ;;  %v4496_v42 = vadd.f32 %v1221_v35, %v1173_v5  ;;  %v4498_v47 = vadd.f32 %v1219_v52, %v1171_v36  ;;  %v5567_v36 = vld [vmem:[#allocation62_spill] sm:$0xff]  ;;  %v5570_v52 = vld [vmem:[#allocation63_spill] sm:$0xff]  ;;  %v5572_v35 = vld [vmem:[#allocation64_spill] sm:$0xff]  ;;  %v1292_v37 = vmul.f32 %v4438_v21, %v4263_v60 }
 0x1f5   : > { %v4500_v63 = vadd.f32 %v1222_v41, %v1174_v24  ;;  %1469 = vrot.lane.b32.xlu1 %v1429_v2, %s3078_s18  ;;  %v1431_v5 = vadd.f32 %v1407_v8, %v1359_v7  ;;  %v1271_v24 = vmul.f32 %v4378_v32, %v5567_v36  ;;  %v1391_v28 = vmul.f32 %v5571_v44, %v5570_v52  ;;  %v4528_v15 = vld [vmem:[%s5254_s5 + $0x28] sm:$0xff]  ;;  %v5574_v7 = vld [vmem:[#allocation11_spill] sm:$0xff]  ;;  %v5577_v60 = vld [vmem:[#allocation65_spill] sm:$0xff] }
 0x1f6   : > { %5560 = vst [vmem:[#allocation47_spill] sm:$0xff] %v4494_v57  ;;  %5561 = vst [vmem:[#allocation42_spill] sm:$0xff] %v4496_v42  ;;  %v4505_v62 = vpop.permute.xlu0 %1973  ;;  %v1272_v41 = vmul.f32 %v4378_v32, %v5572_v35  ;;  %v1339_v2 = vmul.f32 %v5573_v45, %v5515_v30  ;;  %v1340_v42 = vmul.f32 %v5573_v45, %v5517_v50  ;;  %v5575_v30 = vld [vmem:[#allocation66_spill] sm:$0xff]  ;;  %v5578_v50 = vld [vmem:[#allocation16_spill] sm:$0xff] }
 0x1f7   : > { %5562 = vst [vmem:[#allocation19_spill] sm:$0xff] %v4498_v47  ;;  %5563 = vst [vmem:[#allocation61_spill] sm:$0xff] %v4500_v63  ;;  %v1273_v57 = vmul.f32 %v4378_v32, %v5577_v60  ;;  %v4539_v47 = vpop.permute.xlu1 %1958  ;;  %v1393_v13 = vmul.f32 %v5571_v44, %v5579_v22  ;;  %v5580_v3 = vld [vmem:[#allocation70_spill] sm:$0xff] }
 0x1f8   : > { %5565 = vst [vmem:[#allocation50_spill] sm:$0xff] %v4505_v62  ;;  %v1363_v31 = vadd.f32 %v1339_v2, %v1291_v54  ;;  %v1293_v54 = vmul.f32 %v4438_v21, %v4282_v9  ;;  %v1294_v9 = vmul.f32 %v4438_v21, %v4292_v12  ;;  %v5583_v12 = vld [vmem:[#allocation25_spill] sm:$0xff] }
 0x1f9   : > { %1481 = vrot.lane.b32.xlu1 %v1430_v48, %s3078_s18  ;;  %v1636_v21 = vmul.f32 %v5583_v12, %v4415_v26 }
 0x1fb   : > { %v1297_v39 = vpop.permute.xlu0 %1296 }
 0x1fc   : > { %v1319_v49 = vmul.f32 %v1297_v39, %v5568_v34  ;;  %v1320_v4 = vmul.f32 %v1297_v39, %v5569_v55  ;;  %v1321_v48 = vmul.f32 %v1297_v39, %v5574_v7 }
 0x1fd   : > { %1447 = vrot.lane.b32.xlu1 %v1431_v5, %s3078_s18  ;;  %v5576_v5 = vld [vmem:[#allocation24_spill] sm:$0xff] }
 0x1fe   : > { %v1343_v27 = vadd.f32 %v1319_v49, %v1271_v24  ;;  %v1344_v8 = vadd.f32 %v1320_v4, %v1272_v41  ;;  %v1392_v24 = vmul.f32 %v5571_v44, %v5575_v30  ;;  %v1411_v49 = vmul.f32 %v5576_v5, %v5557_v16 }
 0x1ff   : > { %v1364_v4 = vadd.f32 %v1340_v42, %v1292_v37  ;;  %v1345_v41 = vadd.f32 %v1321_v48, %v1273_v57  ;;  %v1341_v16 = vmul.f32 %v5573_v45, %v5518_v59  ;;  %v1412_v62 = vmul.f32 %v5576_v5, %v5558_v58  ;;  %v5582_v48 = vld [vmem:[#allocation71_spill] sm:$0xff] }
 0x200   : > { %v1415_v63 = vadd.f32 %v1391_v28, %v1343_v27  ;;  %v1322_v28 = vmul.f32 %v1297_v39, %v5578_v50  ;;  %v1435_v2 = vadd.f32 %v1411_v49, %v1363_v31  ;;  %v1416_v27 = vadd.f32 %v1392_v24, %v1344_v8  ;;  %v4559_v39 = vpop.permute.xlu1 %2006 }
 0x201   : > { %1978 = vperm.xlu1 %2952, %v4528_v15   ;;  %v5581_v57 = vmov 1   ;;  %v1365_v42 = vadd.f32 %v1341_v16, %v1293_v54  ;;  %v1436_v37 = vadd.f32 %v1412_v62, %v1364_v4  ;;  %v1417_v31 = vadd.f32 %v1393_v13, %v1345_v41  ;;  %v5586_v4 = vld [vmem:[#allocation32_spill] sm:$0xff] }
 0x202   : > { %1439 = vrot.lane.b32.xlu0 %v1415_v63, %s3078_s18  ;;  %v1274_v63 = vmul.f32 %v4378_v32, %v5580_v3  ;;  %v1394_v58 = vmul.f32 %v5571_v44, %v5582_v48  ;;  %v1413_v32 = vmul.f32 %v5576_v5, %v4337_v33  ;;  %v1342_v8 = vmul.f32 %v5573_v45, %v5520_v61  ;;  %v5585_v33 = vld [vmem:[#allocation34_spill] sm:$0xff] }
 0x203   : > { %v1414_v13 = vmul.f32 %v5576_v5, %v4340_v53  ;;  %v1684_v61 = vmul.f32 %v5585_v33, %v5548_v0  ;;  %v1637_v45 = vmul.f32 %v5583_v12, %v4393_v29  ;;  %v5587_v53 = vld [vmem:[#allocation72_spill] sm:$0xff]  ;;  %v1685_v5 = vmul.f32 %v5585_v33, %v5549_v23 }
 0x204   : > { %v1346_v59 = vadd.f32 %v1322_v28, %v1274_v63  ;;  %v1366_v24 = vadd.f32 %v1342_v8, %v1294_v9  ;;  %v1437_v49 = vadd.f32 %v1413_v32, %v1365_v42  ;;  %v4573_v44 = vpop.permute.xlu1 %1968  ;;  %v1756_v28 = vmul.f32 %v5586_v4, %v4455_v1  ;;  %v5588_v1 = vld [vmem:[#allocation73_spill] sm:$0xff] }
 0x205   : > { %1449 = vrot.lane.b32.xlu1 %v1435_v2, %s3078_s18  ;;  %5584 = vst [vmem:[#allocation67_spill] sm:$0xff] %v4573_v44  ;;  %v1708_v26 = vadd.f32 %v1684_v61, %v1636_v21  ;;  %v1638_v41 = vmul.f32 %v5583_v12, %v4396_v19  ;;  %v1757_v16 = vmul.f32 %v5586_v4, %v4452_v51 }
 0x206   : > { %1451 = vrot.lane.b32.xlu0 %v1416_v27, %s3078_s18  ;;  %2953 = vset.pattern.permute.xlu1 %v5581_v57  ;;  %v1418_v62 = vadd.f32 %v1394_v58, %v1346_v59  ;;  %v1438_v54 = vadd.f32 %v1414_v13, %v1366_v24  ;;  %v1709_v27 = vadd.f32 %v1685_v5, %v1637_v45  ;;  %v5589_v58 = vld [vmem:[#allocation74_spill] sm:$0xff]  ;;  %v5590_v24 = vld [vmem:[#allocation76_spill] sm:$0xff]  ;;  %v5591_v13 = vld [vmem:[#allocation55_spill] sm:$0xff] }
 0x207   : > { %v1780_v2 = vadd.f32 %v1756_v28, %v1708_v26  ;;  %v1686_v63 = vmul.f32 %v5585_v33, %v5550_v17  ;;  %v1639_v9 = vmul.f32 %v5583_v12, %v4418_v10  ;;  %v1687_v32 = vmul.f32 %v5585_v33, %v5551_v14  ;;  %v5592_v33 = vld [vmem:[#allocation6_spill] sm:$0xff]  ;;  %v2994_v45 = vld [vmem:[%s5254_s5 + $0x20] sm:$0xff]  ;;  %v5596_v5 = vld [vmem:[#allocation8_spill] sm:$0xff] }
 0x208   : > { %v4590_v0 = vpop.permute.xlu1 %2014  ;;  %v1781_v42 = vadd.f32 %v1757_v16, %v1709_v27  ;;  %v1759_v12 = vmul.f32 %v5586_v4, %v4461_v46  ;;  %v5594_v26 = vmov 0   ;;  %v5595_v28 = vld [vmem:[#allocation9_spill] sm:$0xff]  ;;  %v1336_v27 = vmul.f32 %v5559_v43, %v5549_v23 }
 0x209   : > { %1461 = vrot.lane.b32.xlu1 %v1436_v37, %s3078_s18  ;;  %v1710_v59 = vadd.f32 %v1686_v63, %v1638_v41  ;;  %v1758_v37 = vmul.f32 %v5586_v4, %v4458_v6  ;;  %v1711_v21 = vadd.f32 %v1687_v32, %v1639_v9  ;;  %v1288_v41 = vmul.f32 %v5556_v40, %v4393_v29 }
 0x20a   : > { %1463 = vrot.lane.b32.xlu0 %v1417_v31, %s3078_s18  ;;  %v1289_v16 = vmul.f32 %v5556_v40, %v4396_v19  ;;  %v1408_v9 = vmul.f32 %v5566_v11, %v4452_v51  ;;  %v1337_v29 = vmul.f32 %v5559_v43, %v5550_v17  ;;  %v1409_v19 = vmul.f32 %v5566_v11, %v4458_v6 }
 0x20b   : > { %v1782_v8 = vadd.f32 %v1758_v37, %v1710_v59  ;;  %v1360_v63 = vadd.f32 %v1336_v27, %v1288_v41  ;;  %v1290_v59 = vmul.f32 %v5556_v40, %v4418_v10  ;;  %v1338_v51 = vmul.f32 %v5559_v43, %v5551_v14  ;;  %v5599_v43 = vld [vmem:[#allocation41_spill] sm:$0xff] }
 0x20c   : > { %v4603_v31 = vpop.permute.xlu1 %1788  ;;  %v1361_v23 = vadd.f32 %v1337_v29, %v1289_v16  ;;  %v1410_v17 = vmul.f32 %v5566_v11, %v4461_v46  ;;  %v5600_v11 = vld [vmem:[#allocation48_spill] sm:$0xff] }
 0x20d   : > { %1473 = vrot.lane.b32.xlu1 %v1437_v49, %s3078_s18  ;;  %v1432_v37 = vadd.f32 %v1408_v9, %v1360_v63  ;;  %v5603_v9 = vld [vmem:[#allocation37_spill] sm:$0xff] }
 0x20e   : > { %1475 = vrot.lane.b32.xlu0 %v1418_v62, %s3078_s18  ;;  %v1783_v62 = vadd.f32 %v1759_v12, %v1711_v21  ;;  %v1433_v32 = vadd.f32 %v1409_v19, %v1361_v23  ;;  %v2995_v21 = vld [vmem:[%s5254_s5 + $0x18] sm:$0xff]  ;;  %v1128_v29 = vmul.f32 %v5603_v9, %v5569_v55  ;;  %v2997_v23 = vld [vmem:[%s5250_s1 + $0x8] sm:$0xff] }
 0x210   : > { %v4615_v49 = vpop.permute.xlu1 %1800 }
 0x211   : > { %1485 = vrot.lane.b32.xlu1 %v1438_v54, %s3078_s18  ;;  %v5593_v54 = vld [vmem:[#allocation59_spill] sm:$0xff] }
 0x212   : > { %1790 = vrot.lane.b32.xlu0 %v5587_v53, %s3077_s17 }
 0x214   : > { %v4620_v61 = vpop.permute.xlu1 %1812 }
 0x215   : > { %1796 = vrot.lane.b32.xlu1 %v1780_v2, %s3077_s17  ;;  %v5597_v2 = vld [vmem:[#allocation46_spill] sm:$0xff] }
 0x216   : > { %1802 = vrot.lane.b32.xlu0 %v5588_v1, %s3077_s17 }
 0x218   : > { %v4630_v4 = vpop.permute.xlu1 %1824 }
 0x219   : > { %1808 = vrot.lane.b32.xlu1 %v1781_v42, %s3077_s17  ;;  %v5598_v42 = vld [vmem:[#allocation12_spill] sm:$0xff] }
 0x21a   : > { %1814 = vrot.lane.b32.xlu0 %v5589_v58, %s3077_s17 }
 0x21c   : > { %v4634_v53 = vpop.permute.xlu1 %1441 }
 0x21d   : > { %1820 = vrot.lane.b32.xlu1 %v1782_v8, %s3077_s17  ;;  %v1362_v8 = vadd.f32 %v1338_v51, %v1290_v59  ;;  %v1129_v59 = vmul.f32 %v5603_v9, %v5574_v7  ;;  %v5604_v51 = vld [vmem:[#allocation40_spill] sm:$0xff] }
 0x21e   : > { %1826 = vrot.lane.b32.xlu0 %v5590_v24, %s3077_s17 }
 0x21f   : > { %v1434_v40 = vadd.f32 %v1410_v17, %v1362_v8 }
 0x220   : > { %v4646_v1 = vpop.permute.xlu1 %1453 }
 0x221   : > { %1832 = vrot.lane.b32.xlu1 %v1783_v62, %s3077_s17 }
 0x222   : > { %1455 = vrot.lane.b32.xlu0 %v5591_v13, %s3078_s18 }
 0x224   : > { %v4658_v58 = vpop.permute.xlu1 %1465 }
 0x225   : > { %2022 = vperm.xlu1 %2953, %v2994_v45  }
 0x226   : > { %1467 = vrot.lane.b32.xlu0 %v5592_v33, %s3078_s18  ;;  %v4697_v33 = vpop.permute.xlu0 %2010 }
 0x228   : > { %v4666_v10 = vpop.permute.xlu1 %1477 }
 0x229   : > { %2954 = vset.pattern.permute.xlu1 %v5594_v26 }
 0x22a   : > { %1479 = vrot.lane.b32.xlu0 %v5593_v54, %s3078_s18 }
 0x22c   : > { %v4669_v6 = vpop.permute.xlu1 %1443 }
 0x22e   : > { %1794 = vrot.lane.b32.xlu0 %v5595_v28, %s3077_s17 }
 0x230   : > { %v4676_v14 = vpop.permute.xlu1 %1792 }
 0x232   : > { %1806 = vrot.lane.b32.xlu0 %v5596_v5, %s3077_s17  ;;  %v5602_v5 = vld [vmem:[#allocation45_spill] sm:$0xff] }
 0x233   : > { %v1080_v41 = vmul.f32 %v5602_v5, %v5572_v35  ;;  %v1081_v35 = vmul.f32 %v5602_v5, %v5577_v60  ;;  %v1079_v55 = vmul.f32 %v5602_v5, %v5567_v36  ;;  %v1082_v7 = vmul.f32 %v5602_v5, %v5580_v3 }
 0x234   : > { %v4680_v46 = vpop.permute.xlu1 %1804  ;;  %v1201_v5 = vmul.f32 %v5604_v51, %v5579_v22 }
 0x236   : > { %1818 = vrot.lane.b32.xlu0 %v5597_v2, %s3077_s17 }
 0x238   : > { %v4686_v12 = vpop.permute.xlu1 %1816 }
 0x23a   : > { %1830 = vrot.lane.b32.xlu0 %v5598_v42, %s3077_s17  ;;  %v1127_v42 = vmul.f32 %v5603_v9, %v5568_v34  ;;  %v1200_v34 = vmul.f32 %v5604_v51, %v5575_v30 }
 0x23c   : > { %v4689_v24 = vpop.permute.xlu1 %1828 }
 0x23e   : > { %1459 = vrot.lane.b32.xlu0 %v1432_v37, %s3078_s18  ;;  %v1130_v37 = vmul.f32 %v5603_v9, %v5578_v50  ;;  %v1153_v9 = vadd.f32 %v1129_v59, %v1081_v35 }
 0x240   : > { %v1225_v35 = vadd.f32 %v1201_v5, %v1153_v9 }
 0x242   : > { %1471 = vrot.lane.b32.xlu0 %v1433_v32, %s3078_s18  ;;  %v5605_v32 = vld [vmem:[#allocation54_spill] sm:$0xff] }
 0x243   : > { %vm1836_vm13 = vcmp.lt.s32.totalorder %v5605_v32, 112  ;;  %vm1487_vm14 = vcmp.lt.s32.totalorder %v5605_v32, 16 }
 0x244   : > { %v1843_v36 = vsel %vm1836_vm13, %v4615_v49, %v4620_v61  ;;  %v1837_v22 = vsel %vm1836_vm13, %v4620_v61, %v4630_v4  ;;  %v1849_v61 = vsel %vm1836_vm13, %v4603_v31, %v4615_v49  ;;  %v1507_v49 = vsel %vm1487_vm14, %v4666_v10, %v4634_v53 }
 0x246   : > { %1483 = vrot.lane.b32.xlu0 %v1434_v40, %s3078_s18  ;;  %v1152_v40 = vadd.f32 %v1128_v29, %v1080_v41  ;;  %v1199_v29 = vmul.f32 %v5604_v51, %v5570_v52  ;;  %v1151_v52 = vadd.f32 %v1127_v42, %v1079_v55 }
 0x24a   : > { %2018 = vperm.xlu0 %2951, %v2995_v21  }
 0x24e   : > { %1798 = vrot.lane.b32.xlu0 %v4342_v56, %s3077_s17 }
 0x252   : > { %1810 = vrot.lane.b32.xlu0 %v4344_v18, %s3077_s17  ;;  %v5601_v18 = vld [vmem:[#allocation53_spill] sm:$0xff] }
 0x253   : > { %v1867_v13 = vsub.s32 7, %v5601_v18  ;;  %v1518_v45 = vsub.s32 6, %v5601_v18  ;;  %v1863_v2 = vsub.s32 3, %v5601_v18  ;;  %v1514_v27 = vsub.s32 2, %v5601_v18 }
 0x254   : > { %v1224_v18 = vadd.f32 %v1200_v34, %v1152_v40 }
 0x255   : > { %v1872_v19 = vrot.slane %v2997_v23, %v1863_v2  ;;  %v1523_v8 = vrot.slane %v2997_v23, %v1514_v27  ;;  %v1876_v3 = vrot.slane %v2997_v23, %v1867_v13 }
 0x256   : > { %1822 = vrot.lane.b32.xlu0 %v5599_v43, %s3077_s17 }
 0x257   : > { %v4765_v40 = vrot.slane %v1876_v3, %v1863_v2 }
 0x25a   : > { %1834 = vrot.lane.b32.xlu0 %v5600_v11, %s3077_s17  ;;  %v4742_v11 = vrot.slane %v1872_v19, %v1863_v2  ;;  %v1202_v19 = vmul.f32 %v5604_v51, %v5582_v48  ;;  %s404_s17 = sand.u32 1, %s3056_s22  }
 0x25b   : > { %s2754_s18 = sshll.u32 %s404_s17, 5  ;;  %s2677_s25 = scalar_lea.sflag [#allocation3], %s404_s17 }
 0x25c   : > { %v1899_v42 = vmul.f32 %v4742_v11, %v1837_v22  ;;  %v1495_v22 = vsel %vm1487_vm14, %v4646_v1, %v4658_v58  ;;  %s406_s19 = scalar_lea.vmem [#allocation2], %s2754_s18 }
 0x25d   : > { %s2691_s26 = sshll.u32 %s406_s19, 4  ;;  %s5207_s26 = int_to_ptr.vmem [resolvable:$true] %s2691_s26 }
 0x25e   : > { %2026 = vperm.xlu0 %2951, %v4528_v15   ;;  %v2996_v15 = vld [vmem:[%s5250_s1] sm:$0xff]  ;;  %s3002_s18 = scalar_lea.vmem %s5207_s26, 512 }
 0x25f   : > { %v4692_v56 = vpop.permute.xlu1 %1445  ;;  %v1868_v28 = vrot.slane %v2996_v15, %v1867_v13  ;;  %v1519_v16 = vrot.slane %v2996_v15, %v1518_v45  ;;  %v1864_v30 = vrot.slane %v2996_v15, %v1863_v2  ;;  %v1515_v41 = vrot.slane %v2996_v15, %v1514_v27  ;;  %p3003_p11 = scmp.ne.s32.totalorder %s5207_s26, %s3002_s18 }
 0x260   : > { %v4750_v13 = vrot.slane %v1523_v8, %v1514_v27  ;;  %v1154_v8 = vadd.f32 %v1130_v37, %v1082_v7 }
 0x261   : > { %v4729_v50 = vrot.slane %v1868_v28, %v1863_v2  ;;  %v4732_v60 = vrot.slane %v1519_v16, %v1514_v27  ;;  %v1527_v16 = vrot.slane %v2997_v23, %v1518_v45  ;;  %v4754_v34 = vrot.slane %v1864_v30, %v1863_v2  ;;  %p3004_p12 = pnand %p3003_p11, %p3184_p5 }
 0x262   : > { %2955 = vset.pattern.permute.xlu0 %v5594_v26  ;;  %v4767_v48 = vrot.slane %v1515_v41, %v1514_v27  ;;  %v1223_v30 = vadd.f32 %v1199_v29, %v1151_v52  ;;  %v1855_v2 = vsel %vm1836_vm13, %v4630_v4, %v4603_v31 }
 0x263   : > { %v4694_v62 = vpop.permute.xlu1 %1457  ;;  %v1898_v26 = vmul.f32 %v4729_v50, %v1843_v36  ;;  %v4769_v51 = vrot.slane %v1527_v16, %v1514_v27  ;;  %v1897_v4 = vmul.f32 %v4754_v34, %v1849_v61  ;;  %p3005_p13 = pneg %p3004_p12 }
 0x264   : > { %v1552_v5 = vmul.f32 %v4767_v48, %v1507_v49 }
 0x267   : > { %v4700_v54 = vpop.permute.xlu1 %1469 }
 0x26b   : > { %v4734_v17 = vpop.permute.xlu1 %1481 }
 0x26f   : > { %v4762_v15 = vpop.permute.xlu1 %1447 }
 0x274   : > { %v1440_v63 = vpop.permute.xlu0 %1439 }
 0x278   : > { %v1452_v21 = vpop.permute.xlu0 %1451 }
 0x279   : > { %v1500_v43 = vsel %vm1487_vm14, %v1440_v63, %v1452_v21 }
 0x27a   : > { %v1549_v28 = vmul.f32 %v4732_v60, %v1500_v43  ;;  %v1900_v43 = vmul.f32 %v4765_v40, %v1855_v2 }
 0x27c   : > { %v1573_v57 = vadd.f32 %v1549_v28, %v1224_v18  ;;  %v1464_v44 = vpop.permute.xlu0 %1463 }
 0x27d   : > { %v1494_v45 = vsel %vm1487_vm14, %v1452_v21, %v1464_v44 }
 0x27e   : > { %v1922_v59 = vadd.f32 %v1898_v26, %v1573_v57  ;;  %v1550_v23 = vmul.f32 %v4750_v13, %v1494_v45  ;;  %v1226_v57 = vadd.f32 %v1202_v19, %v1154_v8 }
 0x280   : > { %v1574_v55 = vadd.f32 %v1550_v23, %v1225_v35  ;;  %v1476_v26 = vpop.permute.xlu0 %1475  ;;  %v1982_v37 = vmul.f32 %v4464_v25, %v1922_v59  ;;  %v4789_v36 = vpop.permute.xlu1 %1978  ;;  %v5606_v23 = vld [vmem:[#allocation78_spill] sm:$0xff] }
 0x281   : > { %v1488_v27 = vsel %vm1487_vm14, %v1464_v44, %v1476_v26  ;;  %v1506_v7 = vsel %vm1487_vm14, %v1476_v26, %v1440_v63  ;;  %v1501_v44 = vsel %vm1487_vm14, %v4634_v53, %v4646_v1  ;;  %v1489_v53 = vsel %vm1487_vm14, %v4658_v58, %v4666_v10 }
 0x282   : > { %v1923_v21 = vadd.f32 %v1899_v42, %v1574_v55  ;;  %v1548_v3 = vmul.f32 %v4767_v48, %v1506_v7  ;;  %v1551_v31 = vmul.f32 %v4769_v51, %v1488_v27  ;;  %v2030_v41 = vadd.f32 %v4559_v39, %v1982_v37  ;;  %v5607_v55 = vld [vmem:[#allocation75_spill] sm:$0xff] }
 0x283   : > { %v1553_v19 = vmul.f32 %v4732_v60, %v1501_v44  ;;  %v1576_v8 = vadd.f32 %v1552_v5, %v5606_v23  ;;  %v1555_v26 = vmul.f32 %v4769_v51, %v1489_v53 }
 0x284   : > { %v1572_v63 = vadd.f32 %v1548_v3, %v1223_v30  ;;  %v1575_v18 = vadd.f32 %v1551_v31, %v1226_v57  ;;  %v1791_v28 = vpop.permute.xlu0 %1790  ;;  %v1983_v16 = vmul.f32 %v4464_v25, %v1923_v21  ;;  %v4813_v59 = vpop.permute.xlu1 %1449  ;;  %vm2054_vm15 = vcmp.gt.f32.partialorder %v2030_v41, 0.0 }
 0x285   : > { %v2078_v61 = vmul.f32 0.01, %v2030_v41  ;;  %v1554_v57 = vmul.f32 %v4750_v13, %v1495_v22 }
 0x286   : > { %v1921_v9 = vadd.f32 %v1897_v4, %v1572_v63  ;;  %v1924_v29 = vadd.f32 %v1900_v43, %v1575_v18  ;;  %v2031_v58 = vadd.f32 %v4559_v39, %v1983_v16  ;;  %v5608_v63 = vld [vmem:[#allocation77_spill] sm:$0xff] }
 0x287   : > { %v4827_v49 = vsel %vm2054_vm15, %v2030_v41, %v2078_v61  ;;  %v1578_v18 = vadd.f32 %v1554_v57, %v5608_v63 }
 0x288   : > { %v1981_v45 = vmul.f32 %v4464_v25, %v1921_v9  ;;  %v1984_v52 = vmul.f32 %v4464_v25, %v1924_v29  ;;  %v1803_v35 = vpop.permute.xlu0 %1802  ;;  %v1577_v25 = vadd.f32 %v1553_v19, %v5607_v55  ;;  %v2079_v43 = vmul.f32 0.01, %v2031_v58  ;;  %v5609_v9 = vld [vmem:[#allocation79_spill] sm:$0xff] }
 0x289   : > { %v1850_v30 = vsel %vm1836_vm13, %v1791_v28, %v1803_v35  ;;  %vm2055_vm3 = vcmp.gt.f32.partialorder %v2031_v58, 0.0  ;;  %v1579_v29 = vadd.f32 %v1555_v26, %v5609_v9 }
 0x28a   : > { %v1901_v1 = vmul.f32 %v4754_v34, %v1850_v30  ;;  %v2029_v42 = vadd.f32 %v4559_v39, %v1981_v45  ;;  %v2032_v10 = vadd.f32 %v4559_v39, %v1984_v52  ;;  %v4830_v39 = vpop.permute.xlu1 %1461  ;;  %v4849_v23 = vsel %vm2055_vm3, %v2031_v58, %v2079_v43 }
 0x28b   : > { %v1839_v43 = vsel %vm1836_vm13, %v4686_v12, %v4689_v24 }
 0x28c   : > { %v1925_v2 = vadd.f32 %v1901_v1, %v1576_v8  ;;  %v1815_v37 = vpop.permute.xlu0 %1814  ;;  %vm2053_vm1 = vcmp.gt.f32.partialorder %v2029_v42, 0.0  ;;  %v2077_v27 = vmul.f32 0.01, %v2029_v42  ;;  %vm2056_vm2 = vcmp.gt.f32.partialorder %v2032_v10, 0.0 }
 0x28d   : > { %v1844_v7 = vsel %vm1836_vm13, %v1803_v35, %v1815_v37  ;;  %v2080_v21 = vmul.f32 0.01, %v2032_v10 }
 0x28e   : > { %v1985_v3 = vmul.f32 %v4539_v47, %v1925_v2  ;;  %v1902_v31 = vmul.f32 %v4729_v50, %v1844_v7  ;;  %v4833_v4 = vsel %vm2053_vm1, %v2029_v42, %v2077_v27  ;;  %v4854_v61 = vpop.permute.xlu1 %1473 }
 0x28f   : > { %v2125_v44 = vadd.f32 %v4827_v49, %v4833_v4  ;;  %v4838_v16 = vsel %vm2056_vm2, %v2032_v10, %v2080_v21  ;;  %v5610_v21 = vld [vmem:[#allocation30_spill] sm:$0xff] }
 0x290   : > { %v1926_v5 = vadd.f32 %v1902_v31, %v1577_v25  ;;  %v1827_v41 = vpop.permute.xlu0 %1826  ;;  %v2033_v19 = vadd.f32 %v4697_v33, %v1985_v3  ;;  %v2150_v8 = vadd.f32 %v4838_v16, %v4849_v23 }
 0x291   : > { %v1838_v22 = vsel %vm1836_vm13, %v1815_v37, %v1827_v41  ;;  %v1856_v53 = vsel %vm1836_vm13, %v1827_v41, %v1791_v28  ;;  %2126 = vadd.xlane.f32.xlu1 %v2125_v44  ;;  %v1845_v28 = vsel %vm1836_vm13, %v4680_v46, %v4686_v12  ;;  %v1851_v12 = vsel %vm1836_vm13, %v4676_v14, %v4680_v46 }
 0x292   : > { %v1986_v45 = vmul.f32 %v4539_v47, %v1926_v5  ;;  %v1903_v52 = vmul.f32 %v4742_v11, %v1838_v22  ;;  %v1904_v35 = vmul.f32 %v4765_v40, %v1856_v53  ;;  %v2081_v55 = vmul.f32 0.01, %v2033_v19 }
 0x293   : > { %vm2057_vm4 = vcmp.gt.f32.partialorder %v2033_v19, 0.0  ;;  %v1906_v37 = vmul.f32 %v4729_v50, %v1845_v28  ;;  %v1905_v28 = vmul.f32 %v4754_v34, %v1851_v12 }
 0x294   : > { %v2034_v30 = vadd.f32 %v4697_v33, %v1986_v45  ;;  %v1927_v1 = vadd.f32 %v1903_v52, %v1578_v18  ;;  %v1928_v42 = vadd.f32 %v1904_v35, %v1579_v29  ;;  %v1456_v10 = vpop.permute.xlu0 %1455  ;;  %v4876_v44 = vsel %vm2057_vm4, %v2033_v19, %v2081_v55  ;;  %v4880_v18 = vpop.permute.xlu1 %1485  ;;  %v5611_v19 = vld [vmem:[#allocation43_spill] sm:$0xff]  ;;  %v5612_v55 = vld [vmem:[#allocation44_spill] sm:$0xff] }
 0x295   : > { %v1502_v58 = vsel %vm1487_vm14, %v4669_v6, %v1456_v10  ;;  %2151 = vadd.xlane.f32.xlu1 %v2150_v8  ;;  %v1907_v29 = vmul.f32 %v4742_v11, %v1839_v43  ;;  %v1857_v52 = vsel %vm1836_vm13, %v4689_v24, %v4676_v14 }
 0x296   : > { %v1987_v25 = vmul.f32 %v4539_v47, %v1927_v1  ;;  %v1988_v57 = vmul.f32 %v4539_v47, %v1928_v42  ;;  %v1557_v26 = vmul.f32 %v4732_v60, %v1502_v58  ;;  %vm2058_vm5 = vcmp.gt.f32.partialorder %v2034_v30, 0.0 }
 0x297   : > { %v2082_v2 = vmul.f32 0.01, %v2034_v30  ;;  %v1908_v14 = vmul.f32 %v4765_v40, %v1857_v52 }
 0x298   : > { %v2035_v27 = vadd.f32 %v4697_v33, %v1987_v25  ;;  %v2036_v7 = vadd.f32 %v4697_v33, %v1988_v57  ;;  %v1581_v3 = vadd.f32 %v1557_v26, %v5610_v21  ;;  %v1468_v31 = vpop.permute.xlu0 %1467  ;;  %v1797_v24 = vpop.permute.xlu1 %1796  ;;  %v5613_v57 = vld [vmem:[#allocation29_spill] sm:$0xff] }
 0x299   : > { %v1496_v47 = vsel %vm1487_vm14, %v1456_v10, %v1468_v31  ;;  %v4878_v63 = vsel %vm2058_vm5, %v2034_v30, %v2082_v2 }
 0x29a   : > { %v1930_v5 = vadd.f32 %v1906_v37, %v1581_v3  ;;  %v1558_v33 = vmul.f32 %v4750_v13, %v1496_v47  ;;  %v2128_v41 = vadd.f32 %v4878_v63, %v4876_v44  ;;  %vm2059_vm6 = vcmp.gt.f32.partialorder %v2035_v27, 0.0 }
 0x29b   : > { %v2083_v9 = vmul.f32 0.01, %v2035_v27  ;;  %vm2060_vm7 = vcmp.gt.f32.partialorder %v2036_v7, 0.0  ;;  %v2084_v45 = vmul.f32 0.01, %v2036_v7 }
 0x29c   : > { %v1582_v22 = vadd.f32 %v1558_v33, %v5611_v19  ;;  %2129 = vadd.xlane.f32.xlu0 %v2128_v41  ;;  %v1480_v53 = vpop.permute.xlu0 %1479  ;;  %v1990_v30 = vmul.f32 %v4486_v38, %v1930_v5  ;;  %v1809_v47 = vpop.permute.xlu1 %1808 }
 0x29d   : > { %v1490_v35 = vsel %vm1487_vm14, %v1468_v31, %v1480_v53  ;;  %v1508_v46 = vsel %vm1487_vm14, %v1480_v53, %v4669_v6  ;;  %v4900_v8 = vsel %vm2059_vm6, %v2035_v27, %v2083_v9  ;;  %v4906_v58 = vsel %vm2060_vm7, %v2036_v7, %v2084_v45 }
 0x29e   : > { %v1931_v1 = vadd.f32 %v1907_v29, %v1582_v22  ;;  %v1556_v42 = vmul.f32 %v4767_v48, %v1508_v46  ;;  %v1559_v10 = vmul.f32 %v4769_v51, %v1490_v35  ;;  %v2153_v26 = vadd.f32 %v4906_v58, %v4900_v8 }
 0x29f   : > { %v2038_v7 = vadd.f32 %v4590_v0, %v1990_v30 }
 0x2a0   : > { %v1580_v25 = vadd.f32 %v1556_v42, %v5612_v55  ;;  %v1583_v6 = vadd.f32 %v1559_v10, %v5613_v57  ;;  %v4913_v2 = vpop.permute.xlu0 %1794  ;;  %v1991_v37 = vmul.f32 %v4486_v38, %v1931_v1  ;;  %2154 = vadd.xlane.f32.xlu0 %v2153_v26  ;;  %v1821_v52 = vpop.permute.xlu1 %1820  ;;  %v1503_v55 = vsel %vm1487_vm14, %v4692_v56, %v4694_v62 }
 0x2a1   : > { %v2086_v33 = vmul.f32 0.01, %v2038_v7  ;;  %vm2062_vm8 = vcmp.gt.f32.partialorder %v2038_v7, 0.0  ;;  %v1847_v42 = vsel %vm1836_vm13, %v1809_v47, %v1821_v52 }
 0x2a2   : > { %v1929_v27 = vadd.f32 %v1905_v28, %v1580_v25  ;;  %v1932_v21 = vadd.f32 %v1908_v14, %v1583_v6  ;;  %v2039_v41 = vadd.f32 %v4590_v0, %v1991_v37  ;;  %v1914_v25 = vmul.f32 %v4729_v50, %v1847_v42 }
 0x2a3   : > { %v4924_v53 = vsel %vm2062_vm8, %v2038_v7, %v2086_v33  ;;  %v1561_v7 = vmul.f32 %v4732_v60, %v1503_v55 }
 0x2a4   : > { %v1989_v3 = vmul.f32 %v4486_v38, %v1929_v27  ;;  %v1992_v31 = vmul.f32 %v4486_v38, %v1932_v21  ;;  %v1807_v43 = vpop.permute.xlu0 %1806  ;;  %v2087_v38 = vmul.f32 0.01, %v2039_v41  ;;  %vm2063_vm11 = vcmp.gt.f32.partialorder %v2039_v41, 0.0  ;;  %v1833_v28 = vpop.permute.xlu1 %1832 }
 0x2a5   : > { %v1841_v26 = vsel %vm1836_vm13, %v1821_v52, %v1833_v28  ;;  %v5615_v52 = vld [vmem:[#allocation50_spill] sm:$0xff] }
 0x2a6   : > { %v2037_v5 = vadd.f32 %v4590_v0, %v1989_v3  ;;  %v2040_v12 = vadd.f32 %v4590_v0, %v1992_v31  ;;  %v4930_v0 = vsel %vm2063_vm11, %v2039_v41, %v2087_v38  ;;  %v1853_v3 = vsel %vm1836_vm13, %v1797_v24, %v1809_v47 }
 0x2a7   : > { %v1859_v31 = vsel %vm1836_vm13, %v1833_v28, %v1797_v24  ;;  %vm2321_vm11 = vcmask 97280  }
 0x2a8   : > { %v1819_v9 = vpop.permute.xlu0 %1818  ;;  %vm2061_vm9 = vcmp.gt.f32.partialorder %v2037_v5, 0.0  ;;  %v2085_v29 = vmul.f32 0.01, %v2037_v5  ;;  %vm2064_vm10 = vcmp.gt.f32.partialorder %v2040_v12, 0.0  ;;  %v2088_v19 = vmul.f32 0.01, %v2040_v12  ;;  %v2023_v42 = vpop.permute.xlu1 %2022 }
 0x2aa   : > { %v4922_v22 = vsel %vm2061_vm9, %v2037_v5, %v2085_v29  ;;  %v4928_v46 = vsel %vm2064_vm10, %v2040_v12, %v2088_v19  ;;  %v5614_v5 = vld [vmem:[#allocation58_spill] sm:$0xff]  ;;  %v1497_v12 = vsel %vm1487_vm14, %v4694_v62, %v4700_v54  ;;  %v1509_v29 = vsel %vm1487_vm14, %v4734_v17, %v4692_v56 }
 0x2ab   : > { %v2131_v45 = vadd.f32 %v4924_v53, %v4922_v22  ;;  %v2156_v30 = vadd.f32 %v4928_v46, %v4930_v0  ;;  %v1491_v62 = vsel %vm1487_vm14, %v4700_v54, %v4734_v17  ;;  %v1913_v56 = vmul.f32 %v4754_v34, %v1853_v3 }
 0x2ac   : > { %v1831_v35 = vpop.permute.xlu0 %1830  ;;  %v1562_v54 = vmul.f32 %v4750_v13, %v1497_v12  ;;  %v1560_v17 = vmul.f32 %v4767_v48, %v1509_v29  ;;  %v5620_v29 = vld [vmem:[#allocation28_spill] sm:$0xff]  ;;  %vm2195_vm9 = vcmask 392192   ;;  %vm2174_vm10 = vcmask 7168  }
 0x2ad   : > { %2132 = vadd.xlane.f32.xlu1 %v2131_v45  ;;  %v1840_v28 = vsel %vm1836_vm13, %v1819_v9, %v1831_v35 }
 0x2b0   : > { %v1460_v1 = vpop.permute.xlu0 %1459 }
 0x2b1   : > { %v1504_v10 = vsel %vm1487_vm14, %v4762_v15, %v1460_v1  ;;  %2157 = vadd.xlane.f32.xlu1 %v2156_v30 }
 0x2b2   : > { %v1565_v14 = vmul.f32 %v4732_v60, %v1504_v10  ;;  %v1846_v10 = vsel %vm1836_vm13, %v1807_v43, %v1819_v9 }
 0x2b3   : > { %v1910_v3 = vmul.f32 %v4729_v50, %v1846_v10 }
 0x2b4   : > { %v1589_v57 = vadd.f32 %v1565_v14, %v4471_v20  ;;  %v1472_v6 = vpop.permute.xlu0 %1471  ;;  %v1915_v20 = vmul.f32 %v4742_v11, %v1841_v26  ;;  %v5616_v14 = vld [vmem:[#allocation60_spill] sm:$0xff] }
 0x2b5   : > { %v1498_v37 = vsel %vm1487_vm14, %v1460_v1, %v1472_v6  ;;  %v1916_v1 = vmul.f32 %v4765_v40, %v1859_v31  ;;  %v1911_v31 = vmul.f32 %v4742_v11, %v1840_v28 }
 0x2b6   : > { %v1938_v27 = vadd.f32 %v1914_v25, %v1589_v57  ;;  %v1566_v21 = vmul.f32 %v4750_v13, %v1498_v37  ;;  %v5617_v25 = vld [vmem:[#allocation27_spill] sm:$0xff]  ;;  %v1563_v37 = vmul.f32 %v4769_v51, %v1491_v62 }
 0x2b8   : > { %v1590_v33 = vadd.f32 %v1566_v21, %v5614_v5  ;;  %v1484_v41 = vpop.permute.xlu0 %1483  ;;  %v1998_v30 = vmul.f32 %v5615_v52, %v1938_v27 }
 0x2b9   : > { %v1492_v47 = vsel %vm1487_vm14, %v1472_v6, %v1484_v41  ;;  %v1510_v24 = vsel %vm1487_vm14, %v1484_v41, %v4762_v15  ;;  %v1852_v15 = vsel %vm1836_vm13, %v4913_v2, %v1807_v43  ;;  %v1858_v6 = vsel %vm1836_vm13, %v1831_v35, %v4913_v2  ;;  %v5618_v2 = vld [vmem:[#allocation39_spill] sm:$0xff]  ;;  %v5619_v41 = vld [vmem:[#allocation20_spill] sm:$0xff] }
 0x2ba   : > { %v1939_v19 = vadd.f32 %v1915_v20, %v1590_v33  ;;  %v1564_v38 = vmul.f32 %v4767_v48, %v1510_v24  ;;  %v1567_v45 = vmul.f32 %v4769_v51, %v1492_v47  ;;  %v2046_v21 = vadd.f32 %v2023_v42, %v1998_v30 }
 0x2bb   : > { %v1909_v9 = vmul.f32 %v4754_v34, %v1852_v15  ;;  %v1912_v20 = vmul.f32 %v4765_v40, %v1858_v6  ;;  %v1585_v35 = vadd.f32 %v1561_v7, %v5618_v2  ;;  %v1586_v12 = vadd.f32 %v1562_v54, %v5619_v41 }
 0x2bc   : > { %v1588_v55 = vadd.f32 %v1564_v38, %v5616_v14  ;;  %v1591_v57 = vadd.f32 %v1567_v45, %v5617_v25  ;;  %v1999_v26 = vmul.f32 %v5615_v52, %v1939_v19  ;;  %v1584_v47 = vadd.f32 %v1560_v17, %v5620_v29  ;;  %v5621_v19 = vld [vmem:[#allocation52_spill] sm:$0xff]  ;;  %v5622_v25 = vld [vmem:[#allocation67_spill] sm:$0xff] }
 0x2bd   : > { %v1587_v38 = vadd.f32 %v1563_v37, %v5621_v19  ;;  %v2094_v62 = vmul.f32 0.01, %v2046_v21  ;;  %v1935_v15 = vadd.f32 %v1911_v31, %v1586_v12  ;;  %vm2070_vm12 = vcmp.gt.f32.partialorder %v2046_v21, 0.0 }
 0x2be   : > { %v1937_v43 = vadd.f32 %v1913_v56, %v1588_v55  ;;  %v1940_v27 = vadd.f32 %v1916_v1, %v1591_v57  ;;  %v2047_v24 = vadd.f32 %v2023_v42, %v1999_v26  ;;  %v1933_v56 = vadd.f32 %v1909_v9, %v1584_v47 }
 0x2bf   : > { %v1934_v1 = vadd.f32 %v1910_v3, %v1585_v35  ;;  %v1936_v10 = vadd.f32 %v1912_v20, %v1587_v38  ;;  %v5008_v55 = vsel %vm2070_vm12, %v2046_v21, %v2094_v62  ;;  %v1995_v17 = vmul.f32 %v5622_v25, %v1935_v15 }
 0x2c0   : > { %v1997_v5 = vmul.f32 %v5615_v52, %v1937_v43  ;;  %v2000_v33 = vmul.f32 %v5615_v52, %v1940_v27  ;;  %v2095_v7 = vmul.f32 0.01, %v2047_v24  ;;  %vm2071_vm2 = vcmp.gt.f32.partialorder %v2047_v24, 0.0 }
 0x2c1   : > { %v1993_v57 = vmul.f32 %v5622_v25, %v1933_v56  ;;  %v1994_v54 = vmul.f32 %v5622_v25, %v1934_v1  ;;  %v1996_v6 = vmul.f32 %v5622_v25, %v1936_v10  ;;  %v1511_v29 = vsel %vm1487_vm14, %v4880_v18, %v4813_v59 }
 0x2c2   : > { %v2045_v45 = vadd.f32 %v2023_v42, %v1997_v5  ;;  %v2048_v30 = vadd.f32 %v2023_v42, %v2000_v33  ;;  %v5018_v43 = vsel %vm2071_vm2, %v2047_v24, %v2095_v7  ;;  %v1505_v24 = vsel %vm1487_vm14, %v4813_v59, %v4830_v39 }
 0x2c3   : > { %v1569_v56 = vmul.f32 %v4732_v60, %v1505_v24  ;;  %v1499_v1 = vsel %vm1487_vm14, %v4830_v39, %v4854_v61  ;;  %v1493_v15 = vsel %vm1487_vm14, %v4854_v61, %v4880_v18  ;;  %v5623_v60 = vld [vmem:[#allocation19_spill] sm:$0xff]  ;;  %v5625_v18 = vld [vmem:[#allocation42_spill] sm:$0xff]  ;;  %vm3079_vm12 = vmmov 1  }
 0x2c4   : > { %vm2069_vm15 = vcmp.gt.f32.partialorder %v2045_v45, 0.0  ;;  %v2093_v28 = vmul.f32 0.01, %v2045_v45  ;;  %v2096_v52 = vmul.f32 0.01, %v2048_v30  ;;  %vm2072_vm1 = vcmp.gt.f32.partialorder %v2048_v30, 0.0 }
 0x2c5   : > { %v5624_v39 = vld [vmem:[#allocation47_spill] sm:$0xff] }
 0x2c6   : > { %v5006_v14 = vsel %vm2069_vm15, %v2045_v45, %v2093_v28  ;;  %v5016_v26 = vsel %vm2072_vm1, %v2048_v30, %v2096_v52  ;;  %v1568_v30 = vmul.f32 %v4767_v48, %v1511_v29  ;;  %v1570_v28 = vmul.f32 %v4750_v13, %v1499_v1  ;;  %vm2849_vm15 = vmpackc.low %vm452_vm0, %vm3079_vm12 }
 0x2c7   : > { %v2137_v42 = vadd.f32 %v5008_v55, %v5006_v14  ;;  %v2162_v31 = vadd.f32 %v5016_v26, %v5018_v43  ;;  %v1593_v25 = vadd.f32 %v1569_v56, %v5624_v39  ;;  %v2289_v39 = vld [vmem:[%s5258_s9 + $0x20] sm:$0xff] }
 0x2c8   : > { %v1592_v52 = vadd.f32 %v1568_v30, %v5623_v60  ;;  %v5627_v60 = vmov 1  }
 0x2c9   : > { %v2019_v37 = vpop.permute.xlu0 %2018  ;;  %2138 = vadd.xlane.f32.xlu1 %v2137_v42 }
 0x2ca   : > { %v2041_v27 = vadd.f32 %v2019_v37, %v1993_v57  ;;  %v2042_v21 = vadd.f32 %v2019_v37, %v1994_v54  ;;  %v2043_v9 = vadd.f32 %v2019_v37, %v1995_v17  ;;  %v2044_v3 = vadd.f32 %v2019_v37, %v1996_v6  ;;  %v5626_v37 = vld [vmem:[#allocation61_spill] sm:$0xff] }
 0x2cb   : > { %v1571_v57 = vmul.f32 %v4769_v51, %v1493_v15  ;;  %v2183_v15 = vld [vmem:[%s5256_s7] sm:$0xff] }
 0x2cc   : > { %vm2065_vm3 = vcmp.gt.f32.partialorder %v2041_v27, 0.0  ;;  %vm2066_vm4 = vcmp.gt.f32.partialorder %v2042_v21, 0.0  ;;  %v2089_v20 = vmul.f32 0.01, %v2041_v27  ;;  %v2090_v5 = vmul.f32 0.01, %v2042_v21 }
 0x2cd   : > { %v1799_v33 = vpop.permute.xlu0 %1798  ;;  %2163 = vadd.xlane.f32.xlu1 %v2162_v31  ;;  %vm2067_vm5 = vcmp.gt.f32.partialorder %v2043_v9, 0.0  ;;  %vm2068_vm6 = vcmp.gt.f32.partialorder %v2044_v3, 0.0  ;;  %v2091_v2 = vmul.f32 0.01, %v2043_v9  ;;  %v2092_v35 = vmul.f32 0.01, %v2044_v3 }
 0x2ce   : > { %v5022_v41 = vsel %vm2065_vm3, %v2041_v27, %v2089_v20  ;;  %v5024_v12 = vsel %vm2066_vm4, %v2042_v21, %v2090_v5  ;;  %v1595_v27 = vadd.f32 %v1571_v57, %v5626_v37 }
 0x2cf   : > { %v2134_v47 = vadd.f32 %v5024_v12, %v5022_v41  ;;  %v5036_v19 = vsel %vm2067_vm5, %v2043_v9, %v2091_v2  ;;  %v5038_v38 = vsel %vm2068_vm6, %v2044_v3, %v2092_v35 }
 0x2d0   : > { %v2159_v59 = vadd.f32 %v5038_v38, %v5036_v19 }
 0x2d1   : > { %2135 = vadd.xlane.f32.xlu0 %v2134_v47  ;;  %v1811_v45 = vpop.permute.xlu0 %1810 }
 0x2d2   : > { %v1854_v62 = vsel %vm1836_vm13, %v1799_v33, %v1811_v45 }
 0x2d3   : > { %v1917_v48 = vmul.f32 %v4754_v34, %v1854_v62  ;;  %v1594_v34 = vadd.f32 %v1570_v28, %v5625_v18  ;;  %v2286_v28 = vld [vmem:[%s5258_s9 + $0x8] sm:$0xff] }
 0x2d5   : > { %2160 = vadd.xlane.f32.xlu0 %v2159_v59  ;;  %v1823_v10 = vpop.permute.xlu0 %1822  ;;  %v1941_v54 = vadd.f32 %v1917_v48, %v1592_v52  ;;  %v2181_v59 = vld [vmem:[%s5255_s6] sm:$0xff]  ;;  %v2287_v52 = vld [vmem:[%s5258_s9 + $0x10] sm:$0xff] }
 0x2d6   : > { %v1848_v7 = vsel %vm1836_vm13, %v1811_v45, %v1823_v10  ;;  %2820 = vmatprep.mubr.msk.f32.mxu0 %vm2195_vm9, %v2181_v59  ;;  %v2285_v48 = vld [vmem:[%s5258_s9] sm:$0xff] }
 0x2d7   : > { %v1918_v42 = vmul.f32 %v4729_v50, %v1848_v7  ;;  %v2001_v50 = vmul.f32 %v4789_v36, %v1941_v54  ;;  %v2288_v7 = vld [vmem:[%s5258_s9 + $0x18] sm:$0xff] }
 0x2d9   : > { %v1942_v17 = vadd.f32 %v1918_v42, %v1593_v25  ;;  %v1835_v61 = vpop.permute.xlu0 %1834  ;;  %v2290_v25 = vld [vmem:[%s5258_s9 + $0x28] sm:$0xff] }
 0x2da   : > { %v1842_v6 = vsel %vm1836_vm13, %v1823_v10, %v1835_v61  ;;  %v1860_v13 = vsel %vm1836_vm13, %v1835_v61, %v1799_v33  ;;  %v2184_v10 = vld [vmem:[%s5256_s7 + $0x8] sm:$0xf] }
 0x2db   : > { %v2002_v21 = vmul.f32 %v4789_v36, %v1942_v17  ;;  %v1919_v9 = vmul.f32 %v4742_v11, %v1842_v6  ;;  %v1920_v51 = vmul.f32 %v4765_v40, %v1860_v13 }
 0x2dd   : > { %v1943_v3 = vadd.f32 %v1919_v9, %v1594_v34  ;;  %v1944_v31 = vadd.f32 %v1920_v51, %v1595_v27  ;;  %v2027_v20 = vpop.permute.xlu0 %2026 }
 0x2de   : > { %v2049_v5 = vadd.f32 %v2027_v20, %v2001_v50  ;;  %v2050_v2 = vadd.f32 %v2027_v20, %v2002_v21  ;;  %2187 = vperm.xlu1 %2954, %v2183_v15  }
 0x2df   : > { %v2003_v35 = vmul.f32 %v4789_v36, %v1943_v3  ;;  %v2004_v32 = vmul.f32 %v4789_v36, %v1944_v31 }
 0x2e0   : > { %vm2073_vm13 = vcmp.gt.f32.partialorder %v2049_v5, 0.0  ;;  %vm2074_vm14 = vcmp.gt.f32.partialorder %v2050_v2, 0.0  ;;  %v2097_v33 = vmul.f32 0.01, %v2049_v5  ;;  %v2098_v29 = vmul.f32 0.01, %v2050_v2 }
 0x2e1   : > { %v2051_v47 = vadd.f32 %v2027_v20, %v2003_v35  ;;  %v2052_v24 = vadd.f32 %v2027_v20, %v2004_v32 }
 0x2e2   : > { %v5074_v11 = vsel %vm2073_vm13, %v2049_v5, %v2097_v33  ;;  %v5076_v40 = vsel %vm2074_vm14, %v2050_v2, %v2098_v29  ;;  %2293 = vperm.xlu1 %2954, %v2285_v48  }
 0x2e3   : > { %v2140_v45 = vadd.f32 %v5076_v40, %v5074_v11  ;;  %vm2075_vm7 = vcmp.gt.f32.partialorder %v2051_v47, 0.0  ;;  %vm2076_vm8 = vcmp.gt.f32.partialorder %v2052_v24, 0.0  ;;  %v2099_v30 = vmul.f32 0.01, %v2051_v47 }
 0x2e4   : > { %v2100_v62 = vmul.f32 0.01, %v2052_v24 }
 0x2e5   : > { %2141 = vadd.xlane.f32.xlu0 %v2140_v45  ;;  %v5080_v56 = vsel %vm2075_vm7, %v2051_v47, %v2099_v30 }
 0x2e6   : > { %v5082_v36 = vsel %vm2076_vm8, %v2052_v24, %v2100_v62  ;;  %2298 = vperm.xlu1 %2954, %v2286_v28   ;;  %v5628_v28 = vmov 0  }
 0x2e7   : > { %v2165_v1 = vadd.f32 %v5082_v36, %v5080_v56 }
 0x2e9   : > { %2166 = vadd.xlane.f32.xlu0 %v2165_v1 }
 0x2ea   : > { %2303 = vperm.xlu1 %2954, %v2287_v52   ;;  %v2279_v52 = vld [vmem:[%s5257_s8] sm:$0xff] }
 0x2eb   : > { %2827 = vmatprep.mubr.msk.f32.mxu1 %vm2321_vm11, %v2279_v52 }
 0x2ee   : > { %2308 = vperm.xlu1 %2954, %v2288_v7  }
 0x2f2   : > { %2313 = vperm.xlu1 %2954, %v2289_v39  }
 0x2f6   : > { %2318 = vperm.xlu1 %2954, %v2290_v25  }
 0x2ff   : > { %2192 = vperm.xlu0 %2955, %v2184_v10   ;;  %v2182_v10 = vld [vmem:[%s5255_s6 + $0x8] sm:$0xf] }
 0x303   : > { %2958 = vset.pattern.permute.xlu0 %v5627_v60 }
 0x31e   : > { %v2127_v57 = vpop.xlane.xlu1 %2126 }
 0x31f   : > { %v2144_v18 = vmul.f32 0.00390625, %v2127_v57 }
 0x322   : > { %v2152_v54 = vpop.xlane.xlu1 %2151 }
 0x323   : > { %v2168_v17 = vmul.f32 0.00390625, %v2152_v54 }
 0x325   : > { %v2175_v13 = vsel %vm2174_vm10, %v2144_v18, %v2168_v17 }
 0x329   : > { %v2130_v42 = vpop.xlane.xlu0 %2129 }
 0x32a   : > { %v2145_v34 = vmul.f32 0.00390625, %v2130_v42 }
 0x32d   : > { %v2155_v61 = vpop.xlane.xlu0 %2154 }
 0x32e   : > { %v2169_v6 = vmul.f32 0.00390625, %v2155_v61 }
 0x330   : > { %v2176_v37 = vsel %vm2174_vm10, %v2145_v34, %v2169_v6  ;;  %v2280_v34 = vld [vmem:[%s5257_s8 + $0x8] sm:$0xff]  ;;  %v2281_v6 = vld [vmem:[%s5257_s8 + $0x10] sm:$0xff] }
 0x331   : > { %v2836_v27 = vpack.c.bf16 %v2176_v37, %v2175_v13  ;;  %v2282_v13 = vld [vmem:[%s5257_s8 + $0x18] sm:$0xff]  ;;  %v2283_v37 = vld [vmem:[%s5257_s8 + $0x20] sm:$0xff] }
 0x333   : > { %2837 = vmatprep.subr.bf16.mxu0 %v2836_v27 }
 0x334   : > { %2839 = vmatpush3.bf16.msra.mxu0 %v2836_v27  ;;  %v2284_v27 = vld [vmem:[%s5257_s8 + $0x28] sm:$0xff] }
 0x33a   : > { %v2133_v21 = vpop.xlane.xlu1 %2132 }
 0x33b   : > { %v2146_v31 = vmul.f32 0.00390625, %v2133_v21 }
 0x33e   : > { %v2158_v9 = vpop.xlane.xlu1 %2157 }
 0x33f   : > { %v2170_v50 = vmul.f32 0.00390625, %v2158_v9 }
 0x341   : > { %v2177_v2 = vsel %vm2174_vm10, %v2146_v31, %v2170_v50 }
 0x356   : > { %v2139_v33 = vpop.xlane.xlu1 %2138 }
 0x357   : > { %v2148_v30 = vmul.f32 0.00390625, %v2139_v33 }
 0x35a   : > { %v2164_v29 = vpop.xlane.xlu1 %2163 }
 0x35b   : > { %v2172_v24 = vmul.f32 0.00390625, %v2164_v29 }
 0x35d   : > { %v2179_v59 = vsel %vm2174_vm10, %v2148_v30, %v2172_v24 }
 0x35e   : > { %v2136_v51 = vpop.xlane.xlu0 %2135  ;;  %v2188_v25 = vpop.permute.xlu1 %2187 }
 0x35f   : > { %v2147_v20 = vmul.f32 0.00390625, %v2136_v51 }
 0x362   : > { %v2161_v3 = vpop.xlane.xlu0 %2160  ;;  %v2294_v21 = vpop.permute.xlu1 %2293 }
 0x363   : > { %v2171_v5 = vmul.f32 0.00390625, %v2161_v3 }
 0x365   : > { %v2178_v35 = vsel %vm2174_vm10, %v2147_v20, %v2171_v5 }
 0x366   : > { %v2840_v32 = vpack.c.bf16 %v2178_v35, %v2177_v2  ;;  %v2299_v9 = vpop.permute.xlu1 %2298 }
 0x368   : > { %2841 = vmatprep.subr.bf16.mxu0 %v2840_v32 }
 0x369   : > { %2843 = vmatpush3.bf16.msra.mxu0 %v2840_v32 }
 0x36a   : > { %v2304_v51 = vpop.permute.xlu1 %2303 }
 0x36e   : > { %v2309_v5 = vpop.permute.xlu1 %2308 }
 0x372   : > { %v2142_v47 = vpop.xlane.xlu0 %2141 }
 0x373   : > { %v2149_v62 = vmul.f32 0.00390625, %v2142_v47 }
 0x376   : > { %v2167_v45 = vpop.xlane.xlu0 %2166 }
 0x377   : > { %v2173_v1 = vmul.f32 0.00390625, %v2167_v45  ;;  %v2314_v45 = vpop.permute.xlu1 %2313 }
 0x379   : > { %v2180_v15 = vsel %vm2174_vm10, %v2149_v62, %v2173_v1 }
 0x37a   : > { %v2844_v48 = vpack.c.bf16 %v2180_v15, %v2179_v59 }
 0x37c   : > { %2845 = vmatprep.subr.bf16.mxu0 %v2844_v48 }
 0x37d   : > { %2847 = vmatpush3.bf16.msra.mxu0 %v2844_v48 }
 0x37e   : > { %v2193_v7 = vpop.permute.xlu0 %2192 }
 0x380   : > { %2821 = vmatmul.mubr.msk.f32.vlgmr.msra.gmra.mrb[12].mxu0 %vm2195_vm9, %v2182_v10 }
 0x381   : > { %2600 = vmatprep.mubr.bf16.mxu0 %v5628_v28 }
 0x453   : > { %v2822_v39 = vpop.f32.mrb[12].mxu0 }
 0x454   : > { %v2274_v57 = vadd.f32 %v2822_v39, %v2193_v7  ;;  %v2268_v42 = vpop.f32.mrb[13].mxu0 }
 0x455   : > { %v2269_v54 = vadd.f32 %v2268_v42, %v2188_v25 }
 0x456   : > { %v2278_v17 = vmax.f32 %v2274_v57, 0.0  ;;  %v2319_v57 = vpop.permute.xlu1 %2318 }
 0x457   : > { %v2277_v61 = vmax.f32 %v2269_v54, 0.0 }
 0x459   : > { %v2848_v18 = vpack.c.bf16 %v2278_v17, %v2277_v61 }
 0x45b   : > { %2850 = vmatprep.subr.msk.bf16.mxu1 %vm2849_vm15, %v2848_v18 }
 0x45c   : > { %2853 = vmatpush3.bf16.msk.msra.mxu1 %vm2849_vm15, %v2848_v18 }
 0x45f   : > { %2828 = vmatmul.mubr.msk.f32.vlgmr.msra.gmra.mrb[12].mxu1 %vm2321_vm11, %v2280_v34 }
 0x460   : > { %2830 = vmatprep.mubr.msk.f32.mxu1 %vm2321_vm11, %v2281_v6 }
 0x463   : > { %2831 = vmatmul.mubr.msk.f32.gmra.mrb[14].mxu1 %vm2321_vm11, %v2282_v13 }
 0x464   : > { %2833 = vmatprep.mubr.msk.f32.mxu1 %vm2321_vm11, %v2283_v37 }
 0x467   : > { %2834 = vmatmul.mubr.msk.f32.gmra.mrb[16].mxu1 %vm2321_vm11, %v2284_v27 }
 0x468   : > { %2641 = vmatprep.mubr.bf16.mxu1 %v5628_v28 }
 0x532   : > { %v2829_v50 = vpop.f32.mrb[12].mxu1 }
 0x533   : > { %v2415_v3 = vadd.f32 %v2829_v50, %v2299_v9  ;;  %v2409_v31 = vpop.f32.mrb[13].mxu1 }
 0x534   : > { %v2410_v20 = vadd.f32 %v2409_v31, %v2294_v21 }
 0x535   : > { %v2778_v2 = vmul.f32 -1.442695, %v2415_v3 }
 0x536   : > { %v2777_v35 = vmul.f32 -1.442695, %v2410_v20  ;;  %v2832_v32 = vpop.f32.mrb[14].mxu1 }
 0x537   : > { %2970 = vpow2.f32 %v2778_v2  ;;  %v2425_v33 = vadd.f32 %v2832_v32, %v2309_v5  ;;  %v2419_v29 = vpop.f32.mrb[15].mxu1 }
 0x538   : > { %2972 = vpow2.f32 %v2777_v35  ;;  %v2420_v59 = vadd.f32 %v2419_v29, %v2304_v51  ;;  %v2650_v51 = vld [vmem:[%s5260_s11] sm:$0xff] }
 0x539   : > { %v2780_v47 = vmul.f32 -1.442695, %v2425_v33 }
 0x53a   : > { %v2835_v24 = vpop.f32.mrb[16].mxu1  ;;  %v2779_v7 = vmul.f32 -1.442695, %v2420_v59 }
 0x53b   : > { %2974 = vpow2.f32 %v2780_v47  ;;  %v2429_v30 = vpop.f32.mrb[17].mxu1  ;;  %v2435_v42 = vadd.f32 %v2835_v24, %v2319_v57 }
 0x53c   : > { %v2430_v62 = vadd.f32 %v2429_v30, %v2314_v45 }
 0x53d   : > { %v2782_v61 = vmul.f32 -1.442695, %v2435_v42 }
 0x53e   : > { %v2781_v1 = vmul.f32 -1.442695, %v2430_v62 }
 0x540   : > { %2976 = vpow2.f32 %v2781_v1 }
 0x541   : > { %v2971_v15 = vpop.eup %2970 }
 0x542   : > { %v2973_v48 = vpop.eup %2972  ;;  %v2457_v10 = vadd.f32 1.0, %v2971_v15 }
 0x543   : > { %v2456_v52 = vadd.f32 1.0, %v2973_v48 }
 0x544   : > { %2978 = vrcp.f32 %v2457_v10 }
 0x545   : > { %v2975_v39 = vpop.eup %2974  ;;  %2980 = vrcp.f32 %v2456_v52 }
 0x546   : > { %v2459_v25 = vadd.f32 1.0, %v2975_v39  ;;  %2982 = vpow2.f32 %v2779_v7 }
 0x548   : > { %2984 = vrcp.f32 %v2459_v25 }
 0x54a   : > { %v2977_v54 = vpop.eup %2976 }
 0x54b   : > { %v2460_v17 = vadd.f32 1.0, %v2977_v54 }
 0x54d   : > { %2986 = vrcp.f32 %v2460_v17 }
 0x54e   : > { %v2979_v18 = vpop.eup %2978  ;;  %2988 = vpow2.f32 %v2782_v61 }
 0x54f   : > { %v2981_v34 = vpop.eup %2980  ;;  %2481 = vperm.xlu1 %2954, %v2979_v18  }
 0x550   : > { %2517 = vperm.xlu0 %2958, %v2981_v34   ;;  %v2983_v6 = vpop.eup %2982 }
 0x551   : > { %v2458_v37 = vadd.f32 1.0, %v2983_v6 }
 0x552   : > { %v2985_v13 = vpop.eup %2984 }
 0x553   : > { %2956 = vset.pattern.permute.xlu1 %v5627_v60  ;;  %2990 = vrcp.f32 %v2458_v37 }
 0x554   : > { %2959 = vset.pattern.permute.xlu0 %v5628_v28  ;;  %2521 = vperm.xlu1 %2956, %v2979_v18  }
 0x555   : > { %2491 = vperm.xlu0 %2959, %v2985_v13  }
 0x557   : > { %v2987_v27 = vpop.eup %2986 }
 0x558   : > { %2957 = vset.pattern.permute.xlu1 %v5628_v28  ;;  %v2989_v21 = vpop.eup %2988 }
 0x559   : > { %2476 = vperm.xlu1 %2957, %v2981_v34   ;;  %2496 = vperm.xlu0 %2959, %v2987_v27   ;;  %v2461_v9 = vadd.f32 1.0, %v2989_v21  ;;  %v2998_v21 = vld [vmem:[%s3209_s29] sm:$0xff] }
 0x55b   : > { %2992 = vrcp.f32 %v2461_v9 }
 0x55d   : > { %2960 = vset.pattern.permute.xlu1 %v5627_v60  ;;  %2964 = vset.pattern.permute.xlu0 %v5627_v60  ;;  %v2991_v50 = vpop.eup %2990 }
 0x55e   : > { %2529 = vperm.xlu1 %2960, %v2985_v13   ;;  %2533 = vperm.xlu0 %2964, %v2987_v27  }
 0x562   : > { %2961 = vset.pattern.permute.xlu1 %v5628_v28  ;;  %2661 = vperm.xlu0 %2964, %v2650_v51  }
 0x563   : > { %2486 = vperm.xlu1 %2961, %v2991_v50  }
 0x565   : > { %v2993_v3 = vpop.eup %2992 }
 0x567   : > { %2962 = vset.pattern.permute.xlu1 %v5627_v60 }
 0x568   : > { %2525 = vperm.xlu1 %2962, %v2991_v50   ;;  %v2999_v50 = vld [vmem:[%s3209_s29 + $0x8] sm:$0xff] }
 0x56c   : > { %2963 = vset.pattern.permute.xlu1 %v5628_v28 }
 0x56d   : > { %2501 = vperm.xlu1 %2963, %v2993_v3  }
 0x571   : > { %2965 = vset.pattern.permute.xlu1 %v5627_v60 }
 0x572   : > { %2537 = vperm.xlu1 %2965, %v2993_v3  }
 0x576   : > { %2966 = vset.pattern.permute.xlu1 %v5628_v28 }
 0x577   : > { %2653 = vperm.xlu1 %2966, %v2650_v51  }
 0x5ce   : > { %v2482_v31 = vpop.permute.xlu1 %2481 }
 0x5cf   : > { %v2518_v20 = vpop.permute.xlu0 %2517  ;;  %v2506_v60 = vmul.f32 %v2482_v31, %v4876_v44  ;;  %v2507_v28 = vmul.f32 %v2482_v31, %v4878_v63 }
 0x5d0   : > { %v2540_v2 = vmul.f32 %v2518_v20, %v4849_v23  ;;  %v2541_v35 = vmul.f32 %v2518_v20, %v4838_v16 }
 0x5d3   : > { %v2522_v5 = vpop.permute.xlu1 %2521 }
 0x5d4   : > { %v2542_v32 = vmul.f32 %v2522_v5, %v4900_v8  ;;  %v2543_v33 = vmul.f32 %v2522_v5, %v4906_v58  ;;  %v2492_v8 = vpop.permute.xlu0 %2491 }
 0x5d5   : > { %v2510_v1 = vmul.f32 %v2492_v8, %v5022_v41  ;;  %v2511_v59 = vmul.f32 %v2492_v8, %v5024_v12 }
 0x5d6   : > { %v2555_v29 = vpack.c.bf16 %v2542_v32, %v2540_v2  ;;  %v2556_v47 = vpack.c.bf16 %v2543_v33, %v2541_v35 }
 0x5d8   : > { %2609 = vmatprep.subr.bf16.mxu1 %v2556_v47  ;;  %v2477_v24 = vpop.permute.xlu1 %2476  ;;  %v2497_v41 = vpop.permute.xlu0 %2496 }
 0x5d9   : > { %v2504_v45 = vmul.f32 %v2477_v24, %v4833_v4  ;;  %v2505_v30 = vmul.f32 %v2477_v24, %v4827_v49  ;;  %2610 = vmatpush1.bf16.msra.mxu1 %v2555_v29  ;;  %v2513_v25 = vmul.f32 %v2497_v41, %v5008_v55  ;;  %v3000_v29 = vld [vmem:[%s3209_s29 + $0x10] sm:$0xff]  ;;  %v3001_v24 = vld [vmem:[%s3209_s29 + $0x18] sm:$0xff]  ;;  %s3080_s29 = smov [#allocation2]  }
 0x5da   : > { %s3006_s0 = sshll.u32 %s3080_s29, 4  ;;  %s3007_s0 = int_to_ptr.vmem [resolvable:$false] %s3006_s0 }
 0x5db   : > { %v2553_v23 = vpack.c.bf16 %v2506_v60, %v2504_v45  ;;  %v2554_v62 = vpack.c.bf16 %v2507_v28, %v2505_v30  ;;  %s3008_s28 = scalar_lea.vmem %s3007_s0, 1024  ;;  %p3009_p0 = scmp.lt.s32.totalorder %s5207_s26, %s3007_s0 }
 0x5dc   : > { %p3010_p1 = scmp.lt.s32.totalorder %s3008_s28, %s3002_s18 }
 0x5dd   : > { %2568 = vmatprep.subr.bf16.mxu0 %v2554_v62  ;;  %v2530_v16 = vpop.permute.xlu1 %2529 }
 0x5de   : > { %2569 = vmatpush1.bf16.msra.mxu0 %v2553_v23  ;;  %v2546_v48 = vmul.f32 %v2530_v16, %v5036_v19  ;;  %v2547_v10 = vmul.f32 %v2530_v16, %v5038_v38  ;;  %v2534_v38 = vpop.permute.xlu0 %2533  ;;  %p3011_p2 = por %p3010_p1, %p3009_p0 }
 0x5df   : > { %v2548_v54 = vmul.f32 %v2534_v38, %v5018_v43  ;;  %v2549_v17 = vmul.f32 %v2534_v38, %v5016_v26 }
 0x5e0   : > { %p3012_p3 = pnand %p3011_p2, %p3005_p13 }
 0x5e2   : > { %v2487_v58 = vpop.permute.xlu1 %2486  ;;  %v2662_v18 = vpop.permute.xlu0 %2661 }
 0x5e3   : > { %v2508_v44 = vmul.f32 %v2487_v58, %v4922_v22  ;;  %v2509_v63 = vmul.f32 %v2487_v58, %v4924_v53  ;;  %v2512_v53 = vmul.f32 %v2497_v41, %v5006_v14 }
 0x5e5   : > { %v2557_v15 = vpack.c.bf16 %v2510_v1, %v2508_v44  ;;  %v2558_v4 = vpack.c.bf16 %v2511_v59, %v2509_v63 }
 0x5e7   : > { %2570 = vmatprep.subr.bf16.mxu0 %v2558_v4  ;;  %v2526_v49 = vpop.permute.xlu1 %2525 }
 0x5e8   : > { %v2544_v52 = vmul.f32 %v2526_v49, %v4930_v0  ;;  %v2545_v7 = vmul.f32 %v2526_v49, %v4928_v46  ;;  %2571 = vmatpush1.bf16.msra.mxu0 %v2557_v15 }
 0x5ea   : > { %v2559_v39 = vpack.c.bf16 %v2546_v48, %v2544_v52  ;;  %v2560_v12 = vpack.c.bf16 %v2547_v10, %v2545_v7 }
 0x5ec   : > { %2611 = vmatprep.subr.bf16.mxu1 %v2560_v12  ;;  %v2502_v22 = vpop.permute.xlu1 %2501 }
 0x5ed   : > { %v2514_v57 = vmul.f32 %v2502_v22, %v5074_v11  ;;  %v2515_v19 = vmul.f32 %v2502_v22, %v5076_v40  ;;  %2612 = vmatpush1.bf16.msra.mxu1 %v2559_v39  ;;  %v2552_v11 = vld [vmem:[%s5259_s10] sm:$0xf] }
 0x5ef   : > { %v2561_v42 = vpack.c.bf16 %v2514_v57, %v2512_v53  ;;  %v2562_v0 = vpack.c.bf16 %v2515_v19, %v2513_v25 }
 0x5f1   : > { %2572 = vmatprep.subr.bf16.mxu0 %v2562_v0  ;;  %v2538_v46 = vpop.permute.xlu1 %2537 }
 0x5f2   : > { %v2550_v14 = vmul.f32 %v2538_v46, %v5080_v56  ;;  %v2551_v55 = vmul.f32 %v2538_v46, %v5082_v36  ;;  %2573 = vmatpush1.bf16.msra.mxu0 %v2561_v42 }
 0x5f4   : > { %v2563_v40 = vpack.c.bf16 %v2550_v14, %v2548_v54  ;;  %v2564_v61 = vpack.c.bf16 %v2551_v55, %v2549_v17 }
 0x5f5   : > { %2783 = vmatmul.mubr.msk.bf16.vlgmr.msra.gmra.mrb[16].mxu0 %vm2195_vm9, %v2552_v11 }
 0x5f6   : > { %2613 = vmatprep.subr.bf16.mxu1 %v2564_v61  ;;  %v2654_v26 = vpop.permute.xlu1 %2653 }
 0x5f7   : > { %2614 = vmatpush1.bf16.msra.mxu1 %v2563_v40 }
 0x5fa   : > { %2784 = vmatmul.mubr.msk.bf16.vlgmr.msra.gmra.mrb[20].mxu1 %vm2195_vm9, %v2552_v11 }
 0x6c8   : > { %v2602_v43 = vpop.f32.mrb[16].mxu0 }
 0x6c9   : > { %v2656_v56 = vmul.f32 %v2654_v26, %v2602_v43  ;;  %v2604_v36 = vpop.f32.mrb[17].mxu0 }
 0x6ca   : > { %v2657_v34 = vmul.f32 %v2654_v26, %v2604_v36  ;;  %v2606_v6 = vpop.f32.mrb[18].mxu0 }
 0x6cb   : > { %v2664_v13 = vadd.f32 %v2662_v18, %v2656_v56  ;;  %v2607_v37 = vpop.f32.mrb[19].mxu0 }
 0x6cc   : > { %v2665_v27 = vadd.f32 %v2662_v18, %v2657_v34 }
 0x6cd   : > { %v2668_v9 = vadd.f32 %v2998_v21, %v2664_v13  ;;  %v2643_v51 = vpop.f32.mrb[20].mxu1 }
 0x6ce   : > { %v2669_v3 = vadd.f32 %v2999_v50, %v2665_v27  ;;  %v2658_v31 = vmul.f32 %v2654_v26, %v2643_v51  ;;  %v2645_v20 = vpop.f32.mrb[21].mxu1 }
 0x6cf   : > { %2672 = vst [vmem:[%s406_s19] sm:$0xff] %v2668_v9  ;;  %v2659_v5 = vmul.f32 %v2654_v26, %v2645_v20  ;;  %v2647_v2 = vpop.f32.mrb[22].mxu1 }
 0x6d0   : > { %2673 = vst [vmem:[%s406_s19 + $0x8] sm:$0xff] %v2669_v3  ;;  %v2666_v35 = vadd.f32 %v2662_v18, %v2658_v31  ;;  %v2648_v32 = vpop.f32.mrb[23].mxu1 }
 0x6d1   : > { %v2667_v33 = vadd.f32 %v2662_v18, %v2659_v5 }
 0x6d2   : > { %v2670_v47 = vadd.f32 %v3000_v29, %v2666_v35 }
 0x6d3   : > { %v2671_v60 = vadd.f32 %v3001_v24, %v2667_v33 }
 0x6d4   : > { %2674 = vst [vmem:[%s406_s19 + $0x10] sm:$0xff] %v2670_v47 }
 0x6d5   : > { %2675 = vst [vmem:[%s406_s19 + $0x18] sm:$0xff] %v2671_v60 }
 0x6d6   : > { %3015 = shalt.err (!%p3012_p3)
}
 0x6d7   : > { %s3016_s17 = scalar_lea.hbm %s5205_s16, 512  ;;  %s3020_s15 = scalar_lea.hbm %s5261_s12, 1024 }
 0x6d8   : > { %p3017_p4 = scmp.ne.s32.totalorder %s5205_s16, %s3016_s17  ;;  %p3021_p9 = scmp.lt.u32.totalorder %s5205_s16, %s5261_s12 }
 0x6d9   : > { %p3022_p10 = scmp.lt.u32.totalorder %s3020_s15, %s3016_s17  ;;  %p3024_p12 = scmp.lt.u32.totalorder %s3016_s17, %s5205_s16 }
 0x6da   : > { %p3018_p7 = pnand %p3017_p4, %p3184_p5 }
 0x6db   : > { %p3023_p11 = por %p3022_p10, %p3021_p9 }
 0x6dc   : > { %p3019_p8 = pneg %p3018_p7 }
 0x6dd   : > { %p3025_p13 = por %p3024_p12, %p3023_p11 }
 0x6df   : > { %p3026_p0 = pnand %p3025_p13, %p3019_p8 }
 0x6e1   : > { %3029 = shalt.err (!%p3026_p0)
}
 0x6e2   : > { %2854 = dma.vmem_to_hbm [thread:$0]  (%p3184_p5), %s5207_s26, 512, %s5205_s16, %s2677_s25  }
 0x6e3 PF: > { %p2860_p1 = scmp.ge.s32.totalorder %s3064_s24, 2  ;;  %s2703_s18 = sand.u32 1, %s3052_s21  }
 0x6e4   : > { %s2704_s28 = scalar_lea.sflag [#allocation3], %s2703_s18 }
 0x6e5   : > { %p2857_p2 = pnand %p2860_p1, %p3188_p6 }
 0x6e7   : > { %3047 = dma.done.wait (!%p2857_p2), %s2704_s28, 512  }
 0x6e8   : > { %3049 = vsyncadd (!%p2857_p2), %s2704_s28, 4294966784  ;;  %p22_p3 = scmp.ge.s32.totalorder %s3171_s27, 4   ;;  %s5629_s21 = smov %s3056_s22 }
 0x6e9   : > { %s5630_s22 = smov %s3060_s23  ;;  %s5631_s23 = smov %s3182_s30 }
 0x6ea   : > { %s5632_s24 = smov %s3171_s27  ;;  %24 = sbr.rel (!%p22_p3) target bundleno = 5 (0x5), region = 103 }
 0x6f1   :  { %2709 = vsyncpa [#allocation3], 1 }
 0x6f2   :  { %2711 = vsyncpa [#allocation3 + $0x1], 1 }

// kernel: tpu_custom_call.1
= control target key start
LH: loop header
LB: loop body
LE: loop exit
PB: predicated region body
PF: predicated region fallthrough
CT: control target
= control target key end

     0   :  { %s5249_s0 = inlined_call_operand.vmem [shape: f32[2,8,512], index: 0, kind: input, shape index: {}]   ;;  %s5250_s1 = inlined_call_operand.vmem [shape: f32[4,512], index: 1, kind: input, shape index: {}]   ;;  %s5251_s2 = inlined_call_operand.vmem [shape: bf16[48,8], index: 2, kind: input, shape index: {}]   ;;  %s5252_s3 = inlined_call_operand.vmem [shape: f32[48,2], index: 3, kind: input, shape index: {}]   ;;  %s5253_s4 = inlined_call_operand.vmem [shape: f32[48,9], index: 4, kind: input, shape index: {}]   ;;  %s5254_s5 = inlined_call_operand.vmem [shape: f32[48,2], index: 5, kind: input, shape index: {}]   ;;  %s5255_s6 = inlined_call_operand.vmem [shape: f32[12,48], index: 6, kind: input, shape index: {}]   ;;  %s5256_s7 = inlined_call_operand.vmem [shape: f32[12,1], index: 7, kind: input, shape index: {}]   ;;  %s5257_s8 = inlined_call_operand.vmem [shape: f32[48,12], index: 8, kind: input, shape index: {}]   ;;  %s5258_s9 = inlined_call_operand.vmem [shape: f32[48,1], index: 9, kind: input, shape index: {}]   ;;  %s5259_s10 = inlined_call_operand.vmem [shape: bf16[8,48], index: 10, kind: input, shape index: {}]   ;;  %s5260_s11 = inlined_call_operand.vmem [shape: f32[8,2], index: 11, kind: input, shape index: {}]   ;;  %s5261_s12 = inlined_call_operand.hbm [shape: f32[2,8,512], index: 12, kind: output, shape index: {}]  }
   0x1   :  { %5390 = sst [smem:[#allocation80_spill]] %s5249_s0 }
   0x2   :  { %17 = vsyncpa [#allocation3], 0 }
   0x3   :  { %19 = vsyncpa [#allocation3 + $0x1], 0  ;;  %s3146_s21 = smov 0   ;;  %s3148_s22 = smov 0  }
   0x4   :  { %s3150_s23 = smov 0   ;;  %s3152_s24 = smov 0  }
   0x5 LB: > { %s3167_s25 = sadd.s32 4294967295, %s3064_s24   ;;  %s2750_s26 = sadd.s32 4294967294, %s3064_s24   ;;  %s3064_s24 = sphi %s3152_s24, %s5632_s24   ;;  %s3060_s23 = sphi %s3150_s23, %s5631_s23   ;;  %s3056_s22 = sphi %s3148_s22, %s5630_s22   ;;  %s3052_s21 = sphi %s3146_s21, %s5629_s21  }
   0x6   : > { %s3171_s27 = sadd.s32 1, %s3064_s24   ;;  %s289_s28 = sadd.s32 1, %s3060_s23 }
   0x7   : > { %s286_s29 = ssub.s32 %s3064_s24, %s3171_s27  ;;  %p299_p0 = scmp.ne.s32.totalorder %s3060_s23, %s3056_s22 }
   0x8   : > { %p287_p1 = scmp.eq.s32.totalorder %s286_s29, 0  ;;  %p300_p2 = scmp.eq.s32.totalorder %s3167_s25, 1 }
   0x9   : > { %p305_p3 = scmp.ne.s32.totalorder %s3056_s22, %s3052_s21  ;;  %p306_p4 = scmp.eq.s32.totalorder %s2750_s26, 1 }
   0xa   : > { %s3182_s30 = scalar_select %p287_p1, %s3060_s23, %s289_s28  }
   0xb   : > { %p3184_p5 = por %p300_p2, %p299_p0  ;;  %p3188_p6 = por %p306_p4, %p305_p3 }
   0xc   : > { %p2753_p7 = scmp.ge.s32.totalorder %s3064_s24, 1  ;;  %p365_p8 = scmp.lt.s32.totalorder %s3064_s24, 3 }
   0xe   : > { %p366_p9 = pnand %p2753_p7, %p365_p8 }
  0x10   : > { %369 = sbr.rel (%p366_p9) target bundleno = 1763 (0x6e3), region = 68 }
  0x17   : > { %v591_v0 = vld [vmem:[%s5252_s3] sm:$0xff]  ;;  %p407_p10 = scmp.lt.s32.totalorder %s3167_s25, 1  ;;  %v5262_v1 = vmov 1   ;;  %v5266_v2 = vmov 0   ;;  %v592_v3 = vld [vmem:[%s5252_s3 + $0x8] sm:$0xff]  ;;  %s5393_s0 = sld [smem:[#allocation80_spill]] }
  0x18   : > { %2907 = vset.pattern.permute.xlu1 %v5262_v1  ;;  %497 = vmatprep.mubr.bf16.mxu0 %v5266_v2  ;;  %v593_v4 = vld [vmem:[%s5252_s3 + $0x10] sm:$0xff]  ;;  %vm452_vm0 = vcmask 1043456   ;;  %v594_v13 = vld [vmem:[%s5252_s3 + $0x18] sm:$0xff]  ;;  %v2967_v15 = vld [vmem:[%s5251_s2] sm:$0xff]   ;;  %vm442_vm1 = vcmask 64512   ;;  %v3068_v22 = vmov 2  }
  0x19   : > { %652 = vperm.xlu1 %2907, %v591_v0   ;;  %s408_s17 = scalar_select %p407_p10, %s3167_s25, 1  ;;  %560 = vmatprep.mubr.bf16.mxu1 %v5266_v2  ;;  %v2968_v17 = vld [vmem:[%s5251_s2 + $0x8] sm:$0xff]   ;;  %v595_v18 = vld [vmem:[%s5252_s3 + $0x20] sm:$0xff]  ;;  %v2969_v19 = vld [vmem:[%s5251_s2 + $0x10] sm:$0xff]   ;;  %v3069_v26 = vmov 7   ;;  %v3070_v28 = vmov 6  }
  0x1a   : > { %2909 = vset.pattern.permute.xlu0 %v5262_v1  ;;  %v596_v20 = vld [vmem:[%s5252_s3 + $0x28] sm:$0xff]  ;;  %v3264_v23 = vld [vmem:[%s5253_s4 + $0x18] sm:$0xff]  ;;  %v3280_v25 = vld [vmem:[%s5253_s4] sm:$0xff]  ;;  %v3071_v30 = vmov 8   ;;  %v3072_v31 = vmov 3   ;;  %v5265_v32 = vmov 4  }
  0x1b   : > { %s2790_s20 = sshll.u32 %s408_s17, 5  ;;  %660 = vperm.xlu0 %2909, %v593_v4   ;;  %v3258_v21 = vld [vmem:[%s5253_s4 + $0x8] sm:$0xff]  ;;  %v3287_v27 = vld [vmem:[%s5253_s4 + $0x10] sm:$0xff]  ;;  %v3294_v29 = vld [vmem:[%s5253_s4 + $0x20] sm:$0xff]  ;;  %v5264_v39 = vmov 5   ;;  %s3075_s17 = smov 1  }
  0x1c   : > { %v3272_v24 = vld [vmem:[%s5253_s4 + $0x28] sm:$0xff]  ;;  %s3076_s18 = smov 127  }
  0x1d   : > { %s3209_s29 = scalar_lea.vmem %s5393_s0, %s2790_s20  ;;  %656 = vperm.xlu1 %2907, %v592_v3   ;;  %s2791_s20 = sshll.u32 %s3167_s25, 9 }
  0x1e   : > { %v414_v5 = vld [vmem:[%s3209_s29 + $0x8] sm:$0xff]  ;;  %v416_v6 = vld [vmem:[%s3209_s29 + $0x18] sm:$0xff]  ;;  %v413_v7 = vld [vmem:[%s3209_s29] sm:$0xff]  ;;  %s5205_s16 = scalar_lea.hbm %s5261_s12, %s2791_s20 }
  0x1f   : > { %v424_v8 = vpack.c.bf16 %v414_v5, %v414_v5  ;;  %v426_v9 = vpack.c.bf16 %v416_v6, %v416_v6  ;;  %v423_v10 = vpack.c.bf16 %v413_v7, %v413_v7  ;;  %v415_v11 = vld [vmem:[%s3209_s29 + $0x10] sm:$0xff]  ;;  %2910 = vset.pattern.permute.xlu0 %v5266_v2 }
  0x20   : > { %v425_v12 = vpack.c.bf16 %v415_v11, %v415_v11  ;;  %599 = vperm.xlu0 %2910, %v591_v0  }
  0x21   : > { %2760 = vmatprep.subr.msk.bf16.mxu0 %vm452_vm0, %v424_v8  ;;  %2764 = vmatprep.subr.msk.bf16.mxu1 %vm452_vm0, %v426_v9  ;;  %v454_v14 = vsel %vm452_vm0, %v423_v10, 0 }
  0x22   : > { %2908 = vset.pattern.permute.xlu1 %v5266_v2  ;;  %466 = vmatpush1.bf16.msra.mxu0 %v454_v14  ;;  %v460_v16 = vsel %vm452_vm0, %v425_v12, 0 }
  0x23   : > { %529 = vmatpush1.bf16.msra.mxu1 %v460_v16  ;;  %614 = vperm.xlu1 %2908, %v594_v13  }
  0x24   : > { %604 = vperm.xlu0 %2910, %v592_v3  }
  0x25   : > { %2761 = vmatmul.mubr.msk.bf16.vlgmr.msra.gmra.mrb[0].mxu0 %vm442_vm1, %v2967_v15 }
  0x26   : > { %2765 = vmatmul.mubr.msk.bf16.vlgmr.msra.gmra.mrb[0].mxu1 %vm442_vm1, %v2967_v15  ;;  %507 = vmatprep.mubr.bf16.mxu0 %v5266_v2 }
  0x27   : > { %2911 = vset.pattern.permute.xlu1 %v5262_v1  ;;  %570 = vmatprep.mubr.bf16.mxu1 %v5266_v2 }
  0x28   : > { %664 = vperm.xlu1 %2911, %v594_v13   ;;  %609 = vperm.xlu0 %2910, %v593_v4  }
  0x2c   : > { %2912 = vset.pattern.permute.xlu1 %v5266_v2  ;;  %624 = vperm.xlu0 %2910, %v596_v20  }
  0x2d   : > { %619 = vperm.xlu1 %2912, %v595_v18   ;;  %2762 = vmatmul.mubr.msk.bf16.gmra.mrb[4].mxu0 %vm442_vm1, %v2968_v17 }
  0x2e   : > { %2766 = vmatmul.mubr.msk.bf16.gmra.mrb[4].mxu1 %vm442_vm1, %v2968_v17  ;;  %517 = vmatprep.mubr.bf16.mxu0 %v5266_v2 }
  0x2f   : > { %580 = vmatprep.mubr.bf16.mxu1 %v5266_v2 }
  0x30   : > { %2917 = vset.pattern.permute.xlu0 %v3068_v22 }
  0x31   : > { %2913 = vset.pattern.permute.xlu1 %v5262_v1  ;;  %1372 = vperm.xlu0 %2917, %v3258_v21  }
  0x32   : > { %668 = vperm.xlu1 %2913, %v595_v18  }
  0x35   : > { %2763 = vmatmul.mubr.msk.bf16.gmra.mrb[8].mxu0 %vm442_vm1, %v2969_v19  ;;  %1380 = vperm.xlu0 %2917, %v3264_v23  }
  0x36   : > { %2767 = vmatmul.mubr.msk.bf16.gmra.mrb[8].mxu1 %vm442_vm1, %v2969_v19  ;;  %672 = vperm.xlu1 %2913, %v596_v20  }
  0x39   : > { %1388 = vperm.xlu0 %2917, %v3272_v24  }
  0x3a   : > { %2914 = vset.pattern.permute.xlu1 %v5266_v2 }
  0x3b   : > { %1252 = vperm.xlu1 %2914, %v3258_v21  }
  0x3d   : > { %2930 = vset.pattern.permute.xlu0 %v3069_v26 }
  0x3e   : > { %1645 = vperm.xlu0 %2930, %v3280_v25  }
  0x3f   : > { %2915 = vset.pattern.permute.xlu1 %v5262_v1 }
  0x40   : > { %1300 = vperm.xlu1 %2915, %v3258_v21  }
  0x42   : > { %1653 = vperm.xlu0 %2930, %v3287_v27  }
  0x44   : > { %2916 = vset.pattern.permute.xlu1 %v3068_v22 }
  0x45   : > { %1368 = vperm.xlu1 %2916, %v3280_v25  }
  0x46   : > { %1661 = vperm.xlu0 %2930, %v3294_v29  }
  0x49   : > { %2918 = vset.pattern.permute.xlu1 %v3070_v28 }
  0x4a   : > { %1597 = vperm.xlu1 %2918, %v3280_v25   ;;  %2932 = vset.pattern.permute.xlu0 %v3071_v30 }
  0x4b   : > { %1717 = vperm.xlu0 %2932, %v3280_v25  }
  0x4e   : > { %1601 = vperm.xlu1 %2918, %v3258_v21  }
  0x4f   : > { %1725 = vperm.xlu0 %2932, %v3287_v27  }
  0x52   : > { %2919 = vset.pattern.permute.xlu1 %v3069_v26 }
  0x53   : > { %1649 = vperm.xlu1 %2919, %v3258_v21   ;;  %1737 = vperm.xlu0 %2932, %v3272_v24  }
  0x57   : > { %2920 = vset.pattern.permute.xlu1 %v5266_v2  ;;  %2935 = vset.pattern.permute.xlu0 %v3072_v31 }
  0x58   : > { %1256 = vperm.xlu1 %2920, %v3287_v27   ;;  %1051 = vperm.xlu0 %2935, %v3280_v25  }
  0x5c   : > { %2921 = vset.pattern.permute.xlu1 %v5262_v1  ;;  %1061 = vperm.xlu0 %2935, %v3287_v27  }
  0x5d   : > { %1304 = vperm.xlu1 %2921, %v3287_v27  }
  0x60   : > { %1071 = vperm.xlu0 %2935, %v3294_v29  }
  0x61   : > { %1308 = vperm.xlu1 %2921, %v3264_v23  }
  0x64   : > { %2942 = vset.pattern.permute.xlu0 %v5265_v32 }
  0x65   : > { %2922 = vset.pattern.permute.xlu1 %v3071_v30  ;;  %1108 = vperm.xlu0 %2942, %v3258_v21  }
  0x66   : > { %1721 = vperm.xlu1 %2922, %v3258_v21  }
  0x69   : > { %1116 = vperm.xlu0 %2942, %v3264_v23  }
  0x6a   : > { %2923 = vset.pattern.permute.xlu1 %v3068_v22 }
  0x6b   : > { %1376 = vperm.xlu1 %2923, %v3287_v27  }
  0x6f   : > { %2924 = vset.pattern.permute.xlu1 %v3070_v28 }
  0x70   : > { %1605 = vperm.xlu1 %2924, %v3287_v27  }
  0x74   : > { %1609 = vperm.xlu1 %2924, %v3264_v23  }
  0x78   : > { %2925 = vset.pattern.permute.xlu1 %v3069_v26 }
  0x79   : > { %1657 = vperm.xlu1 %2925, %v3264_v23  }
  0x7d   : > { %2926 = vset.pattern.permute.xlu1 %v5266_v2 }
  0x7e   : > { %1264 = vperm.xlu1 %2926, %v3294_v29  }
  0x82   : > { %2927 = vset.pattern.permute.xlu1 %v5262_v1 }
  0x83   : > { %1312 = vperm.xlu1 %2927, %v3294_v29  }
  0x87   : > { %1316 = vperm.xlu1 %2927, %v3272_v24  }
  0x8b   : > { %2928 = vset.pattern.permute.xlu1 %v3071_v30 }
  0x8c   : > { %1729 = vperm.xlu1 %2928, %v3264_v23  }
  0x90   : > { %2929 = vset.pattern.permute.xlu1 %v3068_v22 }
  0x91   : > { %1384 = vperm.xlu1 %2929, %v3294_v29  }
  0x95   : > { %2931 = vset.pattern.permute.xlu1 %v3070_v28 }
  0x96   : > { %1613 = vperm.xlu1 %2931, %v3294_v29  }
  0x98   : > { %v3326_v33 = vpop.permute.xlu1 %652 }
  0x9a   : > { %1617 = vperm.xlu1 %2931, %v3272_v24   ;;  %v3371_v49 = vpop.permute.xlu0 %660 }
  0x9c   : > { %v3329_v34 = vpop.permute.xlu1 %656 }
  0x9e   : > { %2933 = vset.pattern.permute.xlu1 %v3069_v26 }
  0x9f   : > { %1665 = vperm.xlu1 %2933, %v3272_v24   ;;  %v600_v51 = vpop.permute.xlu0 %599 }
  0xa2   : > { %v3332_v35 = vpop.permute.xlu1 %614 }
  0xa3   : > { %2934 = vset.pattern.permute.xlu1 %v3071_v30  ;;  %v605_v53 = vpop.permute.xlu0 %604 }
  0xa4   : > { %1733 = vperm.xlu1 %2934, %v3294_v29  }
  0xa7   : > { %v3335_v36 = vpop.permute.xlu1 %664 }
  0xa8   : > { %2936 = vset.pattern.permute.xlu1 %v3072_v31 }
  0xa9   : > { %1056 = vperm.xlu1 %2936, %v3258_v21  }
  0xac   : > { %v3338_v37 = vpop.permute.xlu1 %619 }
  0xad   : > { %2937 = vset.pattern.permute.xlu1 %v5265_v32 }
  0xae   : > { %1104 = vperm.xlu1 %2937, %v3280_v25  }
  0xb1   : > { %v3342_v38 = vpop.permute.xlu1 %668 }
  0xb2   : > { %2938 = vset.pattern.permute.xlu1 %v5264_v39 }
  0xb3   : > { %1176 = vperm.xlu1 %2938, %v3280_v25  }
  0xb5   : > { %v3346_v40 = vpop.permute.xlu1 %672 }
  0xb7   : > { %1180 = vperm.xlu1 %2938, %v3258_v21  }
  0xba   : > { %v3350_v41 = vpop.permute.xlu1 %1252 }
  0xbb   : > { %2939 = vset.pattern.permute.xlu1 %v3072_v31 }
  0xbc   : > { %1066 = vperm.xlu1 %2939, %v3264_v23  }
  0xbf   : > { %v3354_v42 = vpop.permute.xlu1 %1300 }
  0xc0   : > { %2940 = vset.pattern.permute.xlu1 %v5265_v32 }
  0xc1   : > { %1112 = vperm.xlu1 %2940, %v3287_v27  }
  0xc4   : > { %v3358_v43 = vpop.permute.xlu1 %1368 }
  0xc5   : > { %2941 = vset.pattern.permute.xlu1 %v5264_v39  ;;  %5394 = vst [vmem:[#allocation5_spill] sm:$0xff] %v3358_v43 }
  0xc6   : > { %1184 = vperm.xlu1 %2941, %v3287_v27  }
  0xc9   : > { %v3361_v44 = vpop.permute.xlu1 %1597 }
  0xca   : > { %1188 = vperm.xlu1 %2941, %v3264_v23  }
  0xcd   : > { %v3363_v45 = vpop.permute.xlu1 %1601 }
  0xce   : > { %2943 = vset.pattern.permute.xlu1 %v3072_v31 }
  0xd2   : > { %v3365_v46 = vpop.permute.xlu1 %1649 }
  0xd7   : > { %v3367_v47 = vpop.permute.xlu1 %1256 }
  0xd8   : > { %5395 = vst [vmem:[#allocation6_spill] sm:$0xff] %v3367_v47 }
  0xdc   : > { %v3369_v48 = vpop.permute.xlu1 %1304 }
  0xe0   : > { %v3373_v50 = vpop.permute.xlu1 %1308 }
  0xe1   : > { %5396 = vst [vmem:[#allocation7_spill] sm:$0xff] %v3373_v50 }
  0xe5   : > { %v3375_v52 = vpop.permute.xlu1 %1721 }
  0xea   : > { %v3377_v54 = vpop.permute.xlu1 %1376 }
  0xeb   : > { %5397 = vst [vmem:[#allocation8_spill] sm:$0xff] %v3377_v54 }
  0xef   : > { %v3382_v9 = vpop.permute.xlu1 %1605 }
  0xf0   : > { %5398 = vst [vmem:[#allocation9_spill] sm:$0xff] %v3382_v9 }
  0xf3   : > { %v3401_v28 = vpop.permute.xlu1 %1609 }
  0xf4   : > { %5401 = vst [vmem:[#allocation12_spill] sm:$0xff] %v3401_v28 }
  0xf8   : > { %v499_v55 = vpop.f32.mrb[0].mxu0 }
  0xf9   : > { %v627_v56 = vmul.f32 %v600_v51, %v499_v55  ;;  %v562_v57 = vpop.f32.mrb[0].mxu1  ;;  %v501_v58 = vpop.f32.mrb[1].mxu0 }
  0xfa   : > { %v629_v59 = vmul.f32 %v600_v51, %v562_v57  ;;  %v564_v60 = vpop.f32.mrb[1].mxu1  ;;  %v503_v61 = vpop.f32.mrb[2].mxu0  ;;  %v628_v21 = vmul.f32 %v600_v51, %v501_v58 }
  0xfb   : > { %v675_v62 = vadd.f32 %v3326_v33, %v627_v56  ;;  %v631_v63 = vmul.f32 %v605_v53, %v503_v61  ;;  %v566_v0 = vpop.f32.mrb[2].mxu1  ;;  %v505_v3 = vpop.f32.mrb[3].mxu0  ;;  %v630_v57 = vmul.f32 %v600_v51, %v564_v60 }
  0xfc   : > { %v677_v4 = vadd.f32 %v3326_v33, %v629_v59  ;;  %v633_v5 = vmul.f32 %v605_v53, %v566_v0  ;;  %v568_v6 = vpop.f32.mrb[3].mxu1  ;;  %v632_v30 = vmul.f32 %v605_v53, %v505_v3  ;;  %v676_v56 = vadd.f32 %v3326_v33, %v628_v21  ;;  %v3425_v3 = vpop.permute.xlu1 %1657 }
  0xfd   : > { %vm699_vm2 = vcmp.gt.f32.partialorder %v675_v62, 0.0  ;;  %v723_v7 = vmul.f32 0.01, %v675_v62  ;;  %v679_v8 = vadd.f32 %v3329_v34, %v631_v63  ;;  %v634_v59 = vmul.f32 %v605_v53, %v568_v6  ;;  %5402 = vst [vmem:[#allocation13_spill] sm:$0xff] %v3425_v3 }
  0xfe   : > { %v725_v11 = vmul.f32 0.01, %v677_v4  ;;  %v681_v12 = vadd.f32 %v3329_v34, %v633_v5  ;;  %vm701_vm4 = vcmp.gt.f32.partialorder %v677_v4, 0.0  ;;  %v680_v58 = vadd.f32 %v3329_v34, %v632_v30 }
  0xff   : > { %vm703_vm3 = vcmp.gt.f32.partialorder %v679_v8, 0.0  ;;  %v727_v10 = vmul.f32 0.01, %v679_v8  ;;  %v3385_v13 = vsel %vm699_vm2, %v675_v62, %v723_v7  ;;  %v724_v51 = vmul.f32 0.01, %v676_v56 }
 0x100   : > { %5399 = vst [vmem:[#allocation10_spill] sm:$0xff] %v3385_v13  ;;  %v509_v14 = vpop.f32.mrb[4].mxu0  ;;  %773 = vrot.lane.b32.xlu1 %v3385_v13, %s3075_s17  ;;  %vm705_vm5 = vcmp.gt.f32.partialorder %v681_v12, 0.0  ;;  %v729_v18 = vmul.f32 0.01, %v681_v12  ;;  %v3397_v22 = vsel %vm701_vm4, %v677_v4, %v725_v11  ;;  %v678_v53 = vadd.f32 %v3326_v33, %v630_v57 }
 0x101   : > { %v572_v15 = vpop.f32.mrb[4].mxu1  ;;  %v3389_v16 = vpop.f32.mrb[5].mxu0  ;;  %v3391_v17 = vsel %vm703_vm3, %v679_v8, %v727_v10  ;;  %5400 = vst [vmem:[#allocation11_spill] sm:$0xff] %v3397_v22  ;;  %vm700_vm6 = vcmp.gt.f32.partialorder %v676_v56, 0.0  ;;  %v728_v5 = vmul.f32 0.01, %v680_v58  ;;  %v682_v6 = vadd.f32 %v3329_v34, %v634_v59 }
 0x102   : > { %775 = vrot.lane.b32.xlu0 %v3391_v17, %s3075_s17  ;;  %v3395_v19 = vpop.f32.mrb[5].mxu1  ;;  %v513_v20 = vpop.f32.mrb[6].mxu0  ;;  %v3405_v31 = vsel %vm705_vm5, %v681_v12, %v729_v18  ;;  %vm704_vm7 = vcmp.gt.f32.partialorder %v680_v58, 0.0  ;;  %v726_v33 = vmul.f32 0.01, %v678_v53  ;;  %v3441_v10 = vsel %vm700_vm6, %v676_v56, %v724_v51 }
 0x103   : > { %v576_v26 = vpop.f32.mrb[6].mxu1  ;;  %v3399_v27 = vpop.f32.mrb[7].mxu0  ;;  %5403 = vst [vmem:[#allocation14_spill] sm:$0xff] %v3441_v10  ;;  %vm702_vm8 = vcmp.gt.f32.partialorder %v678_v53, 0.0  ;;  %v730_v11 = vmul.f32 0.01, %v682_v6  ;;  %v3445_v34 = vsel %vm704_vm7, %v680_v58, %v728_v5  ;;  %v639_v56 = vmul.f32 %v3332_v35, %v513_v20 }
 0x104   : > { %797 = vrot.lane.b32.xlu1 %v3397_v22, %s3075_s17  ;;  %v3407_v55 = vpop.f32.mrb[7].mxu1  ;;  %vm706_vm9 = vcmp.gt.f32.partialorder %v682_v6, 0.0  ;;  %v610_v12 = vpop.permute.xlu0 %609  ;;  %v3451_v30 = vsel %vm702_vm8, %v678_v53, %v726_v33  ;;  %v641_v5 = vmul.f32 %v3332_v35, %v576_v26 }
 0x105   : > { %v3449_v18 = vpop.permute.xlu1 %1264  ;;  %v635_v21 = vmul.f32 %v610_v12, %v509_v14  ;;  %5405 = vst [vmem:[#allocation16_spill] sm:$0xff] %v3451_v30  ;;  %v3456_v57 = vsel %vm706_vm9, %v682_v6, %v730_v11  ;;  %v637_v58 = vmul.f32 %v610_v12, %v572_v15  ;;  %v687_v14 = vadd.f32 %v3335_v36, %v639_v56 }
 0x106   : > { %799 = vrot.lane.b32.xlu0 %v3405_v31, %s3075_s17  ;;  %5404 = vst [vmem:[#allocation15_spill] sm:$0xff] %v3449_v18  ;;  %v689_v15 = vadd.f32 %v3335_v36, %v641_v5  ;;  %v636_v1 = vmul.f32 %v610_v12, %v3389_v16  ;;  %v638_v32 = vmul.f32 %v610_v12, %v3395_v19  ;;  %v5443_v18 = vmov 5  }
 0x107   : > { %v683_v59 = vadd.f32 %v3371_v49, %v635_v21  ;;  %v685_v20 = vadd.f32 %v3371_v49, %v637_v58  ;;  %v735_v6 = vmul.f32 0.01, %v687_v14  ;;  %vm711_vm11 = vcmp.gt.f32.partialorder %v687_v14, 0.0 }
 0x108   : > { %910 = vrot.lane.b32.xlu1 %v3385_v13, %s3076_s18  ;;  %v3417_v62 = vpop.f32.mrb[8].mxu0  ;;  %v3473_v33 = vpop.permute.xlu0 %624  ;;  %v737_v56 = vmul.f32 0.01, %v689_v15  ;;  %vm713_vm13 = vcmp.gt.f32.partialorder %v689_v15, 0.0 }
 0x109   : > { %v3413_v61 = vpop.f32.mrb[8].mxu1  ;;  %v3419_v63 = vpop.f32.mrb[9].mxu0  ;;  %v731_v53 = vmul.f32 0.01, %v683_v59  ;;  %vm707_vm10 = vcmp.gt.f32.partialorder %v683_v59, 0.0  ;;  %vm709_vm12 = vcmp.gt.f32.partialorder %v685_v20, 0.0  ;;  %v3483_v58 = vsel %vm711_vm11, %v687_v14, %v735_v6 }
 0x10a   : > { %v3421_v0 = vpop.f32.mrb[9].mxu1  ;;  %912 = vrot.lane.b32.xlu0 %v3391_v17, %s3076_s18  ;;  %v3430_v4 = vpop.f32.mrb[10].mxu0  ;;  %v733_v11 = vmul.f32 0.01, %v685_v20  ;;  %5408 = vst [vmem:[#allocation19_spill] sm:$0xff] %v3483_v58  ;;  %v3498_v14 = vsel %vm713_vm13, %v689_v15, %v737_v56  ;;  %v684_v6 = vadd.f32 %v3371_v49, %v636_v1  ;;  %v686_v1 = vadd.f32 %v3371_v49, %v638_v32 }
 0x10b   : > { %v3428_v60 = vpop.f32.mrb[10].mxu1  ;;  %v3433_v7 = vpop.f32.mrb[11].mxu0  ;;  %v3479_v21 = vsel %vm707_vm10, %v683_v59, %v731_v53  ;;  %v640_v59 = vmul.f32 %v3332_v35, %v3399_v27  ;;  %5410 = vst [vmem:[#allocation21_spill] sm:$0xff] %v3498_v14 }
 0x10c   : > { %v3435_v8 = vpop.f32.mrb[11].mxu1  ;;  %934 = vrot.lane.b32.xlu1 %v3397_v22, %s3076_s18  ;;  %v3461_v51 = vpop.permute.xlu1 %1312  ;;  %v3490_v39 = vsel %vm709_vm12, %v685_v20, %v733_v11  ;;  %v642_v20 = vmul.f32 %v3332_v35, %v3407_v55  ;;  %v732_v11 = vmul.f32 0.01, %v684_v6  ;;  %vm708_vm14 = vcmp.gt.f32.partialorder %v684_v6, 0.0 }
 0x10d   : > { %5406 = vst [vmem:[#allocation17_spill] sm:$0xff] %v3461_v51  ;;  %v3487_v5 = vpop.permute.xlu0 %1372  ;;  %v688_v16 = vadd.f32 %v3335_v36, %v640_v59  ;;  %v734_v55 = vmul.f32 0.01, %v686_v1  ;;  %vm710_vm1 = vcmp.gt.f32.partialorder %v686_v1, 0.0 }
 0x10e   : > { %936 = vrot.lane.b32.xlu0 %v3405_v31, %s3076_s18  ;;  %v690_v12 = vadd.f32 %v3335_v36, %v642_v20  ;;  %v3523_v56 = vsel %vm708_vm14, %v684_v6, %v732_v11  ;;  %v643_v36 = vmul.f32 %v3338_v37, %v3417_v62  ;;  %v645_v6 = vmul.f32 %v3338_v37, %v3413_v61 }
 0x10f   : > { %v736_v19 = vmul.f32 0.01, %v688_v16  ;;  %vm712_vm15 = vcmp.gt.f32.partialorder %v688_v16, 0.0  ;;  %v3535_v49 = vsel %vm710_vm1, %v686_v1, %v734_v55  ;;  %v644_v1 = vmul.f32 %v3338_v37, %v3419_v63 }
 0x110   : > { %785 = vrot.lane.b32.xlu1 %v3441_v10, %s3075_s17  ;;  %v3477_v26 = vpop.permute.xlu1 %1316  ;;  %v738_v59 = vmul.f32 0.01, %v690_v12  ;;  %vm714_vm2 = vcmp.gt.f32.partialorder %v690_v12, 0.0  ;;  %5416 = vst [vmem:[#allocation27_spill] sm:$0xff] %v3535_v49  ;;  %v693_v62 = vadd.f32 %v3342_v38, %v645_v6 }
 0x111   : > { %5407 = vst [vmem:[#allocation18_spill] sm:$0xff] %v3477_v26  ;;  %v3509_v27 = vpop.permute.xlu0 %1380  ;;  %v3529_v32 = vsel %vm712_vm15, %v688_v16, %v736_v19  ;;  %v691_v19 = vadd.f32 %v3342_v38, %v643_v36  ;;  %v646_v36 = vmul.f32 %v3338_v37, %v3421_v0 }
 0x112   : > { %787 = vrot.lane.b32.xlu0 %v3445_v34, %s3075_s17  ;;  %5411 = vst [vmem:[#allocation22_spill] sm:$0xff] %v3509_v27  ;;  %5415 = vst [vmem:[#allocation26_spill] sm:$0xff] %v3529_v32  ;;  %v3541_v20 = vsel %vm714_vm2, %v690_v12, %v738_v59  ;;  %v741_v55 = vmul.f32 0.01, %v693_v62  ;;  %v692_v59 = vadd.f32 %v3342_v38, %v644_v1  ;;  %vm717_vm4 = vcmp.gt.f32.partialorder %v693_v62, 0.0 }
 0x113   : > { %5417 = vst [vmem:[#allocation28_spill] sm:$0xff] %v3541_v20  ;;  %v739_v12 = vmul.f32 0.01, %v691_v19  ;;  %vm715_vm3 = vcmp.gt.f32.partialorder %v691_v19, 0.0  ;;  %v647_v1 = vmul.f32 %v3473_v33, %v3430_v4  ;;  %v821_v27 = vlaneseq }
 0x114   : > { %809 = vrot.lane.b32.xlu1 %v3451_v30, %s3075_s17  ;;  %v3494_v53 = vpop.permute.xlu1 %1729  ;;  %v3577_v37 = vsel %vm717_vm4, %v693_v62, %v741_v55  ;;  %vm716_vm5 = vcmp.gt.f32.partialorder %v692_v59, 0.0 }
 0x115   : > { %5409 = vst [vmem:[#allocation20_spill] sm:$0xff] %v3494_v53  ;;  %v3521_v35 = vpop.permute.xlu0 %1388  ;;  %v3568_v63 = vsel %vm715_vm3, %v691_v19, %v739_v12  ;;  %5422 = vst [vmem:[#allocation33_spill] sm:$0xff] %v3577_v37  ;;  %v695_v12 = vadd.f32 %v3346_v40, %v647_v1 }
 0x116   : > { %811 = vrot.lane.b32.xlu0 %v3456_v57, %s3075_s17  ;;  %5413 = vst [vmem:[#allocation24_spill] sm:$0xff] %v3521_v35  ;;  %5420 = vst [vmem:[#allocation31_spill] sm:$0xff] %v3568_v63  ;;  %v694_v35 = vadd.f32 %v3342_v38, %v646_v36  ;;  %v649_v38 = vmul.f32 %v3473_v33, %v3428_v60  ;;  %v648_v60 = vmul.f32 %v3473_v33, %v3433_v7 }
 0x117   : > { %vm719_vm7 = vcmp.gt.f32.partialorder %v695_v12, 0.0 }
 0x118   : > { %922 = vrot.lane.b32.xlu1 %v3441_v10, %s3076_s18  ;;  %v3513_v15 = vpop.permute.xlu1 %1384  ;;  %v742_v19 = vmul.f32 0.01, %v694_v35  ;;  %vm718_vm6 = vcmp.gt.f32.partialorder %v694_v35, 0.0  ;;  %v697_v36 = vadd.f32 %v3346_v40, %v649_v38 }
 0x119   : > { %5412 = vst [vmem:[#allocation23_spill] sm:$0xff] %v3513_v15  ;;  %v3543_v11 = vpop.permute.xlu0 %1645  ;;  %v1945_v15 = vld [vmem:[%s5254_s5] sm:$0xff] }
 0x11a   : > { %924 = vrot.lane.b32.xlu0 %v3445_v34, %s3076_s18  ;;  %v3601_v1 = vsel %vm718_vm6, %v694_v35, %v742_v19  ;;  %vm721_vm8 = vcmp.gt.f32.partialorder %v697_v36, 0.0 }
 0x11b   : > { %5425 = vst [vmem:[#allocation36_spill] sm:$0xff] %v3601_v1 }
 0x11c   : > { %946 = vrot.lane.b32.xlu1 %v3451_v30, %s3076_s18  ;;  %v3525_v2 = vpop.permute.xlu1 %1613 }
 0x11d   : > { %5414 = vst [vmem:[#allocation25_spill] sm:$0xff] %v3525_v2  ;;  %v3557_v61 = vpop.permute.xlu0 %1653  ;;  %v740_v2 = vmul.f32 0.01, %v692_v59 }
 0x11e   : > { %948 = vrot.lane.b32.xlu0 %v3456_v57, %s3076_s18 }
 0x11f   : > { %v3588_v4 = vsel %vm716_vm5, %v692_v59, %v740_v2  ;;  %v745_v2 = vmul.f32 0.01, %v697_v36  ;;  %v696_v59 = vadd.f32 %v3346_v40, %v648_v60 }
 0x120   : > { %777 = vrot.lane.b32.xlu1 %v3479_v21, %s3075_s17  ;;  %v3547_v16 = vpop.permute.xlu1 %1617  ;;  %5424 = vst [vmem:[#allocation35_spill] sm:$0xff] %v3588_v4 }
 0x121   : > { %5418 = vst [vmem:[#allocation29_spill] sm:$0xff] %v3547_v16  ;;  %v3579_v0 = vpop.permute.xlu0 %1661  ;;  %v744_v35 = vmul.f32 0.01, %v696_v59  ;;  %vm720_vm9 = vcmp.gt.f32.partialorder %v696_v59, 0.0 }
 0x122   : > { %779 = vrot.lane.b32.xlu0 %v3483_v58, %s3075_s17  ;;  %5423 = vst [vmem:[#allocation34_spill] sm:$0xff] %v3579_v0  ;;  %v650_v0 = vmul.f32 %v3473_v33, %v3435_v8  ;;  %v3623_v8 = vsel %vm721_vm8, %v697_v36, %v745_v2 }
 0x123   : > { %5430 = vst [vmem:[#allocation41_spill] sm:$0xff] %v3623_v8 }
 0x124   : > { %801 = vrot.lane.b32.xlu1 %v3490_v39, %s3075_s17  ;;  %v3562_v6 = vpop.permute.xlu1 %1665  ;;  %v698_v19 = vadd.f32 %v3346_v40, %v650_v0 }
 0x125   : > { %5419 = vst [vmem:[#allocation30_spill] sm:$0xff] %v3562_v6  ;;  %v3594_v55 = vpop.permute.xlu0 %1717  ;;  %v3724_v6 = vand.u32 127, %v821_v27 }
 0x126   : > { %803 = vrot.lane.b32.xlu0 %v3498_v14, %s3075_s17  ;;  %vm722_vm10 = vcmp.gt.f32.partialorder %v698_v19, 0.0 }
 0x127   : > { %5447 = vst [vmem:[#allocation54_spill] sm:$0xff] %v3724_v6  ;;  %vm823_vm11 = vcmp.lt.s32.totalorder %v3724_v6, 1  ;;  %vm958_vm12 = vcmp.lt.s32.totalorder %v3724_v6, 127 }
 0x128   : > { %914 = vrot.lane.b32.xlu1 %v3479_v21, %s3076_s18  ;;  %v3573_v26 = vpop.permute.xlu1 %1733 }
 0x129   : > { %5421 = vst [vmem:[#allocation32_spill] sm:$0xff] %v3573_v26  ;;  %v743_v26 = vmul.f32 0.01, %v695_v12  ;;  %v3614_v43 = vpop.permute.xlu0 %1725 }
 0x12a   : > { %916 = vrot.lane.b32.xlu0 %v3483_v58, %s3076_s18  ;;  %5428 = vst [vmem:[#allocation39_spill] sm:$0xff] %v3614_v43 }
 0x12b   : > { %v3612_v7 = vsel %vm719_vm7, %v695_v12, %v743_v26  ;;  %v746_v26 = vmul.f32 0.01, %v698_v19  ;;  %v3631_v12 = vsel %vm720_vm9, %v696_v59, %v744_v35  ;;  %v5437_v35 = vmov 0  }
 0x12c   : > { %938 = vrot.lane.b32.xlu1 %v3490_v39, %s3076_s18  ;;  %v3592_v62 = vpop.permute.xlu1 %1056  ;;  %5427 = vst [vmem:[#allocation38_spill] sm:$0xff] %v3612_v7  ;;  %5432 = vst [vmem:[#allocation43_spill] sm:$0xff] %v3631_v12 }
 0x12d   : > { %v3627_v33 = vpop.permute.xlu0 %1737  ;;  %v3639_v0 = vsel %vm722_vm10, %v698_v19, %v746_v26 }
 0x12e   : > { %940 = vrot.lane.b32.xlu0 %v3498_v14, %s3076_s18  ;;  %5431 = vst [vmem:[#allocation42_spill] sm:$0xff] %v3627_v33  ;;  %5433 = vst [vmem:[#allocation44_spill] sm:$0xff] %v3639_v0  ;;  %v3709_v33 = vshrl.u32 %v821_v27, 7  ;;  %v1668_v27 = vmul.f32 %v3543_v11, %v3385_v13 }
 0x130   : > { %789 = vrot.lane.b32.xlu1 %v3523_v56, %s3075_s17  ;;  %v3608_v38 = vpop.permute.xlu1 %1104  ;;  %5446 = vst [vmem:[#allocation53_spill] sm:$0xff] %v3709_v33  ;;  %v852_v16 = vsub.s32 0, %v3709_v33 }
 0x131   : > { %5426 = vst [vmem:[#allocation37_spill] sm:$0xff] %v3608_v38  ;;  %v3641_v36 = vpop.permute.xlu0 %1051  ;;  %v5441_v38 = vmov 4  }
 0x132   : > { %791 = vrot.lane.b32.xlu0 %v3529_v32, %s3075_s17  ;;  %5434 = vst [vmem:[#allocation45_spill] sm:$0xff] %v3641_v36 }
 0x134   : > { %813 = vrot.lane.b32.xlu1 %v3535_v49, %s3075_s17  ;;  %v3619_v60 = vpop.permute.xlu1 %1176 }
 0x135   : > { %5429 = vst [vmem:[#allocation40_spill] sm:$0xff] %v3619_v60  ;;  %v3650_v59 = vpop.permute.xlu0 %1061 }
 0x136   : > { %815 = vrot.lane.b32.xlu0 %v3541_v20, %s3075_s17  ;;  %5436 = vst [vmem:[#allocation47_spill] sm:$0xff] %v3650_v59 }
 0x138   : > { %926 = vrot.lane.b32.xlu1 %v3523_v56, %s3076_s18  ;;  %v3635_v40 = vpop.permute.xlu1 %1180 }
 0x139   : > { %v3659_v26 = vpop.permute.xlu0 %1071 }
 0x13a   : > { %928 = vrot.lane.b32.xlu0 %v3529_v32, %s3076_s18  ;;  %5439 = vst [vmem:[#allocation49_spill] sm:$0xff] %v3659_v26 }
 0x13c   : > { %950 = vrot.lane.b32.xlu1 %v3535_v49, %s3076_s18  ;;  %v3645_v2 = vpop.permute.xlu1 %1066 }
 0x13d   : > { %5435 = vst [vmem:[#allocation46_spill] sm:$0xff] %v3645_v2  ;;  %v3667_v36 = vpop.permute.xlu0 %1108 }
 0x13e   : > { %952 = vrot.lane.b32.xlu0 %v3541_v20, %s3076_s18 }
 0x140   : > { %781 = vrot.lane.b32.xlu1 %v3568_v63, %s3075_s17  ;;  %v3655_v19 = vpop.permute.xlu1 %1112 }
 0x141   : > { %5438 = vst [vmem:[#allocation48_spill] sm:$0xff] %v3655_v19  ;;  %v771_v19 = vld [vmem:[%s5250_s1] sm:$0xff] }
 0x142   : > { %942 = vrot.lane.b32.xlu0 %v3577_v37, %s3076_s18 }
 0x144   : > { %805 = vrot.lane.b32.xlu1 %v3577_v37, %s3075_s17 }
 0x145   : > { %v3662_v60 = vpop.permute.xlu1 %1184 }
 0x146   : > { %930 = vrot.lane.b32.xlu0 %v3588_v4, %s3076_s18  ;;  %5440 = vst [vmem:[#allocation50_spill] sm:$0xff] %v3662_v60 }
 0x148   : > { %918 = vrot.lane.b32.xlu1 %v3568_v63, %s3076_s18  ;;  %v5445_v63 = vmov 1  }
 0x149   : > { %v3672_v51 = vpop.permute.xlu1 %1188 }
 0x14a   : > { %954 = vrot.lane.b32.xlu0 %v3601_v1, %s3076_s18  ;;  %5442 = vst [vmem:[#allocation51_spill] sm:$0xff] %v3672_v51 }
 0x14c   : > { %793 = vrot.lane.b32.xlu1 %v3588_v4, %s3075_s17 }
 0x14e   : > { %783 = vrot.lane.b32.xlu0 %v3612_v7, %s3075_s17 }
 0x150   : > { %817 = vrot.lane.b32.xlu1 %v3601_v1, %s3075_s17 }
 0x152   : > { %807 = vrot.lane.b32.xlu0 %v3623_v8, %s3075_s17 }
 0x154   : > { %920 = vrot.lane.b32.xlu1 %v3612_v7, %s3076_s18 }
 0x156   : > { %795 = vrot.lane.b32.xlu0 %v3631_v12, %s3075_s17 }
 0x158   : > { %944 = vrot.lane.b32.xlu1 %v3623_v8, %s3076_s18  ;;  %v772_v8 = vld [vmem:[%s5250_s1 + $0x8] sm:$0xff] }
 0x159   : > { %v861_v51 = vrot.slane %v772_v8, %v852_v16 }
 0x15a   : > { %819 = vrot.lane.b32.xlu0 %v3639_v0, %s3075_s17  ;;  %s3077_s17 = smov 112  }
 0x15c   : > { %932 = vrot.lane.b32.xlu1 %v3631_v12, %s3076_s18 }
 0x15e   : > { %1124 = vperm.xlu0 %2942, %v3272_v24  }
 0x160   : > { %956 = vrot.lane.b32.xlu1 %v3639_v0, %s3076_s18  ;;  %v856_v0 = vsub.s32 4, %v3709_v33  ;;  %s3078_s18 = smov 16  }
 0x162   : > { %2945 = vset.pattern.permute.xlu0 %v5437_v35  ;;  %v857_v7 = vrot.slane %v771_v19, %v856_v0  ;;  %v865_v53 = vrot.slane %v772_v8, %v856_v0  ;;  %v3744_v0 = vmul.f32 %v3543_v11, %v3397_v22 }
 0x163   : > { %1248 = vperm.xlu0 %2945, %v3280_v25  }
 0x164   : > { %1076 = vperm.xlu1 %2943, %v3272_v24  }
 0x167   : > { %1260 = vperm.xlu0 %2945, %v3264_v23   ;;  %v3676_v23 = vpop.permute.xlu0 %1116 }
 0x168   : > { %2944 = vset.pattern.permute.xlu1 %v5441_v38  ;;  %5444 = vst [vmem:[#allocation52_spill] sm:$0xff] %v3676_v23  ;;  %v1947_v38 = vld [vmem:[%s5254_s5 + $0x10] sm:$0xff] }
 0x169   : > { %1120 = vperm.xlu1 %2944, %v3294_v29  }
 0x16b   : > { %1268 = vperm.xlu0 %2945, %v3272_v24  }
 0x16d   : > { %2946 = vset.pattern.permute.xlu1 %v5443_v18  ;;  %v1949_v18 = vld [vmem:[%s5254_s5 + $0x20] sm:$0xff] }
 0x16e   : > { %1192 = vperm.xlu1 %2946, %v3294_v29   ;;  %v1946_v29 = vld [vmem:[%s5254_s5 + $0x8] sm:$0xff] }
 0x16f   : > { %1953 = vperm.xlu0 %2945, %v1945_v15  }
 0x172   : > { %v3681_v26 = vpop.permute.xlu1 %773  ;;  %1196 = vperm.xlu1 %2946, %v3272_v24  }
 0x173   : > { %1963 = vperm.xlu0 %2945, %v1947_v38  }
 0x174   : > { %v3684_v1 = vpop.permute.xlu0 %775 }
 0x176   : > { %v3692_v37 = vpop.permute.xlu1 %797  ;;  %2947 = vset.pattern.permute.xlu1 %v5437_v35 }
 0x177   : > { %1973 = vperm.xlu0 %2945, %v1949_v18   ;;  %1958 = vperm.xlu1 %2947, %v1946_v29   ;;  %v1948_v18 = vld [vmem:[%s5254_s5 + $0x18] sm:$0xff] }
 0x178   : > { %v3695_v4 = vpop.permute.xlu0 %799 }
 0x17a   : > { %v3697_v24 = vpop.permute.xlu1 %910 }
 0x17b   : > { %2951 = vset.pattern.permute.xlu0 %v5445_v63  ;;  %2948 = vset.pattern.permute.xlu1 %v5445_v63 }
 0x17c   : > { %v3701_v50 = vpop.permute.xlu0 %912  ;;  %1296 = vperm.xlu0 %2951, %v3280_v25   ;;  %2006 = vperm.xlu1 %2948, %v1945_v15   ;;  %v985_v15 = vsub.s32 1, %v3709_v33 }
 0x17e   : > { %v3704_v60 = vpop.permute.xlu1 %934  ;;  %v986_v20 = vrot.slane %v771_v19, %v985_v15  ;;  %v994_v2 = vrot.slane %v772_v8, %v985_v15 }
 0x180   : > { %v3711_v59 = vpop.permute.xlu0 %936  ;;  %2010 = vperm.xlu0 %2951, %v1946_v29   ;;  %2949 = vset.pattern.permute.xlu1 %v5437_v35  ;;  %v989_v29 = vsub.s32 5, %v3709_v33  ;;  %v3762_v47 = vrot.slane %v994_v2, %v985_v15  ;;  %v3789_v2 = vmul.f32 %v3365_v46, %v3405_v31 }
 0x181   : > { %1968 = vperm.xlu1 %2949, %v1948_v18   ;;  %v853_v18 = vrot.slane %v771_v19, %v852_v16 }
 0x182   : > { %v786_v25 = vpop.permute.xlu1 %785  ;;  %v990_v28 = vrot.slane %v771_v19, %v989_v29  ;;  %v998_v54 = vrot.slane %v772_v8, %v989_v29  ;;  %v3748_v8 = vmul.f32 %v3543_v11, %v3451_v30  ;;  %v3750_v19 = vrot.slane %v857_v7, %v852_v16  ;;  %5454 = vst [vmem:[#allocation61_spill] sm:$0xff] %v3762_v47 }
 0x183   : > { %v3730_v9 = vrot.slane %v853_v18, %v852_v16  ;;  %v3752_v29 = vrot.slane %v861_v51, %v852_v16  ;;  %v3755_v18 = vrot.slane %v986_v20, %v985_v15  ;;  %v830_v51 = vsel %vm823_vm11, %v786_v25, %v3692_v37 }
 0x184   : > { %v788_v12 = vpop.permute.xlu0 %787  ;;  %5449 = vst [vmem:[#allocation56_spill] sm:$0xff] %v3750_v19  ;;  %v3760_v13 = vrot.slane %v990_v28, %v985_v15  ;;  %v836_v20 = vsel %vm823_vm11, %v3681_v26, %v786_v25  ;;  %v1672_v28 = vmul.f32 %v3365_v46, %v3391_v17 }
 0x185   : > { %2950 = vset.pattern.permute.xlu1 %v5445_v63  ;;  %5448 = vst [vmem:[#allocation55_spill] sm:$0xff] %v3730_v9  ;;  %5450 = vst [vmem:[#allocation57_spill] sm:$0xff] %v3752_v29  ;;  %v3803_v30 = vmul.f32 %v3750_v19, %v836_v20  ;;  %v3806_v14 = vmul.f32 %v3752_v29, %v830_v51  ;;  %v3825_v20 = vmul.f32 %v3667_v36, %v3405_v31 }
 0x186   : > { %v3727_v23 = vpop.permute.xlu1 %809  ;;  %2014 = vperm.xlu1 %2950, %v1947_v38   ;;  %v3740_v38 = vmul.f32 %v3543_v11, %v3441_v10  ;;  %5451 = vst [vmem:[#allocation58_spill] sm:$0xff] %v3755_v18  ;;  %v3758_v10 = vrot.slane %v865_v53, %v852_v16  ;;  %5453 = vst [vmem:[#allocation60_spill] sm:$0xff] %v3760_v13  ;;  %v3764_v11 = vrot.slane %v998_v54, %v985_v15 }
 0x187   : > { %v842_v33 = vsel %vm823_vm11, %v3727_v23, %v3681_v26  ;;  %v837_v53 = vsel %vm823_vm11, %v3684_v1, %v788_v12  ;;  %v3785_v16 = vmul.f32 %v3365_v46, %v3445_v34  ;;  %5457 = vst [vmem:[#allocation64_spill] sm:$0xff] %v3803_v30  ;;  %5458 = vst [vmem:[#allocation65_spill] sm:$0xff] %v3806_v14 }
 0x188   : > { %v812_v43 = vpop.permute.xlu0 %811  ;;  %5452 = vst [vmem:[#allocation59_spill] sm:$0xff] %v3758_v10  ;;  %v3773_v7 = vmul.f32 %v3730_v9, %v842_v33  ;;  %v831_v33 = vsel %vm823_vm11, %v788_v12, %v3695_v4 }
 0x189   : > { %v843_v26 = vsel %vm823_vm11, %v812_v43, %v3684_v1  ;;  %v3813_v1 = vmul.f32 %v3365_v46, %v3456_v57  ;;  %v825_v46 = vsel %vm823_vm11, %v3695_v4, %v812_v43 }
 0x18a   : > { %v923_v63 = vpop.permute.xlu1 %922  ;;  %2952 = vset.pattern.permute.xlu1 %v5437_v35  ;;  %5455 = vst [vmem:[#allocation62_spill] sm:$0xff] %v3773_v7  ;;  %v1132_v35 = vmul.f32 %v3667_v36, %v3445_v34  ;;  %v1620_v3 = vmul.f32 %v3361_v44, %v3773_v7  ;;  %v3836_v7 = vmul.f32 %v3667_v36, %v3391_v17 }
 0x18b   : > { %v971_v54 = vsel %vm958_vm12, %v3697_v24, %v923_v63  ;;  %v965_v12 = vsel %vm958_vm12, %v923_v63, %v3704_v60  ;;  %v3828_v63 = vmul.f32 %v3752_v29, %v831_v33  ;;  %v3870_v29 = vmul.f32 %v3758_v10, %v825_v46 }
 0x18c   : > { %v925_v22 = vpop.permute.xlu0 %924  ;;  %v3798_v25 = vmul.f32 %v3755_v18, %v971_v54  ;;  %v3816_v54 = vmul.f32 %v3750_v19, %v837_v53  ;;  %v890_v53 = vmul.f32 %v3730_v9, %v843_v26  ;;  %v3839_v19 = vmul.f32 %v3760_v13, %v965_v12 }
 0x18d   : > { %v972_v51 = vsel %vm958_vm12, %v3701_v50, %v925_v22  ;;  %v966_v33 = vsel %vm958_vm12, %v925_v22, %v3711_v59  ;;  %v1621_v26 = vmul.f32 %v3361_v44, %v3803_v30  ;;  %v1622_v12 = vmul.f32 %v3361_v44, %v3806_v14 }
 0x18e   : > { %5456 = vst [vmem:[#allocation63_spill] sm:$0xff] %v3798_v25  ;;  %v947_v15 = vpop.permute.xlu1 %946  ;;  %5459 = vst [vmem:[#allocation66_spill] sm:$0xff] %v3839_v19  ;;  %v1740_v58 = vmul.f32 %v3594_v55, %v3798_v25  ;;  %v3856_v9 = vmul.f32 %v3755_v18, %v972_v51  ;;  %v824_v30 = vsel %vm823_vm11, %v3692_v37, %v3727_v23 }
 0x18f   : > { %v959_v25 = vsel %vm958_vm12, %v3704_v60, %v947_v15  ;;  %v1692_v14 = vadd.f32 %v1668_v27, %v1620_v3  ;;  %v1624_v51 = vmul.f32 %v3363_v45, %v890_v53  ;;  %v3874_v18 = vmul.f32 %v3760_v13, %v966_v33 }
 0x190   : > { %v949_v32 = vpop.permute.xlu0 %948  ;;  %v1085_v49 = vmul.f32 %v3592_v62, %v3828_v63  ;;  %v1741_v37 = vmul.f32 %v3594_v55, %v3839_v19  ;;  %v3887_v3 = vmul.f32 %v3762_v47, %v959_v25  ;;  %v1625_v46 = vmul.f32 %v3363_v45, %v3816_v54 }
 0x191   : > { %v960_v43 = vsel %vm958_vm12, %v3711_v59, %v949_v32  ;;  %v1084_v59 = vmul.f32 %v3592_v62, %v3816_v54  ;;  %v978_v60 = vsel %vm958_vm12, %v949_v32, %v3701_v50  ;;  %v1764_v23 = vadd.f32 %v1740_v58, %v1692_v14 }
 0x192   : > { %v3849_v4 = vpop.permute.xlu1 %777  ;;  %5461 = vst [vmem:[#allocation68_spill] sm:$0xff] %v3887_v3  ;;  %v1626_v50 = vmul.f32 %v3363_v45, %v3828_v63  ;;  %v1744_v32 = vmul.f32 %v3375_v52, %v3856_v9  ;;  %v977_v33 = vsel %vm958_vm12, %v947_v15, %v3697_v24  ;;  %v3903_v25 = vmul.f32 %v3758_v10, %v824_v30 }
 0x193   : > { %v1083_v58 = vmul.f32 %v3592_v62, %v890_v53  ;;  %v3907_v14 = vmul.f32 %v3764_v11, %v978_v60  ;;  %1788 = vrot.lane.b32.xlu1 %v1764_v23, %s3077_s17  ;;  %v1693_v19 = vadd.f32 %v3740_v38, %v1621_v26  ;;  %v1745_v24 = vmul.f32 %v3375_v52, %v3874_v18 }
 0x194   : > { %v3861_v22 = vpop.permute.xlu0 %779  ;;  %5463 = vst [vmem:[#allocation70_spill] sm:$0xff] %v3903_v25  ;;  %v1696_v15 = vadd.f32 %v1672_v28, %v1624_v51  ;;  %v1627_v13 = vmul.f32 %v3363_v45, %v3870_v29  ;;  %v3920_v60 = vmul.f32 %v3764_v11, %v977_v33  ;;  %v1742_v23 = vmul.f32 %v3594_v55, %v3887_v3 }
 0x195   : > { %5460 = vst [vmem:[#allocation67_spill] sm:$0xff] %v3861_v22  ;;  %v3880_v22 = vmul.f32 %v3762_v47, %v960_v43  ;;  %v1086_v47 = vmul.f32 %v3592_v62, %v3870_v29  ;;  %v1765_v38 = vadd.f32 %v1741_v37, %v1693_v19  ;;  %v1698_v28 = vadd.f32 %v3789_v2, %v1626_v50 }
 0x196   : > { %v3889_v27 = vpop.permute.xlu1 %801  ;;  %5464 = vst [vmem:[#allocation71_spill] sm:$0xff] %v3920_v60  ;;  %v3928_v10 = vadd.f32 %v1744_v32, %v1696_v15  ;;  %v1156_v51 = vadd.f32 %v1132_v35, %v1084_v59  ;;  %v1623_v45 = vmul.f32 %v3361_v44, %v3903_v25  ;;  %v1747_v33 = vmul.f32 %v3375_v52, %v3907_v14 }
 0x197   : > { %v1746_v30 = vmul.f32 %v3375_v52, %v3880_v22  ;;  %1800 = vrot.lane.b32.xlu1 %v1765_v38, %s3077_s17  ;;  %v1694_v19 = vadd.f32 %v3744_v0, %v1622_v12  ;;  %v1134_v37 = vmul.f32 %v3667_v36, %v3456_v57  ;;  %v1275_v32 = vmul.f32 %v3350_v41, %v890_v53 }
 0x198   : > { %v3900_v43 = vpop.permute.xlu0 %803  ;;  %5465 = vst [vmem:[#allocation72_spill] sm:$0xff] %v3928_v10  ;;  %v1204_v35 = vmul.f32 %v3635_v40, %v3874_v18  ;;  %v1743_v44 = vmul.f32 %v3594_v55, %v3920_v60  ;;  %v1699_v0 = vadd.f32 %v3813_v1, %v1627_v13  ;;  %v1157_v12 = vadd.f32 %v3825_v20, %v1085_v49 }
 0x199   : > { %5462 = vst [vmem:[#allocation69_spill] sm:$0xff] %v3900_v43  ;;  %v1697_v43 = vadd.f32 %v3785_v16, %v1625_v46  ;;  %v3943_v16 = vadd.f32 %v1746_v30, %v1698_v28  ;;  %v1766_v52 = vadd.f32 %v1742_v23, %v1694_v19  ;;  %v1205_v59 = vmul.f32 %v3635_v40, %v3880_v22 }
 0x19a   : > { %v3924_v26 = vpop.permute.xlu1 %914  ;;  %v3955_v53 = vadd.f32 %v1204_v35, %v1156_v51  ;;  %v1155_v46 = vadd.f32 %v3836_v7, %v1083_v58  ;;  %v1158_v50 = vadd.f32 %v1134_v37, %v1086_v47  ;;  %v1695_v55 = vadd.f32 %v3748_v8, %v1623_v45 }
 0x19b   : > { %v3941_v15 = vadd.f32 %v1745_v24, %v1697_v43  ;;  %5467 = vst [vmem:[#allocation74_spill] sm:$0xff] %v3943_v16  ;;  %1812 = vrot.lane.b32.xlu1 %v1766_v52, %s3077_s17  ;;  %v3962_v43 = vadd.f32 %v1747_v33, %v1699_v0  ;;  %v1203_v13 = vmul.f32 %v3635_v40, %v3856_v9  ;;  %v5474_v0 = vld [vmem:[#allocation19_spill] sm:$0xff] }
 0x19c   : > { %v3926_v62 = vpop.permute.xlu0 %916  ;;  %5468 = vst [vmem:[#allocation75_spill] sm:$0xff] %v3955_v53  ;;  %v1206_v49 = vmul.f32 %v3635_v40, %v3907_v14  ;;  %v1323_v1 = vmul.f32 %v3354_v42, %v3391_v17  ;;  %v3970_v20 = vadd.f32 %v1205_v59, %v1157_v12  ;;  %v1395_v47 = vmul.f32 %v3487_v5, %v3856_v9  ;;  %v5475_v12 = vld [vmem:[#allocation13_spill] sm:$0xff] }
 0x19d   : > { %5466 = vst [vmem:[#allocation73_spill] sm:$0xff] %v3941_v15  ;;  %5469 = vst [vmem:[#allocation76_spill] sm:$0xff] %v3962_v43  ;;  %v1767_v7 = vadd.f32 %v1743_v44, %v1695_v55  ;;  %v3974_v24 = vadd.f32 %v1203_v13, %v1155_v46  ;;  %v1276_v23 = vmul.f32 %v3350_v41, %v3816_v54  ;;  %v5476_v46 = vld [vmem:[#allocation67_spill] sm:$0xff] }
 0x19e   : > { %v3949_v2 = vpop.permute.xlu1 %938  ;;  %5470 = vst [vmem:[#allocation77_spill] sm:$0xff] %v3970_v20  ;;  %v3976_v8 = vadd.f32 %v1206_v49, %v1158_v50  ;;  %v1347_v40 = vadd.f32 %v1323_v1, %v1275_v32  ;;  %v1324_v17 = vmul.f32 %v3354_v42, %v3445_v34  ;;  %v1325_v38 = vmul.f32 %v3354_v42, %v3405_v31  ;;  %v5473_v32 = vld [vmem:[#allocation27_spill] sm:$0xff]  ;;  %v5478_v49 = vld [vmem:[#allocation56_spill] sm:$0xff] }
 0x19f   : > { %5471 = vst [vmem:[#allocation78_spill] sm:$0xff] %v3974_v24  ;;  %1824 = vrot.lane.b32.xlu1 %v1767_v7, %s3077_s17  ;;  %v1326_v9 = vmul.f32 %v3354_v42, %v3456_v57  ;;  %v3989_v28 = vmul.f32 %v3369_v48, %v3479_v21  ;;  %v3993_v51 = vmul.f32 %v3557_v61, %v3479_v21 }
 0x1a0   : > { %v3953_v36 = vpop.permute.xlu0 %940  ;;  %5472 = vst [vmem:[#allocation79_spill] sm:$0xff] %v3976_v8  ;;  %v1277_v54 = vmul.f32 %v3350_v41, %v3828_v63  ;;  %v1396_v34 = vmul.f32 %v3487_v5, %v3874_v18  ;;  %v1419_v45 = vadd.f32 %v1395_v47, %v1347_v40  ;;  %v4001_v31 = vmul.f32 %v3557_v61, %v3523_v56  ;;  %v5480_v47 = vld [vmem:[#allocation69_spill] sm:$0xff] }
 0x1a1   : > { %v1278_v42 = vmul.f32 %v3350_v41, %v3870_v29  ;;  %v4007_v19 = vmul.f32 %v3557_v61, %v3490_v39  ;;  %v4011_v63 = vmul.f32 %v3369_v48, %v3523_v56  ;;  %v4015_v18 = vmul.f32 %v3369_v48, %v3490_v39 }
 0x1a2   : > { %v790_v58 = vpop.permute.xlu1 %789  ;;  %v1397_v37 = vmul.f32 %v3487_v5, %v3880_v22  ;;  %v1348_v29 = vadd.f32 %v1324_v17, %v1276_v23  ;;  %v4025_v35 = vmul.f32 %v3369_v48, %v5473_v32  ;;  %v1398_v44 = vmul.f32 %v3487_v5, %v3907_v14  ;;  %v5477_v5 = vld [vmem:[#allocation26_spill] sm:$0xff]  ;;  %v5481_v23 = vld [vmem:[#allocation21_spill] sm:$0xff] }
 0x1a3   : > { %v838_v41 = vsel %vm823_vm11, %v3849_v4, %v790_v58  ;;  %1441 = vrot.lane.b32.xlu1 %v1419_v45, %s3078_s18  ;;  %v832_v52 = vsel %vm823_vm11, %v790_v58, %v3889_v27  ;;  %v4037_v59 = vmul.f32 %v5475_v12, %v5474_v0  ;;  %v1349_v13 = vadd.f32 %v1325_v38, %v1277_v54  ;;  %v5482_v17 = vld [vmem:[#allocation57_spill] sm:$0xff]  ;;  %v5483_v54 = vld [vmem:[#allocation55_spill] sm:$0xff] }
 0x1a4   : > { %v792_v30 = vpop.permute.xlu0 %791  ;;  %v1420_v50 = vadd.f32 %v1396_v34, %v1348_v29  ;;  %v4044_v14 = vmul.f32 %v5475_v12, %v5477_v5  ;;  %v4047_v1 = vmul.f32 %v5478_v49, %v838_v41  ;;  %v1350_v58 = vadd.f32 %v1326_v9, %v1278_v42 }
 0x1a5   : > { %v839_v48 = vsel %vm823_vm11, %v5476_v46, %v792_v30  ;;  %v4054_v40 = vmul.f32 %v5475_v12, %v5481_v23  ;;  %v4057_v34 = vmul.f32 %v5482_v17, %v832_v52  ;;  %v1421_v41 = vadd.f32 %v1397_v37, %v1349_v13  ;;  %v5486_v37 = vld [vmem:[#allocation58_spill] sm:$0xff]  ;;  %v5489_v13 = vld [vmem:[#allocation59_spill] sm:$0xff] }
 0x1a6   : > { %v814_v33 = vpop.permute.xlu1 %813  ;;  %5479 = vst [vmem:[#allocation27_spill] sm:$0xff] %v4047_v1  ;;  %v1422_v29 = vadd.f32 %v1398_v44, %v1350_v58 }
 0x1a7   : > { %v844_v22 = vsel %vm823_vm11, %v814_v33, %v3849_v4  ;;  %v833_v4 = vsel %vm823_vm11, %v792_v30, %v5480_v47  ;;  %v826_v38 = vsel %vm823_vm11, %v3889_v27, %v814_v33  ;;  %1453 = vrot.lane.b32.xlu1 %v1420_v50, %s3078_s18  ;;  %v4067_v30 = vmul.f32 %v5478_v49, %v839_v48  ;;  %v5488_v48 = vld [vmem:[#allocation6_spill] sm:$0xff] }
 0x1a8   : > { %v816_v57 = vpop.permute.xlu0 %815  ;;  %v4063_v45 = vmul.f32 %v5483_v54, %v844_v22  ;;  %v4076_v27 = vmul.f32 %v5482_v17, %v833_v4  ;;  %v1280_v50 = vmul.f32 %v5488_v48, %v4047_v1  ;;  %v4090_v44 = vmul.f32 %v5489_v13, %v826_v38 }
 0x1a9   : > { %5485 = vst [vmem:[#allocation13_spill] sm:$0xff] %v4067_v30  ;;  %v845_v9 = vsel %vm823_vm11, %v816_v57, %v5476_v46  ;;  %v827_v38 = vsel %vm823_vm11, %v5480_v47, %v816_v57  ;;  %v5492_v57 = vld [vmem:[#allocation8_spill] sm:$0xff] }
 0x1aa   : > { %v927_v55 = vpop.permute.xlu1 %926  ;;  %5484 = vst [vmem:[#allocation19_spill] sm:$0xff] %v4063_v45  ;;  %v1279_v8 = vmul.f32 %v5488_v48, %v4063_v45  ;;  %v4106_v20 = vmul.f32 %v5483_v54, %v845_v9  ;;  %v5493_v9 = vld [vmem:[#allocation61_spill] sm:$0xff]  ;;  %v1282_v25 = vmul.f32 %v5488_v48, %v4090_v44 }
 0x1ab   : > { %v973_v42 = vsel %vm958_vm12, %v3924_v26, %v927_v55  ;;  %v967_v33 = vsel %vm958_vm12, %v927_v55, %v3949_v2  ;;  %1465 = vrot.lane.b32.xlu1 %v1421_v41, %s3078_s18 }
 0x1ac   : > { %v929_v7 = vpop.permute.xlu0 %928  ;;  %v4082_v52 = vmul.f32 %v5486_v37, %v973_v42  ;;  %v1281_v42 = vmul.f32 %v5488_v48, %v4057_v34 }
 0x1ad   : > { %v974_v22 = vsel %vm958_vm12, %v3926_v62, %v929_v7  ;;  %v968_v24 = vsel %vm958_vm12, %v929_v7, %v3953_v36  ;;  %v5495_v7 = vld [vmem:[#allocation46_spill] sm:$0xff] }
 0x1ae   : > { %5487 = vst [vmem:[#allocation67_spill] sm:$0xff] %v4082_v52  ;;  %v951_v46 = vpop.permute.xlu1 %950  ;;  %v4118_v43 = vmul.f32 %v5486_v37, %v974_v22  ;;  %v1399_v47 = vmul.f32 %v5492_v57, %v4082_v52  ;;  %v1092_v10 = vmul.f32 %v5495_v7, %v4067_v30  ;;  %v5496_v22 = vld [vmem:[#allocation12_spill] sm:$0xff] }
 0x1af   : > { %v961_v4 = vsel %vm958_vm12, %v3949_v2, %v951_v46  ;;  %v979_v55 = vsel %vm958_vm12, %v951_v46, %v3924_v26  ;;  %v5490_v2 = vld [vmem:[#allocation9_spill] sm:$0xff]  ;;  %v5491_v26 = vld [vmem:[#allocation60_spill] sm:$0xff]  ;;  %v1633_v60 = vmul.f32 %v5496_v22, %v4067_v30  ;;  %1477 = vrot.lane.b32.xlu1 %v1422_v29, %s3078_s18 }
 0x1b0   : > { %v953_v58 = vpop.permute.xlu0 %952  ;;  %v1629_v53 = vmul.f32 %v5490_v2, %v4047_v1  ;;  %v4112_v46 = vmul.f32 %v5491_v26, %v967_v33  ;;  %v4123_v16 = vmul.f32 %v5493_v9, %v961_v4  ;;  %v4126_v41 = vmul.f32 %v3764_v11, %v979_v55  ;;  %v5499_v29 = vld [vmem:[#allocation20_spill] sm:$0xff] }
 0x1b1   : > { %v962_v33 = vsel %vm958_vm12, %v3953_v36, %v953_v58  ;;  %v4140_v4 = vmul.f32 %v5489_v13, %v827_v38  ;;  %v1628_v3 = vmul.f32 %v5490_v2, %v4063_v45  ;;  %v1632_v36 = vmul.f32 %v5496_v22, %v4106_v20  ;;  %v5498_v38 = vld [vmem:[#allocation39_spill] sm:$0xff] }
 0x1b2   : > { %v4131_v15 = vpop.permute.xlu1 %781  ;;  %v980_v30 = vsel %vm958_vm12, %v953_v58, %v3926_v62  ;;  %v1400_v48 = vmul.f32 %v5492_v57, %v4112_v46  ;;  %v4158_v1 = vmul.f32 %v5491_v26, %v968_v24  ;;  %v4161_v45 = vmul.f32 %v5493_v9, %v962_v33 }
 0x1b3   : > { %5494 = vst [vmem:[#allocation26_spill] sm:$0xff] %v4131_v15  ;;  %v1351_v15 = vadd.f32 %v3989_v28, %v1279_v8  ;;  %v1752_v37 = vmul.f32 %v5499_v29, %v4118_v43  ;;  %v1401_v62 = vmul.f32 %v5492_v57, %v4123_v16  ;;  %v1402_v8 = vmul.f32 %v5492_v57, %v4126_v41 }
 0x1b4   : > { %v4142_v55 = vpop.permute.xlu0 %942  ;;  %v1635_v24 = vmul.f32 %v5496_v22, %v4140_v4  ;;  %v4176_v33 = vmul.f32 %v3764_v11, %v980_v30  ;;  %v1352_v26 = vadd.f32 %v4011_v63, %v1280_v50  ;;  %v1700_v57 = vadd.f32 %v3993_v51, %v1628_v3 }
 0x1b5   : > { %5497 = vst [vmem:[#allocation56_spill] sm:$0xff] %v4142_v55  ;;  %v1748_v55 = vmul.f32 %v5498_v38, %v4082_v52  ;;  %v1423_v28 = vadd.f32 %v1399_v47, %v1351_v15  ;;  %v1634_v52 = vmul.f32 %v5496_v22, %v4076_v27  ;;  %v1353_v15 = vadd.f32 %v4015_v18, %v1281_v42  ;;  %v5507_v42 = vld [vmem:[#allocation28_spill] sm:$0xff] }
 0x1b6   : > { %v4169_v58 = vpop.permute.xlu1 %805  ;;  %5501 = vst [vmem:[#allocation21_spill] sm:$0xff] %v4176_v33  ;;  %v1354_v47 = vadd.f32 %v4025_v35, %v1282_v25  ;;  %v1749_v22 = vmul.f32 %v5498_v38, %v4112_v46  ;;  %v1753_v30 = vmul.f32 %v5499_v29, %v4158_v1  ;;  %v4192_v63 = vadd.f32 %v1400_v48, %v1352_v26 }
 0x1b7   : > { %5500 = vst [vmem:[#allocation69_spill] sm:$0xff] %v4169_v58  ;;  %1443 = vrot.lane.b32.xlu1 %v1423_v28, %s3078_s18  ;;  %v1704_v58 = vadd.f32 %v4037_v59, %v1632_v36  ;;  %v1772_v50 = vadd.f32 %v1748_v55, %v1700_v57  ;;  %v4196_v3 = vadd.f32 %v1401_v62, %v1353_v15  ;;  %v5508_v55 = vld [vmem:[#allocation52_spill] sm:$0xff] }
 0x1b8   : > { %v4178_v9 = vpop.permute.xlu0 %930  ;;  %5503 = vst [vmem:[#allocation55_spill] sm:$0xff] %v4192_v63  ;;  %v4198_v51 = vadd.f32 %v1402_v8, %v1354_v47  ;;  %v1630_v18 = vmul.f32 %v5490_v2, %v4057_v34  ;;  %v1705_v59 = vadd.f32 %v4044_v14, %v1633_v60  ;;  %v1683_v26 = vmul.f32 %v5475_v12, %v5507_v42  ;;  %v5531_v63 = vld [vmem:[#allocation19_spill] sm:$0xff] }
 0x1b9   : > { %5502 = vst [vmem:[#allocation57_spill] sm:$0xff] %v4178_v9  ;;  %v1754_v9 = vmul.f32 %v5499_v29, %v4161_v45  ;;  %5504 = vst [vmem:[#allocation6_spill] sm:$0xff] %v4196_v3  ;;  %v4200_v25 = vadd.f32 %v1752_v37, %v1704_v58  ;;  %v1140_v36 = vmul.f32 %v5508_v55, %v5477_v5 }
 0x1ba   : > { %v4194_v28 = vpop.permute.xlu1 %918  ;;  %5505 = vst [vmem:[#allocation59_spill] sm:$0xff] %v4198_v51  ;;  %v1093_v48 = vmul.f32 %v5495_v7, %v4076_v27  ;;  %v1755_v37 = vmul.f32 %v5499_v29, %v4176_v33  ;;  %v1701_v62 = vadd.f32 %v4001_v31, %v1629_v53  ;;  %v1706_v8 = vadd.f32 %v4054_v40, %v1634_v52 }
 0x1bb   : > { %5506 = vst [vmem:[#allocation9_spill] sm:$0xff] %v4200_v25  ;;  %1792 = vrot.lane.b32.xlu1 %v1772_v50, %s3077_s17  ;;  %v1091_v60 = vmul.f32 %v5495_v7, %v4106_v20  ;;  %v1750_v12 = vmul.f32 %v5498_v38, %v4123_v16  ;;  %v4222_v14 = vadd.f32 %v1753_v30, %v1705_v59 }
 0x1bc   : > { %v4204_v35 = vpop.permute.xlu0 %954  ;;  %v1707_v58 = vadd.f32 %v1683_v26, %v1635_v24  ;;  %v1094_v57 = vmul.f32 %v5495_v7, %v4140_v4  ;;  %v1773_v15 = vadd.f32 %v1749_v22, %v1701_v62  ;;  %v4228_v47 = vadd.f32 %v1754_v9, %v1706_v8  ;;  %v5512_v9 = vld [vmem:[#allocation51_spill] sm:$0xff] }
 0x1bd   : > { %5509 = vst [vmem:[#allocation8_spill] sm:$0xff] %v4222_v14  ;;  %v1164_v53 = vadd.f32 %v1140_v36, %v1092_v10  ;;  %v1702_v31 = vadd.f32 %v4007_v19, %v1630_v18  ;;  %v1141_v52 = vmul.f32 %v5508_v55, %v5481_v23  ;;  %v1139_v30 = vmul.f32 %v5508_v55, %v5474_v0 }
 0x1be   : > { %v4226_v29 = vpop.permute.xlu1 %793  ;;  %5510 = vst [vmem:[#allocation46_spill] sm:$0xff] %v4228_v47  ;;  %v1631_v24 = vmul.f32 %v5490_v2, %v4090_v44  ;;  %v4238_v7 = vadd.f32 %v1755_v37, %v1707_v58  ;;  %v1212_v22 = vmul.f32 %v5512_v9, %v4158_v1  ;;  %v1142_v10 = vmul.f32 %v5508_v55, %v5507_v42 }
 0x1bf   : > { %1804 = vrot.lane.b32.xlu1 %v1773_v15, %s3077_s17  ;;  %v1751_v19 = vmul.f32 %v5498_v38, %v4126_v41  ;;  %v1774_v50 = vadd.f32 %v1750_v12, %v1702_v31  ;;  %v1679_v18 = vmul.f32 %v3557_v61, %v5473_v32  ;;  %v1165_v59 = vadd.f32 %v1141_v52, %v1093_v48 }
 0x1c0   : > { %v784_v40 = vpop.permute.xlu0 %783  ;;  %5511 = vst [vmem:[#allocation12_spill] sm:$0xff] %v4238_v7  ;;  %v4250_v2 = vadd.f32 %v1212_v22, %v1164_v53  ;;  %v1213_v36 = vmul.f32 %v5512_v9, %v4161_v45  ;;  %v1163_v37 = vadd.f32 %v1139_v30, %v1091_v60  ;;  %v1166_v62 = vadd.f32 %v1142_v10, %v1094_v57  ;;  %v5515_v30 = vld [vmem:[#allocation38_spill] sm:$0xff] }
 0x1c1   : > { %v1703_v55 = vadd.f32 %v1679_v18, %v1631_v24  ;;  %v1211_v53 = vmul.f32 %v5512_v9, %v4118_v43  ;;  %v1214_v31 = vmul.f32 %v5512_v9, %v4176_v33  ;;  %v5516_v24 = vld [vmem:[#allocation30_spill] sm:$0xff] }
 0x1c2   : > { %v4248_v26 = vpop.permute.xlu1 %817  ;;  %5513 = vst [vmem:[#allocation39_spill] sm:$0xff] %v4250_v2  ;;  %v4255_v12 = vadd.f32 %v1213_v36, %v1165_v59  ;;  %v1688_v22 = vmul.f32 %v5516_v24, %v5515_v30  ;;  %v5518_v59 = vld [vmem:[#allocation41_spill] sm:$0xff] }
 0x1c3   : > { %1816 = vrot.lane.b32.xlu1 %v1774_v50, %s3077_s17  ;;  %v1775_v58 = vadd.f32 %v1751_v19, %v1703_v55  ;;  %v5517_v50 = vld [vmem:[#allocation43_spill] sm:$0xff]  ;;  %v1690_v36 = vmul.f32 %v5516_v24, %v5518_v59  ;;  %v5519_v55 = vld [vmem:[#allocation48_spill] sm:$0xff]  ;;  %v4294_v7 = vadd.f32 %v1211_v53, %v1163_v37  ;;  %v4296_v47 = vadd.f32 %v1214_v31, %v1166_v62  ;;  %v5524_v62 = vld [vmem:[#allocation58_spill] sm:$0xff] }
 0x1c4   : > { %v808_v8 = vpop.permute.xlu0 %807  ;;  %5514 = vst [vmem:[#allocation20_spill] sm:$0xff] %v4255_v12  ;;  %v1689_v18 = vmul.f32 %v5516_v24, %v5517_v50  ;;  %v1138_v37 = vmul.f32 %v5519_v55, %v5473_v32  ;;  %v5526_v31 = vld [vmem:[#allocation60_spill] sm:$0xff]  ;;  %v5530_v32 = vld [vmem:[#allocation42_spill] sm:$0xff] }
 0x1c5   : > { %5522 = vst [vmem:[#allocation28_spill] sm:$0xff] %v4294_v7  ;;  %5523 = vst [vmem:[#allocation52_spill] sm:$0xff] %v4296_v47  ;;  %v5528_v47 = vld [vmem:[#allocation27_spill] sm:$0xff] }
 0x1c6   : > { %v921_v38 = vpop.permute.xlu1 %920  ;;  %v5529_v7 = vld [vmem:[#allocation47_spill] sm:$0xff] }
 0x1c7   : > { %1828 = vrot.lane.b32.xlu1 %v1775_v58, %s3077_s17  ;;  %v1135_v58 = vmul.f32 %v5519_v55, %v3479_v21  ;;  %v1136_v21 = vmul.f32 %v5519_v55, %v3523_v56  ;;  %v1088_v14 = vmul.f32 %v5529_v7, %v5528_v47  ;;  %v1089_v25 = vmul.f32 %v5529_v7, %v4057_v34 }
 0x1c8   : > { %v796_v15 = vpop.permute.xlu0 %795  ;;  %v1087_v47 = vmul.f32 %v5529_v7, %v5531_v63  ;;  %v1090_v34 = vmul.f32 %v5529_v7, %v4090_v44 }
 0x1c9   : > { %v841_v61 = vsel %vm823_vm11, %v784_v40, %v796_v15  ;;  %v835_v48 = vsel %vm823_vm11, %v796_v15, %v808_v8  ;;  %v1160_v63 = vadd.f32 %v1136_v21, %v1088_v14 }
 0x1ca   : > { %v4263_v60 = vmul.f32 %v5478_v49, %v841_v61  ;;  %v945_v57 = vpop.permute.xlu1 %944  ;;  %v4282_v9 = vmul.f32 %v5482_v17, %v835_v48  ;;  %v5520_v61 = vld [vmem:[#allocation44_spill] sm:$0xff]  ;;  %v1159_v14 = vadd.f32 %v1135_v58, %v1087_v47  ;;  %v1162_v21 = vadd.f32 %v1138_v37, %v1090_v34  ;;  %v5542_v37 = vld [vmem:[#allocation26_spill] sm:$0xff]  ;;  %v5543_v47 = vld [vmem:[#allocation7_spill] sm:$0xff] }
 0x1cb   : > { %v5544_v34 = vld [vmem:[#allocation22_spill] sm:$0xff] }
 0x1cc   : > { %v820_v52 = vpop.permute.xlu0 %819 }
 0x1cd   : > { %v829_v10 = vsel %vm823_vm11, %v808_v8, %v820_v52  ;;  %v847_v19 = vsel %vm823_vm11, %v820_v52, %v784_v40  ;;  %v1691_v8 = vmul.f32 %v5516_v24, %v5520_v61  ;;  %v5521_v40 = vld [vmem:[#allocation29_spill] sm:$0xff] }
 0x1ce   : > { %v4285_v15 = vmul.f32 %v5483_v54, %v847_v19  ;;  %v1641_v52 = vmul.f32 %v5521_v40, %v4263_v60  ;;  %v4292_v12 = vmul.f32 %v5489_v13, %v829_v10  ;;  %v933_v2 = vpop.permute.xlu1 %932  ;;  %v1137_v10 = vmul.f32 %v5519_v55, %v3490_v39 }
 0x1cf   : > { %v970_v24 = vsel %vm958_vm12, %v933_v2, %v945_v57  ;;  %v976_v19 = vsel %vm958_vm12, %v921_v38, %v933_v2  ;;  %v1642_v2 = vmul.f32 %v5521_v40, %v4282_v9 }
 0x1d0   : > { %v1640_v48 = vmul.f32 %v5521_v40, %v4285_v15  ;;  %v4311_v53 = vmul.f32 %v5524_v62, %v976_v19  ;;  %v4314_v56 = vmul.f32 %v5526_v31, %v970_v24  ;;  %v1643_v39 = vmul.f32 %v5521_v40, %v4292_v12 }
 0x1d1   : > { %v1713_v3 = vadd.f32 %v1689_v18, %v1641_v52  ;;  %v5533_v52 = vld [vmem:[#allocation50_spill] sm:$0xff]  ;;  %v1161_v7 = vadd.f32 %v1137_v10, %v1089_v25  ;;  %v5538_v25 = vld [vmem:[#allocation67_spill] sm:$0xff] }
 0x1d2   : > { %5525 = vst [vmem:[#allocation51_spill] sm:$0xff] %v4311_v53  ;;  %5527 = vst [vmem:[#allocation38_spill] sm:$0xff] %v4314_v56  ;;  %v1712_v51 = vadd.f32 %v1688_v22, %v1640_v48  ;;  %v1760_v55 = vmul.f32 %v5530_v32, %v4311_v53  ;;  %v1761_v24 = vmul.f32 %v5530_v32, %v4314_v56  ;;  %v957_v19 = vpop.permute.xlu1 %956  ;;  %v5532_v48 = vld [vmem:[#allocation61_spill] sm:$0xff] }
 0x1d3   : > { %v964_v22 = vsel %vm958_vm12, %v945_v57, %v957_v19  ;;  %v982_v40 = vsel %vm958_vm12, %v957_v19, %v921_v38  ;;  %v1208_v44 = vmul.f32 %v5533_v52, %v4112_v46  ;;  %v1209_v57 = vmul.f32 %v5533_v52, %v4123_v16 }
 0x1d4   : > { %v4337_v33 = vmul.f32 %v5532_v48, %v964_v22  ;;  %v4340_v53 = vmul.f32 %v3764_v11, %v982_v40  ;;  %v4342_v56 = vadd.f32 %v1760_v55, %v1712_v51  ;;  %v4344_v18 = vadd.f32 %v1761_v24, %v1713_v3 }
 0x1d5   : > { %v1714_v22 = vadd.f32 %v1690_v36, %v1642_v2  ;;  %v1715_v40 = vadd.f32 %v1691_v8, %v1643_v39  ;;  %v4354_v51 = vadd.f32 %v1208_v44, %v1160_v63  ;;  %v4356_v3 = vadd.f32 %v1209_v57, %v1161_v7  ;;  %v5541_v2 = vld [vmem:[#allocation69_spill] sm:$0xff] }
 0x1d6   : > { %v1762_v38 = vmul.f32 %v5530_v32, %v4337_v33  ;;  %v1763_v19 = vmul.f32 %v5530_v32, %v4340_v53  ;;  %v1207_v16 = vmul.f32 %v5533_v52, %v5538_v25  ;;  %v1210_v10 = vmul.f32 %v5533_v52, %v4126_v41  ;;  %v5545_v52 = vld [vmem:[#allocation56_spill] sm:$0xff]  ;;  %v5546_v44 = vld [vmem:[#allocation57_spill] sm:$0xff] }
 0x1d7   : > { %5534 = vst [vmem:[#allocation30_spill] sm:$0xff] %v4354_v51  ;;  %5535 = vst [vmem:[#allocation43_spill] sm:$0xff] %v4356_v3  ;;  %v834_v58 = vsel %vm823_vm11, %v4226_v29, %v5541_v2  ;;  %v840_v39 = vsel %vm823_vm11, %v5542_v37, %v4226_v29  ;;  %v1331_v41 = vmul.f32 %v5543_v47, %v5474_v0 }
 0x1d8   : > { %v4358_v55 = vadd.f32 %v1762_v38, %v1714_v22  ;;  %v4360_v46 = vadd.f32 %v1763_v19, %v1715_v40  ;;  %v4366_v24 = vadd.f32 %v1207_v16, %v1159_v14  ;;  %v4368_v36 = vadd.f32 %v1210_v10, %v1162_v21 }
 0x1d9   : > { %v1403_v63 = vmul.f32 %v5544_v34, %v4118_v43  ;;  %v969_v7 = vsel %vm958_vm12, %v5546_v44, %v5545_v52  ;;  %v1332_v57 = vmul.f32 %v5543_v47, %v5477_v5  ;;  %v1333_v38 = vmul.f32 %v5543_v47, %v5481_v23 }
 0x1da   : > { %5536 = vst [vmem:[#allocation41_spill] sm:$0xff] %v4358_v55  ;;  %5537 = vst [vmem:[#allocation48_spill] sm:$0xff] %v4360_v46  ;;  %v4393_v29 = vmul.f32 %v5478_v49, %v840_v39  ;;  %v4396_v19 = vmul.f32 %v5482_v17, %v834_v58  ;;  %v828_v43 = vsel %vm823_vm11, %v5541_v2, %v4248_v26  ;;  %v5547_v58 = vld [vmem:[#allocation13_spill] sm:$0xff] }
 0x1db   : > { %5539 = vst [vmem:[#allocation44_spill] sm:$0xff] %v4366_v24  ;;  %5540 = vst [vmem:[#allocation29_spill] sm:$0xff] %v4368_v36  ;;  %v846_v0 = vsel %vm823_vm11, %v4248_v26, %v5542_v37  ;;  %v4418_v10 = vmul.f32 %v5489_v13, %v828_v43  ;;  %v4452_v51 = vmul.f32 %v5526_v31, %v969_v7 }
 0x1dc   : > { %v4415_v26 = vmul.f32 %v5483_v54, %v846_v0  ;;  %v963_v54 = vsel %vm958_vm12, %v5545_v52, %v4204_v35  ;;  %v5548_v0 = vld [vmem:[#allocation31_spill] sm:$0xff]  ;;  %v1404_v52 = vmul.f32 %v5544_v34, %v4158_v1 }
 0x1dd   : > { %v1125_v8 = vpop.permute.xlu0 %1124  ;;  %v4458_v6 = vmul.f32 %v5532_v48, %v963_v54 }
 0x1de   : > { %v1147_v40 = vmul.f32 %v1125_v8, %v5515_v30  ;;  %v1148_v14 = vmul.f32 %v1125_v8, %v5517_v50  ;;  %v1149_v21 = vmul.f32 %v1125_v8, %v5518_v59  ;;  %v1150_v25 = vmul.f32 %v1125_v8, %v5520_v61 }
 0x1df   : > { %v975_v8 = vsel %vm958_vm12, %v4194_v28, %v5546_v44 }
 0x1e0   : > { %v4455_v1 = vmul.f32 %v5524_v62, %v975_v8 }
 0x1e2   : > { %v4378_v32 = vpop.permute.xlu0 %1248 }
 0x1e3   : > { %v1077_v5 = vpop.permute.xlu1 %1076 }
 0x1e4   : > { %v1099_v22 = vmul.f32 %v1077_v5, %v4285_v15  ;;  %v1100_v23 = vmul.f32 %v1077_v5, %v4263_v60  ;;  %v1101_v49 = vmul.f32 %v1077_v5, %v4282_v9  ;;  %v1102_v17 = vmul.f32 %v1077_v5, %v4292_v12 }
 0x1e6   : > { %v1261_v16 = vpop.permute.xlu0 %1260  ;;  %v1172_v39 = vadd.f32 %v1148_v14, %v1100_v23  ;;  %v1173_v5 = vadd.f32 %v1149_v21, %v1101_v49  ;;  %v1171_v36 = vadd.f32 %v1147_v40, %v1099_v22  ;;  %v1174_v24 = vadd.f32 %v1150_v25, %v1102_v17  ;;  %v5549_v23 = vld [vmem:[#allocation35_spill] sm:$0xff]  ;;  %v5550_v17 = vld [vmem:[#allocation33_spill] sm:$0xff]  ;;  %v5551_v14 = vld [vmem:[#allocation36_spill] sm:$0xff] }
 0x1e7   : > { %v1283_v2 = vmul.f32 %v1261_v16, %v4106_v20  ;;  %v1284_v37 = vmul.f32 %v1261_v16, %v5547_v58  ;;  %v981_v20 = vsel %vm958_vm12, %v4204_v35, %v4194_v28  ;;  %v5552_v25 = vld [vmem:[#allocation49_spill] sm:$0xff] }
 0x1e8   : > { %v1121_v43 = vpop.permute.xlu1 %1120  ;;  %v1096_v58 = vmul.f32 %v5552_v25, %v4393_v29  ;;  %v1097_v28 = vmul.f32 %v5552_v25, %v4396_v19  ;;  %v1095_v35 = vmul.f32 %v5552_v25, %v4415_v26  ;;  %v4461_v46 = vmul.f32 %v3764_v11, %v981_v20 }
 0x1e9   : > { %v1355_v13 = vadd.f32 %v1331_v41, %v1283_v2  ;;  %v1143_v22 = vmul.f32 %v1121_v43, %v5548_v0  ;;  %v1144_v49 = vmul.f32 %v1121_v43, %v5549_v23  ;;  %v1145_v40 = vmul.f32 %v1121_v43, %v5550_v17 }
 0x1ea   : > { %v1146_v44 = vmul.f32 %v1121_v43, %v5551_v14  ;;  %v4438_v21 = vpop.permute.xlu0 %1268  ;;  %v1098_v41 = vmul.f32 %v5552_v25, %v4418_v10  ;;  %v1285_v2 = vmul.f32 %v1261_v16, %v4076_v27  ;;  %v1356_v43 = vadd.f32 %v1332_v57, %v1284_v37 }
 0x1eb   : > { %v1427_v3 = vadd.f32 %v1403_v63, %v1355_v13  ;;  %v1168_v27 = vadd.f32 %v1144_v49, %v1096_v58  ;;  %v1169_v57 = vadd.f32 %v1145_v40, %v1097_v28  ;;  %v1167_v63 = vadd.f32 %v1143_v22, %v1095_v35  ;;  %v5556_v40 = vld [vmem:[#allocation15_spill] sm:$0xff]  ;;  %v5558_v58 = vld [vmem:[#allocation38_spill] sm:$0xff] }
 0x1ec   : > { %v1170_v37 = vadd.f32 %v1146_v44, %v1098_v41  ;;  %v1286_v11 = vmul.f32 %v1261_v16, %v4140_v4  ;;  %v1357_v8 = vadd.f32 %v1333_v38, %v1285_v2  ;;  %v1428_v54 = vadd.f32 %v1404_v52, %v1356_v43  ;;  %v5557_v16 = vld [vmem:[#allocation51_spill] sm:$0xff]  ;;  %v5559_v43 = vld [vmem:[#allocation17_spill] sm:$0xff] }
 0x1ed   : > { %v1193_v55 = vpop.permute.xlu1 %1192  ;;  %1445 = vrot.lane.b32.xlu1 %v1427_v3, %s3078_s18  ;;  %v1405_v49 = vmul.f32 %v5544_v34, %v4161_v45  ;;  %v1287_v44 = vmul.f32 %v5556_v40, %v4415_v26 }
 0x1ee   : > { %v4464_v25 = vpop.permute.xlu0 %1953  ;;  %v1215_v31 = vmul.f32 %v1193_v55, %v4455_v1  ;;  %v1216_v62 = vmul.f32 %v1193_v55, %v4452_v51  ;;  %v1217_v7 = vmul.f32 %v1193_v55, %v4458_v6  ;;  %v1218_v48 = vmul.f32 %v1193_v55, %v4461_v46 }
 0x1ef   : > { %v1334_v55 = vmul.f32 %v5543_v47, %v5507_v42  ;;  %v1429_v2 = vadd.f32 %v1405_v49, %v1357_v8 }
 0x1f0   : > { %v4471_v20 = vadd.f32 %v1216_v62, %v1168_v27  ;;  %v4473_v3 = vadd.f32 %v1217_v7, %v1169_v57  ;;  %v4475_v13 = vadd.f32 %v1215_v31, %v1167_v63  ;;  %v4477_v22 = vadd.f32 %v1218_v48, %v1170_v37  ;;  %v5564_v37 = vld [vmem:[#allocation21_spill] sm:$0xff] }
 0x1f1   : > { %v1197_v4 = vpop.permute.xlu1 %1196  ;;  %1457 = vrot.lane.b32.xlu1 %v1428_v54, %s3078_s18  ;;  %v1358_v45 = vadd.f32 %v1334_v55, %v1286_v11  ;;  %v1335_v27 = vmul.f32 %v5559_v43, %v5548_v0  ;;  %v1406_v31 = vmul.f32 %v5544_v34, %v5564_v37  ;;  %v5566_v11 = vld [vmem:[#allocation23_spill] sm:$0xff]  ;;  %v1291_v54 = vmul.f32 %v4438_v21, %v4285_v15  ;;  %v5568_v34 = vld [vmem:[#allocation10_spill] sm:$0xff] }
 0x1f2   : > { %5553 = vst [vmem:[#allocation58_spill] sm:$0xff] %v4473_v3  ;;  %5554 = vst [vmem:[#allocation60_spill] sm:$0xff] %v4475_v13  ;;  %v4486_v38 = vpop.permute.xlu0 %1963  ;;  %v1219_v52 = vmul.f32 %v1197_v4, %v5557_v16  ;;  %v1220_v28 = vmul.f32 %v1197_v4, %v5558_v58  ;;  %v1221_v35 = vmul.f32 %v1197_v4, %v4337_v33  ;;  %v5569_v55 = vld [vmem:[#allocation14_spill] sm:$0xff] }
 0x1f3   : > { %5555 = vst [vmem:[#allocation27_spill] sm:$0xff] %v4477_v22  ;;  %v1222_v41 = vmul.f32 %v1197_v4, %v4340_v53  ;;  %v1359_v7 = vadd.f32 %v1335_v27, %v1287_v44  ;;  %v1430_v48 = vadd.f32 %v1406_v31, %v1358_v45  ;;  %v1407_v8 = vmul.f32 %v5566_v11, %v4455_v1  ;;  %v5571_v44 = vld [vmem:[#allocation5_spill] sm:$0xff]  ;;  %v5573_v45 = vld [vmem:[#allocation18_spill] sm:$0xff]  ;;  %v5579_v22 = vld [vmem:[#allocation68_spill] sm:$0xff] }
 0x1f4   : > { %v4494_v57 = vadd.f32 %v1220_v28, %v1172_v39  ;;  %v4496_v42 = vadd.f32 %v1221_v35, %v1173_v5  ;;  %v4498_v47 = vadd.f32 %v1219_v52, %v1171_v36  ;;  %v5567_v36 = vld [vmem:[#allocation62_spill] sm:$0xff]  ;;  %v5570_v52 = vld [vmem:[#allocation63_spill] sm:$0xff]  ;;  %v5572_v35 = vld [vmem:[#allocation64_spill] sm:$0xff]  ;;  %v1292_v37 = vmul.f32 %v4438_v21, %v4263_v60 }
 0x1f5   : > { %v4500_v63 = vadd.f32 %v1222_v41, %v1174_v24  ;;  %1469 = vrot.lane.b32.xlu1 %v1429_v2, %s3078_s18  ;;  %v1431_v5 = vadd.f32 %v1407_v8, %v1359_v7  ;;  %v1271_v24 = vmul.f32 %v4378_v32, %v5567_v36  ;;  %v1391_v28 = vmul.f32 %v5571_v44, %v5570_v52  ;;  %v4528_v15 = vld [vmem:[%s5254_s5 + $0x28] sm:$0xff]  ;;  %v5574_v7 = vld [vmem:[#allocation11_spill] sm:$0xff]  ;;  %v5577_v60 = vld [vmem:[#allocation65_spill] sm:$0xff] }
 0x1f6   : > { %5560 = vst [vmem:[#allocation47_spill] sm:$0xff] %v4494_v57  ;;  %5561 = vst [vmem:[#allocation42_spill] sm:$0xff] %v4496_v42  ;;  %v4505_v62 = vpop.permute.xlu0 %1973  ;;  %v1272_v41 = vmul.f32 %v4378_v32, %v5572_v35  ;;  %v1339_v2 = vmul.f32 %v5573_v45, %v5515_v30  ;;  %v1340_v42 = vmul.f32 %v5573_v45, %v5517_v50  ;;  %v5575_v30 = vld [vmem:[#allocation66_spill] sm:$0xff]  ;;  %v5578_v50 = vld [vmem:[#allocation16_spill] sm:$0xff] }
 0x1f7   : > { %5562 = vst [vmem:[#allocation19_spill] sm:$0xff] %v4498_v47  ;;  %5563 = vst [vmem:[#allocation61_spill] sm:$0xff] %v4500_v63  ;;  %v1273_v57 = vmul.f32 %v4378_v32, %v5577_v60  ;;  %v4539_v47 = vpop.permute.xlu1 %1958  ;;  %v1393_v13 = vmul.f32 %v5571_v44, %v5579_v22  ;;  %v5580_v3 = vld [vmem:[#allocation70_spill] sm:$0xff] }
 0x1f8   : > { %5565 = vst [vmem:[#allocation50_spill] sm:$0xff] %v4505_v62  ;;  %v1363_v31 = vadd.f32 %v1339_v2, %v1291_v54  ;;  %v1293_v54 = vmul.f32 %v4438_v21, %v4282_v9  ;;  %v1294_v9 = vmul.f32 %v4438_v21, %v4292_v12  ;;  %v5583_v12 = vld [vmem:[#allocation25_spill] sm:$0xff] }
 0x1f9   : > { %1481 = vrot.lane.b32.xlu1 %v1430_v48, %s3078_s18  ;;  %v1636_v21 = vmul.f32 %v5583_v12, %v4415_v26 }
 0x1fb   : > { %v1297_v39 = vpop.permute.xlu0 %1296 }
 0x1fc   : > { %v1319_v49 = vmul.f32 %v1297_v39, %v5568_v34  ;;  %v1320_v4 = vmul.f32 %v1297_v39, %v5569_v55  ;;  %v1321_v48 = vmul.f32 %v1297_v39, %v5574_v7 }
 0x1fd   : > { %1447 = vrot.lane.b32.xlu1 %v1431_v5, %s3078_s18  ;;  %v5576_v5 = vld [vmem:[#allocation24_spill] sm:$0xff] }
 0x1fe   : > { %v1343_v27 = vadd.f32 %v1319_v49, %v1271_v24  ;;  %v1344_v8 = vadd.f32 %v1320_v4, %v1272_v41  ;;  %v1392_v24 = vmul.f32 %v5571_v44, %v5575_v30  ;;  %v1411_v49 = vmul.f32 %v5576_v5, %v5557_v16 }
 0x1ff   : > { %v1364_v4 = vadd.f32 %v1340_v42, %v1292_v37  ;;  %v1345_v41 = vadd.f32 %v1321_v48, %v1273_v57  ;;  %v1341_v16 = vmul.f32 %v5573_v45, %v5518_v59  ;;  %v1412_v62 = vmul.f32 %v5576_v5, %v5558_v58  ;;  %v5582_v48 = vld [vmem:[#allocation71_spill] sm:$0xff] }
 0x200   : > { %v1415_v63 = vadd.f32 %v1391_v28, %v1343_v27  ;;  %v1322_v28 = vmul.f32 %v1297_v39, %v5578_v50  ;;  %v1435_v2 = vadd.f32 %v1411_v49, %v1363_v31  ;;  %v1416_v27 = vadd.f32 %v1392_v24, %v1344_v8  ;;  %v4559_v39 = vpop.permute.xlu1 %2006 }
 0x201   : > { %1978 = vperm.xlu1 %2952, %v4528_v15   ;;  %v5581_v57 = vmov 1   ;;  %v1365_v42 = vadd.f32 %v1341_v16, %v1293_v54  ;;  %v1436_v37 = vadd.f32 %v1412_v62, %v1364_v4  ;;  %v1417_v31 = vadd.f32 %v1393_v13, %v1345_v41  ;;  %v5586_v4 = vld [vmem:[#allocation32_spill] sm:$0xff] }
 0x202   : > { %1439 = vrot.lane.b32.xlu0 %v1415_v63, %s3078_s18  ;;  %v1274_v63 = vmul.f32 %v4378_v32, %v5580_v3  ;;  %v1394_v58 = vmul.f32 %v5571_v44, %v5582_v48  ;;  %v1413_v32 = vmul.f32 %v5576_v5, %v4337_v33  ;;  %v1342_v8 = vmul.f32 %v5573_v45, %v5520_v61  ;;  %v5585_v33 = vld [vmem:[#allocation34_spill] sm:$0xff] }
 0x203   : > { %v1414_v13 = vmul.f32 %v5576_v5, %v4340_v53  ;;  %v1684_v61 = vmul.f32 %v5585_v33, %v5548_v0  ;;  %v1637_v45 = vmul.f32 %v5583_v12, %v4393_v29  ;;  %v5587_v53 = vld [vmem:[#allocation72_spill] sm:$0xff]  ;;  %v1685_v5 = vmul.f32 %v5585_v33, %v5549_v23 }
 0x204   : > { %v1346_v59 = vadd.f32 %v1322_v28, %v1274_v63  ;;  %v1366_v24 = vadd.f32 %v1342_v8, %v1294_v9  ;;  %v1437_v49 = vadd.f32 %v1413_v32, %v1365_v42  ;;  %v4573_v44 = vpop.permute.xlu1 %1968  ;;  %v1756_v28 = vmul.f32 %v5586_v4, %v4455_v1  ;;  %v5588_v1 = vld [vmem:[#allocation73_spill] sm:$0xff] }
 0x205   : > { %1449 = vrot.lane.b32.xlu1 %v1435_v2, %s3078_s18  ;;  %5584 = vst [vmem:[#allocation67_spill] sm:$0xff] %v4573_v44  ;;  %v1708_v26 = vadd.f32 %v1684_v61, %v1636_v21  ;;  %v1638_v41 = vmul.f32 %v5583_v12, %v4396_v19  ;;  %v1757_v16 = vmul.f32 %v5586_v4, %v4452_v51 }
 0x206   : > { %1451 = vrot.lane.b32.xlu0 %v1416_v27, %s3078_s18  ;;  %2953 = vset.pattern.permute.xlu1 %v5581_v57  ;;  %v1418_v62 = vadd.f32 %v1394_v58, %v1346_v59  ;;  %v1438_v54 = vadd.f32 %v1414_v13, %v1366_v24  ;;  %v1709_v27 = vadd.f32 %v1685_v5, %v1637_v45  ;;  %v5589_v58 = vld [vmem:[#allocation74_spill] sm:$0xff]  ;;  %v5590_v24 = vld [vmem:[#allocation76_spill] sm:$0xff]  ;;  %v5591_v13 = vld [vmem:[#allocation55_spill] sm:$0xff] }
 0x207   : > { %v1780_v2 = vadd.f32 %v1756_v28, %v1708_v26  ;;  %v1686_v63 = vmul.f32 %v5585_v33, %v5550_v17  ;;  %v1639_v9 = vmul.f32 %v5583_v12, %v4418_v10  ;;  %v1687_v32 = vmul.f32 %v5585_v33, %v5551_v14  ;;  %v5592_v33 = vld [vmem:[#allocation6_spill] sm:$0xff]  ;;  %v2994_v45 = vld [vmem:[%s5254_s5 + $0x20] sm:$0xff]  ;;  %v5596_v5 = vld [vmem:[#allocation8_spill] sm:$0xff] }
 0x208   : > { %v4590_v0 = vpop.permute.xlu1 %2014  ;;  %v1781_v42 = vadd.f32 %v1757_v16, %v1709_v27  ;;  %v1759_v12 = vmul.f32 %v5586_v4, %v4461_v46  ;;  %v5594_v26 = vmov 0   ;;  %v5595_v28 = vld [vmem:[#allocation9_spill] sm:$0xff]  ;;  %v1336_v27 = vmul.f32 %v5559_v43, %v5549_v23 }
 0x209   : > { %1461 = vrot.lane.b32.xlu1 %v1436_v37, %s3078_s18  ;;  %v1710_v59 = vadd.f32 %v1686_v63, %v1638_v41  ;;  %v1758_v37 = vmul.f32 %v5586_v4, %v4458_v6  ;;  %v1711_v21 = vadd.f32 %v1687_v32, %v1639_v9  ;;  %v1288_v41 = vmul.f32 %v5556_v40, %v4393_v29 }
 0x20a   : > { %1463 = vrot.lane.b32.xlu0 %v1417_v31, %s3078_s18  ;;  %v1289_v16 = vmul.f32 %v5556_v40, %v4396_v19  ;;  %v1408_v9 = vmul.f32 %v5566_v11, %v4452_v51  ;;  %v1337_v29 = vmul.f32 %v5559_v43, %v5550_v17  ;;  %v1409_v19 = vmul.f32 %v5566_v11, %v4458_v6 }
 0x20b   : > { %v1782_v8 = vadd.f32 %v1758_v37, %v1710_v59  ;;  %v1360_v63 = vadd.f32 %v1336_v27, %v1288_v41  ;;  %v1290_v59 = vmul.f32 %v5556_v40, %v4418_v10  ;;  %v1338_v51 = vmul.f32 %v5559_v43, %v5551_v14  ;;  %v5599_v43 = vld [vmem:[#allocation41_spill] sm:$0xff] }
 0x20c   : > { %v4603_v31 = vpop.permute.xlu1 %1788  ;;  %v1361_v23 = vadd.f32 %v1337_v29, %v1289_v16  ;;  %v1410_v17 = vmul.f32 %v5566_v11, %v4461_v46  ;;  %v5600_v11 = vld [vmem:[#allocation48_spill] sm:$0xff] }
 0x20d   : > { %1473 = vrot.lane.b32.xlu1 %v1437_v49, %s3078_s18  ;;  %v1432_v37 = vadd.f32 %v1408_v9, %v1360_v63  ;;  %v5603_v9 = vld [vmem:[#allocation37_spill] sm:$0xff] }
 0x20e   : > { %1475 = vrot.lane.b32.xlu0 %v1418_v62, %s3078_s18  ;;  %v1783_v62 = vadd.f32 %v1759_v12, %v1711_v21  ;;  %v1433_v32 = vadd.f32 %v1409_v19, %v1361_v23  ;;  %v2995_v21 = vld [vmem:[%s5254_s5 + $0x18] sm:$0xff]  ;;  %v1128_v29 = vmul.f32 %v5603_v9, %v5569_v55  ;;  %v2997_v23 = vld [vmem:[%s5250_s1 + $0x8] sm:$0xff] }
 0x210   : > { %v4615_v49 = vpop.permute.xlu1 %1800 }
 0x211   : > { %1485 = vrot.lane.b32.xlu1 %v1438_v54, %s3078_s18  ;;  %v5593_v54 = vld [vmem:[#allocation59_spill] sm:$0xff] }
 0x212   : > { %1790 = vrot.lane.b32.xlu0 %v5587_v53, %s3077_s17 }
 0x214   : > { %v4620_v61 = vpop.permute.xlu1 %1812 }
 0x215   : > { %1796 = vrot.lane.b32.xlu1 %v1780_v2, %s3077_s17  ;;  %v5597_v2 = vld [vmem:[#allocation46_spill] sm:$0xff] }
 0x216   : > { %1802 = vrot.lane.b32.xlu0 %v5588_v1, %s3077_s17 }
 0x218   : > { %v4630_v4 = vpop.permute.xlu1 %1824 }
 0x219   : > { %1808 = vrot.lane.b32.xlu1 %v1781_v42, %s3077_s17  ;;  %v5598_v42 = vld [vmem:[#allocation12_spill] sm:$0xff] }
 0x21a   : > { %1814 = vrot.lane.b32.xlu0 %v5589_v58, %s3077_s17 }
 0x21c   : > { %v4634_v53 = vpop.permute.xlu1 %1441 }
 0x21d   : > { %1820 = vrot.lane.b32.xlu1 %v1782_v8, %s3077_s17  ;;  %v1362_v8 = vadd.f32 %v1338_v51, %v1290_v59  ;;  %v1129_v59 = vmul.f32 %v5603_v9, %v5574_v7  ;;  %v5604_v51 = vld [vmem:[#allocation40_spill] sm:$0xff] }
 0x21e   : > { %1826 = vrot.lane.b32.xlu0 %v5590_v24, %s3077_s17 }
 0x21f   : > { %v1434_v40 = vadd.f32 %v1410_v17, %v1362_v8 }
 0x220   : > { %v4646_v1 = vpop.permute.xlu1 %1453 }
 0x221   : > { %1832 = vrot.lane.b32.xlu1 %v1783_v62, %s3077_s17 }
 0x222   : > { %1455 = vrot.lane.b32.xlu0 %v5591_v13, %s3078_s18 }
 0x224   : > { %v4658_v58 = vpop.permute.xlu1 %1465 }
 0x225   : > { %2022 = vperm.xlu1 %2953, %v2994_v45  }
 0x226   : > { %1467 = vrot.lane.b32.xlu0 %v5592_v33, %s3078_s18  ;;  %v4697_v33 = vpop.permute.xlu0 %2010 }
 0x228   : > { %v4666_v10 = vpop.permute.xlu1 %1477 }
 0x229   : > { %2954 = vset.pattern.permute.xlu1 %v5594_v26 }
 0x22a   : > { %1479 = vrot.lane.b32.xlu0 %v5593_v54, %s3078_s18 }
 0x22c   : > { %v4669_v6 = vpop.permute.xlu1 %1443 }
 0x22e   : > { %1794 = vrot.lane.b32.xlu0 %v5595_v28, %s3077_s17 }
 0x230   : > { %v4676_v14 = vpop.permute.xlu1 %1792 }
 0x232   : > { %1806 = vrot.lane.b32.xlu0 %v5596_v5, %s3077_s17  ;;  %v5602_v5 = vld [vmem:[#allocation45_spill] sm:$0xff] }
 0x233   : > { %v1080_v41 = vmul.f32 %v5602_v5, %v5572_v35  ;;  %v1081_v35 = vmul.f32 %v5602_v5, %v5577_v60  ;;  %v1079_v55 = vmul.f32 %v5602_v5, %v5567_v36  ;;  %v1082_v7 = vmul.f32 %v5602_v5, %v5580_v3 }
 0x234   : > { %v4680_v46 = vpop.permute.xlu1 %1804  ;;  %v1201_v5 = vmul.f32 %v5604_v51, %v5579_v22 }
 0x236   : > { %1818 = vrot.lane.b32.xlu0 %v5597_v2, %s3077_s17 }
 0x238   : > { %v4686_v12 = vpop.permute.xlu1 %1816 }
 0x23a   : > { %1830 = vrot.lane.b32.xlu0 %v5598_v42, %s3077_s17  ;;  %v1127_v42 = vmul.f32 %v5603_v9, %v5568_v34  ;;  %v1200_v34 = vmul.f32 %v5604_v51, %v5575_v30 }
 0x23c   : > { %v4689_v24 = vpop.permute.xlu1 %1828 }
 0x23e   : > { %1459 = vrot.lane.b32.xlu0 %v1432_v37, %s3078_s18  ;;  %v1130_v37 = vmul.f32 %v5603_v9, %v5578_v50  ;;  %v1153_v9 = vadd.f32 %v1129_v59, %v1081_v35 }
 0x240   : > { %v1225_v35 = vadd.f32 %v1201_v5, %v1153_v9 }
 0x242   : > { %1471 = vrot.lane.b32.xlu0 %v1433_v32, %s3078_s18  ;;  %v5605_v32 = vld [vmem:[#allocation54_spill] sm:$0xff] }
 0x243   : > { %vm1836_vm13 = vcmp.lt.s32.totalorder %v5605_v32, 112  ;;  %vm1487_vm14 = vcmp.lt.s32.totalorder %v5605_v32, 16 }
 0x244   : > { %v1843_v36 = vsel %vm1836_vm13, %v4615_v49, %v4620_v61  ;;  %v1837_v22 = vsel %vm1836_vm13, %v4620_v61, %v4630_v4  ;;  %v1849_v61 = vsel %vm1836_vm13, %v4603_v31, %v4615_v49  ;;  %v1507_v49 = vsel %vm1487_vm14, %v4666_v10, %v4634_v53 }
 0x246   : > { %1483 = vrot.lane.b32.xlu0 %v1434_v40, %s3078_s18  ;;  %v1152_v40 = vadd.f32 %v1128_v29, %v1080_v41  ;;  %v1199_v29 = vmul.f32 %v5604_v51, %v5570_v52  ;;  %v1151_v52 = vadd.f32 %v1127_v42, %v1079_v55 }
 0x24a   : > { %2018 = vperm.xlu0 %2951, %v2995_v21  }
 0x24e   : > { %1798 = vrot.lane.b32.xlu0 %v4342_v56, %s3077_s17 }
 0x252   : > { %1810 = vrot.lane.b32.xlu0 %v4344_v18, %s3077_s17  ;;  %v5601_v18 = vld [vmem:[#allocation53_spill] sm:$0xff] }
 0x253   : > { %v1867_v13 = vsub.s32 7, %v5601_v18  ;;  %v1518_v45 = vsub.s32 6, %v5601_v18  ;;  %v1863_v2 = vsub.s32 3, %v5601_v18  ;;  %v1514_v27 = vsub.s32 2, %v5601_v18 }
 0x254   : > { %v1224_v18 = vadd.f32 %v1200_v34, %v1152_v40 }
 0x255   : > { %v1872_v19 = vrot.slane %v2997_v23, %v1863_v2  ;;  %v1523_v8 = vrot.slane %v2997_v23, %v1514_v27  ;;  %v1876_v3 = vrot.slane %v2997_v23, %v1867_v13 }
 0x256   : > { %1822 = vrot.lane.b32.xlu0 %v5599_v43, %s3077_s17 }
 0x257   : > { %v4765_v40 = vrot.slane %v1876_v3, %v1863_v2 }
 0x25a   : > { %1834 = vrot.lane.b32.xlu0 %v5600_v11, %s3077_s17  ;;  %v4742_v11 = vrot.slane %v1872_v19, %v1863_v2  ;;  %v1202_v19 = vmul.f32 %v5604_v51, %v5582_v48  ;;  %s404_s17 = sand.u32 1, %s3056_s22  }
 0x25b   : > { %s2754_s18 = sshll.u32 %s404_s17, 5  ;;  %s2677_s25 = scalar_lea.sflag [#allocation3], %s404_s17 }
 0x25c   : > { %v1899_v42 = vmul.f32 %v4742_v11, %v1837_v22  ;;  %v1495_v22 = vsel %vm1487_vm14, %v4646_v1, %v4658_v58  ;;  %s406_s19 = scalar_lea.vmem [#allocation2], %s2754_s18 }
 0x25d   : > { %s2691_s26 = sshll.u32 %s406_s19, 4  ;;  %s5207_s26 = int_to_ptr.vmem [resolvable:$true] %s2691_s26 }
 0x25e   : > { %2026 = vperm.xlu0 %2951, %v4528_v15   ;;  %v2996_v15 = vld [vmem:[%s5250_s1] sm:$0xff]  ;;  %s3002_s18 = scalar_lea.vmem %s5207_s26, 512 }
 0x25f   : > { %v4692_v56 = vpop.permute.xlu1 %1445  ;;  %v1868_v28 = vrot.slane %v2996_v15, %v1867_v13  ;;  %v1519_v16 = vrot.slane %v2996_v15, %v1518_v45  ;;  %v1864_v30 = vrot.slane %v2996_v15, %v1863_v2  ;;  %v1515_v41 = vrot.slane %v2996_v15, %v1514_v27  ;;  %p3003_p11 = scmp.ne.s32.totalorder %s5207_s26, %s3002_s18 }
 0x260   : > { %v4750_v13 = vrot.slane %v1523_v8, %v1514_v27  ;;  %v1154_v8 = vadd.f32 %v1130_v37, %v1082_v7 }
 0x261   : > { %v4729_v50 = vrot.slane %v1868_v28, %v1863_v2  ;;  %v4732_v60 = vrot.slane %v1519_v16, %v1514_v27  ;;  %v1527_v16 = vrot.slane %v2997_v23, %v1518_v45  ;;  %v4754_v34 = vrot.slane %v1864_v30, %v1863_v2  ;;  %p3004_p12 = pnand %p3003_p11, %p3184_p5 }
 0x262   : > { %2955 = vset.pattern.permute.xlu0 %v5594_v26  ;;  %v4767_v48 = vrot.slane %v1515_v41, %v1514_v27  ;;  %v1223_v30 = vadd.f32 %v1199_v29, %v1151_v52  ;;  %v1855_v2 = vsel %vm1836_vm13, %v4630_v4, %v4603_v31 }
 0x263   : > { %v4694_v62 = vpop.permute.xlu1 %1457  ;;  %v1898_v26 = vmul.f32 %v4729_v50, %v1843_v36  ;;  %v4769_v51 = vrot.slane %v1527_v16, %v1514_v27  ;;  %v1897_v4 = vmul.f32 %v4754_v34, %v1849_v61  ;;  %p3005_p13 = pneg %p3004_p12 }
 0x264   : > { %v1552_v5 = vmul.f32 %v4767_v48, %v1507_v49 }
 0x267   : > { %v4700_v54 = vpop.permute.xlu1 %1469 }
 0x26b   : > { %v4734_v17 = vpop.permute.xlu1 %1481 }
 0x26f   : > { %v4762_v15 = vpop.permute.xlu1 %1447 }
 0x274   : > { %v1440_v63 = vpop.permute.xlu0 %1439 }
 0x278   : > { %v1452_v21 = vpop.permute.xlu0 %1451 }
 0x279   : > { %v1500_v43 = vsel %vm1487_vm14, %v1440_v63, %v1452_v21 }
 0x27a   : > { %v1549_v28 = vmul.f32 %v4732_v60, %v1500_v43  ;;  %v1900_v43 = vmul.f32 %v4765_v40, %v1855_v2 }
 0x27c   : > { %v1573_v57 = vadd.f32 %v1549_v28, %v1224_v18  ;;  %v1464_v44 = vpop.permute.xlu0 %1463 }
 0x27d   : > { %v1494_v45 = vsel %vm1487_vm14, %v1452_v21, %v1464_v44 }
 0x27e   : > { %v1922_v59 = vadd.f32 %v1898_v26, %v1573_v57  ;;  %v1550_v23 = vmul.f32 %v4750_v13, %v1494_v45  ;;  %v1226_v57 = vadd.f32 %v1202_v19, %v1154_v8 }
 0x280   : > { %v1574_v55 = vadd.f32 %v1550_v23, %v1225_v35  ;;  %v1476_v26 = vpop.permute.xlu0 %1475  ;;  %v1982_v37 = vmul.f32 %v4464_v25, %v1922_v59  ;;  %v4789_v36 = vpop.permute.xlu1 %1978  ;;  %v5606_v23 = vld [vmem:[#allocation78_spill] sm:$0xff] }
 0x281   : > { %v1488_v27 = vsel %vm1487_vm14, %v1464_v44, %v1476_v26  ;;  %v1506_v7 = vsel %vm1487_vm14, %v1476_v26, %v1440_v63  ;;  %v1501_v44 = vsel %vm1487_vm14, %v4634_v53, %v4646_v1  ;;  %v1489_v53 = vsel %vm1487_vm14, %v4658_v58, %v4666_v10 }
 0x282   : > { %v1923_v21 = vadd.f32 %v1899_v42, %v1574_v55  ;;  %v1548_v3 = vmul.f32 %v4767_v48, %v1506_v7  ;;  %v1551_v31 = vmul.f32 %v4769_v51, %v1488_v27  ;;  %v2030_v41 = vadd.f32 %v4559_v39, %v1982_v37  ;;  %v5607_v55 = vld [vmem:[#allocation75_spill] sm:$0xff] }
 0x283   : > { %v1553_v19 = vmul.f32 %v4732_v60, %v1501_v44  ;;  %v1576_v8 = vadd.f32 %v1552_v5, %v5606_v23  ;;  %v1555_v26 = vmul.f32 %v4769_v51, %v1489_v53 }
 0x284   : > { %v1572_v63 = vadd.f32 %v1548_v3, %v1223_v30  ;;  %v1575_v18 = vadd.f32 %v1551_v31, %v1226_v57  ;;  %v1791_v28 = vpop.permute.xlu0 %1790  ;;  %v1983_v16 = vmul.f32 %v4464_v25, %v1923_v21  ;;  %v4813_v59 = vpop.permute.xlu1 %1449  ;;  %vm2054_vm15 = vcmp.gt.f32.partialorder %v2030_v41, 0.0 }
 0x285   : > { %v2078_v61 = vmul.f32 0.01, %v2030_v41  ;;  %v1554_v57 = vmul.f32 %v4750_v13, %v1495_v22 }
 0x286   : > { %v1921_v9 = vadd.f32 %v1897_v4, %v1572_v63  ;;  %v1924_v29 = vadd.f32 %v1900_v43, %v1575_v18  ;;  %v2031_v58 = vadd.f32 %v4559_v39, %v1983_v16  ;;  %v5608_v63 = vld [vmem:[#allocation77_spill] sm:$0xff] }
 0x287   : > { %v4827_v49 = vsel %vm2054_vm15, %v2030_v41, %v2078_v61  ;;  %v1578_v18 = vadd.f32 %v1554_v57, %v5608_v63 }
 0x288   : > { %v1981_v45 = vmul.f32 %v4464_v25, %v1921_v9  ;;  %v1984_v52 = vmul.f32 %v4464_v25, %v1924_v29  ;;  %v1803_v35 = vpop.permute.xlu0 %1802  ;;  %v1577_v25 = vadd.f32 %v1553_v19, %v5607_v55  ;;  %v2079_v43 = vmul.f32 0.01, %v2031_v58  ;;  %v5609_v9 = vld [vmem:[#allocation79_spill] sm:$0xff] }
 0x289   : > { %v1850_v30 = vsel %vm1836_vm13, %v1791_v28, %v1803_v35  ;;  %vm2055_vm3 = vcmp.gt.f32.partialorder %v2031_v58, 0.0  ;;  %v1579_v29 = vadd.f32 %v1555_v26, %v5609_v9 }
 0x28a   : > { %v1901_v1 = vmul.f32 %v4754_v34, %v1850_v30  ;;  %v2029_v42 = vadd.f32 %v4559_v39, %v1981_v45  ;;  %v2032_v10 = vadd.f32 %v4559_v39, %v1984_v52  ;;  %v4830_v39 = vpop.permute.xlu1 %1461  ;;  %v4849_v23 = vsel %vm2055_vm3, %v2031_v58, %v2079_v43 }
 0x28b   : > { %v1839_v43 = vsel %vm1836_vm13, %v4686_v12, %v4689_v24 }
 0x28c   : > { %v1925_v2 = vadd.f32 %v1901_v1, %v1576_v8  ;;  %v1815_v37 = vpop.permute.xlu0 %1814  ;;  %vm2053_vm1 = vcmp.gt.f32.partialorder %v2029_v42, 0.0  ;;  %v2077_v27 = vmul.f32 0.01, %v2029_v42  ;;  %vm2056_vm2 = vcmp.gt.f32.partialorder %v2032_v10, 0.0 }
 0x28d   : > { %v1844_v7 = vsel %vm1836_vm13, %v1803_v35, %v1815_v37  ;;  %v2080_v21 = vmul.f32 0.01, %v2032_v10 }
 0x28e   : > { %v1985_v3 = vmul.f32 %v4539_v47, %v1925_v2  ;;  %v1902_v31 = vmul.f32 %v4729_v50, %v1844_v7  ;;  %v4833_v4 = vsel %vm2053_vm1, %v2029_v42, %v2077_v27  ;;  %v4854_v61 = vpop.permute.xlu1 %1473 }
 0x28f   : > { %v2125_v44 = vadd.f32 %v4827_v49, %v4833_v4  ;;  %v4838_v16 = vsel %vm2056_vm2, %v2032_v10, %v2080_v21  ;;  %v5610_v21 = vld [vmem:[#allocation30_spill] sm:$0xff] }
 0x290   : > { %v1926_v5 = vadd.f32 %v1902_v31, %v1577_v25  ;;  %v1827_v41 = vpop.permute.xlu0 %1826  ;;  %v2033_v19 = vadd.f32 %v4697_v33, %v1985_v3  ;;  %v2150_v8 = vadd.f32 %v4838_v16, %v4849_v23 }
 0x291   : > { %v1838_v22 = vsel %vm1836_vm13, %v1815_v37, %v1827_v41  ;;  %v1856_v53 = vsel %vm1836_vm13, %v1827_v41, %v1791_v28  ;;  %2126 = vadd.xlane.f32.xlu1 %v2125_v44  ;;  %v1845_v28 = vsel %vm1836_vm13, %v4680_v46, %v4686_v12  ;;  %v1851_v12 = vsel %vm1836_vm13, %v4676_v14, %v4680_v46 }
 0x292   : > { %v1986_v45 = vmul.f32 %v4539_v47, %v1926_v5  ;;  %v1903_v52 = vmul.f32 %v4742_v11, %v1838_v22  ;;  %v1904_v35 = vmul.f32 %v4765_v40, %v1856_v53  ;;  %v2081_v55 = vmul.f32 0.01, %v2033_v19 }
 0x293   : > { %vm2057_vm4 = vcmp.gt.f32.partialorder %v2033_v19, 0.0  ;;  %v1906_v37 = vmul.f32 %v4729_v50, %v1845_v28  ;;  %v1905_v28 = vmul.f32 %v4754_v34, %v1851_v12 }
 0x294   : > { %v2034_v30 = vadd.f32 %v4697_v33, %v1986_v45  ;;  %v1927_v1 = vadd.f32 %v1903_v52, %v1578_v18  ;;  %v1928_v42 = vadd.f32 %v1904_v35, %v1579_v29  ;;  %v1456_v10 = vpop.permute.xlu0 %1455  ;;  %v4876_v44 = vsel %vm2057_vm4, %v2033_v19, %v2081_v55  ;;  %v4880_v18 = vpop.permute.xlu1 %1485  ;;  %v5611_v19 = vld [vmem:[#allocation43_spill] sm:$0xff]  ;;  %v5612_v55 = vld [vmem:[#allocation44_spill] sm:$0xff] }
 0x295   : > { %v1502_v58 = vsel %vm1487_vm14, %v4669_v6, %v1456_v10  ;;  %2151 = vadd.xlane.f32.xlu1 %v2150_v8  ;;  %v1907_v29 = vmul.f32 %v4742_v11, %v1839_v43  ;;  %v1857_v52 = vsel %vm1836_vm13, %v4689_v24, %v4676_v14 }
 0x296   : > { %v1987_v25 = vmul.f32 %v4539_v47, %v1927_v1  ;;  %v1988_v57 = vmul.f32 %v4539_v47, %v1928_v42  ;;  %v1557_v26 = vmul.f32 %v4732_v60, %v1502_v58  ;;  %vm2058_vm5 = vcmp.gt.f32.partialorder %v2034_v30, 0.0 }
 0x297   : > { %v2082_v2 = vmul.f32 0.01, %v2034_v30  ;;  %v1908_v14 = vmul.f32 %v4765_v40, %v1857_v52 }
 0x298   : > { %v2035_v27 = vadd.f32 %v4697_v33, %v1987_v25  ;;  %v2036_v7 = vadd.f32 %v4697_v33, %v1988_v57  ;;  %v1581_v3 = vadd.f32 %v1557_v26, %v5610_v21  ;;  %v1468_v31 = vpop.permute.xlu0 %1467  ;;  %v1797_v24 = vpop.permute.xlu1 %1796  ;;  %v5613_v57 = vld [vmem:[#allocation29_spill] sm:$0xff] }
 0x299   : > { %v1496_v47 = vsel %vm1487_vm14, %v1456_v10, %v1468_v31  ;;  %v4878_v63 = vsel %vm2058_vm5, %v2034_v30, %v2082_v2 }
 0x29a   : > { %v1930_v5 = vadd.f32 %v1906_v37, %v1581_v3  ;;  %v1558_v33 = vmul.f32 %v4750_v13, %v1496_v47  ;;  %v2128_v41 = vadd.f32 %v4878_v63, %v4876_v44  ;;  %vm2059_vm6 = vcmp.gt.f32.partialorder %v2035_v27, 0.0 }
 0x29b   : > { %v2083_v9 = vmul.f32 0.01, %v2035_v27  ;;  %vm2060_vm7 = vcmp.gt.f32.partialorder %v2036_v7, 0.0  ;;  %v2084_v45 = vmul.f32 0.01, %v2036_v7 }
 0x29c   : > { %v1582_v22 = vadd.f32 %v1558_v33, %v5611_v19  ;;  %2129 = vadd.xlane.f32.xlu0 %v2128_v41  ;;  %v1480_v53 = vpop.permute.xlu0 %1479  ;;  %v1990_v30 = vmul.f32 %v4486_v38, %v1930_v5  ;;  %v1809_v47 = vpop.permute.xlu1 %1808 }
 0x29d   : > { %v1490_v35 = vsel %vm1487_vm14, %v1468_v31, %v1480_v53  ;;  %v1508_v46 = vsel %vm1487_vm14, %v1480_v53, %v4669_v6  ;;  %v4900_v8 = vsel %vm2059_vm6, %v2035_v27, %v2083_v9  ;;  %v4906_v58 = vsel %vm2060_vm7, %v2036_v7, %v2084_v45 }
 0x29e   : > { %v1931_v1 = vadd.f32 %v1907_v29, %v1582_v22  ;;  %v1556_v42 = vmul.f32 %v4767_v48, %v1508_v46  ;;  %v1559_v10 = vmul.f32 %v4769_v51, %v1490_v35  ;;  %v2153_v26 = vadd.f32 %v4906_v58, %v4900_v8 }
 0x29f   : > { %v2038_v7 = vadd.f32 %v4590_v0, %v1990_v30 }
 0x2a0   : > { %v1580_v25 = vadd.f32 %v1556_v42, %v5612_v55  ;;  %v1583_v6 = vadd.f32 %v1559_v10, %v5613_v57  ;;  %v4913_v2 = vpop.permute.xlu0 %1794  ;;  %v1991_v37 = vmul.f32 %v4486_v38, %v1931_v1  ;;  %2154 = vadd.xlane.f32.xlu0 %v2153_v26  ;;  %v1821_v52 = vpop.permute.xlu1 %1820  ;;  %v1503_v55 = vsel %vm1487_vm14, %v4692_v56, %v4694_v62 }
 0x2a1   : > { %v2086_v33 = vmul.f32 0.01, %v2038_v7  ;;  %vm2062_vm8 = vcmp.gt.f32.partialorder %v2038_v7, 0.0  ;;  %v1847_v42 = vsel %vm1836_vm13, %v1809_v47, %v1821_v52 }
 0x2a2   : > { %v1929_v27 = vadd.f32 %v1905_v28, %v1580_v25  ;;  %v1932_v21 = vadd.f32 %v1908_v14, %v1583_v6  ;;  %v2039_v41 = vadd.f32 %v4590_v0, %v1991_v37  ;;  %v1914_v25 = vmul.f32 %v4729_v50, %v1847_v42 }
 0x2a3   : > { %v4924_v53 = vsel %vm2062_vm8, %v2038_v7, %v2086_v33  ;;  %v1561_v7 = vmul.f32 %v4732_v60, %v1503_v55 }
 0x2a4   : > { %v1989_v3 = vmul.f32 %v4486_v38, %v1929_v27  ;;  %v1992_v31 = vmul.f32 %v4486_v38, %v1932_v21  ;;  %v1807_v43 = vpop.permute.xlu0 %1806  ;;  %v2087_v38 = vmul.f32 0.01, %v2039_v41  ;;  %vm2063_vm11 = vcmp.gt.f32.partialorder %v2039_v41, 0.0  ;;  %v1833_v28 = vpop.permute.xlu1 %1832 }
 0x2a5   : > { %v1841_v26 = vsel %vm1836_vm13, %v1821_v52, %v1833_v28  ;;  %v5615_v52 = vld [vmem:[#allocation50_spill] sm:$0xff] }
 0x2a6   : > { %v2037_v5 = vadd.f32 %v4590_v0, %v1989_v3  ;;  %v2040_v12 = vadd.f32 %v4590_v0, %v1992_v31  ;;  %v4930_v0 = vsel %vm2063_vm11, %v2039_v41, %v2087_v38  ;;  %v1853_v3 = vsel %vm1836_vm13, %v1797_v24, %v1809_v47 }
 0x2a7   : > { %v1859_v31 = vsel %vm1836_vm13, %v1833_v28, %v1797_v24  ;;  %vm2321_vm11 = vcmask 97280  }
 0x2a8   : > { %v1819_v9 = vpop.permute.xlu0 %1818  ;;  %vm2061_vm9 = vcmp.gt.f32.partialorder %v2037_v5, 0.0  ;;  %v2085_v29 = vmul.f32 0.01, %v2037_v5  ;;  %vm2064_vm10 = vcmp.gt.f32.partialorder %v2040_v12, 0.0  ;;  %v2088_v19 = vmul.f32 0.01, %v2040_v12  ;;  %v2023_v42 = vpop.permute.xlu1 %2022 }
 0x2aa   : > { %v4922_v22 = vsel %vm2061_vm9, %v2037_v5, %v2085_v29  ;;  %v4928_v46 = vsel %vm2064_vm10, %v2040_v12, %v2088_v19  ;;  %v5614_v5 = vld [vmem:[#allocation58_spill] sm:$0xff]  ;;  %v1497_v12 = vsel %vm1487_vm14, %v4694_v62, %v4700_v54  ;;  %v1509_v29 = vsel %vm1487_vm14, %v4734_v17, %v4692_v56 }
 0x2ab   : > { %v2131_v45 = vadd.f32 %v4924_v53, %v4922_v22  ;;  %v2156_v30 = vadd.f32 %v4928_v46, %v4930_v0  ;;  %v1491_v62 = vsel %vm1487_vm14, %v4700_v54, %v4734_v17  ;;  %v1913_v56 = vmul.f32 %v4754_v34, %v1853_v3 }
 0x2ac   : > { %v1831_v35 = vpop.permute.xlu0 %1830  ;;  %v1562_v54 = vmul.f32 %v4750_v13, %v1497_v12  ;;  %v1560_v17 = vmul.f32 %v4767_v48, %v1509_v29  ;;  %v5620_v29 = vld [vmem:[#allocation28_spill] sm:$0xff]  ;;  %vm2195_vm9 = vcmask 392192   ;;  %vm2174_vm10 = vcmask 7168  }
 0x2ad   : > { %2132 = vadd.xlane.f32.xlu1 %v2131_v45  ;;  %v1840_v28 = vsel %vm1836_vm13, %v1819_v9, %v1831_v35 }
 0x2b0   : > { %v1460_v1 = vpop.permute.xlu0 %1459 }
 0x2b1   : > { %v1504_v10 = vsel %vm1487_vm14, %v4762_v15, %v1460_v1  ;;  %2157 = vadd.xlane.f32.xlu1 %v2156_v30 }
 0x2b2   : > { %v1565_v14 = vmul.f32 %v4732_v60, %v1504_v10  ;;  %v1846_v10 = vsel %vm1836_vm13, %v1807_v43, %v1819_v9 }
 0x2b3   : > { %v1910_v3 = vmul.f32 %v4729_v50, %v1846_v10 }
 0x2b4   : > { %v1589_v57 = vadd.f32 %v1565_v14, %v4471_v20  ;;  %v1472_v6 = vpop.permute.xlu0 %1471  ;;  %v1915_v20 = vmul.f32 %v4742_v11, %v1841_v26  ;;  %v5616_v14 = vld [vmem:[#allocation60_spill] sm:$0xff] }
 0x2b5   : > { %v1498_v37 = vsel %vm1487_vm14, %v1460_v1, %v1472_v6  ;;  %v1916_v1 = vmul.f32 %v4765_v40, %v1859_v31  ;;  %v1911_v31 = vmul.f32 %v4742_v11, %v1840_v28 }
 0x2b6   : > { %v1938_v27 = vadd.f32 %v1914_v25, %v1589_v57  ;;  %v1566_v21 = vmul.f32 %v4750_v13, %v1498_v37  ;;  %v5617_v25 = vld [vmem:[#allocation27_spill] sm:$0xff]  ;;  %v1563_v37 = vmul.f32 %v4769_v51, %v1491_v62 }
 0x2b8   : > { %v1590_v33 = vadd.f32 %v1566_v21, %v5614_v5  ;;  %v1484_v41 = vpop.permute.xlu0 %1483  ;;  %v1998_v30 = vmul.f32 %v5615_v52, %v1938_v27 }
 0x2b9   : > { %v1492_v47 = vsel %vm1487_vm14, %v1472_v6, %v1484_v41  ;;  %v1510_v24 = vsel %vm1487_vm14, %v1484_v41, %v4762_v15  ;;  %v1852_v15 = vsel %vm1836_vm13, %v4913_v2, %v1807_v43  ;;  %v1858_v6 = vsel %vm1836_vm13, %v1831_v35, %v4913_v2  ;;  %v5618_v2 = vld [vmem:[#allocation39_spill] sm:$0xff]  ;;  %v5619_v41 = vld [vmem:[#allocation20_spill] sm:$0xff] }
 0x2ba   : > { %v1939_v19 = vadd.f32 %v1915_v20, %v1590_v33  ;;  %v1564_v38 = vmul.f32 %v4767_v48, %v1510_v24  ;;  %v1567_v45 = vmul.f32 %v4769_v51, %v1492_v47  ;;  %v2046_v21 = vadd.f32 %v2023_v42, %v1998_v30 }
 0x2bb   : > { %v1909_v9 = vmul.f32 %v4754_v34, %v1852_v15  ;;  %v1912_v20 = vmul.f32 %v4765_v40, %v1858_v6  ;;  %v1585_v35 = vadd.f32 %v1561_v7, %v5618_v2  ;;  %v1586_v12 = vadd.f32 %v1562_v54, %v5619_v41 }
 0x2bc   : > { %v1588_v55 = vadd.f32 %v1564_v38, %v5616_v14  ;;  %v1591_v57 = vadd.f32 %v1567_v45, %v5617_v25  ;;  %v1999_v26 = vmul.f32 %v5615_v52, %v1939_v19  ;;  %v1584_v47 = vadd.f32 %v1560_v17, %v5620_v29  ;;  %v5621_v19 = vld [vmem:[#allocation52_spill] sm:$0xff]  ;;  %v5622_v25 = vld [vmem:[#allocation67_spill] sm:$0xff] }
 0x2bd   : > { %v1587_v38 = vadd.f32 %v1563_v37, %v5621_v19  ;;  %v2094_v62 = vmul.f32 0.01, %v2046_v21  ;;  %v1935_v15 = vadd.f32 %v1911_v31, %v1586_v12  ;;  %vm2070_vm12 = vcmp.gt.f32.partialorder %v2046_v21, 0.0 }
 0x2be   : > { %v1937_v43 = vadd.f32 %v1913_v56, %v1588_v55  ;;  %v1940_v27 = vadd.f32 %v1916_v1, %v1591_v57  ;;  %v2047_v24 = vadd.f32 %v2023_v42, %v1999_v26  ;;  %v1933_v56 = vadd.f32 %v1909_v9, %v1584_v47 }
 0x2bf   : > { %v1934_v1 = vadd.f32 %v1910_v3, %v1585_v35  ;;  %v1936_v10 = vadd.f32 %v1912_v20, %v1587_v38  ;;  %v5008_v55 = vsel %vm2070_vm12, %v2046_v21, %v2094_v62  ;;  %v1995_v17 = vmul.f32 %v5622_v25, %v1935_v15 }
 0x2c0   : > { %v1997_v5 = vmul.f32 %v5615_v52, %v1937_v43  ;;  %v2000_v33 = vmul.f32 %v5615_v52, %v1940_v27  ;;  %v2095_v7 = vmul.f32 0.01, %v2047_v24  ;;  %vm2071_vm2 = vcmp.gt.f32.partialorder %v2047_v24, 0.0 }
 0x2c1   : > { %v1993_v57 = vmul.f32 %v5622_v25, %v1933_v56  ;;  %v1994_v54 = vmul.f32 %v5622_v25, %v1934_v1  ;;  %v1996_v6 = vmul.f32 %v5622_v25, %v1936_v10  ;;  %v1511_v29 = vsel %vm1487_vm14, %v4880_v18, %v4813_v59 }
 0x2c2   : > { %v2045_v45 = vadd.f32 %v2023_v42, %v1997_v5  ;;  %v2048_v30 = vadd.f32 %v2023_v42, %v2000_v33  ;;  %v5018_v43 = vsel %vm2071_vm2, %v2047_v24, %v2095_v7  ;;  %v1505_v24 = vsel %vm1487_vm14, %v4813_v59, %v4830_v39 }
 0x2c3   : > { %v1569_v56 = vmul.f32 %v4732_v60, %v1505_v24  ;;  %v1499_v1 = vsel %vm1487_vm14, %v4830_v39, %v4854_v61  ;;  %v1493_v15 = vsel %vm1487_vm14, %v4854_v61, %v4880_v18  ;;  %v5623_v60 = vld [vmem:[#allocation19_spill] sm:$0xff]  ;;  %v5625_v18 = vld [vmem:[#allocation42_spill] sm:$0xff]  ;;  %vm3079_vm12 = vmmov 1  }
 0x2c4   : > { %vm2069_vm15 = vcmp.gt.f32.partialorder %v2045_v45, 0.0  ;;  %v2093_v28 = vmul.f32 0.01, %v2045_v45  ;;  %v2096_v52 = vmul.f32 0.01, %v2048_v30  ;;  %vm2072_vm1 = vcmp.gt.f32.partialorder %v2048_v30, 0.0 }
 0x2c5   : > { %v5624_v39 = vld [vmem:[#allocation47_spill] sm:$0xff] }
 0x2c6   : > { %v5006_v14 = vsel %vm2069_vm15, %v2045_v45, %v2093_v28  ;;  %v5016_v26 = vsel %vm2072_vm1, %v2048_v30, %v2096_v52  ;;  %v1568_v30 = vmul.f32 %v4767_v48, %v1511_v29  ;;  %v1570_v28 = vmul.f32 %v4750_v13, %v1499_v1  ;;  %vm2849_vm15 = vmpackc.low %vm452_vm0, %vm3079_vm12 }
 0x2c7   : > { %v2137_v42 = vadd.f32 %v5008_v55, %v5006_v14  ;;  %v2162_v31 = vadd.f32 %v5016_v26, %v5018_v43  ;;  %v1593_v25 = vadd.f32 %v1569_v56, %v5624_v39  ;;  %v2289_v39 = vld [vmem:[%s5258_s9 + $0x20] sm:$0xff] }
 0x2c8   : > { %v1592_v52 = vadd.f32 %v1568_v30, %v5623_v60  ;;  %v5627_v60 = vmov 1  }
 0x2c9   : > { %v2019_v37 = vpop.permute.xlu0 %2018  ;;  %2138 = vadd.xlane.f32.xlu1 %v2137_v42 }
 0x2ca   : > { %v2041_v27 = vadd.f32 %v2019_v37, %v1993_v57  ;;  %v2042_v21 = vadd.f32 %v2019_v37, %v1994_v54  ;;  %v2043_v9 = vadd.f32 %v2019_v37, %v1995_v17  ;;  %v2044_v3 = vadd.f32 %v2019_v37, %v1996_v6  ;;  %v5626_v37 = vld [vmem:[#allocation61_spill] sm:$0xff] }
 0x2cb   : > { %v1571_v57 = vmul.f32 %v4769_v51, %v1493_v15  ;;  %v2183_v15 = vld [vmem:[%s5256_s7] sm:$0xff] }
 0x2cc   : > { %vm2065_vm3 = vcmp.gt.f32.partialorder %v2041_v27, 0.0  ;;  %vm2066_vm4 = vcmp.gt.f32.partialorder %v2042_v21, 0.0  ;;  %v2089_v20 = vmul.f32 0.01, %v2041_v27  ;;  %v2090_v5 = vmul.f32 0.01, %v2042_v21 }
 0x2cd   : > { %v1799_v33 = vpop.permute.xlu0 %1798  ;;  %2163 = vadd.xlane.f32.xlu1 %v2162_v31  ;;  %vm2067_vm5 = vcmp.gt.f32.partialorder %v2043_v9, 0.0  ;;  %vm2068_vm6 = vcmp.gt.f32.partialorder %v2044_v3, 0.0  ;;  %v2091_v2 = vmul.f32 0.01, %v2043_v9  ;;  %v2092_v35 = vmul.f32 0.01, %v2044_v3 }
 0x2ce   : > { %v5022_v41 = vsel %vm2065_vm3, %v2041_v27, %v2089_v20  ;;  %v5024_v12 = vsel %vm2066_vm4, %v2042_v21, %v2090_v5  ;;  %v1595_v27 = vadd.f32 %v1571_v57, %v5626_v37 }
 0x2cf   : > { %v2134_v47 = vadd.f32 %v5024_v12, %v5022_v41  ;;  %v5036_v19 = vsel %vm2067_vm5, %v2043_v9, %v2091_v2  ;;  %v5038_v38 = vsel %vm2068_vm6, %v2044_v3, %v2092_v35 }
 0x2d0   : > { %v2159_v59 = vadd.f32 %v5038_v38, %v5036_v19 }
 0x2d1   : > { %2135 = vadd.xlane.f32.xlu0 %v2134_v47  ;;  %v1811_v45 = vpop.permute.xlu0 %1810 }
 0x2d2   : > { %v1854_v62 = vsel %vm1836_vm13, %v1799_v33, %v1811_v45 }
 0x2d3   : > { %v1917_v48 = vmul.f32 %v4754_v34, %v1854_v62  ;;  %v1594_v34 = vadd.f32 %v1570_v28, %v5625_v18  ;;  %v2286_v28 = vld [vmem:[%s5258_s9 + $0x8] sm:$0xff] }
 0x2d5   : > { %2160 = vadd.xlane.f32.xlu0 %v2159_v59  ;;  %v1823_v10 = vpop.permute.xlu0 %1822  ;;  %v1941_v54 = vadd.f32 %v1917_v48, %v1592_v52  ;;  %v2181_v59 = vld [vmem:[%s5255_s6] sm:$0xff]  ;;  %v2287_v52 = vld [vmem:[%s5258_s9 + $0x10] sm:$0xff] }
 0x2d6   : > { %v1848_v7 = vsel %vm1836_vm13, %v1811_v45, %v1823_v10  ;;  %2820 = vmatprep.mubr.msk.f32.mxu0 %vm2195_vm9, %v2181_v59  ;;  %v2285_v48 = vld [vmem:[%s5258_s9] sm:$0xff] }
 0x2d7   : > { %v1918_v42 = vmul.f32 %v4729_v50, %v1848_v7  ;;  %v2001_v50 = vmul.f32 %v4789_v36, %v1941_v54  ;;  %v2288_v7 = vld [vmem:[%s5258_s9 + $0x18] sm:$0xff] }
 0x2d9   : > { %v1942_v17 = vadd.f32 %v1918_v42, %v1593_v25  ;;  %v1835_v61 = vpop.permute.xlu0 %1834  ;;  %v2290_v25 = vld [vmem:[%s5258_s9 + $0x28] sm:$0xff] }
 0x2da   : > { %v1842_v6 = vsel %vm1836_vm13, %v1823_v10, %v1835_v61  ;;  %v1860_v13 = vsel %vm1836_vm13, %v1835_v61, %v1799_v33  ;;  %v2184_v10 = vld [vmem:[%s5256_s7 + $0x8] sm:$0xf] }
 0x2db   : > { %v2002_v21 = vmul.f32 %v4789_v36, %v1942_v17  ;;  %v1919_v9 = vmul.f32 %v4742_v11, %v1842_v6  ;;  %v1920_v51 = vmul.f32 %v4765_v40, %v1860_v13 }
 0x2dd   : > { %v1943_v3 = vadd.f32 %v1919_v9, %v1594_v34  ;;  %v1944_v31 = vadd.f32 %v1920_v51, %v1595_v27  ;;  %v2027_v20 = vpop.permute.xlu0 %2026 }
 0x2de   : > { %v2049_v5 = vadd.f32 %v2027_v20, %v2001_v50  ;;  %v2050_v2 = vadd.f32 %v2027_v20, %v2002_v21  ;;  %2187 = vperm.xlu1 %2954, %v2183_v15  }
 0x2df   : > { %v2003_v35 = vmul.f32 %v4789_v36, %v1943_v3  ;;  %v2004_v32 = vmul.f32 %v4789_v36, %v1944_v31 }
 0x2e0   : > { %vm2073_vm13 = vcmp.gt.f32.partialorder %v2049_v5, 0.0  ;;  %vm2074_vm14 = vcmp.gt.f32.partialorder %v2050_v2, 0.0  ;;  %v2097_v33 = vmul.f32 0.01, %v2049_v5  ;;  %v2098_v29 = vmul.f32 0.01, %v2050_v2 }
 0x2e1   : > { %v2051_v47 = vadd.f32 %v2027_v20, %v2003_v35  ;;  %v2052_v24 = vadd.f32 %v2027_v20, %v2004_v32 }
 0x2e2   : > { %v5074_v11 = vsel %vm2073_vm13, %v2049_v5, %v2097_v33  ;;  %v5076_v40 = vsel %vm2074_vm14, %v2050_v2, %v2098_v29  ;;  %2293 = vperm.xlu1 %2954, %v2285_v48  }
 0x2e3   : > { %v2140_v45 = vadd.f32 %v5076_v40, %v5074_v11  ;;  %vm2075_vm7 = vcmp.gt.f32.partialorder %v2051_v47, 0.0  ;;  %vm2076_vm8 = vcmp.gt.f32.partialorder %v2052_v24, 0.0  ;;  %v2099_v30 = vmul.f32 0.01, %v2051_v47 }
 0x2e4   : > { %v2100_v62 = vmul.f32 0.01, %v2052_v24 }
 0x2e5   : > { %2141 = vadd.xlane.f32.xlu0 %v2140_v45  ;;  %v5080_v56 = vsel %vm2075_vm7, %v2051_v47, %v2099_v30 }
 0x2e6   : > { %v5082_v36 = vsel %vm2076_vm8, %v2052_v24, %v2100_v62  ;;  %2298 = vperm.xlu1 %2954, %v2286_v28   ;;  %v5628_v28 = vmov 0  }
 0x2e7   : > { %v2165_v1 = vadd.f32 %v5082_v36, %v5080_v56 }
 0x2e9   : > { %2166 = vadd.xlane.f32.xlu0 %v2165_v1 }
 0x2ea   : > { %2303 = vperm.xlu1 %2954, %v2287_v52   ;;  %v2279_v52 = vld [vmem:[%s5257_s8] sm:$0xff] }
 0x2eb   : > { %2827 = vmatprep.mubr.msk.f32.mxu1 %vm2321_vm11, %v2279_v52 }
 0x2ee   : > { %2308 = vperm.xlu1 %2954, %v2288_v7  }
 0x2f2   : > { %2313 = vperm.xlu1 %2954, %v2289_v39  }
 0x2f6   : > { %2318 = vperm.xlu1 %2954, %v2290_v25  }
 0x2ff   : > { %2192 = vperm.xlu0 %2955, %v2184_v10   ;;  %v2182_v10 = vld [vmem:[%s5255_s6 + $0x8] sm:$0xf] }
 0x303   : > { %2958 = vset.pattern.permute.xlu0 %v5627_v60 }
 0x31e   : > { %v2127_v57 = vpop.xlane.xlu1 %2126 }
 0x31f   : > { %v2144_v18 = vmul.f32 0.00390625, %v2127_v57 }
 0x322   : > { %v2152_v54 = vpop.xlane.xlu1 %2151 }
 0x323   : > { %v2168_v17 = vmul.f32 0.00390625, %v2152_v54 }
 0x325   : > { %v2175_v13 = vsel %vm2174_vm10, %v2144_v18, %v2168_v17 }
 0x329   : > { %v2130_v42 = vpop.xlane.xlu0 %2129 }
 0x32a   : > { %v2145_v34 = vmul.f32 0.00390625, %v2130_v42 }
 0x32d   : > { %v2155_v61 = vpop.xlane.xlu0 %2154 }
 0x32e   : > { %v2169_v6 = vmul.f32 0.00390625, %v2155_v61 }
 0x330   : > { %v2176_v37 = vsel %vm2174_vm10, %v2145_v34, %v2169_v6  ;;  %v2280_v34 = vld [vmem:[%s5257_s8 + $0x8] sm:$0xff]  ;;  %v2281_v6 = vld [vmem:[%s5257_s8 + $0x10] sm:$0xff] }
 0x331   : > { %v2836_v27 = vpack.c.bf16 %v2176_v37, %v2175_v13  ;;  %v2282_v13 = vld [vmem:[%s5257_s8 + $0x18] sm:$0xff]  ;;  %v2283_v37 = vld [vmem:[%s5257_s8 + $0x20] sm:$0xff] }
 0x333   : > { %2837 = vmatprep.subr.bf16.mxu0 %v2836_v27 }
 0x334   : > { %2839 = vmatpush3.bf16.msra.mxu0 %v2836_v27  ;;  %v2284_v27 = vld [vmem:[%s5257_s8 + $0x28] sm:$0xff] }
 0x33a   : > { %v2133_v21 = vpop.xlane.xlu1 %2132 }
 0x33b   : > { %v2146_v31 = vmul.f32 0.00390625, %v2133_v21 }
 0x33e   : > { %v2158_v9 = vpop.xlane.xlu1 %2157 }
 0x33f   : > { %v2170_v50 = vmul.f32 0.00390625, %v2158_v9 }
 0x341   : > { %v2177_v2 = vsel %vm2174_vm10, %v2146_v31, %v2170_v50 }
 0x356   : > { %v2139_v33 = vpop.xlane.xlu1 %2138 }
 0x357   : > { %v2148_v30 = vmul.f32 0.00390625, %v2139_v33 }
 0x35a   : > { %v2164_v29 = vpop.xlane.xlu1 %2163 }
 0x35b   : > { %v2172_v24 = vmul.f32 0.00390625, %v2164_v29 }
 0x35d   : > { %v2179_v59 = vsel %vm2174_vm10, %v2148_v30, %v2172_v24 }
 0x35e   : > { %v2136_v51 = vpop.xlane.xlu0 %2135  ;;  %v2188_v25 = vpop.permute.xlu1 %2187 }
 0x35f   : > { %v2147_v20 = vmul.f32 0.00390625, %v2136_v51 }
 0x362   : > { %v2161_v3 = vpop.xlane.xlu0 %2160  ;;  %v2294_v21 = vpop.permute.xlu1 %2293 }
 0x363   : > { %v2171_v5 = vmul.f32 0.00390625, %v2161_v3 }
 0x365   : > { %v2178_v35 = vsel %vm2174_vm10, %v2147_v20, %v2171_v5 }
 0x366   : > { %v2840_v32 = vpack.c.bf16 %v2178_v35, %v2177_v2  ;;  %v2299_v9 = vpop.permute.xlu1 %2298 }
 0x368   : > { %2841 = vmatprep.subr.bf16.mxu0 %v2840_v32 }
 0x369   : > { %2843 = vmatpush3.bf16.msra.mxu0 %v2840_v32 }
 0x36a   : > { %v2304_v51 = vpop.permute.xlu1 %2303 }
 0x36e   : > { %v2309_v5 = vpop.permute.xlu1 %2308 }
 0x372   : > { %v2142_v47 = vpop.xlane.xlu0 %2141 }
 0x373   : > { %v2149_v62 = vmul.f32 0.00390625, %v2142_v47 }
 0x376   : > { %v2167_v45 = vpop.xlane.xlu0 %2166 }
 0x377   : > { %v2173_v1 = vmul.f32 0.00390625, %v2167_v45  ;;  %v2314_v45 = vpop.permute.xlu1 %2313 }
 0x379   : > { %v2180_v15 = vsel %vm2174_vm10, %v2149_v62, %v2173_v1 }
 0x37a   : > { %v2844_v48 = vpack.c.bf16 %v2180_v15, %v2179_v59 }
 0x37c   : > { %2845 = vmatprep.subr.bf16.mxu0 %v2844_v48 }
 0x37d   : > { %2847 = vmatpush3.bf16.msra.mxu0 %v2844_v48 }
 0x37e   : > { %v2193_v7 = vpop.permute.xlu0 %2192 }
 0x380   : > { %2821 = vmatmul.mubr.msk.f32.vlgmr.msra.gmra.mrb[12].mxu0 %vm2195_vm9, %v2182_v10 }
 0x381   : > { %2600 = vmatprep.mubr.bf16.mxu0 %v5628_v28 }
 0x453   : > { %v2822_v39 = vpop.f32.mrb[12].mxu0 }
 0x454   : > { %v2274_v57 = vadd.f32 %v2822_v39, %v2193_v7  ;;  %v2268_v42 = vpop.f32.mrb[13].mxu0 }
 0x455   : > { %v2269_v54 = vadd.f32 %v2268_v42, %v2188_v25 }
 0x456   : > { %v2278_v17 = vmax.f32 %v2274_v57, 0.0  ;;  %v2319_v57 = vpop.permute.xlu1 %2318 }
 0x457   : > { %v2277_v61 = vmax.f32 %v2269_v54, 0.0 }
 0x459   : > { %v2848_v18 = vpack.c.bf16 %v2278_v17, %v2277_v61 }
 0x45b   : > { %2850 = vmatprep.subr.msk.bf16.mxu1 %vm2849_vm15, %v2848_v18 }
 0x45c   : > { %2853 = vmatpush3.bf16.msk.msra.mxu1 %vm2849_vm15, %v2848_v18 }
 0x45f   : > { %2828 = vmatmul.mubr.msk.f32.vlgmr.msra.gmra.mrb[12].mxu1 %vm2321_vm11, %v2280_v34 }
 0x460   : > { %2830 = vmatprep.mubr.msk.f32.mxu1 %vm2321_vm11, %v2281_v6 }
 0x463   : > { %2831 = vmatmul.mubr.msk.f32.gmra.mrb[14].mxu1 %vm2321_vm11, %v2282_v13 }
 0x464   : > { %2833 = vmatprep.mubr.msk.f32.mxu1 %vm2321_vm11, %v2283_v37 }
 0x467   : > { %2834 = vmatmul.mubr.msk.f32.gmra.mrb[16].mxu1 %vm2321_vm11, %v2284_v27 }
 0x468   : > { %2641 = vmatprep.mubr.bf16.mxu1 %v5628_v28 }
 0x532   : > { %v2829_v50 = vpop.f32.mrb[12].mxu1 }
 0x533   : > { %v2415_v3 = vadd.f32 %v2829_v50, %v2299_v9  ;;  %v2409_v31 = vpop.f32.mrb[13].mxu1 }
 0x534   : > { %v2410_v20 = vadd.f32 %v2409_v31, %v2294_v21 }
 0x535   : > { %v2778_v2 = vmul.f32 -1.442695, %v2415_v3 }
 0x536   : > { %v2777_v35 = vmul.f32 -1.442695, %v2410_v20  ;;  %v2832_v32 = vpop.f32.mrb[14].mxu1 }
 0x537   : > { %2970 = vpow2.f32 %v2778_v2  ;;  %v2425_v33 = vadd.f32 %v2832_v32, %v2309_v5  ;;  %v2419_v29 = vpop.f32.mrb[15].mxu1 }
 0x538   : > { %2972 = vpow2.f32 %v2777_v35  ;;  %v2420_v59 = vadd.f32 %v2419_v29, %v2304_v51  ;;  %v2650_v51 = vld [vmem:[%s5260_s11] sm:$0xff] }
 0x539   : > { %v2780_v47 = vmul.f32 -1.442695, %v2425_v33 }
 0x53a   : > { %v2835_v24 = vpop.f32.mrb[16].mxu1  ;;  %v2779_v7 = vmul.f32 -1.442695, %v2420_v59 }
 0x53b   : > { %2974 = vpow2.f32 %v2780_v47  ;;  %v2429_v30 = vpop.f32.mrb[17].mxu1  ;;  %v2435_v42 = vadd.f32 %v2835_v24, %v2319_v57 }
 0x53c   : > { %v2430_v62 = vadd.f32 %v2429_v30, %v2314_v45 }
 0x53d   : > { %v2782_v61 = vmul.f32 -1.442695, %v2435_v42 }
 0x53e   : > { %v2781_v1 = vmul.f32 -1.442695, %v2430_v62 }
 0x540   : > { %2976 = vpow2.f32 %v2781_v1 }
 0x541   : > { %v2971_v15 = vpop.eup %2970 }
 0x542   : > { %v2973_v48 = vpop.eup %2972  ;;  %v2457_v10 = vadd.f32 1.0, %v2971_v15 }
 0x543   : > { %v2456_v52 = vadd.f32 1.0, %v2973_v48 }
 0x544   : > { %2978 = vrcp.f32 %v2457_v10 }
 0x545   : > { %v2975_v39 = vpop.eup %2974  ;;  %2980 = vrcp.f32 %v2456_v52 }
 0x546   : > { %v2459_v25 = vadd.f32 1.0, %v2975_v39  ;;  %2982 = vpow2.f32 %v2779_v7 }
 0x548   : > { %2984 = vrcp.f32 %v2459_v25 }
 0x54a   : > { %v2977_v54 = vpop.eup %2976 }
 0x54b   : > { %v2460_v17 = vadd.f32 1.0, %v2977_v54 }
 0x54d   : > { %2986 = vrcp.f32 %v2460_v17 }
 0x54e   : > { %v2979_v18 = vpop.eup %2978  ;;  %2988 = vpow2.f32 %v2782_v61 }
 0x54f   : > { %v2981_v34 = vpop.eup %2980  ;;  %2481 = vperm.xlu1 %2954, %v2979_v18  }
 0x550   : > { %2517 = vperm.xlu0 %2958, %v2981_v34   ;;  %v2983_v6 = vpop.eup %2982 }
 0x551   : > { %v2458_v37 = vadd.f32 1.0, %v2983_v6 }
 0x552   : > { %v2985_v13 = vpop.eup %2984 }
 0x553   : > { %2956 = vset.pattern.permute.xlu1 %v5627_v60  ;;  %2990 = vrcp.f32 %v2458_v37 }
 0x554   : > { %2959 = vset.pattern.permute.xlu0 %v5628_v28  ;;  %2521 = vperm.xlu1 %2956, %v2979_v18  }
 0x555   : > { %2491 = vperm.xlu0 %2959, %v2985_v13  }
 0x557   : > { %v2987_v27 = vpop.eup %2986 }
 0x558   : > { %2957 = vset.pattern.permute.xlu1 %v5628_v28  ;;  %v2989_v21 = vpop.eup %2988 }
 0x559   : > { %2476 = vperm.xlu1 %2957, %v2981_v34   ;;  %2496 = vperm.xlu0 %2959, %v2987_v27   ;;  %v2461_v9 = vadd.f32 1.0, %v2989_v21  ;;  %v2998_v21 = vld [vmem:[%s3209_s29] sm:$0xff] }
 0x55b   : > { %2992 = vrcp.f32 %v2461_v9 }
 0x55d   : > { %2960 = vset.pattern.permute.xlu1 %v5627_v60  ;;  %2964 = vset.pattern.permute.xlu0 %v5627_v60  ;;  %v2991_v50 = vpop.eup %2990 }
 0x55e   : > { %2529 = vperm.xlu1 %2960, %v2985_v13   ;;  %2533 = vperm.xlu0 %2964, %v2987_v27  }
 0x562   : > { %2961 = vset.pattern.permute.xlu1 %v5628_v28  ;;  %2661 = vperm.xlu0 %2964, %v2650_v51  }
 0x563   : > { %2486 = vperm.xlu1 %2961, %v2991_v50  }
 0x565   : > { %v2993_v3 = vpop.eup %2992 }
 0x567   : > { %2962 = vset.pattern.permute.xlu1 %v5627_v60 }
 0x568   : > { %2525 = vperm.xlu1 %2962, %v2991_v50   ;;  %v2999_v50 = vld [vmem:[%s3209_s29 + $0x8] sm:$0xff] }
 0x56c   : > { %2963 = vset.pattern.permute.xlu1 %v5628_v28 }
 0x56d   : > { %2501 = vperm.xlu1 %2963, %v2993_v3  }
 0x571   : > { %2965 = vset.pattern.permute.xlu1 %v5627_v60 }
 0x572   : > { %2537 = vperm.xlu1 %2965, %v2993_v3  }
 0x576   : > { %2966 = vset.pattern.permute.xlu1 %v5628_v28 }
 0x577   : > { %2653 = vperm.xlu1 %2966, %v2650_v51  }
 0x5ce   : > { %v2482_v31 = vpop.permute.xlu1 %2481 }
 0x5cf   : > { %v2518_v20 = vpop.permute.xlu0 %2517  ;;  %v2506_v60 = vmul.f32 %v2482_v31, %v4876_v44  ;;  %v2507_v28 = vmul.f32 %v2482_v31, %v4878_v63 }
 0x5d0   : > { %v2540_v2 = vmul.f32 %v2518_v20, %v4849_v23  ;;  %v2541_v35 = vmul.f32 %v2518_v20, %v4838_v16 }
 0x5d3   : > { %v2522_v5 = vpop.permute.xlu1 %2521 }
 0x5d4   : > { %v2542_v32 = vmul.f32 %v2522_v5, %v4900_v8  ;;  %v2543_v33 = vmul.f32 %v2522_v5, %v4906_v58  ;;  %v2492_v8 = vpop.permute.xlu0 %2491 }
 0x5d5   : > { %v2510_v1 = vmul.f32 %v2492_v8, %v5022_v41  ;;  %v2511_v59 = vmul.f32 %v2492_v8, %v5024_v12 }
 0x5d6   : > { %v2555_v29 = vpack.c.bf16 %v2542_v32, %v2540_v2  ;;  %v2556_v47 = vpack.c.bf16 %v2543_v33, %v2541_v35 }
 0x5d8   : > { %2609 = vmatprep.subr.bf16.mxu1 %v2556_v47  ;;  %v2477_v24 = vpop.permute.xlu1 %2476  ;;  %v2497_v41 = vpop.permute.xlu0 %2496 }
 0x5d9   : > { %v2504_v45 = vmul.f32 %v2477_v24, %v4833_v4  ;;  %v2505_v30 = vmul.f32 %v2477_v24, %v4827_v49  ;;  %2610 = vmatpush1.bf16.msra.mxu1 %v2555_v29  ;;  %v2513_v25 = vmul.f32 %v2497_v41, %v5008_v55  ;;  %v3000_v29 = vld [vmem:[%s3209_s29 + $0x10] sm:$0xff]  ;;  %v3001_v24 = vld [vmem:[%s3209_s29 + $0x18] sm:$0xff]  ;;  %s3080_s29 = smov [#allocation2]  }
 0x5da   : > { %s3006_s0 = sshll.u32 %s3080_s29, 4  ;;  %s3007_s0 = int_to_ptr.vmem [resolvable:$false] %s3006_s0 }
 0x5db   : > { %v2553_v23 = vpack.c.bf16 %v2506_v60, %v2504_v45  ;;  %v2554_v62 = vpack.c.bf16 %v2507_v28, %v2505_v30  ;;  %s3008_s28 = scalar_lea.vmem %s3007_s0, 1024  ;;  %p3009_p0 = scmp.lt.s32.totalorder %s5207_s26, %s3007_s0 }
 0x5dc   : > { %p3010_p1 = scmp.lt.s32.totalorder %s3008_s28, %s3002_s18 }
 0x5dd   : > { %2568 = vmatprep.subr.bf16.mxu0 %v2554_v62  ;;  %v2530_v16 = vpop.permute.xlu1 %2529 }
 0x5de   : > { %2569 = vmatpush1.bf16.msra.mxu0 %v2553_v23  ;;  %v2546_v48 = vmul.f32 %v2530_v16, %v5036_v19  ;;  %v2547_v10 = vmul.f32 %v2530_v16, %v5038_v38  ;;  %v2534_v38 = vpop.permute.xlu0 %2533  ;;  %p3011_p2 = por %p3010_p1, %p3009_p0 }
 0x5df   : > { %v2548_v54 = vmul.f32 %v2534_v38, %v5018_v43  ;;  %v2549_v17 = vmul.f32 %v2534_v38, %v5016_v26 }
 0x5e0   : > { %p3012_p3 = pnand %p3011_p2, %p3005_p13 }
 0x5e2   : > { %v2487_v58 = vpop.permute.xlu1 %2486  ;;  %v2662_v18 = vpop.permute.xlu0 %2661 }
 0x5e3   : > { %v2508_v44 = vmul.f32 %v2487_v58, %v4922_v22  ;;  %v2509_v63 = vmul.f32 %v2487_v58, %v4924_v53  ;;  %v2512_v53 = vmul.f32 %v2497_v41, %v5006_v14 }
 0x5e5   : > { %v2557_v15 = vpack.c.bf16 %v2510_v1, %v2508_v44  ;;  %v2558_v4 = vpack.c.bf16 %v2511_v59, %v2509_v63 }
 0x5e7   : > { %2570 = vmatprep.subr.bf16.mxu0 %v2558_v4  ;;  %v2526_v49 = vpop.permute.xlu1 %2525 }
 0x5e8   : > { %v2544_v52 = vmul.f32 %v2526_v49, %v4930_v0  ;;  %v2545_v7 = vmul.f32 %v2526_v49, %v4928_v46  ;;  %2571 = vmatpush1.bf16.msra.mxu0 %v2557_v15 }
 0x5ea   : > { %v2559_v39 = vpack.c.bf16 %v2546_v48, %v2544_v52  ;;  %v2560_v12 = vpack.c.bf16 %v2547_v10, %v2545_v7 }
 0x5ec   : > { %2611 = vmatprep.subr.bf16.mxu1 %v2560_v12  ;;  %v2502_v22 = vpop.permute.xlu1 %2501 }
 0x5ed   : > { %v2514_v57 = vmul.f32 %v2502_v22, %v5074_v11  ;;  %v2515_v19 = vmul.f32 %v2502_v22, %v5076_v40  ;;  %2612 = vmatpush1.bf16.msra.mxu1 %v2559_v39  ;;  %v2552_v11 = vld [vmem:[%s5259_s10] sm:$0xf] }
 0x5ef   : > { %v2561_v42 = vpack.c.bf16 %v2514_v57, %v2512_v53  ;;  %v2562_v0 = vpack.c.bf16 %v2515_v19, %v2513_v25 }
 0x5f1   : > { %2572 = vmatprep.subr.bf16.mxu0 %v2562_v0  ;;  %v2538_v46 = vpop.permute.xlu1 %2537 }
 0x5f2   : > { %v2550_v14 = vmul.f32 %v2538_v46, %v5080_v56  ;;  %v2551_v55 = vmul.f32 %v2538_v46, %v5082_v36  ;;  %2573 = vmatpush1.bf16.msra.mxu0 %v2561_v42 }
 0x5f4   : > { %v2563_v40 = vpack.c.bf16 %v2550_v14, %v2548_v54  ;;  %v2564_v61 = vpack.c.bf16 %v2551_v55, %v2549_v17 }
 0x5f5   : > { %2783 = vmatmul.mubr.msk.bf16.vlgmr.msra.gmra.mrb[16].mxu0 %vm2195_vm9, %v2552_v11 }
 0x5f6   : > { %2613 = vmatprep.subr.bf16.mxu1 %v2564_v61  ;;  %v2654_v26 = vpop.permute.xlu1 %2653 }
 0x5f7   : > { %2614 = vmatpush1.bf16.msra.mxu1 %v2563_v40 }
 0x5fa   : > { %2784 = vmatmul.mubr.msk.bf16.vlgmr.msra.gmra.mrb[20].mxu1 %vm2195_vm9, %v2552_v11 }
 0x6c8   : > { %v2602_v43 = vpop.f32.mrb[16].mxu0 }
 0x6c9   : > { %v2656_v56 = vmul.f32 %v2654_v26, %v2602_v43  ;;  %v2604_v36 = vpop.f32.mrb[17].mxu0 }
 0x6ca   : > { %v2657_v34 = vmul.f32 %v2654_v26, %v2604_v36  ;;  %v2606_v6 = vpop.f32.mrb[18].mxu0 }
 0x6cb   : > { %v2664_v13 = vadd.f32 %v2662_v18, %v2656_v56  ;;  %v2607_v37 = vpop.f32.mrb[19].mxu0 }
 0x6cc   : > { %v2665_v27 = vadd.f32 %v2662_v18, %v2657_v34 }
 0x6cd   : > { %v2668_v9 = vadd.f32 %v2998_v21, %v2664_v13  ;;  %v2643_v51 = vpop.f32.mrb[20].mxu1 }
 0x6ce   : > { %v2669_v3 = vadd.f32 %v2999_v50, %v2665_v27  ;;  %v2658_v31 = vmul.f32 %v2654_v26, %v2643_v51  ;;  %v2645_v20 = vpop.f32.mrb[21].mxu1 }
 0x6cf   : > { %2672 = vst [vmem:[%s406_s19] sm:$0xff] %v2668_v9  ;;  %v2659_v5 = vmul.f32 %v2654_v26, %v2645_v20  ;;  %v2647_v2 = vpop.f32.mrb[22].mxu1 }
 0x6d0   : > { %2673 = vst [vmem:[%s406_s19 + $0x8] sm:$0xff] %v2669_v3  ;;  %v2666_v35 = vadd.f32 %v2662_v18, %v2658_v31  ;;  %v2648_v32 = vpop.f32.mrb[23].mxu1 }
 0x6d1   : > { %v2667_v33 = vadd.f32 %v2662_v18, %v2659_v5 }
 0x6d2   : > { %v2670_v47 = vadd.f32 %v3000_v29, %v2666_v35 }
 0x6d3   : > { %v2671_v60 = vadd.f32 %v3001_v24, %v2667_v33 }
 0x6d4   : > { %2674 = vst [vmem:[%s406_s19 + $0x10] sm:$0xff] %v2670_v47 }
 0x6d5   : > { %2675 = vst [vmem:[%s406_s19 + $0x18] sm:$0xff] %v2671_v60 }
 0x6d6   : > { %3015 = shalt.err (!%p3012_p3)
}
 0x6d7   : > { %s3016_s17 = scalar_lea.hbm %s5205_s16, 512  ;;  %s3020_s15 = scalar_lea.hbm %s5261_s12, 1024 }
 0x6d8   : > { %p3017_p4 = scmp.ne.s32.totalorder %s5205_s16, %s3016_s17  ;;  %p3021_p9 = scmp.lt.u32.totalorder %s5205_s16, %s5261_s12 }
 0x6d9   : > { %p3022_p10 = scmp.lt.u32.totalorder %s3020_s15, %s3016_s17  ;;  %p3024_p12 = scmp.lt.u32.totalorder %s3016_s17, %s5205_s16 }
 0x6da   : > { %p3018_p7 = pnand %p3017_p4, %p3184_p5 }
 0x6db   : > { %p3023_p11 = por %p3022_p10, %p3021_p9 }
 0x6dc   : > { %p3019_p8 = pneg %p3018_p7 }
 0x6dd   : > { %p3025_p13 = por %p3024_p12, %p3023_p11 }
 0x6df   : > { %p3026_p0 = pnand %p3025_p13, %p3019_p8 }
 0x6e1   : > { %3029 = shalt.err (!%p3026_p0)
}
 0x6e2   : > { %2854 = dma.vmem_to_hbm [thread:$0]  (%p3184_p5), %s5207_s26, 512, %s5205_s16, %s2677_s25  }
 0x6e3 PF: > { %p2860_p1 = scmp.ge.s32.totalorder %s3064_s24, 2  ;;  %s2703_s18 = sand.u32 1, %s3052_s21  }
 0x6e4   : > { %s2704_s28 = scalar_lea.sflag [#allocation3], %s2703_s18 }
 0x6e5   : > { %p2857_p2 = pnand %p2860_p1, %p3188_p6 }
 0x6e7   : > { %3047 = dma.done.wait (!%p2857_p2), %s2704_s28, 512  }
 0x6e8   : > { %3049 = vsyncadd (!%p2857_p2), %s2704_s28, 4294966784  ;;  %p22_p3 = scmp.ge.s32.totalorder %s3171_s27, 4   ;;  %s5629_s21 = smov %s3056_s22 }
 0x6e9   : > { %s5630_s22 = smov %s3060_s23  ;;  %s5631_s23 = smov %s3182_s30 }
 0x6ea   : > { %s5632_s24 = smov %s3171_s27  ;;  %24 = sbr.rel (!%p22_p3) target bundleno = 5 (0x5), region = 103 }
 0x6f1   :  { %2709 = vsyncpa [#allocation3], 1 }
 0x6f2   :  { %2711 = vsyncpa [#allocation3 + $0x1], 1 }

</bundles_post_ra>
